<compile_context>
chip_gen: v7x
topology: tpu7x:2x2x1
jax: 0.10.0
libtpu: 0.0.40
codegen_flags: <defaults>
</compile_context>

<pallas_src>
import functools

import jax
import jax.numpy as jnp
from jax import lax
from jax.experimental import pallas as pl
from jax.experimental.pallas import tpu as pltpu


# ---------------------------------------------------------------------------
# Small but tile-aligned hyper-parameters (scaled down from 200/256/4 but kept
# (8,128)-aligned): B=8 (f32 sublanes), E=H=128, 4H=512, V=256.
# ---------------------------------------------------------------------------
VOCAB_SIZE = 256
EMBED_SIZE = 128
NUM_HIDDEN = 128
NUM_LAYERS = 2
BATCH = 8
SEQ = 8
DROP_PROB = 0.3  # dropout is identity in eval mode (see TODO below)

LANE = 128
VPAD = ((VOCAB_SIZE + LANE - 1) // LANE) * LANE  # FC output padded to 128 lanes


def _sigmoid(x):
    # sigmoid(x) == 0.5*tanh(0.5*x)+0.5 : one EUP op + one VPU FMA (perf review).
    return 0.5 * jnp.tanh(0.5 * x) + 0.5


# ---------------------------------------------------------------------------
# Fused Pallas kernel: embed + L-layer LSTM wavefront + per-step FC, one grid step.
# ---------------------------------------------------------------------------
def _lyric_lstm_kernel(*refs, num_layers, hidden, seq, batch):
    """Ref layout (in order):
      inputs : tok (T*B,1) i32 [time-major rows], emb (V,E),
               h0 (L,B,H), c0 (L,B,H),
               [w_ih_t (in,4H), w_hh_t (H,4H), b (1,4H)] * L,
               w_fc_t (H,Vp), b_fc (1,Vp)
      outputs: out (B, T*Vp) [batch-major logits], h_n (L,B,H), c_n (L,B,H)
      scratch: gx_sc (T*B, 4H)  -- hoisted layer-0 input projection
    """
    T, B, H = seq, batch, hidden
    L = num_layers
    n_w = 3 * L

    tok_ref, emb_ref, h0_ref, c0_ref = refs[0:4]
    w_refs = refs[4:4 + n_w]
    wfc_ref, bfc_ref = refs[4 + n_w], refs[5 + n_w]
    out_ref, hT_ref, cT_ref = refs[6 + n_w:9 + n_w]
    (gx_sc,) = refs[9 + n_w:]

    V = emb_ref.shape[0]
    Vp = wfc_ref.shape[1]

    # ---- fused embedding gather: one-hot(tokens) @ table on the MXU --------
    tok = tok_ref[...]                                           # (T*B, 1) int32
    vocab_ids = lax.broadcasted_iota(jnp.int32, (T * B, V), 1)   # (T*B, V)
    onehot = (vocab_ids == tok).astype(jnp.float32)
    x = jnp.dot(onehot, emb_ref[...],
                preferred_element_type=jnp.float32)              # (T*B, E)

    # ---- hoisted layer-0 input projection (one matmul for all time steps) --
    gx_sc[...] = (jnp.dot(x, w_refs[0][...],
                          preferred_element_type=jnp.float32)
                  + w_refs[2][...])                              # (T*B, 4H)

    # Hoist bias broadcasts out of the unrolled loop (broadcasts are not CSE'd).
    b_full = [None] + [jnp.broadcast_to(w_refs[3 * l + 2][...], (B, 4 * H))
                       for l in range(1, L)]
    bfc_full = jnp.broadcast_to(bfc_ref[...], (B, Vp))

    h = [h0_ref[l] for l in range(L)]
    c = [c0_ref[l] for l in range(L)]

    # ---- wavefront over time + layers (fully unrolled, all indices static) --
    # At wave w, layer l runs time t = w - l.  Layers are visited in decreasing
    # l so that h[l-1] still holds layer (l-1)'s output at time t (stale carry).
    # TODO(synk): W_hh could be held MXU-stationary via matmul_push_rhs if the
    # bundle dump shows per-step RHS re-pushes; relying on Mosaic hoisting here.
    for w in range(T + L - 1):
        for l in reversed(range(L)):
            t = w - l
            if t < 0 or t >= T:
                continue
            whh_t_ref = w_refs[3 * l + 1]
            if l == 0:
                gates = gx_sc[pl.ds(t * B, B), :] + jnp.dot(
                    h[0], whh_t_ref[...], preferred_element_type=jnp.float32)
            else:
                wih_t_ref = w_refs[3 * l + 0]
                gates = (jnp.dot(h[l - 1], wih_t_ref[...],
                                 preferred_element_type=jnp.float32)
                         + b_full[l]
                         + jnp.dot(h[l], whh_t_ref[...],
                                   preferred_element_type=jnp.float32))
            i_g = _sigmoid(gates[:, 0 * H:1 * H])
            f_g = _sigmoid(gates[:, 1 * H:2 * H])
            g_g = jnp.tanh(gates[:, 2 * H:3 * H])
            o_g = _sigmoid(gates[:, 3 * H:4 * H])
            c[l] = f_g * c[l] + i_g * g_g
            h[l] = o_g * jnp.tanh(c[l])

            if l == L - 1:
                # FC for this time step, stored batch-major & lane-dense:
                # row b, lanes [t*Vp, (t+1)*Vp) of the (B, T*Vp) output.
                logits = jnp.dot(h[l], wfc_ref[...],
                                 preferred_element_type=jnp.float32) + bfc_full
                out_ref[:, t * Vp:(t + 1) * Vp] = logits

    # TODO(synk): inter-layer LSTM dropout and self.dropout are train-mode only;
    # this forward is eval-mode where nn.Dropout is identity.

    for l in range(L):
        hT_ref[l] = h[l]
        cT_ref[l] = c[l]


def _fused_forward(tok_tm, emb, h0, c0, lstm_weights, fc_w_t, fc_b):
    """One pallas_call running embed + L-layer LSTM wavefront + FC."""
    TB = tok_tm.shape[0]
    V, E = emb.shape
    L, B, H = h0.shape
    T = TB // B
    Vp = fc_w_t.shape[1]

    kernel = functools.partial(_lyric_lstm_kernel, num_layers=L, hidden=H,
                               seq=T, batch=B)

    in_arrays = [tok_tm, emb, h0, c0]
    in_specs = [
        pl.BlockSpec((TB, 1), lambda i: (0, 0)),
        pl.BlockSpec((V, E), lambda i: (0, 0)),
        pl.BlockSpec((L, B, H), lambda i: (0, 0, 0)),
        pl.BlockSpec((L, B, H), lambda i: (0, 0, 0)),
    ]
    for (w_ih_t, w_hh_t, b_sum) in lstm_weights:
        in_arrays += [w_ih_t, w_hh_t, b_sum]
        in_specs += [
            pl.BlockSpec(w_ih_t.shape, lambda i: (0, 0)),
            pl.BlockSpec(w_hh_t.shape, lambda i: (0, 0)),
            pl.BlockSpec(b_sum.shape, lambda i: (0, 0)),
        ]
    in_arrays += [fc_w_t, fc_b]
    in_specs += [
        pl.BlockSpec(fc_w_t.shape, lambda i: (0, 0)),
        pl.BlockSpec(fc_b.shape, lambda i: (0, 0)),
    ]

    out_shape = (
        jax.ShapeDtypeStruct((B, T * Vp), jnp.float32),  # batch-major logits
        jax.ShapeDtypeStruct((L, B, H), jnp.float32),    # h_n
        jax.ShapeDtypeStruct((L, B, H), jnp.float32),    # c_n
    )
    out_specs = [
        pl.BlockSpec((B, T * Vp), lambda i: (0, 0)),
        pl.BlockSpec((L, B, H), lambda i: (0, 0, 0)),
        pl.BlockSpec((L, B, H), lambda i: (0, 0, 0)),
    ]

    return pl.pallas_call(
        kernel,
        out_shape=out_shape,
        grid_spec=pltpu.PrefetchScalarGridSpec(
            num_scalar_prefetch=0,
            grid=(1,),                      # single invocation; time loop in-kernel
            in_specs=in_specs,
            out_specs=out_specs,
            scratch_shapes=[
                pltpu.VMEM((T * B, 4 * H), jnp.float32),  # hoisted layer-0 gates
            ],
        ),
        compiler_params=pltpu.CompilerParams(
            dimension_semantics=("arbitrary",)),
    )(*in_arrays)


# ---------------------------------------------------------------------------
# Parameter init (deterministic; PyTorch layouts, pre-transposed for the kernel)
# ---------------------------------------------------------------------------
def init_params(key):
    H, E, V, L = NUM_HIDDEN, EMBED_SIZE, VOCAB_SIZE, NUM_LAYERS
    scale = 1.0 / jnp.sqrt(jnp.float32(H))
    keys = jax.random.split(key, 1 + 4 * L + 2)
    k = iter(keys)

    params = {}
    params["embedding"] = jax.random.normal(next(k), (V, E), jnp.float32)

    lstm = []
    for layer in range(L):
        in_dim = E if layer == 0 else H
        w_ih = jax.random.uniform(next(k), (4 * H, in_dim), jnp.float32,
                                  -scale, scale)
        w_hh = jax.random.uniform(next(k), (4 * H, H), jnp.float32,
                                  -scale, scale)
        b_ih = jax.random.uniform(next(k), (4 * H,), jnp.float32, -scale, scale)
        b_hh = jax.random.uniform(next(k), (4 * H,), jnp.float32, -scale, scale)
        lstm.append(dict(
            w_ih_t=jnp.transpose(w_ih),                    # (in_dim, 4H)
            w_hh_t=jnp.transpose(w_hh),                    # (H, 4H)
            b_sum=(b_ih + b_hh).reshape(1, 4 * H),         # (1, 4H)
        ))
    params["lstm"] = lstm

    fc_w = jax.random.uniform(next(k), (V, H), jnp.float32, -scale, scale)
    fc_b = jax.random.uniform(next(k), (V,), jnp.float32, -scale, scale)
    fc_w_t = jnp.transpose(fc_w)                           # (H, V)
    params["fc_w_t"] = jnp.pad(fc_w_t, ((0, 0), (0, VPAD - VOCAB_SIZE)))
    params["fc_b"] = jnp.pad(fc_b.reshape(1, VOCAB_SIZE),
                             ((0, 0), (0, VPAD - VOCAB_SIZE)))
    return params


# ---------------------------------------------------------------------------
# Forward pass (mirrors LyricLSTM.forward, eval mode)
# ---------------------------------------------------------------------------
def lyric_lstm_forward(params, x_tokens, hidden):
    """x_tokens: (B, T) int32; hidden = (h0, c0), each (L, B, H).
    Returns (out, (h_n, c_n)) with out (B*T, VOCAB_SIZE) matching PyTorch's
    batch_first reshape(-1, num_hidden) -> Linear ordering."""
    h0, c0 = hidden
    B, T = x_tokens.shape

    # Only a 256-byte int transpose stays in the wrapper: time-major token ids.
    tok_tm = jnp.transpose(x_tokens).reshape(T * B, 1).astype(jnp.int32)

    lstm_weights = [(p["w_ih_t"], p["w_hh_t"], p["b_sum"]) for p in params["lstm"]]
    out_flat, h_n, c_n = _fused_forward(tok_tm, params["embedding"], h0, c0,
                                        lstm_weights, params["fc_w_t"],
                                        params["fc_b"])

    # Kernel already wrote batch-major rows; these reshapes are metadata-only.
    out = out_flat.reshape(B, T, VPAD)[:, :, :VOCAB_SIZE].reshape(B * T, VOCAB_SIZE)
    return out, (h_n, c_n)


def init_hidden(batch_size):
    z = jnp.zeros((NUM_LAYERS, batch_size, NUM_HIDDEN), jnp.float32)
    return (z, z)


# ---------------------------------------------------------------------------
# Pure-JAX reference (same math, no Pallas) for correctness checking.
# ---------------------------------------------------------------------------
def reference_forward(params, x_tokens, hidden):
    h0, c0 = hidden
    B, T = x_tokens.shape
    H = NUM_HIDDEN
    emb = jnp.take(params["embedding"], x_tokens, axis=0).astype(jnp.float32)
    layer_in = jnp.transpose(emb, (1, 0, 2))                       # (T, B, E)

    h_fin, c_fin = [], []
    for layer in range(NUM_LAYERS):
        p = params["lstm"][layer]
        w_ih_t, w_hh_t, b = p["w_ih_t"], p["w_hh_t"], p["b_sum"]

        def step(carry, x_t):
            h, c = carry
            gates = x_t @ w_ih_t + b + h @ w_hh_t
            i_g = jax.nn.sigmoid(gates[:, 0 * H:1 * H])
            f_g = jax.nn.sigmoid(gates[:, 1 * H:2 * H])
            g_g = jnp.tanh(gates[:, 2 * H:3 * H])
            o_g = jax.nn.sigmoid(gates[:, 3 * H:4 * H])
            c2 = f_g * c + i_g * g_g
            h2 = o_g * jnp.tanh(c2)
            return (h2, c2), h2

        (hT, cT), ys = lax.scan(step, (h0[layer], c0[layer]), layer_in)
        h_fin.append(hT)
        c_fin.append(cT)
        layer_in = ys

    flat = jnp.transpose(layer_in, (1, 0, 2)).reshape(B * T, H)
    logits = flat @ params["fc_w_t"][:, :VOCAB_SIZE] + params["fc_b"][0, :VOCAB_SIZE]
    return logits, (jnp.stack(h_fin), jnp.stack(c_fin))


# ---------------------------------------------------------------------------
if __name__ == "__main__":
    key = jax.random.PRNGKey(0)
    pkey, xkey = jax.random.split(key)

    params = init_params(pkey)
    x_tokens = jax.random.randint(xkey, (BATCH, SEQ), 0, VOCAB_SIZE,
                                  dtype=jnp.int32)
    hidden = init_hidden(BATCH)

    fwd = jax.jit(lyric_lstm_forward)
    out, (h_n, c_n) = fwd(params, x_tokens, hidden)
    jax.block_until_ready((out, h_n, c_n))

    assert out.shape == (BATCH * SEQ, VOCAB_SIZE), out.shape
    assert h_n.shape == (NUM_LAYERS, BATCH, NUM_HIDDEN), h_n.shape
    assert c_n.shape == (NUM_LAYERS, BATCH, NUM_HIDDEN), c_n.shape
    assert bool(jnp.all(jnp.isfinite(out)))

    # Correctness vs pure-JAX reference (tolerance covers MXU vs XLA f32 matmul
    # path differences; both sides use f32 weights/activations).
    ref_out, (ref_h, ref_c) = reference_forward(params, x_tokens, hidden)
    err = max(float(jnp.max(jnp.abs(out - ref_out))),
              float(jnp.max(jnp.abs(h_n - ref_h))),
              float(jnp.max(jnp.abs(c_n - ref_c))))
    assert err < 5e-2, f"mismatch vs reference: max abs err {err}"

    print("KERNEL_OK")
</pallas_src>

<mosaic_0001>
module attributes {stable_mosaic.version = 11 : i64} {
  func.func @_lyric_lstm_kernel(%arg0: i32, %arg1: memref<64x1xi32, #tpu.memory_space<vmem>>, %arg2: memref<256x128xf32, #tpu.memory_space<vmem>>, %arg3: memref<2x8x128xf32, #tpu.memory_space<vmem>>, %arg4: memref<2x8x128xf32, #tpu.memory_space<vmem>>, %arg5: memref<128x512xf32, #tpu.memory_space<vmem>>, %arg6: memref<128x512xf32, #tpu.memory_space<vmem>>, %arg7: memref<1x512xf32, #tpu.memory_space<vmem>>, %arg8: memref<128x512xf32, #tpu.memory_space<vmem>>, %arg9: memref<128x512xf32, #tpu.memory_space<vmem>>, %arg10: memref<1x512xf32, #tpu.memory_space<vmem>>, %arg11: memref<128x256xf32, #tpu.memory_space<vmem>>, %arg12: memref<1x256xf32, #tpu.memory_space<vmem>>, %arg13: memref<8x2048xf32, #tpu.memory_space<vmem>>, %arg14: memref<2x8x128xf32, #tpu.memory_space<vmem>>, %arg15: memref<2x8x128xf32, #tpu.memory_space<vmem>>, %arg16: memref<64x512xf32, #tpu.memory_space<vmem>>) attributes {dimension_semantics = [#tpu.dimension_semantics<arbitrary>], iteration_bounds = array<i64: 1>, scalar_prefetch = 0 : i64, scratch_operands = 1 : i64, tpu.core_type = #tpu.core_type<tc>, window_params = [{pipeline_mode = #tpu.pipeline_mode<synchronous>, transform_indices = @transform_0, window_bounds = array<i64: 64, 1>}, {pipeline_mode = #tpu.pipeline_mode<synchronous>, transform_indices = @transform_1, window_bounds = array<i64: 256, 128>}, {pipeline_mode = #tpu.pipeline_mode<synchronous>, transform_indices = @transform_2, window_bounds = array<i64: 2, 8, 128>}, {pipeline_mode = #tpu.pipeline_mode<synchronous>, transform_indices = @transform_3, window_bounds = array<i64: 2, 8, 128>}, {pipeline_mode = #tpu.pipeline_mode<synchronous>, transform_indices = @transform_4, window_bounds = array<i64: 128, 512>}, {pipeline_mode = #tpu.pipeline_mode<synchronous>, transform_indices = @transform_5, window_bounds = array<i64: 128, 512>}, {pipeline_mode = #tpu.pipeline_mode<synchronous>, transform_indices = @transform_6, window_bounds = array<i64: 1, 512>}, {pipeline_mode = #tpu.pipeline_mode<synchronous>, transform_indices = @transform_7, window_bounds = array<i64: 128, 512>}, {pipeline_mode = #tpu.pipeline_mode<synchronous>, transform_indices = @transform_8, window_bounds = array<i64: 128, 512>}, {pipeline_mode = #tpu.pipeline_mode<synchronous>, transform_indices = @transform_9, window_bounds = array<i64: 1, 512>}, {pipeline_mode = #tpu.pipeline_mode<synchronous>, transform_indices = @transform_10, window_bounds = array<i64: 128, 256>}, {pipeline_mode = #tpu.pipeline_mode<synchronous>, transform_indices = @transform_11, window_bounds = array<i64: 1, 256>}, {pipeline_mode = #tpu.pipeline_mode<synchronous>, transform_indices = @transform_12, window_bounds = array<i64: 8, 2048>}, {pipeline_mode = #tpu.pipeline_mode<synchronous>, transform_indices = @transform_13, window_bounds = array<i64: 2, 8, 128>}, {pipeline_mode = #tpu.pipeline_mode<synchronous>, transform_indices = @transform_14, window_bounds = array<i64: 2, 8, 128>}]} {
    %c0 = arith.constant 0 : index
    %c0_0 = arith.constant 0 : index
    %0 = vector.load %arg1[%c0, %c0_0] : memref<64x1xi32, #tpu.memory_space<vmem>>, vector<64x1xi32>
    %1 = tpu.iota {dimensions = array<i32: 1>} : vector<64x256xi32>
    %2 = vector.broadcast %0 : vector<64x1xi32> to vector<64x256xi32>
    %3 = arith.cmpi eq, %1, %2 : vector<64x256xi32>
    %4 = arith.extui %3 : vector<64x256xi1> to vector<64x256xi32>
    %5 = arith.sitofp %4 : vector<64x256xi32> to vector<64x256xf32>
    %c0_1 = arith.constant 0 : index
    %c0_2 = arith.constant 0 : index
    %6 = vector.load %arg2[%c0_1, %c0_2] : memref<256x128xf32, #tpu.memory_space<vmem>>, vector<256x128xf32>
    %cst = arith.constant dense<0.000000e+00> : vector<64x128xf32>
    %7 = tpu.matmul %5, %6, %cst {dimension_numbers = #tpu.dot_dimension_numbers<[1], [0], [0], [1], [0, 0, 1, 1], [], []>} : vector<64x256xf32>, vector<256x128xf32>, vector<64x128xf32> -> vector<64x128xf32>
    %c0_3 = arith.constant 0 : index
    %c0_4 = arith.constant 0 : index
    %8 = vector.load %arg5[%c0_3, %c0_4] : memref<128x512xf32, #tpu.memory_space<vmem>>, vector<128x512xf32>
    %cst_5 = arith.constant dense<0.000000e+00> : vector<64x512xf32>
    %9 = tpu.matmul %7, %8, %cst_5 {dimension_numbers = #tpu.dot_dimension_numbers<[1], [0], [0], [1], [0, 0, 1, 1], [], []>} : vector<64x128xf32>, vector<128x512xf32>, vector<64x512xf32> -> vector<64x512xf32>
    %c0_6 = arith.constant 0 : index
    %c0_7 = arith.constant 0 : index
    %10 = vector.load %arg7[%c0_6, %c0_7] : memref<1x512xf32, #tpu.memory_space<vmem>>, vector<1x512xf32>
    %11 = vector.broadcast %10 : vector<1x512xf32> to vector<64x512xf32>
    %12 = arith.addf %9, %11 : vector<64x512xf32>
    %c0_8 = arith.constant 0 : index
    %c0_9 = arith.constant 0 : index
    %13 = vector.load %arg16[%c0_8, %c0_9] : memref<64x512xf32, #tpu.memory_space<vmem>>, vector<64x512xf32>
    tpu.vector_store %arg16[%c0_8, %c0_9], %12 {strides = array<i32>} : memref<64x512xf32, #tpu.memory_space<vmem>>, vector<64x512xf32>,
    %c0_10 = arith.constant 0 : index
    %c0_11 = arith.constant 0 : index
    %14 = vector.load %arg10[%c0_10, %c0_11] : memref<1x512xf32, #tpu.memory_space<vmem>>, vector<1x512xf32>
    %15 = vector.shape_cast %14 : vector<1x512xf32> to vector<1x512xf32>
    %16 = vector.broadcast %15 : vector<1x512xf32> to vector<8x512xf32>
    %c0_12 = arith.constant 0 : index
    %c0_13 = arith.constant 0 : index
    %17 = vector.load %arg12[%c0_12, %c0_13] : memref<1x256xf32, #tpu.memory_space<vmem>>, vector<1x256xf32>
    %18 = vector.shape_cast %17 : vector<1x256xf32> to vector<1x256xf32>
    %19 = vector.broadcast %18 : vector<1x256xf32> to vector<8x256xf32>
    %c0_14 = arith.constant 0 : index
    %c0_15 = arith.constant 0 : index
    %c0_16 = arith.constant 0 : index
    %20 = vector.load %arg3[%c0_14, %c0_15, %c0_16] : memref<2x8x128xf32, #tpu.memory_space<vmem>>, vector<1x8x128xf32>
    %21 = vector.shape_cast %20 : vector<1x8x128xf32> to vector<8x128xf32>
    %c1 = arith.constant 1 : index
    %c0_17 = arith.constant 0 : index
    %c0_18 = arith.constant 0 : index
    %22 = vector.load %arg3[%c1, %c0_17, %c0_18] : memref<2x8x128xf32, #tpu.memory_space<vmem>>, vector<1x8x128xf32>
    %23 = vector.shape_cast %22 : vector<1x8x128xf32> to vector<8x128xf32>
    %c0_19 = arith.constant 0 : index
    %c0_20 = arith.constant 0 : index
    %c0_21 = arith.constant 0 : index
    %24 = vector.load %arg4[%c0_19, %c0_20, %c0_21] : memref<2x8x128xf32, #tpu.memory_space<vmem>>, vector<1x8x128xf32>
    %25 = vector.shape_cast %24 : vector<1x8x128xf32> to vector<8x128xf32>
    %c1_22 = arith.constant 1 : index
    %c0_23 = arith.constant 0 : index
    %c0_24 = arith.constant 0 : index
    %26 = vector.load %arg4[%c1_22, %c0_23, %c0_24] : memref<2x8x128xf32, #tpu.memory_space<vmem>>, vector<1x8x128xf32>
    %27 = vector.shape_cast %26 : vector<1x8x128xf32> to vector<8x128xf32>
    %c0_25 = arith.constant 0 : index
    %c0_26 = arith.constant 0 : index
    %28 = vector.load %arg16[%c0_25, %c0_26] : memref<64x512xf32, #tpu.memory_space<vmem>>, vector<8x512xf32>
    %c0_27 = arith.constant 0 : index
    %c0_28 = arith.constant 0 : index
    %29 = vector.load %arg6[%c0_27, %c0_28] : memref<128x512xf32, #tpu.memory_space<vmem>>, vector<128x512xf32>
    %cst_29 = arith.constant dense<0.000000e+00> : vector<8x512xf32>
    %30 = tpu.matmul %21, %29, %cst_29 {dimension_numbers = #tpu.dot_dimension_numbers<[1], [0], [0], [1], [0, 0, 1, 1], [], []>} : vector<8x128xf32>, vector<128x512xf32>, vector<8x512xf32> -> vector<8x512xf32>
    %31 = arith.addf %28, %30 : vector<8x512xf32>
    %32 = vector.extract_strided_slice %31 {offsets = [0, 0], sizes = [8, 128], strides = [1, 1]} : vector<8x512xf32> to vector<8x128xf32>
    %cst_30 = arith.constant 5.000000e-01 : f32
    %33 = vector.broadcast %cst_30 : f32 to vector<8x128xf32>
    %34 = arith.mulf %33, %32 : vector<8x128xf32>
    %35 = math.tanh %34 : vector<8x128xf32>
    %cst_31 = arith.constant 5.000000e-01 : f32
    %36 = vector.broadcast %cst_31 : f32 to vector<8x128xf32>
    %37 = arith.mulf %36, %35 : vector<8x128xf32>
    %cst_32 = arith.constant 5.000000e-01 : f32
    %38 = vector.broadcast %cst_32 : f32 to vector<8x128xf32>
    %39 = arith.addf %37, %38 : vector<8x128xf32>
    %40 = vector.extract_strided_slice %31 {offsets = [0, 128], sizes = [8, 128], strides = [1, 1]} : vector<8x512xf32> to vector<8x128xf32>
    %cst_33 = arith.constant 5.000000e-01 : f32
    %41 = vector.broadcast %cst_33 : f32 to vector<8x128xf32>
    %42 = arith.mulf %41, %40 : vector<8x128xf32>
    %43 = math.tanh %42 : vector<8x128xf32>
    %cst_34 = arith.constant 5.000000e-01 : f32
    %44 = vector.broadcast %cst_34 : f32 to vector<8x128xf32>
    %45 = arith.mulf %44, %43 : vector<8x128xf32>
    %cst_35 = arith.constant 5.000000e-01 : f32
    %46 = vector.broadcast %cst_35 : f32 to vector<8x128xf32>
    %47 = arith.addf %45, %46 : vector<8x128xf32>
    %48 = vector.extract_strided_slice %31 {offsets = [0, 256], sizes = [8, 128], strides = [1, 1]} : vector<8x512xf32> to vector<8x128xf32>
    %49 = math.tanh %48 : vector<8x128xf32>
    %50 = vector.extract_strided_slice %31 {offsets = [0, 384], sizes = [8, 128], strides = [1, 1]} : vector<8x512xf32> to vector<8x128xf32>
    %cst_36 = arith.constant 5.000000e-01 : f32
    %51 = vector.broadcast %cst_36 : f32 to vector<8x128xf32>
    %52 = arith.mulf %51, %50 : vector<8x128xf32>
    %53 = math.tanh %52 : vector<8x128xf32>
    %cst_37 = arith.constant 5.000000e-01 : f32
    %54 = vector.broadcast %cst_37 : f32 to vector<8x128xf32>
    %55 = arith.mulf %54, %53 : vector<8x128xf32>
    %cst_38 = arith.constant 5.000000e-01 : f32
    %56 = vector.broadcast %cst_38 : f32 to vector<8x128xf32>
    %57 = arith.addf %55, %56 : vector<8x128xf32>
    %58 = arith.mulf %47, %25 : vector<8x128xf32>
    %59 = arith.mulf %39, %49 : vector<8x128xf32>
    %60 = arith.addf %58, %59 : vector<8x128xf32>
    %61 = math.tanh %60 : vector<8x128xf32>
    %62 = arith.mulf %57, %61 : vector<8x128xf32>
    %c0_39 = arith.constant 0 : index
    %c0_40 = arith.constant 0 : index
    %63 = vector.load %arg8[%c0_39, %c0_40] : memref<128x512xf32, #tpu.memory_space<vmem>>, vector<128x512xf32>
    %cst_41 = arith.constant dense<0.000000e+00> : vector<8x512xf32>
    %64 = tpu.matmul %62, %63, %cst_41 {dimension_numbers = #tpu.dot_dimension_numbers<[1], [0], [0], [1], [0, 0, 1, 1], [], []>} : vector<8x128xf32>, vector<128x512xf32>, vector<8x512xf32> -> vector<8x512xf32>
    %65 = arith.addf %64, %16 : vector<8x512xf32>
    %c0_42 = arith.constant 0 : index
    %c0_43 = arith.constant 0 : index
    %66 = vector.load %arg9[%c0_42, %c0_43] : memref<128x512xf32, #tpu.memory_space<vmem>>, vector<128x512xf32>
    %cst_44 = arith.constant dense<0.000000e+00> : vector<8x512xf32>
    %67 = tpu.matmul %23, %66, %cst_44 {dimension_numbers = #tpu.dot_dimension_numbers<[1], [0], [0], [1], [0, 0, 1, 1], [], []>} : vector<8x128xf32>, vector<128x512xf32>, vector<8x512xf32> -> vector<8x512xf32>
    %68 = arith.addf %65, %67 : vector<8x512xf32>
    %69 = vector.extract_strided_slice %68 {offsets = [0, 0], sizes = [8, 128], strides = [1, 1]} : vector<8x512xf32> to vector<8x128xf32>
    %cst_45 = arith.constant 5.000000e-01 : f32
    %70 = vector.broadcast %cst_45 : f32 to vector<8x128xf32>
    %71 = arith.mulf %70, %69 : vector<8x128xf32>
    %72 = math.tanh %71 : vector<8x128xf32>
    %cst_46 = arith.constant 5.000000e-01 : f32
    %73 = vector.broadcast %cst_46 : f32 to vector<8x128xf32>
    %74 = arith.mulf %73, %72 : vector<8x128xf32>
    %cst_47 = arith.constant 5.000000e-01 : f32
    %75 = vector.broadcast %cst_47 : f32 to vector<8x128xf32>
    %76 = arith.addf %74, %75 : vector<8x128xf32>
    %77 = vector.extract_strided_slice %68 {offsets = [0, 128], sizes = [8, 128], strides = [1, 1]} : vector<8x512xf32> to vector<8x128xf32>
    %cst_48 = arith.constant 5.000000e-01 : f32
    %78 = vector.broadcast %cst_48 : f32 to vector<8x128xf32>
    %79 = arith.mulf %78, %77 : vector<8x128xf32>
    %80 = math.tanh %79 : vector<8x128xf32>
    %cst_49 = arith.constant 5.000000e-01 : f32
    %81 = vector.broadcast %cst_49 : f32 to vector<8x128xf32>
    %82 = arith.mulf %81, %80 : vector<8x128xf32>
    %cst_50 = arith.constant 5.000000e-01 : f32
    %83 = vector.broadcast %cst_50 : f32 to vector<8x128xf32>
    %84 = arith.addf %82, %83 : vector<8x128xf32>
    %85 = vector.extract_strided_slice %68 {offsets = [0, 256], sizes = [8, 128], strides = [1, 1]} : vector<8x512xf32> to vector<8x128xf32>
    %86 = math.tanh %85 : vector<8x128xf32>
    %87 = vector.extract_strided_slice %68 {offsets = [0, 384], sizes = [8, 128], strides = [1, 1]} : vector<8x512xf32> to vector<8x128xf32>
    %cst_51 = arith.constant 5.000000e-01 : f32
    %88 = vector.broadcast %cst_51 : f32 to vector<8x128xf32>
    %89 = arith.mulf %88, %87 : vector<8x128xf32>
    %90 = math.tanh %89 : vector<8x128xf32>
    %cst_52 = arith.constant 5.000000e-01 : f32
    %91 = vector.broadcast %cst_52 : f32 to vector<8x128xf32>
    %92 = arith.mulf %91, %90 : vector<8x128xf32>
    %cst_53 = arith.constant 5.000000e-01 : f32
    %93 = vector.broadcast %cst_53 : f32 to vector<8x128xf32>
    %94 = arith.addf %92, %93 : vector<8x128xf32>
    %95 = arith.mulf %84, %27 : vector<8x128xf32>
    %96 = arith.mulf %76, %86 : vector<8x128xf32>
    %97 = arith.addf %95, %96 : vector<8x128xf32>
    %98 = math.tanh %97 : vector<8x128xf32>
    %99 = arith.mulf %94, %98 : vector<8x128xf32>
    %c0_54 = arith.constant 0 : index
    %c0_55 = arith.constant 0 : index
    %100 = vector.load %arg11[%c0_54, %c0_55] : memref<128x256xf32, #tpu.memory_space<vmem>>, vector<128x256xf32>
    %cst_56 = arith.constant dense<0.000000e+00> : vector<8x256xf32>
    %101 = tpu.matmul %99, %100, %cst_56 {dimension_numbers = #tpu.dot_dimension_numbers<[1], [0], [0], [1], [0, 0, 1, 1], [], []>} : vector<8x128xf32>, vector<128x256xf32>, vector<8x256xf32> -> vector<8x256xf32>
    %102 = arith.addf %101, %19 : vector<8x256xf32>
    %c0_57 = arith.constant 0 : index
    %c0_58 = arith.constant 0 : index
    %103 = vector.load %arg13[%c0_57, %c0_58] : memref<8x2048xf32, #tpu.memory_space<vmem>>, vector<8x256xf32>
    tpu.vector_store %arg13[%c0_57, %c0_58], %102 {strides = array<i32>} : memref<8x2048xf32, #tpu.memory_space<vmem>>, vector<8x256xf32>,
    %c8 = arith.constant 8 : index
    %c0_59 = arith.constant 0 : index
    %104 = vector.load %arg16[%c8, %c0_59] : memref<64x512xf32, #tpu.memory_space<vmem>>, vector<8x512xf32>
    %c0_60 = arith.constant 0 : index
    %c0_61 = arith.constant 0 : index
    %105 = vector.load %arg6[%c0_60, %c0_61] : memref<128x512xf32, #tpu.memory_space<vmem>>, vector<128x512xf32>
    %cst_62 = arith.constant dense<0.000000e+00> : vector<8x512xf32>
    %106 = tpu.matmul %62, %105, %cst_62 {dimension_numbers = #tpu.dot_dimension_numbers<[1], [0], [0], [1], [0, 0, 1, 1], [], []>} : vector<8x128xf32>, vector<128x512xf32>, vector<8x512xf32> -> vector<8x512xf32>
    %107 = arith.addf %104, %106 : vector<8x512xf32>
    %108 = vector.extract_strided_slice %107 {offsets = [0, 0], sizes = [8, 128], strides = [1, 1]} : vector<8x512xf32> to vector<8x128xf32>
    %cst_63 = arith.constant 5.000000e-01 : f32
    %109 = vector.broadcast %cst_63 : f32 to vector<8x128xf32>
    %110 = arith.mulf %109, %108 : vector<8x128xf32>
    %111 = math.tanh %110 : vector<8x128xf32>
    %cst_64 = arith.constant 5.000000e-01 : f32
    %112 = vector.broadcast %cst_64 : f32 to vector<8x128xf32>
    %113 = arith.mulf %112, %111 : vector<8x128xf32>
    %cst_65 = arith.constant 5.000000e-01 : f32
    %114 = vector.broadcast %cst_65 : f32 to vector<8x128xf32>
    %115 = arith.addf %113, %114 : vector<8x128xf32>
    %116 = vector.extract_strided_slice %107 {offsets = [0, 128], sizes = [8, 128], strides = [1, 1]} : vector<8x512xf32> to vector<8x128xf32>
    %cst_66 = arith.constant 5.000000e-01 : f32
    %117 = vector.broadcast %cst_66 : f32 to vector<8x128xf32>
    %118 = arith.mulf %117, %116 : vector<8x128xf32>
    %119 = math.tanh %118 : vector<8x128xf32>
    %cst_67 = arith.constant 5.000000e-01 : f32
    %120 = vector.broadcast %cst_67 : f32 to vector<8x128xf32>
    %121 = arith.mulf %120, %119 : vector<8x128xf32>
    %cst_68 = arith.constant 5.000000e-01 : f32
    %122 = vector.broadcast %cst_68 : f32 to vector<8x128xf32>
    %123 = arith.addf %121, %122 : vector<8x128xf32>
    %124 = vector.extract_strided_slice %107 {offsets = [0, 256], sizes = [8, 128], strides = [1, 1]} : vector<8x512xf32> to vector<8x128xf32>
    %125 = math.tanh %124 : vector<8x128xf32>
    %126 = vector.extract_strided_slice %107 {offsets = [0, 384], sizes = [8, 128], strides = [1, 1]} : vector<8x512xf32> to vector<8x128xf32>
    %cst_69 = arith.constant 5.000000e-01 : f32
    %127 = vector.broadcast %cst_69 : f32 to vector<8x128xf32>
    %128 = arith.mulf %127, %126 : vector<8x128xf32>
    %129 = math.tanh %128 : vector<8x128xf32>
    %cst_70 = arith.constant 5.000000e-01 : f32
    %130 = vector.broadcast %cst_70 : f32 to vector<8x128xf32>
    %131 = arith.mulf %130, %129 : vector<8x128xf32>
    %cst_71 = arith.constant 5.000000e-01 : f32
    %132 = vector.broadcast %cst_71 : f32 to vector<8x128xf32>
    %133 = arith.addf %131, %132 : vector<8x128xf32>
    %134 = arith.mulf %123, %60 : vector<8x128xf32>
    %135 = arith.mulf %115, %125 : vector<8x128xf32>
    %136 = arith.addf %134, %135 : vector<8x128xf32>
    %137 = math.tanh %136 : vector<8x128xf32>
    %138 = arith.mulf %133, %137 : vector<8x128xf32>
    %c0_72 = arith.constant 0 : index
    %c0_73 = arith.constant 0 : index
    %139 = vector.load %arg8[%c0_72, %c0_73] : memref<128x512xf32, #tpu.memory_space<vmem>>, vector<128x512xf32>
    %cst_74 = arith.constant dense<0.000000e+00> : vector<8x512xf32>
    %140 = tpu.matmul %138, %139, %cst_74 {dimension_numbers = #tpu.dot_dimension_numbers<[1], [0], [0], [1], [0, 0, 1, 1], [], []>} : vector<8x128xf32>, vector<128x512xf32>, vector<8x512xf32> -> vector<8x512xf32>
    %141 = arith.addf %140, %16 : vector<8x512xf32>
    %c0_75 = arith.constant 0 : index
    %c0_76 = arith.constant 0 : index
    %142 = vector.load %arg9[%c0_75, %c0_76] : memref<128x512xf32, #tpu.memory_space<vmem>>, vector<128x512xf32>
    %cst_77 = arith.constant dense<0.000000e+00> : vector<8x512xf32>
    %143 = tpu.matmul %99, %142, %cst_77 {dimension_numbers = #tpu.dot_dimension_numbers<[1], [0], [0], [1], [0, 0, 1, 1], [], []>} : vector<8x128xf32>, vector<128x512xf32>, vector<8x512xf32> -> vector<8x512xf32>
    %144 = arith.addf %141, %143 : vector<8x512xf32>
    %145 = vector.extract_strided_slice %144 {offsets = [0, 0], sizes = [8, 128], strides = [1, 1]} : vector<8x512xf32> to vector<8x128xf32>
    %cst_78 = arith.constant 5.000000e-01 : f32
    %146 = vector.broadcast %cst_78 : f32 to vector<8x128xf32>
    %147 = arith.mulf %146, %145 : vector<8x128xf32>
    %148 = math.tanh %147 : vector<8x128xf32>
    %cst_79 = arith.constant 5.000000e-01 : f32
    %149 = vector.broadcast %cst_79 : f32 to vector<8x128xf32>
    %150 = arith.mulf %149, %148 : vector<8x128xf32>
    %cst_80 = arith.constant 5.000000e-01 : f32
    %151 = vector.broadcast %cst_80 : f32 to vector<8x128xf32>
    %152 = arith.addf %150, %151 : vector<8x128xf32>
    %153 = vector.extract_strided_slice %144 {offsets = [0, 128], sizes = [8, 128], strides = [1, 1]} : vector<8x512xf32> to vector<8x128xf32>
    %cst_81 = arith.constant 5.000000e-01 : f32
    %154 = vector.broadcast %cst_81 : f32 to vector<8x128xf32>
    %155 = arith.mulf %154, %153 : vector<8x128xf32>
    %156 = math.tanh %155 : vector<8x128xf32>
    %cst_82 = arith.constant 5.000000e-01 : f32
    %157 = vector.broadcast %cst_82 : f32 to vector<8x128xf32>
    %158 = arith.mulf %157, %156 : vector<8x128xf32>
    %cst_83 = arith.constant 5.000000e-01 : f32
    %159 = vector.broadcast %cst_83 : f32 to vector<8x128xf32>
    %160 = arith.addf %158, %159 : vector<8x128xf32>
    %161 = vector.extract_strided_slice %144 {offsets = [0, 256], sizes = [8, 128], strides = [1, 1]} : vector<8x512xf32> to vector<8x128xf32>
    %162 = math.tanh %161 : vector<8x128xf32>
    %163 = vector.extract_strided_slice %144 {offsets = [0, 384], sizes = [8, 128], strides = [1, 1]} : vector<8x512xf32> to vector<8x128xf32>
    %cst_84 = arith.constant 5.000000e-01 : f32
    %164 = vector.broadcast %cst_84 : f32 to vector<8x128xf32>
    %165 = arith.mulf %164, %163 : vector<8x128xf32>
    %166 = math.tanh %165 : vector<8x128xf32>
    %cst_85 = arith.constant 5.000000e-01 : f32
    %167 = vector.broadcast %cst_85 : f32 to vector<8x128xf32>
    %168 = arith.mulf %167, %166 : vector<8x128xf32>
    %cst_86 = arith.constant 5.000000e-01 : f32
    %169 = vector.broadcast %cst_86 : f32 to vector<8x128xf32>
    %170 = arith.addf %168, %169 : vector<8x128xf32>
    %171 = arith.mulf %160, %97 : vector<8x128xf32>
    %172 = arith.mulf %152, %162 : vector<8x128xf32>
    %173 = arith.addf %171, %172 : vector<8x128xf32>
    %174 = math.tanh %173 : vector<8x128xf32>
    %175 = arith.mulf %170, %174 : vector<8x128xf32>
    %c0_87 = arith.constant 0 : index
    %c0_88 = arith.constant 0 : index
    %176 = vector.load %arg11[%c0_87, %c0_88] : memref<128x256xf32, #tpu.memory_space<vmem>>, vector<128x256xf32>
    %cst_89 = arith.constant dense<0.000000e+00> : vector<8x256xf32>
    %177 = tpu.matmul %175, %176, %cst_89 {dimension_numbers = #tpu.dot_dimension_numbers<[1], [0], [0], [1], [0, 0, 1, 1], [], []>} : vector<8x128xf32>, vector<128x256xf32>, vector<8x256xf32> -> vector<8x256xf32>
    %178 = arith.addf %177, %19 : vector<8x256xf32>
    %c0_90 = arith.constant 0 : index
    %c256 = arith.constant 256 : index
    %179 = vector.load %arg13[%c0_90, %c256] : memref<8x2048xf32, #tpu.memory_space<vmem>>, vector<8x256xf32>
    tpu.vector_store %arg13[%c0_90, %c256], %178 {strides = array<i32>} : memref<8x2048xf32, #tpu.memory_space<vmem>>, vector<8x256xf32>,
    %c16 = arith.constant 16 : index
    %c0_91 = arith.constant 0 : index
    %180 = vector.load %arg16[%c16, %c0_91] : memref<64x512xf32, #tpu.memory_space<vmem>>, vector<8x512xf32>
    %c0_92 = arith.constant 0 : index
    %c0_93 = arith.constant 0 : index
    %181 = vector.load %arg6[%c0_92, %c0_93] : memref<128x512xf32, #tpu.memory_space<vmem>>, vector<128x512xf32>
    %cst_94 = arith.constant dense<0.000000e+00> : vector<8x512xf32>
    %182 = tpu.matmul %138, %181, %cst_94 {dimension_numbers = #tpu.dot_dimension_numbers<[1], [0], [0], [1], [0, 0, 1, 1], [], []>} : vector<8x128xf32>, vector<128x512xf32>, vector<8x512xf32> -> vector<8x512xf32>
    %183 = arith.addf %180, %182 : vector<8x512xf32>
    %184 = vector.extract_strided_slice %183 {offsets = [0, 0], sizes = [8, 128], strides = [1, 1]} : vector<8x512xf32> to vector<8x128xf32>
    %cst_95 = arith.constant 5.000000e-01 : f32
    %185 = vector.broadcast %cst_95 : f32 to vector<8x128xf32>
    %186 = arith.mulf %185, %184 : vector<8x128xf32>
    %187 = math.tanh %186 : vector<8x128xf32>
    %cst_96 = arith.constant 5.000000e-01 : f32
    %188 = vector.broadcast %cst_96 : f32 to vector<8x128xf32>
    %189 = arith.mulf %188, %187 : vector<8x128xf32>
    %cst_97 = arith.constant 5.000000e-01 : f32
    %190 = vector.broadcast %cst_97 : f32 to vector<8x128xf32>
    %191 = arith.addf %189, %190 : vector<8x128xf32>
    %192 = vector.extract_strided_slice %183 {offsets = [0, 128], sizes = [8, 128], strides = [1, 1]} : vector<8x512xf32> to vector<8x128xf32>
    %cst_98 = arith.constant 5.000000e-01 : f32
    %193 = vector.broadcast %cst_98 : f32 to vector<8x128xf32>
    %194 = arith.mulf %193, %192 : vector<8x128xf32>
    %195 = math.tanh %194 : vector<8x128xf32>
    %cst_99 = arith.constant 5.000000e-01 : f32
    %196 = vector.broadcast %cst_99 : f32 to vector<8x128xf32>
    %197 = arith.mulf %196, %195 : vector<8x128xf32>
    %cst_100 = arith.constant 5.000000e-01 : f32
    %198 = vector.broadcast %cst_100 : f32 to vector<8x128xf32>
    %199 = arith.addf %197, %198 : vector<8x128xf32>
    %200 = vector.extract_strided_slice %183 {offsets = [0, 256], sizes = [8, 128], strides = [1, 1]} : vector<8x512xf32> to vector<8x128xf32>
    %201 = math.tanh %200 : vector<8x128xf32>
    %202 = vector.extract_strided_slice %183 {offsets = [0, 384], sizes = [8, 128], strides = [1, 1]} : vector<8x512xf32> to vector<8x128xf32>
    %cst_101 = arith.constant 5.000000e-01 : f32
    %203 = vector.broadcast %cst_101 : f32 to vector<8x128xf32>
    %204 = arith.mulf %203, %202 : vector<8x128xf32>
    %205 = math.tanh %204 : vector<8x128xf32>
    %cst_102 = arith.constant 5.000000e-01 : f32
    %206 = vector.broadcast %cst_102 : f32 to vector<8x128xf32>
    %207 = arith.mulf %206, %205 : vector<8x128xf32>
    %cst_103 = arith.constant 5.000000e-01 : f32
    %208 = vector.broadcast %cst_103 : f32 to vector<8x128xf32>
    %209 = arith.addf %207, %208 : vector<8x128xf32>
    %210 = arith.mulf %199, %136 : vector<8x128xf32>
    %211 = arith.mulf %191, %201 : vector<8x128xf32>
    %212 = arith.addf %210, %211 : vector<8x128xf32>
    %213 = math.tanh %212 : vector<8x128xf32>
    %214 = arith.mulf %209, %213 : vector<8x128xf32>
    %c0_104 = arith.constant 0 : index
    %c0_105 = arith.constant 0 : index
    %215 = vector.load %arg8[%c0_104, %c0_105] : memref<128x512xf32, #tpu.memory_space<vmem>>, vector<128x512xf32>
    %cst_106 = arith.constant dense<0.000000e+00> : vector<8x512xf32>
    %216 = tpu.matmul %214, %215, %cst_106 {dimension_numbers = #tpu.dot_dimension_numbers<[1], [0], [0], [1], [0, 0, 1, 1], [], []>} : vector<8x128xf32>, vector<128x512xf32>, vector<8x512xf32> -> vector<8x512xf32>
    %217 = arith.addf %216, %16 : vector<8x512xf32>
    %c0_107 = arith.constant 0 : index
    %c0_108 = arith.constant 0 : index
    %218 = vector.load %arg9[%c0_107, %c0_108] : memref<128x512xf32, #tpu.memory_space<vmem>>, vector<128x512xf32>
    %cst_109 = arith.constant dense<0.000000e+00> : vector<8x512xf32>
    %219 = tpu.matmul %175, %218, %cst_109 {dimension_numbers = #tpu.dot_dimension_numbers<[1], [0], [0], [1], [0, 0, 1, 1], [], []>} : vector<8x128xf32>, vector<128x512xf32>, vector<8x512xf32> -> vector<8x512xf32>
    %220 = arith.addf %217, %219 : vector<8x512xf32>
    %221 = vector.extract_strided_slice %220 {offsets = [0, 0], sizes = [8, 128], strides = [1, 1]} : vector<8x512xf32> to vector<8x128xf32>
    %cst_110 = arith.constant 5.000000e-01 : f32
    %222 = vector.broadcast %cst_110 : f32 to vector<8x128xf32>
    %223 = arith.mulf %222, %221 : vector<8x128xf32>
    %224 = math.tanh %223 : vector<8x128xf32>
    %cst_111 = arith.constant 5.000000e-01 : f32
    %225 = vector.broadcast %cst_111 : f32 to vector<8x128xf32>
    %226 = arith.mulf %225, %224 : vector<8x128xf32>
    %cst_112 = arith.constant 5.000000e-01 : f32
    %227 = vector.broadcast %cst_112 : f32 to vector<8x128xf32>
    %228 = arith.addf %226, %227 : vector<8x128xf32>
    %229 = vector.extract_strided_slice %220 {offsets = [0, 128], sizes = [8, 128], strides = [1, 1]} : vector<8x512xf32> to vector<8x128xf32>
    %cst_113 = arith.constant 5.000000e-01 : f32
    %230 = vector.broadcast %cst_113 : f32 to vector<8x128xf32>
    %231 = arith.mulf %230, %229 : vector<8x128xf32>
    %232 = math.tanh %231 : vector<8x128xf32>
    %cst_114 = arith.constant 5.000000e-01 : f32
    %233 = vector.broadcast %cst_114 : f32 to vector<8x128xf32>
    %234 = arith.mulf %233, %232 : vector<8x128xf32>
    %cst_115 = arith.constant 5.000000e-01 : f32
    %235 = vector.broadcast %cst_115 : f32 to vector<8x128xf32>
    %236 = arith.addf %234, %235 : vector<8x128xf32>
    %237 = vector.extract_strided_slice %220 {offsets = [0, 256], sizes = [8, 128], strides = [1, 1]} : vector<8x512xf32> to vector<8x128xf32>
    %238 = math.tanh %237 : vector<8x128xf32>
    %239 = vector.extract_strided_slice %220 {offsets = [0, 384], sizes = [8, 128], strides = [1, 1]} : vector<8x512xf32> to vector<8x128xf32>
    %cst_116 = arith.constant 5.000000e-01 : f32
    %240 = vector.broadcast %cst_116 : f32 to vector<8x128xf32>
    %241 = arith.mulf %240, %239 : vector<8x128xf32>
    %242 = math.tanh %241 : vector<8x128xf32>
    %cst_117 = arith.constant 5.000000e-01 : f32
    %243 = vector.broadcast %cst_117 : f32 to vector<8x128xf32>
    %244 = arith.mulf %243, %242 : vector<8x128xf32>
    %cst_118 = arith.constant 5.000000e-01 : f32
    %245 = vector.broadcast %cst_118 : f32 to vector<8x128xf32>
    %246 = arith.addf %244, %245 : vector<8x128xf32>
    %247 = arith.mulf %236, %173 : vector<8x128xf32>
    %248 = arith.mulf %228, %238 : vector<8x128xf32>
    %249 = arith.addf %247, %248 : vector<8x128xf32>
    %250 = math.tanh %249 : vector<8x128xf32>
    %251 = arith.mulf %246, %250 : vector<8x128xf32>
    %c0_119 = arith.constant 0 : index
    %c0_120 = arith.constant 0 : index
    %252 = vector.load %arg11[%c0_119, %c0_120] : memref<128x256xf32, #tpu.memory_space<vmem>>, vector<128x256xf32>
    %cst_121 = arith.constant dense<0.000000e+00> : vector<8x256xf32>
    %253 = tpu.matmul %251, %252, %cst_121 {dimension_numbers = #tpu.dot_dimension_numbers<[1], [0], [0], [1], [0, 0, 1, 1], [], []>} : vector<8x128xf32>, vector<128x256xf32>, vector<8x256xf32> -> vector<8x256xf32>
    %254 = arith.addf %253, %19 : vector<8x256xf32>
    %c0_122 = arith.constant 0 : index
    %c512 = arith.constant 512 : index
    %255 = vector.load %arg13[%c0_122, %c512] : memref<8x2048xf32, #tpu.memory_space<vmem>>, vector<8x256xf32>
    tpu.vector_store %arg13[%c0_122, %c512], %254 {strides = array<i32>} : memref<8x2048xf32, #tpu.memory_space<vmem>>, vector<8x256xf32>,
    %c24 = arith.constant 24 : index
    %c0_123 = arith.constant 0 : index
    %256 = vector.load %arg16[%c24, %c0_123] : memref<64x512xf32, #tpu.memory_space<vmem>>, vector<8x512xf32>
    %c0_124 = arith.constant 0 : index
    %c0_125 = arith.constant 0 : index
    %257 = vector.load %arg6[%c0_124, %c0_125] : memref<128x512xf32, #tpu.memory_space<vmem>>, vector<128x512xf32>
    %cst_126 = arith.constant dense<0.000000e+00> : vector<8x512xf32>
    %258 = tpu.matmul %214, %257, %cst_126 {dimension_numbers = #tpu.dot_dimension_numbers<[1], [0], [0], [1], [0, 0, 1, 1], [], []>} : vector<8x128xf32>, vector<128x512xf32>, vector<8x512xf32> -> vector<8x512xf32>
    %259 = arith.addf %256, %258 : vector<8x512xf32>
    %260 = vector.extract_strided_slice %259 {offsets = [0, 0], sizes = [8, 128], strides = [1, 1]} : vector<8x512xf32> to vector<8x128xf32>
    %cst_127 = arith.constant 5.000000e-01 : f32
    %261 = vector.broadcast %cst_127 : f32 to vector<8x128xf32>
    %262 = arith.mulf %261, %260 : vector<8x128xf32>
    %263 = math.tanh %262 : vector<8x128xf32>
    %cst_128 = arith.constant 5.000000e-01 : f32
    %264 = vector.broadcast %cst_128 : f32 to vector<8x128xf32>
    %265 = arith.mulf %264, %263 : vector<8x128xf32>
    %cst_129 = arith.constant 5.000000e-01 : f32
    %266 = vector.broadcast %cst_129 : f32 to vector<8x128xf32>
    %267 = arith.addf %265, %266 : vector<8x128xf32>
    %268 = vector.extract_strided_slice %259 {offsets = [0, 128], sizes = [8, 128], strides = [1, 1]} : vector<8x512xf32> to vector<8x128xf32>
    %cst_130 = arith.constant 5.000000e-01 : f32
    %269 = vector.broadcast %cst_130 : f32 to vector<8x128xf32>
    %270 = arith.mulf %269, %268 : vector<8x128xf32>
    %271 = math.tanh %270 : vector<8x128xf32>
    %cst_131 = arith.constant 5.000000e-01 : f32
    %272 = vector.broadcast %cst_131 : f32 to vector<8x128xf32>
    %273 = arith.mulf %272, %271 : vector<8x128xf32>
    %cst_132 = arith.constant 5.000000e-01 : f32
    %274 = vector.broadcast %cst_132 : f32 to vector<8x128xf32>
    %275 = arith.addf %273, %274 : vector<8x128xf32>
    %276 = vector.extract_strided_slice %259 {offsets = [0, 256], sizes = [8, 128], strides = [1, 1]} : vector<8x512xf32> to vector<8x128xf32>
    %277 = math.tanh %276 : vector<8x128xf32>
    %278 = vector.extract_strided_slice %259 {offsets = [0, 384], sizes = [8, 128], strides = [1, 1]} : vector<8x512xf32> to vector<8x128xf32>
    %cst_133 = arith.constant 5.000000e-01 : f32
    %279 = vector.broadcast %cst_133 : f32 to vector<8x128xf32>
    %280 = arith.mulf %279, %278 : vector<8x128xf32>
    %281 = math.tanh %280 : vector<8x128xf32>
    %cst_134 = arith.constant 5.000000e-01 : f32
    %282 = vector.broadcast %cst_134 : f32 to vector<8x128xf32>
    %283 = arith.mulf %282, %281 : vector<8x128xf32>
    %cst_135 = arith.constant 5.000000e-01 : f32
    %284 = vector.broadcast %cst_135 : f32 to vector<8x128xf32>
    %285 = arith.addf %283, %284 : vector<8x128xf32>
    %286 = arith.mulf %275, %212 : vector<8x128xf32>
    %287 = arith.mulf %267, %277 : vector<8x128xf32>
    %288 = arith.addf %286, %287 : vector<8x128xf32>
    %289 = math.tanh %288 : vector<8x128xf32>
    %290 = arith.mulf %285, %289 : vector<8x128xf32>
    %c0_136 = arith.constant 0 : index
    %c0_137 = arith.constant 0 : index
    %291 = vector.load %arg8[%c0_136, %c0_137] : memref<128x512xf32, #tpu.memory_space<vmem>>, vector<128x512xf32>
    %cst_138 = arith.constant dense<0.000000e+00> : vector<8x512xf32>
    %292 = tpu.matmul %290, %291, %cst_138 {dimension_numbers = #tpu.dot_dimension_numbers<[1], [0], [0], [1], [0, 0, 1, 1], [], []>} : vector<8x128xf32>, vector<128x512xf32>, vector<8x512xf32> -> vector<8x512xf32>
    %293 = arith.addf %292, %16 : vector<8x512xf32>
    %c0_139 = arith.constant 0 : index
    %c0_140 = arith.constant 0 : index
    %294 = vector.load %arg9[%c0_139, %c0_140] : memref<128x512xf32, #tpu.memory_space<vmem>>, vector<128x512xf32>
    %cst_141 = arith.constant dense<0.000000e+00> : vector<8x512xf32>
    %295 = tpu.matmul %251, %294, %cst_141 {dimension_numbers = #tpu.dot_dimension_numbers<[1], [0], [0], [1], [0, 0, 1, 1], [], []>} : vector<8x128xf32>, vector<128x512xf32>, vector<8x512xf32> -> vector<8x512xf32>
    %296 = arith.addf %293, %295 : vector<8x512xf32>
    %297 = vector.extract_strided_slice %296 {offsets = [0, 0], sizes = [8, 128], strides = [1, 1]} : vector<8x512xf32> to vector<8x128xf32>
    %cst_142 = arith.constant 5.000000e-01 : f32
    %298 = vector.broadcast %cst_142 : f32 to vector<8x128xf32>
    %299 = arith.mulf %298, %297 : vector<8x128xf32>
    %300 = math.tanh %299 : vector<8x128xf32>
    %cst_143 = arith.constant 5.000000e-01 : f32
    %301 = vector.broadcast %cst_143 : f32 to vector<8x128xf32>
    %302 = arith.mulf %301, %300 : vector<8x128xf32>
    %cst_144 = arith.constant 5.000000e-01 : f32
    %303 = vector.broadcast %cst_144 : f32 to vector<8x128xf32>
    %304 = arith.addf %302, %303 : vector<8x128xf32>
    %305 = vector.extract_strided_slice %296 {offsets = [0, 128], sizes = [8, 128], strides = [1, 1]} : vector<8x512xf32> to vector<8x128xf32>
    %cst_145 = arith.constant 5.000000e-01 : f32
    %306 = vector.broadcast %cst_145 : f32 to vector<8x128xf32>
    %307 = arith.mulf %306, %305 : vector<8x128xf32>
    %308 = math.tanh %307 : vector<8x128xf32>
    %cst_146 = arith.constant 5.000000e-01 : f32
    %309 = vector.broadcast %cst_146 : f32 to vector<8x128xf32>
    %310 = arith.mulf %309, %308 : vector<8x128xf32>
    %cst_147 = arith.constant 5.000000e-01 : f32
    %311 = vector.broadcast %cst_147 : f32 to vector<8x128xf32>
    %312 = arith.addf %310, %311 : vector<8x128xf32>
    %313 = vector.extract_strided_slice %296 {offsets = [0, 256], sizes = [8, 128], strides = [1, 1]} : vector<8x512xf32> to vector<8x128xf32>
    %314 = math.tanh %313 : vector<8x128xf32>
    %315 = vector.extract_strided_slice %296 {offsets = [0, 384], sizes = [8, 128], strides = [1, 1]} : vector<8x512xf32> to vector<8x128xf32>
    %cst_148 = arith.constant 5.000000e-01 : f32
    %316 = vector.broadcast %cst_148 : f32 to vector<8x128xf32>
    %317 = arith.mulf %316, %315 : vector<8x128xf32>
    %318 = math.tanh %317 : vector<8x128xf32>
    %cst_149 = arith.constant 5.000000e-01 : f32
    %319 = vector.broadcast %cst_149 : f32 to vector<8x128xf32>
    %320 = arith.mulf %319, %318 : vector<8x128xf32>
    %cst_150 = arith.constant 5.000000e-01 : f32
    %321 = vector.broadcast %cst_150 : f32 to vector<8x128xf32>
    %322 = arith.addf %320, %321 : vector<8x128xf32>
    %323 = arith.mulf %312, %249 : vector<8x128xf32>
    %324 = arith.mulf %304, %314 : vector<8x128xf32>
    %325 = arith.addf %323, %324 : vector<8x128xf32>
    %326 = math.tanh %325 : vector<8x128xf32>
    %327 = arith.mulf %322, %326 : vector<8x128xf32>
    %c0_151 = arith.constant 0 : index
    %c0_152 = arith.constant 0 : index
    %328 = vector.load %arg11[%c0_151, %c0_152] : memref<128x256xf32, #tpu.memory_space<vmem>>, vector<128x256xf32>
    %cst_153 = arith.constant dense<0.000000e+00> : vector<8x256xf32>
    %329 = tpu.matmul %327, %328, %cst_153 {dimension_numbers = #tpu.dot_dimension_numbers<[1], [0], [0], [1], [0, 0, 1, 1], [], []>} : vector<8x128xf32>, vector<128x256xf32>, vector<8x256xf32> -> vector<8x256xf32>
    %330 = arith.addf %329, %19 : vector<8x256xf32>
    %c0_154 = arith.constant 0 : index
    %c768 = arith.constant 768 : index
    %331 = vector.load %arg13[%c0_154, %c768] : memref<8x2048xf32, #tpu.memory_space<vmem>>, vector<8x256xf32>
    tpu.vector_store %arg13[%c0_154, %c768], %330 {strides = array<i32>} : memref<8x2048xf32, #tpu.memory_space<vmem>>, vector<8x256xf32>,
    %c32 = arith.constant 32 : index
    %c0_155 = arith.constant 0 : index
    %332 = vector.load %arg16[%c32, %c0_155] : memref<64x512xf32, #tpu.memory_space<vmem>>, vector<8x512xf32>
    %c0_156 = arith.constant 0 : index
    %c0_157 = arith.constant 0 : index
    %333 = vector.load %arg6[%c0_156, %c0_157] : memref<128x512xf32, #tpu.memory_space<vmem>>, vector<128x512xf32>
    %cst_158 = arith.constant dense<0.000000e+00> : vector<8x512xf32>
    %334 = tpu.matmul %290, %333, %cst_158 {dimension_numbers = #tpu.dot_dimension_numbers<[1], [0], [0], [1], [0, 0, 1, 1], [], []>} : vector<8x128xf32>, vector<128x512xf32>, vector<8x512xf32> -> vector<8x512xf32>
    %335 = arith.addf %332, %334 : vector<8x512xf32>
    %336 = vector.extract_strided_slice %335 {offsets = [0, 0], sizes = [8, 128], strides = [1, 1]} : vector<8x512xf32> to vector<8x128xf32>
    %cst_159 = arith.constant 5.000000e-01 : f32
    %337 = vector.broadcast %cst_159 : f32 to vector<8x128xf32>
    %338 = arith.mulf %337, %336 : vector<8x128xf32>
    %339 = math.tanh %338 : vector<8x128xf32>
    %cst_160 = arith.constant 5.000000e-01 : f32
    %340 = vector.broadcast %cst_160 : f32 to vector<8x128xf32>
    %341 = arith.mulf %340, %339 : vector<8x128xf32>
    %cst_161 = arith.constant 5.000000e-01 : f32
    %342 = vector.broadcast %cst_161 : f32 to vector<8x128xf32>
    %343 = arith.addf %341, %342 : vector<8x128xf32>
    %344 = vector.extract_strided_slice %335 {offsets = [0, 128], sizes = [8, 128], strides = [1, 1]} : vector<8x512xf32> to vector<8x128xf32>
    %cst_162 = arith.constant 5.000000e-01 : f32
    %345 = vector.broadcast %cst_162 : f32 to vector<8x128xf32>
    %346 = arith.mulf %345, %344 : vector<8x128xf32>
    %347 = math.tanh %346 : vector<8x128xf32>
    %cst_163 = arith.constant 5.000000e-01 : f32
    %348 = vector.broadcast %cst_163 : f32 to vector<8x128xf32>
    %349 = arith.mulf %348, %347 : vector<8x128xf32>
    %cst_164 = arith.constant 5.000000e-01 : f32
    %350 = vector.broadcast %cst_164 : f32 to vector<8x128xf32>
    %351 = arith.addf %349, %350 : vector<8x128xf32>
    %352 = vector.extract_strided_slice %335 {offsets = [0, 256], sizes = [8, 128], strides = [1, 1]} : vector<8x512xf32> to vector<8x128xf32>
    %353 = math.tanh %352 : vector<8x128xf32>
    %354 = vector.extract_strided_slice %335 {offsets = [0, 384], sizes = [8, 128], strides = [1, 1]} : vector<8x512xf32> to vector<8x128xf32>
    %cst_165 = arith.constant 5.000000e-01 : f32
    %355 = vector.broadcast %cst_165 : f32 to vector<8x128xf32>
    %356 = arith.mulf %355, %354 : vector<8x128xf32>
    %357 = math.tanh %356 : vector<8x128xf32>
    %cst_166 = arith.constant 5.000000e-01 : f32
    %358 = vector.broadcast %cst_166 : f32 to vector<8x128xf32>
    %359 = arith.mulf %358, %357 : vector<8x128xf32>
    %cst_167 = arith.constant 5.000000e-01 : f32
    %360 = vector.broadcast %cst_167 : f32 to vector<8x128xf32>
    %361 = arith.addf %359, %360 : vector<8x128xf32>
    %362 = arith.mulf %351, %288 : vector<8x128xf32>
    %363 = arith.mulf %343, %353 : vector<8x128xf32>
    %364 = arith.addf %362, %363 : vector<8x128xf32>
    %365 = math.tanh %364 : vector<8x128xf32>
    %366 = arith.mulf %361, %365 : vector<8x128xf32>
    %c0_168 = arith.constant 0 : index
    %c0_169 = arith.constant 0 : index
    %367 = vector.load %arg8[%c0_168, %c0_169] : memref<128x512xf32, #tpu.memory_space<vmem>>, vector<128x512xf32>
    %cst_170 = arith.constant dense<0.000000e+00> : vector<8x512xf32>
    %368 = tpu.matmul %366, %367, %cst_170 {dimension_numbers = #tpu.dot_dimension_numbers<[1], [0], [0], [1], [0, 0, 1, 1], [], []>} : vector<8x128xf32>, vector<128x512xf32>, vector<8x512xf32> -> vector<8x512xf32>
    %369 = arith.addf %368, %16 : vector<8x512xf32>
    %c0_171 = arith.constant 0 : index
    %c0_172 = arith.constant 0 : index
    %370 = vector.load %arg9[%c0_171, %c0_172] : memref<128x512xf32, #tpu.memory_space<vmem>>, vector<128x512xf32>
    %cst_173 = arith.constant dense<0.000000e+00> : vector<8x512xf32>
    %371 = tpu.matmul %327, %370, %cst_173 {dimension_numbers = #tpu.dot_dimension_numbers<[1], [0], [0], [1], [0, 0, 1, 1], [], []>} : vector<8x128xf32>, vector<128x512xf32>, vector<8x512xf32> -> vector<8x512xf32>
    %372 = arith.addf %369, %371 : vector<8x512xf32>
    %373 = vector.extract_strided_slice %372 {offsets = [0, 0], sizes = [8, 128], strides = [1, 1]} : vector<8x512xf32> to vector<8x128xf32>
    %cst_174 = arith.constant 5.000000e-01 : f32
    %374 = vector.broadcast %cst_174 : f32 to vector<8x128xf32>
    %375 = arith.mulf %374, %373 : vector<8x128xf32>
    %376 = math.tanh %375 : vector<8x128xf32>
    %cst_175 = arith.constant 5.000000e-01 : f32
    %377 = vector.broadcast %cst_175 : f32 to vector<8x128xf32>
    %378 = arith.mulf %377, %376 : vector<8x128xf32>
    %cst_176 = arith.constant 5.000000e-01 : f32
    %379 = vector.broadcast %cst_176 : f32 to vector<8x128xf32>
    %380 = arith.addf %378, %379 : vector<8x128xf32>
    %381 = vector.extract_strided_slice %372 {offsets = [0, 128], sizes = [8, 128], strides = [1, 1]} : vector<8x512xf32> to vector<8x128xf32>
    %cst_177 = arith.constant 5.000000e-01 : f32
    %382 = vector.broadcast %cst_177 : f32 to vector<8x128xf32>
    %383 = arith.mulf %382, %381 : vector<8x128xf32>
    %384 = math.tanh %383 : vector<8x128xf32>
    %cst_178 = arith.constant 5.000000e-01 : f32
    %385 = vector.broadcast %cst_178 : f32 to vector<8x128xf32>
    %386 = arith.mulf %385, %384 : vector<8x128xf32>
    %cst_179 = arith.constant 5.000000e-01 : f32
    %387 = vector.broadcast %cst_179 : f32 to vector<8x128xf32>
    %388 = arith.addf %386, %387 : vector<8x128xf32>
    %389 = vector.extract_strided_slice %372 {offsets = [0, 256], sizes = [8, 128], strides = [1, 1]} : vector<8x512xf32> to vector<8x128xf32>
    %390 = math.tanh %389 : vector<8x128xf32>
    %391 = vector.extract_strided_slice %372 {offsets = [0, 384], sizes = [8, 128], strides = [1, 1]} : vector<8x512xf32> to vector<8x128xf32>
    %cst_180 = arith.constant 5.000000e-01 : f32
    %392 = vector.broadcast %cst_180 : f32 to vector<8x128xf32>
    %393 = arith.mulf %392, %391 : vector<8x128xf32>
    %394 = math.tanh %393 : vector<8x128xf32>
    %cst_181 = arith.constant 5.000000e-01 : f32
    %395 = vector.broadcast %cst_181 : f32 to vector<8x128xf32>
    %396 = arith.mulf %395, %394 : vector<8x128xf32>
    %cst_182 = arith.constant 5.000000e-01 : f32
    %397 = vector.broadcast %cst_182 : f32 to vector<8x128xf32>
    %398 = arith.addf %396, %397 : vector<8x128xf32>
    %399 = arith.mulf %388, %325 : vector<8x128xf32>
    %400 = arith.mulf %380, %390 : vector<8x128xf32>
    %401 = arith.addf %399, %400 : vector<8x128xf32>
    %402 = math.tanh %401 : vector<8x128xf32>
    %403 = arith.mulf %398, %402 : vector<8x128xf32>
    %c0_183 = arith.constant 0 : index
    %c0_184 = arith.constant 0 : index
    %404 = vector.load %arg11[%c0_183, %c0_184] : memref<128x256xf32, #tpu.memory_space<vmem>>, vector<128x256xf32>
    %cst_185 = arith.constant dense<0.000000e+00> : vector<8x256xf32>
    %405 = tpu.matmul %403, %404, %cst_185 {dimension_numbers = #tpu.dot_dimension_numbers<[1], [0], [0], [1], [0, 0, 1, 1], [], []>} : vector<8x128xf32>, vector<128x256xf32>, vector<8x256xf32> -> vector<8x256xf32>
    %406 = arith.addf %405, %19 : vector<8x256xf32>
    %c0_186 = arith.constant 0 : index
    %c1024 = arith.constant 1024 : index
    %407 = vector.load %arg13[%c0_186, %c1024] : memref<8x2048xf32, #tpu.memory_space<vmem>>, vector<8x256xf32>
    tpu.vector_store %arg13[%c0_186, %c1024], %406 {strides = array<i32>} : memref<8x2048xf32, #tpu.memory_space<vmem>>, vector<8x256xf32>,
    %c40 = arith.constant 40 : index
    %c0_187 = arith.constant 0 : index
    %408 = vector.load %arg16[%c40, %c0_187] : memref<64x512xf32, #tpu.memory_space<vmem>>, vector<8x512xf32>
    %c0_188 = arith.constant 0 : index
    %c0_189 = arith.constant 0 : index
    %409 = vector.load %arg6[%c0_188, %c0_189] : memref<128x512xf32, #tpu.memory_space<vmem>>, vector<128x512xf32>
    %cst_190 = arith.constant dense<0.000000e+00> : vector<8x512xf32>
    %410 = tpu.matmul %366, %409, %cst_190 {dimension_numbers = #tpu.dot_dimension_numbers<[1], [0], [0], [1], [0, 0, 1, 1], [], []>} : vector<8x128xf32>, vector<128x512xf32>, vector<8x512xf32> -> vector<8x512xf32>
    %411 = arith.addf %408, %410 : vector<8x512xf32>
    %412 = vector.extract_strided_slice %411 {offsets = [0, 0], sizes = [8, 128], strides = [1, 1]} : vector<8x512xf32> to vector<8x128xf32>
    %cst_191 = arith.constant 5.000000e-01 : f32
    %413 = vector.broadcast %cst_191 : f32 to vector<8x128xf32>
    %414 = arith.mulf %413, %412 : vector<8x128xf32>
    %415 = math.tanh %414 : vector<8x128xf32>
    %cst_192 = arith.constant 5.000000e-01 : f32
    %416 = vector.broadcast %cst_192 : f32 to vector<8x128xf32>
    %417 = arith.mulf %416, %415 : vector<8x128xf32>
    %cst_193 = arith.constant 5.000000e-01 : f32
    %418 = vector.broadcast %cst_193 : f32 to vector<8x128xf32>
    %419 = arith.addf %417, %418 : vector<8x128xf32>
    %420 = vector.extract_strided_slice %411 {offsets = [0, 128], sizes = [8, 128], strides = [1, 1]} : vector<8x512xf32> to vector<8x128xf32>
    %cst_194 = arith.constant 5.000000e-01 : f32
    %421 = vector.broadcast %cst_194 : f32 to vector<8x128xf32>
    %422 = arith.mulf %421, %420 : vector<8x128xf32>
    %423 = math.tanh %422 : vector<8x128xf32>
    %cst_195 = arith.constant 5.000000e-01 : f32
    %424 = vector.broadcast %cst_195 : f32 to vector<8x128xf32>
    %425 = arith.mulf %424, %423 : vector<8x128xf32>
    %cst_196 = arith.constant 5.000000e-01 : f32
    %426 = vector.broadcast %cst_196 : f32 to vector<8x128xf32>
    %427 = arith.addf %425, %426 : vector<8x128xf32>
    %428 = vector.extract_strided_slice %411 {offsets = [0, 256], sizes = [8, 128], strides = [1, 1]} : vector<8x512xf32> to vector<8x128xf32>
    %429 = math.tanh %428 : vector<8x128xf32>
    %430 = vector.extract_strided_slice %411 {offsets = [0, 384], sizes = [8, 128], strides = [1, 1]} : vector<8x512xf32> to vector<8x128xf32>
    %cst_197 = arith.constant 5.000000e-01 : f32
    %431 = vector.broadcast %cst_197 : f32 to vector<8x128xf32>
    %432 = arith.mulf %431, %430 : vector<8x128xf32>
    %433 = math.tanh %432 : vector<8x128xf32>
    %cst_198 = arith.constant 5.000000e-01 : f32
    %434 = vector.broadcast %cst_198 : f32 to vector<8x128xf32>
    %435 = arith.mulf %434, %433 : vector<8x128xf32>
    %cst_199 = arith.constant 5.000000e-01 : f32
    %436 = vector.broadcast %cst_199 : f32 to vector<8x128xf32>
    %437 = arith.addf %435, %436 : vector<8x128xf32>
    %438 = arith.mulf %427, %364 : vector<8x128xf32>
    %439 = arith.mulf %419, %429 : vector<8x128xf32>
    %440 = arith.addf %438, %439 : vector<8x128xf32>
    %441 = math.tanh %440 : vector<8x128xf32>
    %442 = arith.mulf %437, %441 : vector<8x128xf32>
    %c0_200 = arith.constant 0 : index
    %c0_201 = arith.constant 0 : index
    %443 = vector.load %arg8[%c0_200, %c0_201] : memref<128x512xf32, #tpu.memory_space<vmem>>, vector<128x512xf32>
    %cst_202 = arith.constant dense<0.000000e+00> : vector<8x512xf32>
    %444 = tpu.matmul %442, %443, %cst_202 {dimension_numbers = #tpu.dot_dimension_numbers<[1], [0], [0], [1], [0, 0, 1, 1], [], []>} : vector<8x128xf32>, vector<128x512xf32>, vector<8x512xf32> -> vector<8x512xf32>
    %445 = arith.addf %444, %16 : vector<8x512xf32>
    %c0_203 = arith.constant 0 : index
    %c0_204 = arith.constant 0 : index
    %446 = vector.load %arg9[%c0_203, %c0_204] : memref<128x512xf32, #tpu.memory_space<vmem>>, vector<128x512xf32>
    %cst_205 = arith.constant dense<0.000000e+00> : vector<8x512xf32>
    %447 = tpu.matmul %403, %446, %cst_205 {dimension_numbers = #tpu.dot_dimension_numbers<[1], [0], [0], [1], [0, 0, 1, 1], [], []>} : vector<8x128xf32>, vector<128x512xf32>, vector<8x512xf32> -> vector<8x512xf32>
    %448 = arith.addf %445, %447 : vector<8x512xf32>
    %449 = vector.extract_strided_slice %448 {offsets = [0, 0], sizes = [8, 128], strides = [1, 1]} : vector<8x512xf32> to vector<8x128xf32>
    %cst_206 = arith.constant 5.000000e-01 : f32
    %450 = vector.broadcast %cst_206 : f32 to vector<8x128xf32>
    %451 = arith.mulf %450, %449 : vector<8x128xf32>
    %452 = math.tanh %451 : vector<8x128xf32>
    %cst_207 = arith.constant 5.000000e-01 : f32
    %453 = vector.broadcast %cst_207 : f32 to vector<8x128xf32>
    %454 = arith.mulf %453, %452 : vector<8x128xf32>
    %cst_208 = arith.constant 5.000000e-01 : f32
    %455 = vector.broadcast %cst_208 : f32 to vector<8x128xf32>
    %456 = arith.addf %454, %455 : vector<8x128xf32>
    %457 = vector.extract_strided_slice %448 {offsets = [0, 128], sizes = [8, 128], strides = [1, 1]} : vector<8x512xf32> to vector<8x128xf32>
    %cst_209 = arith.constant 5.000000e-01 : f32
    %458 = vector.broadcast %cst_209 : f32 to vector<8x128xf32>
    %459 = arith.mulf %458, %457 : vector<8x128xf32>
    %460 = math.tanh %459 : vector<8x128xf32>
    %cst_210 = arith.constant 5.000000e-01 : f32
    %461 = vector.broadcast %cst_210 : f32 to vector<8x128xf32>
    %462 = arith.mulf %461, %460 : vector<8x128xf32>
    %cst_211 = arith.constant 5.000000e-01 : f32
    %463 = vector.broadcast %cst_211 : f32 to vector<8x128xf32>
    %464 = arith.addf %462, %463 : vector<8x128xf32>
    %465 = vector.extract_strided_slice %448 {offsets = [0, 256], sizes = [8, 128], strides = [1, 1]} : vector<8x512xf32> to vector<8x128xf32>
    %466 = math.tanh %465 : vector<8x128xf32>
    %467 = vector.extract_strided_slice %448 {offsets = [0, 384], sizes = [8, 128], strides = [1, 1]} : vector<8x512xf32> to vector<8x128xf32>
    %cst_212 = arith.constant 5.000000e-01 : f32
    %468 = vector.broadcast %cst_212 : f32 to vector<8x128xf32>
    %469 = arith.mulf %468, %467 : vector<8x128xf32>
    %470 = math.tanh %469 : vector<8x128xf32>
    %cst_213 = arith.constant 5.000000e-01 : f32
    %471 = vector.broadcast %cst_213 : f32 to vector<8x128xf32>
    %472 = arith.mulf %471, %470 : vector<8x128xf32>
    %cst_214 = arith.constant 5.000000e-01 : f32
    %473 = vector.broadcast %cst_214 : f32 to vector<8x128xf32>
    %474 = arith.addf %472, %473 : vector<8x128xf32>
    %475 = arith.mulf %464, %401 : vector<8x128xf32>
    %476 = arith.mulf %456, %466 : vector<8x128xf32>
    %477 = arith.addf %475, %476 : vector<8x128xf32>
    %478 = math.tanh %477 : vector<8x128xf32>
    %479 = arith.mulf %474, %478 : vector<8x128xf32>
    %c0_215 = arith.constant 0 : index
    %c0_216 = arith.constant 0 : index
    %480 = vector.load %arg11[%c0_215, %c0_216] : memref<128x256xf32, #tpu.memory_space<vmem>>, vector<128x256xf32>
    %cst_217 = arith.constant dense<0.000000e+00> : vector<8x256xf32>
    %481 = tpu.matmul %479, %480, %cst_217 {dimension_numbers = #tpu.dot_dimension_numbers<[1], [0], [0], [1], [0, 0, 1, 1], [], []>} : vector<8x128xf32>, vector<128x256xf32>, vector<8x256xf32> -> vector<8x256xf32>
    %482 = arith.addf %481, %19 : vector<8x256xf32>
    %c0_218 = arith.constant 0 : index
    %c1280 = arith.constant 1280 : index
    %483 = vector.load %arg13[%c0_218, %c1280] : memref<8x2048xf32, #tpu.memory_space<vmem>>, vector<8x256xf32>
    tpu.vector_store %arg13[%c0_218, %c1280], %482 {strides = array<i32>} : memref<8x2048xf32, #tpu.memory_space<vmem>>, vector<8x256xf32>,
    %c48 = arith.constant 48 : index
    %c0_219 = arith.constant 0 : index
    %484 = vector.load %arg16[%c48, %c0_219] : memref<64x512xf32, #tpu.memory_space<vmem>>, vector<8x512xf32>
    %c0_220 = arith.constant 0 : index
    %c0_221 = arith.constant 0 : index
    %485 = vector.load %arg6[%c0_220, %c0_221] : memref<128x512xf32, #tpu.memory_space<vmem>>, vector<128x512xf32>
    %cst_222 = arith.constant dense<0.000000e+00> : vector<8x512xf32>
    %486 = tpu.matmul %442, %485, %cst_222 {dimension_numbers = #tpu.dot_dimension_numbers<[1], [0], [0], [1], [0, 0, 1, 1], [], []>} : vector<8x128xf32>, vector<128x512xf32>, vector<8x512xf32> -> vector<8x512xf32>
    %487 = arith.addf %484, %486 : vector<8x512xf32>
    %488 = vector.extract_strided_slice %487 {offsets = [0, 0], sizes = [8, 128], strides = [1, 1]} : vector<8x512xf32> to vector<8x128xf32>
    %cst_223 = arith.constant 5.000000e-01 : f32
    %489 = vector.broadcast %cst_223 : f32 to vector<8x128xf32>
    %490 = arith.mulf %489, %488 : vector<8x128xf32>
    %491 = math.tanh %490 : vector<8x128xf32>
    %cst_224 = arith.constant 5.000000e-01 : f32
    %492 = vector.broadcast %cst_224 : f32 to vector<8x128xf32>
    %493 = arith.mulf %492, %491 : vector<8x128xf32>
    %cst_225 = arith.constant 5.000000e-01 : f32
    %494 = vector.broadcast %cst_225 : f32 to vector<8x128xf32>
    %495 = arith.addf %493, %494 : vector<8x128xf32>
    %496 = vector.extract_strided_slice %487 {offsets = [0, 128], sizes = [8, 128], strides = [1, 1]} : vector<8x512xf32> to vector<8x128xf32>
    %cst_226 = arith.constant 5.000000e-01 : f32
    %497 = vector.broadcast %cst_226 : f32 to vector<8x128xf32>
    %498 = arith.mulf %497, %496 : vector<8x128xf32>
    %499 = math.tanh %498 : vector<8x128xf32>
    %cst_227 = arith.constant 5.000000e-01 : f32
    %500 = vector.broadcast %cst_227 : f32 to vector<8x128xf32>
    %501 = arith.mulf %500, %499 : vector<8x128xf32>
    %cst_228 = arith.constant 5.000000e-01 : f32
    %502 = vector.broadcast %cst_228 : f32 to vector<8x128xf32>
    %503 = arith.addf %501, %502 : vector<8x128xf32>
    %504 = vector.extract_strided_slice %487 {offsets = [0, 256], sizes = [8, 128], strides = [1, 1]} : vector<8x512xf32> to vector<8x128xf32>
    %505 = math.tanh %504 : vector<8x128xf32>
    %506 = vector.extract_strided_slice %487 {offsets = [0, 384], sizes = [8, 128], strides = [1, 1]} : vector<8x512xf32> to vector<8x128xf32>
    %cst_229 = arith.constant 5.000000e-01 : f32
    %507 = vector.broadcast %cst_229 : f32 to vector<8x128xf32>
    %508 = arith.mulf %507, %506 : vector<8x128xf32>
    %509 = math.tanh %508 : vector<8x128xf32>
    %cst_230 = arith.constant 5.000000e-01 : f32
    %510 = vector.broadcast %cst_230 : f32 to vector<8x128xf32>
    %511 = arith.mulf %510, %509 : vector<8x128xf32>
    %cst_231 = arith.constant 5.000000e-01 : f32
    %512 = vector.broadcast %cst_231 : f32 to vector<8x128xf32>
    %513 = arith.addf %511, %512 : vector<8x128xf32>
    %514 = arith.mulf %503, %440 : vector<8x128xf32>
    %515 = arith.mulf %495, %505 : vector<8x128xf32>
    %516 = arith.addf %514, %515 : vector<8x128xf32>
    %517 = math.tanh %516 : vector<8x128xf32>
    %518 = arith.mulf %513, %517 : vector<8x128xf32>
    %c0_232 = arith.constant 0 : index
    %c0_233 = arith.constant 0 : index
    %519 = vector.load %arg8[%c0_232, %c0_233] : memref<128x512xf32, #tpu.memory_space<vmem>>, vector<128x512xf32>
    %cst_234 = arith.constant dense<0.000000e+00> : vector<8x512xf32>
    %520 = tpu.matmul %518, %519, %cst_234 {dimension_numbers = #tpu.dot_dimension_numbers<[1], [0], [0], [1], [0, 0, 1, 1], [], []>} : vector<8x128xf32>, vector<128x512xf32>, vector<8x512xf32> -> vector<8x512xf32>
    %521 = arith.addf %520, %16 : vector<8x512xf32>
    %c0_235 = arith.constant 0 : index
    %c0_236 = arith.constant 0 : index
    %522 = vector.load %arg9[%c0_235, %c0_236] : memref<128x512xf32, #tpu.memory_space<vmem>>, vector<128x512xf32>
    %cst_237 = arith.constant dense<0.000000e+00> : vector<8x512xf32>
    %523 = tpu.matmul %479, %522, %cst_237 {dimension_numbers = #tpu.dot_dimension_numbers<[1], [0], [0], [1], [0, 0, 1, 1], [], []>} : vector<8x128xf32>, vector<128x512xf32>, vector<8x512xf32> -> vector<8x512xf32>
    %524 = arith.addf %521, %523 : vector<8x512xf32>
    %525 = vector.extract_strided_slice %524 {offsets = [0, 0], sizes = [8, 128], strides = [1, 1]} : vector<8x512xf32> to vector<8x128xf32>
    %cst_238 = arith.constant 5.000000e-01 : f32
    %526 = vector.broadcast %cst_238 : f32 to vector<8x128xf32>
    %527 = arith.mulf %526, %525 : vector<8x128xf32>
    %528 = math.tanh %527 : vector<8x128xf32>
    %cst_239 = arith.constant 5.000000e-01 : f32
    %529 = vector.broadcast %cst_239 : f32 to vector<8x128xf32>
    %530 = arith.mulf %529, %528 : vector<8x128xf32>
    %cst_240 = arith.constant 5.000000e-01 : f32
    %531 = vector.broadcast %cst_240 : f32 to vector<8x128xf32>
    %532 = arith.addf %530, %531 : vector<8x128xf32>
    %533 = vector.extract_strided_slice %524 {offsets = [0, 128], sizes = [8, 128], strides = [1, 1]} : vector<8x512xf32> to vector<8x128xf32>
    %cst_241 = arith.constant 5.000000e-01 : f32
    %534 = vector.broadcast %cst_241 : f32 to vector<8x128xf32>
    %535 = arith.mulf %534, %533 : vector<8x128xf32>
    %536 = math.tanh %535 : vector<8x128xf32>
    %cst_242 = arith.constant 5.000000e-01 : f32
    %537 = vector.broadcast %cst_242 : f32 to vector<8x128xf32>
    %538 = arith.mulf %537, %536 : vector<8x128xf32>
    %cst_243 = arith.constant 5.000000e-01 : f32
    %539 = vector.broadcast %cst_243 : f32 to vector<8x128xf32>
    %540 = arith.addf %538, %539 : vector<8x128xf32>
    %541 = vector.extract_strided_slice %524 {offsets = [0, 256], sizes = [8, 128], strides = [1, 1]} : vector<8x512xf32> to vector<8x128xf32>
    %542 = math.tanh %541 : vector<8x128xf32>
    %543 = vector.extract_strided_slice %524 {offsets = [0, 384], sizes = [8, 128], strides = [1, 1]} : vector<8x512xf32> to vector<8x128xf32>
    %cst_244 = arith.constant 5.000000e-01 : f32
    %544 = vector.broadcast %cst_244 : f32 to vector<8x128xf32>
    %545 = arith.mulf %544, %543 : vector<8x128xf32>
    %546 = math.tanh %545 : vector<8x128xf32>
    %cst_245 = arith.constant 5.000000e-01 : f32
    %547 = vector.broadcast %cst_245 : f32 to vector<8x128xf32>
    %548 = arith.mulf %547, %546 : vector<8x128xf32>
    %cst_246 = arith.constant 5.000000e-01 : f32
    %549 = vector.broadcast %cst_246 : f32 to vector<8x128xf32>
    %550 = arith.addf %548, %549 : vector<8x128xf32>
    %551 = arith.mulf %540, %477 : vector<8x128xf32>
    %552 = arith.mulf %532, %542 : vector<8x128xf32>
    %553 = arith.addf %551, %552 : vector<8x128xf32>
    %554 = math.tanh %553 : vector<8x128xf32>
    %555 = arith.mulf %550, %554 : vector<8x128xf32>
    %c0_247 = arith.constant 0 : index
    %c0_248 = arith.constant 0 : index
    %556 = vector.load %arg11[%c0_247, %c0_248] : memref<128x256xf32, #tpu.memory_space<vmem>>, vector<128x256xf32>
    %cst_249 = arith.constant dense<0.000000e+00> : vector<8x256xf32>
    %557 = tpu.matmul %555, %556, %cst_249 {dimension_numbers = #tpu.dot_dimension_numbers<[1], [0], [0], [1], [0, 0, 1, 1], [], []>} : vector<8x128xf32>, vector<128x256xf32>, vector<8x256xf32> -> vector<8x256xf32>
    %558 = arith.addf %557, %19 : vector<8x256xf32>
    %c0_250 = arith.constant 0 : index
    %c1536 = arith.constant 1536 : index
    %559 = vector.load %arg13[%c0_250, %c1536] : memref<8x2048xf32, #tpu.memory_space<vmem>>, vector<8x256xf32>
    tpu.vector_store %arg13[%c0_250, %c1536], %558 {strides = array<i32>} : memref<8x2048xf32, #tpu.memory_space<vmem>>, vector<8x256xf32>,
    %c56 = arith.constant 56 : index
    %c0_251 = arith.constant 0 : index
    %560 = vector.load %arg16[%c56, %c0_251] : memref<64x512xf32, #tpu.memory_space<vmem>>, vector<8x512xf32>
    %c0_252 = arith.constant 0 : index
    %c0_253 = arith.constant 0 : index
    %561 = vector.load %arg6[%c0_252, %c0_253] : memref<128x512xf32, #tpu.memory_space<vmem>>, vector<128x512xf32>
    %cst_254 = arith.constant dense<0.000000e+00> : vector<8x512xf32>
    %562 = tpu.matmul %518, %561, %cst_254 {dimension_numbers = #tpu.dot_dimension_numbers<[1], [0], [0], [1], [0, 0, 1, 1], [], []>} : vector<8x128xf32>, vector<128x512xf32>, vector<8x512xf32> -> vector<8x512xf32>
    %563 = arith.addf %560, %562 : vector<8x512xf32>
    %564 = vector.extract_strided_slice %563 {offsets = [0, 0], sizes = [8, 128], strides = [1, 1]} : vector<8x512xf32> to vector<8x128xf32>
    %cst_255 = arith.constant 5.000000e-01 : f32
    %565 = vector.broadcast %cst_255 : f32 to vector<8x128xf32>
    %566 = arith.mulf %565, %564 : vector<8x128xf32>
    %567 = math.tanh %566 : vector<8x128xf32>
    %cst_256 = arith.constant 5.000000e-01 : f32
    %568 = vector.broadcast %cst_256 : f32 to vector<8x128xf32>
    %569 = arith.mulf %568, %567 : vector<8x128xf32>
    %cst_257 = arith.constant 5.000000e-01 : f32
    %570 = vector.broadcast %cst_257 : f32 to vector<8x128xf32>
    %571 = arith.addf %569, %570 : vector<8x128xf32>
    %572 = vector.extract_strided_slice %563 {offsets = [0, 128], sizes = [8, 128], strides = [1, 1]} : vector<8x512xf32> to vector<8x128xf32>
    %cst_258 = arith.constant 5.000000e-01 : f32
    %573 = vector.broadcast %cst_258 : f32 to vector<8x128xf32>
    %574 = arith.mulf %573, %572 : vector<8x128xf32>
    %575 = math.tanh %574 : vector<8x128xf32>
    %cst_259 = arith.constant 5.000000e-01 : f32
    %576 = vector.broadcast %cst_259 : f32 to vector<8x128xf32>
    %577 = arith.mulf %576, %575 : vector<8x128xf32>
    %cst_260 = arith.constant 5.000000e-01 : f32
    %578 = vector.broadcast %cst_260 : f32 to vector<8x128xf32>
    %579 = arith.addf %577, %578 : vector<8x128xf32>
    %580 = vector.extract_strided_slice %563 {offsets = [0, 256], sizes = [8, 128], strides = [1, 1]} : vector<8x512xf32> to vector<8x128xf32>
    %581 = math.tanh %580 : vector<8x128xf32>
    %582 = vector.extract_strided_slice %563 {offsets = [0, 384], sizes = [8, 128], strides = [1, 1]} : vector<8x512xf32> to vector<8x128xf32>
    %cst_261 = arith.constant 5.000000e-01 : f32
    %583 = vector.broadcast %cst_261 : f32 to vector<8x128xf32>
    %584 = arith.mulf %583, %582 : vector<8x128xf32>
    %585 = math.tanh %584 : vector<8x128xf32>
    %cst_262 = arith.constant 5.000000e-01 : f32
    %586 = vector.broadcast %cst_262 : f32 to vector<8x128xf32>
    %587 = arith.mulf %586, %585 : vector<8x128xf32>
    %cst_263 = arith.constant 5.000000e-01 : f32
    %588 = vector.broadcast %cst_263 : f32 to vector<8x128xf32>
    %589 = arith.addf %587, %588 : vector<8x128xf32>
    %590 = arith.mulf %579, %516 : vector<8x128xf32>
    %591 = arith.mulf %571, %581 : vector<8x128xf32>
    %592 = arith.addf %590, %591 : vector<8x128xf32>
    %593 = math.tanh %592 : vector<8x128xf32>
    %594 = arith.mulf %589, %593 : vector<8x128xf32>
    %c0_264 = arith.constant 0 : index
    %c0_265 = arith.constant 0 : index
    %595 = vector.load %arg8[%c0_264, %c0_265] : memref<128x512xf32, #tpu.memory_space<vmem>>, vector<128x512xf32>
    %cst_266 = arith.constant dense<0.000000e+00> : vector<8x512xf32>
    %596 = tpu.matmul %594, %595, %cst_266 {dimension_numbers = #tpu.dot_dimension_numbers<[1], [0], [0], [1], [0, 0, 1, 1], [], []>} : vector<8x128xf32>, vector<128x512xf32>, vector<8x512xf32> -> vector<8x512xf32>
    %597 = arith.addf %596, %16 : vector<8x512xf32>
    %c0_267 = arith.constant 0 : index
    %c0_268 = arith.constant 0 : index
    %598 = vector.load %arg9[%c0_267, %c0_268] : memref<128x512xf32, #tpu.memory_space<vmem>>, vector<128x512xf32>
    %cst_269 = arith.constant dense<0.000000e+00> : vector<8x512xf32>
    %599 = tpu.matmul %555, %598, %cst_269 {dimension_numbers = #tpu.dot_dimension_numbers<[1], [0], [0], [1], [0, 0, 1, 1], [], []>} : vector<8x128xf32>, vector<128x512xf32>, vector<8x512xf32> -> vector<8x512xf32>
    %600 = arith.addf %597, %599 : vector<8x512xf32>
    %601 = vector.extract_strided_slice %600 {offsets = [0, 0], sizes = [8, 128], strides = [1, 1]} : vector<8x512xf32> to vector<8x128xf32>
    %cst_270 = arith.constant 5.000000e-01 : f32
    %602 = vector.broadcast %cst_270 : f32 to vector<8x128xf32>
    %603 = arith.mulf %602, %601 : vector<8x128xf32>
    %604 = math.tanh %603 : vector<8x128xf32>
    %cst_271 = arith.constant 5.000000e-01 : f32
    %605 = vector.broadcast %cst_271 : f32 to vector<8x128xf32>
    %606 = arith.mulf %605, %604 : vector<8x128xf32>
    %cst_272 = arith.constant 5.000000e-01 : f32
    %607 = vector.broadcast %cst_272 : f32 to vector<8x128xf32>
    %608 = arith.addf %606, %607 : vector<8x128xf32>
    %609 = vector.extract_strided_slice %600 {offsets = [0, 128], sizes = [8, 128], strides = [1, 1]} : vector<8x512xf32> to vector<8x128xf32>
    %cst_273 = arith.constant 5.000000e-01 : f32
    %610 = vector.broadcast %cst_273 : f32 to vector<8x128xf32>
    %611 = arith.mulf %610, %609 : vector<8x128xf32>
    %612 = math.tanh %611 : vector<8x128xf32>
    %cst_274 = arith.constant 5.000000e-01 : f32
    %613 = vector.broadcast %cst_274 : f32 to vector<8x128xf32>
    %614 = arith.mulf %613, %612 : vector<8x128xf32>
    %cst_275 = arith.constant 5.000000e-01 : f32
    %615 = vector.broadcast %cst_275 : f32 to vector<8x128xf32>
    %616 = arith.addf %614, %615 : vector<8x128xf32>
    %617 = vector.extract_strided_slice %600 {offsets = [0, 256], sizes = [8, 128], strides = [1, 1]} : vector<8x512xf32> to vector<8x128xf32>
    %618 = math.tanh %617 : vector<8x128xf32>
    %619 = vector.extract_strided_slice %600 {offsets = [0, 384], sizes = [8, 128], strides = [1, 1]} : vector<8x512xf32> to vector<8x128xf32>
    %cst_276 = arith.constant 5.000000e-01 : f32
    %620 = vector.broadcast %cst_276 : f32 to vector<8x128xf32>
    %621 = arith.mulf %620, %619 : vector<8x128xf32>
    %622 = math.tanh %621 : vector<8x128xf32>
    %cst_277 = arith.constant 5.000000e-01 : f32
    %623 = vector.broadcast %cst_277 : f32 to vector<8x128xf32>
    %624 = arith.mulf %623, %622 : vector<8x128xf32>
    %cst_278 = arith.constant 5.000000e-01 : f32
    %625 = vector.broadcast %cst_278 : f32 to vector<8x128xf32>
    %626 = arith.addf %624, %625 : vector<8x128xf32>
    %627 = arith.mulf %616, %553 : vector<8x128xf32>
    %628 = arith.mulf %608, %618 : vector<8x128xf32>
    %629 = arith.addf %627, %628 : vector<8x128xf32>
    %630 = math.tanh %629 : vector<8x128xf32>
    %631 = arith.mulf %626, %630 : vector<8x128xf32>
    %c0_279 = arith.constant 0 : index
    %c0_280 = arith.constant 0 : index
    %632 = vector.load %arg11[%c0_279, %c0_280] : memref<128x256xf32, #tpu.memory_space<vmem>>, vector<128x256xf32>
    %cst_281 = arith.constant dense<0.000000e+00> : vector<8x256xf32>
    %633 = tpu.matmul %631, %632, %cst_281 {dimension_numbers = #tpu.dot_dimension_numbers<[1], [0], [0], [1], [0, 0, 1, 1], [], []>} : vector<8x128xf32>, vector<128x256xf32>, vector<8x256xf32> -> vector<8x256xf32>
    %634 = arith.addf %633, %19 : vector<8x256xf32>
    %c0_282 = arith.constant 0 : index
    %c1792 = arith.constant 1792 : index
    %635 = vector.load %arg13[%c0_282, %c1792] : memref<8x2048xf32, #tpu.memory_space<vmem>>, vector<8x256xf32>
    tpu.vector_store %arg13[%c0_282, %c1792], %634 {strides = array<i32>} : memref<8x2048xf32, #tpu.memory_space<vmem>>, vector<8x256xf32>,
    %c0_283 = arith.constant 0 : index
    %c0_284 = arith.constant 0 : index
    %c0_285 = arith.constant 0 : index
    %636 = vector.load %arg14[%c0_283, %c0_284, %c0_285] : memref<2x8x128xf32, #tpu.memory_space<vmem>>, vector<1x8x128xf32>
    %637 = vector.shape_cast %636 : vector<1x8x128xf32> to vector<8x128xf32>
    %638 = vector.shape_cast %594 : vector<8x128xf32> to vector<1x8x128xf32>
    tpu.vector_store %arg14[%c0_283, %c0_284, %c0_285], %638 {strides = array<i32>} : memref<2x8x128xf32, #tpu.memory_space<vmem>>, vector<1x8x128xf32>,
    %c0_286 = arith.constant 0 : index
    %c0_287 = arith.constant 0 : index
    %c0_288 = arith.constant 0 : index
    %639 = vector.load %arg15[%c0_286, %c0_287, %c0_288] : memref<2x8x128xf32, #tpu.memory_space<vmem>>, vector<1x8x128xf32>
    %640 = vector.shape_cast %639 : vector<1x8x128xf32> to vector<8x128xf32>
    %641 = vector.shape_cast %592 : vector<8x128xf32> to vector<1x8x128xf32>
    tpu.vector_store %arg15[%c0_286, %c0_287, %c0_288], %641 {strides = array<i32>} : memref<2x8x128xf32, #tpu.memory_space<vmem>>, vector<1x8x128xf32>,
    %c1_289 = arith.constant 1 : index
    %c0_290 = arith.constant 0 : index
    %c0_291 = arith.constant 0 : index
    %642 = vector.load %arg14[%c1_289, %c0_290, %c0_291] : memref<2x8x128xf32, #tpu.memory_space<vmem>>, vector<1x8x128xf32>
    %643 = vector.shape_cast %642 : vector<1x8x128xf32> to vector<8x128xf32>
    %644 = vector.shape_cast %631 : vector<8x128xf32> to vector<1x8x128xf32>
    tpu.vector_store %arg14[%c1_289, %c0_290, %c0_291], %644 {strides = array<i32>} : memref<2x8x128xf32, #tpu.memory_space<vmem>>, vector<1x8x128xf32>,
    %c1_292 = arith.constant 1 : index
    %c0_293 = arith.constant 0 : index
    %c0_294 = arith.constant 0 : index
    %645 = vector.load %arg15[%c1_292, %c0_293, %c0_294] : memref<2x8x128xf32, #tpu.memory_space<vmem>>, vector<1x8x128xf32>
    %646 = vector.shape_cast %645 : vector<1x8x128xf32> to vector<8x128xf32>
    %647 = vector.shape_cast %629 : vector<8x128xf32> to vector<1x8x128xf32>
    tpu.vector_store %arg15[%c1_292, %c0_293, %c0_294], %647 {strides = array<i32>} : memref<2x8x128xf32, #tpu.memory_space<vmem>>, vector<1x8x128xf32>,
    return
  }
  func.func @transform_0(%arg0: i32) -> (i32, i32) {
    %c0_i32 = arith.constant 0 : i32
    %c0_i32_0 = arith.constant 0 : i32
    %c0_i32_1 = arith.constant 0 : i32
    return %c0_i32, %c0_i32_0 : i32, i32
  }
  func.func @transform_1(%arg0: i32) -> (i32, i32) {
    %c0_i32 = arith.constant 0 : i32
    %c0_i32_0 = arith.constant 0 : i32
    %c0_i32_1 = arith.constant 0 : i32
    return %c0_i32, %c0_i32_0 : i32, i32
  }
  func.func @transform_2(%arg0: i32) -> (i32, i32, i32) {
    %c0_i32 = arith.constant 0 : i32
    %c0_i32_0 = arith.constant 0 : i32
    %c0_i32_1 = arith.constant 0 : i32
    %c0_i32_2 = arith.constant 0 : i32
    return %c0_i32, %c0_i32_0, %c0_i32_1 : i32, i32, i32
  }
  func.func @transform_3(%arg0: i32) -> (i32, i32, i32) {
    %c0_i32 = arith.constant 0 : i32
    %c0_i32_0 = arith.constant 0 : i32
    %c0_i32_1 = arith.constant 0 : i32
    %c0_i32_2 = arith.constant 0 : i32
    return %c0_i32, %c0_i32_0, %c0_i32_1 : i32, i32, i32
  }
  func.func @transform_4(%arg0: i32) -> (i32, i32) {
    %c0_i32 = arith.constant 0 : i32
    %c0_i32_0 = arith.constant 0 : i32
    %c0_i32_1 = arith.constant 0 : i32
    return %c0_i32, %c0_i32_0 : i32, i32
  }
  func.func @transform_5(%arg0: i32) -> (i32, i32) {
    %c0_i32 = arith.constant 0 : i32
    %c0_i32_0 = arith.constant 0 : i32
    %c0_i32_1 = arith.constant 0 : i32
    return %c0_i32, %c0_i32_0 : i32, i32
  }
  func.func @transform_6(%arg0: i32) -> (i32, i32) {
    %c0_i32 = arith.constant 0 : i32
    %c0_i32_0 = arith.constant 0 : i32
    %c0_i32_1 = arith.constant 0 : i32
    return %c0_i32, %c0_i32_0 : i32, i32
  }
  func.func @transform_7(%arg0: i32) -> (i32, i32) {
    %c0_i32 = arith.constant 0 : i32
    %c0_i32_0 = arith.constant 0 : i32
    %c0_i32_1 = arith.constant 0 : i32
    return %c0_i32, %c0_i32_0 : i32, i32
  }
  func.func @transform_8(%arg0: i32) -> (i32, i32) {
    %c0_i32 = arith.constant 0 : i32
    %c0_i32_0 = arith.constant 0 : i32
    %c0_i32_1 = arith.constant 0 : i32
    return %c0_i32, %c0_i32_0 : i32, i32
  }
  func.func @transform_9(%arg0: i32) -> (i32, i32) {
    %c0_i32 = arith.constant 0 : i32
    %c0_i32_0 = arith.constant 0 : i32
    %c0_i32_1 = arith.constant 0 : i32
    return %c0_i32, %c0_i32_0 : i32, i32
  }
  func.func @transform_10(%arg0: i32) -> (i32, i32) {
    %c0_i32 = arith.constant 0 : i32
    %c0_i32_0 = arith.constant 0 : i32
    %c0_i32_1 = arith.constant 0 : i32
    return %c0_i32, %c0_i32_0 : i32, i32
  }
  func.func @transform_11(%arg0: i32) -> (i32, i32) {
    %c0_i32 = arith.constant 0 : i32
    %c0_i32_0 = arith.constant 0 : i32
    %c0_i32_1 = arith.constant 0 : i32
    return %c0_i32, %c0_i32_0 : i32, i32
  }
  func.func @transform_12(%arg0: i32) -> (i32, i32) {
    %c0_i32 = arith.constant 0 : i32
    %c0_i32_0 = arith.constant 0 : i32
    %c0_i32_1 = arith.constant 0 : i32
    return %c0_i32, %c0_i32_0 : i32, i32
  }
  func.func @transform_13(%arg0: i32) -> (i32, i32, i32) {
    %c0_i32 = arith.constant 0 : i32
    %c0_i32_0 = arith.constant 0 : i32
    %c0_i32_1 = arith.constant 0 : i32
    %c0_i32_2 = arith.constant 0 : i32
    return %c0_i32, %c0_i32_0, %c0_i32_1 : i32, i32, i32
  }
  func.func @transform_14(%arg0: i32) -> (i32, i32, i32) {
    %c0_i32 = arith.constant 0 : i32
    %c0_i32_0 = arith.constant 0 : i32
    %c0_i32_1 = arith.constant 0 : i32
    %c0_i32_2 = arith.constant 0 : i32
    return %c0_i32, %c0_i32_0, %c0_i32_1 : i32, i32, i32
  }
}

</mosaic_0001>

<bundles_post_ra>
// kernel: lyric_lstm_forward.1
= control target key start
LH: loop header
LB: loop body
LE: loop exit
PB: predicated region body
PF: predicated region fallthrough
CT: control target
= control target key end

     0   :  { %20 = vsyncpa [#allocation4], 0  ;;  %s10698_s0 = inlined_call_operand.vmem [shape: s32[64,1], index: 0, kind: input, shape index: {}]   ;;  %s10699_s1 = inlined_call_operand.hbm [shape: f32[256,128], index: 1, kind: input, shape index: {}]   ;;  %s10700_s2 = inlined_call_operand.vmem [shape: f32[2,8,128], index: 2, kind: input, shape index: {}]   ;;  %s10701_s3 = inlined_call_operand.vmem [shape: f32[2,8,128], index: 3, kind: input, shape index: {}]   ;;  %s10702_s4 = inlined_call_operand.hbm [shape: f32[128,512], index: 4, kind: input, shape index: {}]   ;;  %s10703_s5 = inlined_call_operand.hbm [shape: f32[128,512], index: 5, kind: input, shape index: {}]   ;;  %s10704_s6 = inlined_call_operand.vmem [shape: f32[1,512], index: 6, kind: input, shape index: {}]   ;;  %s10705_s7 = inlined_call_operand.hbm [shape: f32[128,512], index: 7, kind: input, shape index: {}]   ;;  %s10706_s8 = inlined_call_operand.hbm [shape: f32[128,512], index: 8, kind: input, shape index: {}]   ;;  %s10707_s9 = inlined_call_operand.vmem [shape: f32[1,512], index: 9, kind: input, shape index: {}]   ;;  %s10708_s10 = inlined_call_operand.hbm [shape: f32[128,256], index: 10, kind: input, shape index: {}]   ;;  %s10709_s11 = inlined_call_operand.vmem [shape: f32[1,256], index: 11, kind: input, shape index: {}]   ;;  %s10710_s12 = inlined_call_operand.vmem [shape: f32[8,2048], index: 12, kind: output, shape index: {0}]   ;;  %s10711_s13 = inlined_call_operand.hbm [shape: f32[2,8,128], index: 13, kind: output, shape index: {1}]   ;;  %s10712_s14 = inlined_call_operand.hbm [shape: f32[2,8,128], index: 14, kind: output, shape index: {2}]  }
   0x1   :  { %21 = vsyncpa [#allocation7], 0 }
   0x2   :  { %22 = vsyncpa [#allocation10], 0 }
   0x3   :  { %23 = vsyncpa [#allocation13], 0 }
   0x4   :  { %24 = vsyncpa [#allocation5], 0 }
   0x5   :  { %25 = vsyncpa [#allocation16], 0  ;;  %s9419_s29 = smov [#allocation6]   ;;  %s9231_s17 = scalar_lea.hbm %s10702_s4, 8192 }
   0x6   :  { %s49_s30 = sshll.u32 %s9419_s29, 4  ;;  %p9232_p0 = scmp.ne.s32.totalorder %s10702_s4, %s9231_s17  ;;  %s50_s30 = int_to_ptr.vmem [resolvable:$true] %s49_s30 }
   0x7   :  { %p9235_p1 = scmp.lt.u32.totalorder %s9231_s17, %s10702_s4 }
   0x9   :  { %p9237_p2 = pnand %p9235_p1, %p9232_p0 }
   0xb   :  { %9240 = shalt.err (!%p9237_p2)
}
   0xc   :  { %s9241_s22 = scalar_lea.vmem %s50_s30, 8192  ;;  %p9246_p4 = scmp.lt.s32.totalorder %s50_s30, %s50_s30 }
   0xd   :  { %p9242_p3 = scmp.ne.s32.totalorder %s50_s30, %s9241_s22  ;;  %p9247_p5 = scmp.lt.s32.totalorder %s9241_s22, %s9241_s22 }
   0xf   :  { %p9248_p6 = por %p9247_p5, %p9246_p4 }
  0x11   :  { %p9249_p7 = pnand %p9248_p6, %p9242_p3 }
  0x13   :  { %9252 = shalt.err (!%p9249_p7)
}
  0x14   :  { %s9420_s23 = smov 512   ;;  %s9421_s24 = smov 32  }
  0x15   :  { %55 = dma.hbm_to_vmem [thread:$0]  %s10702_s4, 8192, %s50_s30, [#allocation7], %s9420_s23, %s9420_s23, %s9421_s24  }
  0x16   :  { %s9422_s27 = smov [#allocation9]   ;;  %s9423_s29 = smov [#allocation3]  }
  0x17   :  { %s75_s28 = sshll.u32 %s9422_s27, 4  ;;  %s33_s15 = sshll.u32 %s9423_s29, 4  ;;  %s76_s28 = int_to_ptr.vmem [resolvable:$true] %s75_s28  ;;  %s34_s15 = int_to_ptr.vmem [resolvable:$true] %s33_s15 }
  0x18   :  { %s9253_s18 = scalar_lea.hbm %s10705_s7, 8192 }
  0x19   :  { %p9254_p8 = scmp.ne.s32.totalorder %s10705_s7, %s9253_s18  ;;  %p9257_p9 = scmp.lt.u32.totalorder %s9253_s18, %s10705_s7 }
  0x1b   :  { %p9259_p10 = pnand %p9257_p9, %p9254_p8 }
  0x1d   :  { %9262 = shalt.err (!%p9259_p10)
}
  0x1e   :  { %s9263_s4 = scalar_lea.vmem %s76_s28, 8192  ;;  %p9268_p12 = scmp.lt.s32.totalorder %s76_s28, %s76_s28 }
  0x1f   :  { %p9264_p11 = scmp.ne.s32.totalorder %s76_s28, %s9263_s4  ;;  %p9269_p13 = scmp.lt.s32.totalorder %s9263_s4, %s9263_s4 }
  0x21   :  { %p9270_p0 = por %p9269_p13, %p9268_p12 }
  0x23   :  { %p9271_p1 = pnand %p9270_p0, %p9264_p11 }
  0x25   :  { %9274 = shalt.err (!%p9271_p1)
}
  0x26   :  { %81 = dma.hbm_to_vmem [thread:$0]  %s10705_s7, 8192, %s76_s28, [#allocation10], %s9420_s23, %s9420_s23, %s9421_s24  }
  0x27   :  { %s9275_s29 = scalar_lea.hbm %s10699_s1, 4096 }
  0x28   :  { %p9276_p2 = scmp.ne.s32.totalorder %s10699_s1, %s9275_s29  ;;  %p9279_p3 = scmp.lt.u32.totalorder %s9275_s29, %s10699_s1 }
  0x2a   :  { %p9281_p4 = pnand %p9279_p3, %p9276_p2 }
  0x2c   :  { %9284 = shalt.err (!%p9281_p4)
}
  0x2d   :  { %s9285_s20 = scalar_lea.vmem %s34_s15, 4096  ;;  %p9290_p6 = scmp.lt.s32.totalorder %s34_s15, %s34_s15 }
  0x2e   :  { %p9286_p5 = scmp.ne.s32.totalorder %s34_s15, %s9285_s20  ;;  %p9291_p7 = scmp.lt.s32.totalorder %s9285_s20, %s9285_s20 }
  0x30   :  { %p9292_p8 = por %p9291_p7, %p9290_p6 }
  0x32   :  { %p9293_p9 = pnand %p9292_p8, %p9286_p5 }
  0x34   :  { %9296 = shalt.err (!%p9293_p9)
}
  0x35   :  { %s9424_s7 = smov 128   ;;  %s9425_s28 = smov 8  }
  0x36   :  { %39 = dma.hbm_to_vmem [thread:$0]  %s10699_s1, 4096, %s34_s15, [#allocation4], %s9424_s7, %s9424_s7, %s9425_s28  }
  0x37   :  { %s9426_s4 = smov [#allocation8]   ;;  %s9427_s25 = smov [#allocation11]  }
  0x38   :  { %s61_s30 = sshll.u32 %s9426_s4, 4  ;;  %s87_s26 = sshll.u32 %s9427_s25, 4  ;;  %s62_s30 = int_to_ptr.vmem [resolvable:$true] %s61_s30  ;;  %s88_s26 = int_to_ptr.vmem [resolvable:$true] %s87_s26 }
  0x39   :  { %s9297_s16 = scalar_lea.hbm %s10703_s5, 8192 }
  0x3a   :  { %p9298_p10 = scmp.ne.s32.totalorder %s10703_s5, %s9297_s16  ;;  %p9301_p11 = scmp.lt.u32.totalorder %s9297_s16, %s10703_s5 }
  0x3c   :  { %p9303_p12 = pnand %p9301_p11, %p9298_p10 }
  0x3e   :  { %9306 = shalt.err (!%p9303_p12)
}
  0x3f   :  { %s9307_s1 = scalar_lea.vmem %s62_s30, 8192  ;;  %p9312_p0 = scmp.lt.s32.totalorder %s62_s30, %s62_s30 }
  0x40   :  { %p9308_p13 = scmp.ne.s32.totalorder %s62_s30, %s9307_s1  ;;  %p9313_p1 = scmp.lt.s32.totalorder %s9307_s1, %s9307_s1 }
  0x42   :  { %p9314_p2 = por %p9313_p1, %p9312_p0 }
  0x44   :  { %p9315_p3 = pnand %p9314_p2, %p9308_p13 }
  0x46   :  { %9318 = shalt.err (!%p9315_p3)
}
  0x47   :  { %67 = dma.hbm_to_vmem [thread:$0]  %s10703_s5, 8192, %s62_s30, [#allocation7], %s9420_s23, %s9420_s23, %s9421_s24  }
  0x48   :  { %s9319_s25 = scalar_lea.hbm %s10706_s8, 8192 }
  0x49   :  { %p9320_p4 = scmp.ne.s32.totalorder %s10706_s8, %s9319_s25  ;;  %p9323_p5 = scmp.lt.u32.totalorder %s9319_s25, %s10706_s8 }
  0x4b   :  { %p9325_p6 = pnand %p9323_p5, %p9320_p4 }
  0x4d   :  { %9328 = shalt.err (!%p9325_p6)
}
  0x4e   :  { %s9329_s18 = scalar_lea.vmem %s88_s26, 8192  ;;  %p9334_p8 = scmp.lt.s32.totalorder %s88_s26, %s88_s26 }
  0x4f   :  { %p9330_p7 = scmp.ne.s32.totalorder %s88_s26, %s9329_s18  ;;  %p9335_p9 = scmp.lt.s32.totalorder %s9329_s18, %s9329_s18 }
  0x51   :  { %p9336_p10 = por %p9335_p9, %p9334_p8 }
  0x53   :  { %p9337_p11 = pnand %p9336_p10, %p9330_p7 }
  0x55   :  { %9340 = shalt.err (!%p9337_p11)
}
  0x56   :  { %93 = dma.hbm_to_vmem [thread:$0]  %s10706_s8, 8192, %s88_s26, [#allocation10], %s9420_s23, %s9420_s23, %s9421_s24  }
  0x57   :  { %s9428_s19 = smov [#allocation12]   ;;  %s9341_s21 = scalar_lea.hbm %s10708_s10, 4096 }
  0x58   :  { %s101_s20 = sshll.u32 %s9428_s19, 4  ;;  %p9342_p12 = scmp.ne.s32.totalorder %s10708_s10, %s9341_s21  ;;  %s102_s20 = int_to_ptr.vmem [resolvable:$true] %s101_s20 }
  0x59   :  { %p9345_p13 = scmp.lt.u32.totalorder %s9341_s21, %s10708_s10 }
  0x5b   :  { %p9347_p0 = pnand %p9345_p13, %p9342_p12 }
  0x5d   :  { %9350 = shalt.err (!%p9347_p0)
}
  0x5e   :  { %s9351_s29 = scalar_lea.vmem %s102_s20, 4096  ;;  %p9356_p2 = scmp.lt.s32.totalorder %s102_s20, %s102_s20 }
  0x5f   :  { %p9352_p1 = scmp.ne.s32.totalorder %s102_s20, %s9351_s29  ;;  %p9357_p3 = scmp.lt.s32.totalorder %s9351_s29, %s9351_s29 }
  0x61   :  { %p9358_p4 = por %p9357_p3, %p9356_p2 }
  0x63   :  { %p9359_p5 = pnand %p9358_p4, %p9352_p1 }
  0x65   :  { %9362 = shalt.err (!%p9359_p5)
}
  0x66   :  { %s9429_s8 = smov 256   ;;  %s9430_s23 = smov 16  }
  0x67   :  { %107 = dma.hbm_to_vmem [thread:$0]  %s10708_s10, 4096, %s102_s20, [#allocation13], %s9429_s8, %s9429_s8, %s9430_s23  }
  0x68   :  { %9407 = dma.done.wait [#allocation4], 4096  }
  0x69   :  { %9408 = vsyncadd [#allocation4], 4294963200 }
  0x6a   :  { %9409 = dma.done.wait [#allocation7], 16384  }
  0x6b   :  { %9410 = vsyncadd [#allocation7], 4294950912 }
  0x6c   :  { %9411 = dma.done.wait [#allocation10], 16384  }
  0x6d   :  { %9412 = vsyncadd [#allocation10], 4294950912 }
  0x6e   :  { %9413 = dma.done.wait [#allocation13], 4096  }
  0x6f   :  { %9414 = vsyncadd [#allocation13], 4294963200  ;;  %v9431_v0 = vmov 0   ;;  %v130_v1 = vld [vmem:[%s10698_s0 + $0x10] sm:$0xff]  ;;  %v128_v2 = vld [vmem:[%s10698_s0] sm:$0xff]  ;;  %s9434_s20 = smov [#allocation14]  }
  0x70   :  { %9070 = vset.pattern.permute.xlu1 %v9431_v0  ;;  %9069 = vset.pattern.permute.xlu0 %v9431_v0  ;;  %v131_v3 = vld [vmem:[%s10698_s0 + $0x18] sm:$0xff]  ;;  %v129_v4 = vld [vmem:[%s10698_s0 + $0x8] sm:$0xff]  ;;  %v227_v5 = vld [vmem:[#allocation3 + $0x80] sm:$0xff]  ;;  %s6913_s1 = sshll.u32 %s9434_s20, 4  ;;  %s6914_s1 = int_to_ptr.vmem [resolvable:$true] %s6913_s1 }
  0x71   :  { %146 = vperm.xlu1 %9070, %v130_v1   ;;  %140 = vperm.xlu0 %9069, %v128_v2   ;;  %v228_v6 = vld [vmem:[#allocation3 + $0x88] sm:$0xff]  ;;  %v211_v7 = vld [vmem:[#allocation3] sm:$0xff]  ;;  %v229_v11 = vld [vmem:[#allocation3 + $0x90] sm:$0xff]  ;;  %s9363_s21 = scalar_lea.vmem %s6914_s1, 256  ;;  %p9368_p7 = scmp.lt.s32.totalorder %s6914_s1, %s6914_s1 }
  0x72   :  { %v212_v8 = vld [vmem:[#allocation3 + $0x8] sm:$0xff]  ;;  %v7036_v9 = vpack.c.bf16 %v228_v6, %v227_v5  ;;  %v230_v12 = vld [vmem:[#allocation3 + $0x98] sm:$0xff]  ;;  %v213_v13 = vld [vmem:[#allocation3 + $0x10] sm:$0xff]  ;;  %p9364_p6 = scmp.ne.s32.totalorder %s6914_s1, %s9363_s21  ;;  %p9369_p8 = scmp.lt.s32.totalorder %s9363_s21, %s9363_s21 }
  0x73   :  { %v7038_v10 = vpack.c.bf16 %v212_v8, %v211_v7  ;;  %v7040_v14 = vpack.c.bf16 %v230_v12, %v229_v11  ;;  %v214_v15 = vld [vmem:[#allocation3 + $0x18] sm:$0xff]  ;;  %v231_v16 = vld [vmem:[#allocation3 + $0xa0] sm:$0xff]  ;;  %v232_v17 = vld [vmem:[#allocation3 + $0xa8] sm:$0xff] }
  0x74   :  { %v133_v18 = vld [vmem:[%s10698_s0 + $0x28] sm:$0xff]  ;;  %v132_v19 = vld [vmem:[%s10698_s0 + $0x20] sm:$0xff]  ;;  %7037 = vmatprep.subr.bf16.mxu0 %v7036_v9  ;;  %v7042_v20 = vpack.c.bf16 %v214_v15, %v213_v13  ;;  %v7044_v21 = vpack.c.bf16 %v232_v17, %v231_v16  ;;  %v233_v24 = vld [vmem:[#allocation3 + $0xb0] sm:$0xff]  ;;  %p9370_p9 = por %p9369_p8, %p9368_p7 }
  0x75   :  { %149 = vperm.xlu1 %9070, %v131_v3   ;;  %143 = vperm.xlu0 %9069, %v129_v4   ;;  %v215_v22 = vld [vmem:[#allocation3 + $0x20] sm:$0xff]  ;;  %v216_v23 = vld [vmem:[#allocation3 + $0x28] sm:$0xff]  ;;  %v234_v25 = vld [vmem:[#allocation3 + $0xb8] sm:$0xff] }
  0x76   :  { %7039 = vmatpush3.bf16.msra.mxu0 %v7038_v10  ;;  %v135_v26 = vld [vmem:[%s10698_s0 + $0x38] sm:$0xff]  ;;  %v134_v27 = vld [vmem:[%s10698_s0 + $0x30] sm:$0xff]  ;;  %v7046_v28 = vpack.c.bf16 %v216_v23, %v215_v22  ;;  %v7048_v29 = vpack.c.bf16 %v234_v25, %v233_v24  ;;  %v235_v32 = vld [vmem:[#allocation3 + $0xc0] sm:$0xff]  ;;  %p9371_p10 = pnand %p9370_p9, %p9364_p6 }
  0x77   :  { %7041 = vmatprep.subr.bf16.mxu0 %v7040_v14  ;;  %v217_v30 = vld [vmem:[#allocation3 + $0x30] sm:$0xff]  ;;  %v218_v31 = vld [vmem:[#allocation3 + $0x38] sm:$0xff]  ;;  %v236_v33 = vld [vmem:[#allocation3 + $0xc8] sm:$0xff] }
  0x78   :  { %v7050_v34 = vpack.c.bf16 %v218_v31, %v217_v30  ;;  %v7052_v35 = vpack.c.bf16 %v236_v33, %v235_v32  ;;  %v219_v36 = vld [vmem:[#allocation3 + $0x40] sm:$0xff]  ;;  %v220_v37 = vld [vmem:[#allocation3 + $0x48] sm:$0xff]  ;;  %v237_v38 = vld [vmem:[#allocation3 + $0xd0] sm:$0xff] }
  0x79   :  { %155 = vperm.xlu1 %9070, %v133_v18   ;;  %152 = vperm.xlu0 %9069, %v132_v19   ;;  %v238_v39 = vld [vmem:[#allocation3 + $0xd8] sm:$0xff]  ;;  %v7054_v40 = vpack.c.bf16 %v220_v37, %v219_v36  ;;  %v221_v42 = vld [vmem:[#allocation3 + $0x50] sm:$0xff]  ;;  %v239_v44 = vld [vmem:[#allocation3 + $0xe0] sm:$0xff] }
  0x7a   :  { %7043 = vmatpush3.bf16.msra.mxu0 %v7042_v20  ;;  %v7056_v41 = vpack.c.bf16 %v238_v39, %v237_v38  ;;  %v222_v43 = vld [vmem:[#allocation3 + $0x58] sm:$0xff]  ;;  %v240_v45 = vld [vmem:[#allocation3 + $0xe8] sm:$0xff]  ;;  %v223_v48 = vld [vmem:[#allocation3 + $0x60] sm:$0xff] }
  0x7b   :  { %7045 = vmatprep.subr.bf16.mxu0 %v7044_v21  ;;  %v7058_v46 = vpack.c.bf16 %v222_v43, %v221_v42  ;;  %v7060_v47 = vpack.c.bf16 %v240_v45, %v239_v44  ;;  %v224_v49 = vld [vmem:[#allocation3 + $0x68] sm:$0xff]  ;;  %v241_v50 = vld [vmem:[#allocation3 + $0xf0] sm:$0xff]  ;;  %v242_v51 = vld [vmem:[#allocation3 + $0xf8] sm:$0xff] }
  0x7c   :  { %v7062_v52 = vpack.c.bf16 %v224_v49, %v223_v48  ;;  %v7064_v53 = vpack.c.bf16 %v242_v51, %v241_v50  ;;  %v225_v54 = vld [vmem:[#allocation3 + $0x70] sm:$0xff]  ;;  %v226_v55 = vld [vmem:[#allocation3 + $0x78] sm:$0xff]  ;;  %v349_v57 = vld [vmem:[#allocation6 + $0x8] sm:$0xff] }
  0x7d   :  { %161 = vperm.xlu1 %9070, %v135_v26   ;;  %158 = vperm.xlu0 %9069, %v134_v27   ;;  %v7066_v56 = vpack.c.bf16 %v226_v55, %v225_v54  ;;  %v353_v58 = vld [vmem:[#allocation6 + $0x28] sm:$0xff]  ;;  %v348_v59 = vld [vmem:[#allocation6] sm:$0xff]  ;;  %v351_v62 = vld [vmem:[#allocation6 + $0x18] sm:$0xff] }
  0x7e   :  { %7047 = vmatpush3.bf16.msra.mxu0 %v7046_v28  ;;  %v7068_v60 = vpack.c.bf16 %v353_v58, %v349_v57  ;;  %v352_v61 = vld [vmem:[#allocation6 + $0x20] sm:$0xff]  ;;  %v355_v63 = vld [vmem:[#allocation6 + $0x38] sm:$0xff]  ;;  %v357_v2 = vld [vmem:[#allocation6 + $0x48] sm:$0xff] }
  0x7f   :  { %7049 = vmatprep.subr.bf16.mxu0 %v7048_v29  ;;  %v7070_v0 = vpack.c.bf16 %v352_v61, %v348_v59  ;;  %v7100_v1 = vpack.c.bf16 %v355_v63, %v351_v62  ;;  %v361_v3 = vld [vmem:[#allocation6 + $0x68] sm:$0xff]  ;;  %v356_v4 = vld [vmem:[#allocation6 + $0x40] sm:$0xff]  ;;  %v350_v44 = vld [vmem:[#allocation6 + $0x10] sm:$0xff] }
  0x80   :  { %7069 = vmatprep.subr.bf16.mxu1 %v7068_v60  ;;  %v360_v5 = vld [vmem:[#allocation6 + $0x60] sm:$0xff]  ;;  %v7072_v6 = vpack.c.bf16 %v361_v3, %v357_v2  ;;  %v365_v8 = vld [vmem:[#allocation6 + $0x88] sm:$0xff]  ;;  %v354_v45 = vld [vmem:[#allocation6 + $0x30] sm:$0xff] }
  0x81   :  { %7071 = vmatpush1.bf16.msra.mxu1 %v7070_v0  ;;  %v7074_v7 = vpack.c.bf16 %v360_v5, %v356_v4  ;;  %v369_v9 = vld [vmem:[#allocation6 + $0xa8] sm:$0xff]  ;;  %v364_v11 = vld [vmem:[#allocation6 + $0x80] sm:$0xff]  ;;  %v7102_v49 = vpack.c.bf16 %v354_v45, %v350_v44  ;;  %v358_v51 = vld [vmem:[#allocation6 + $0x50] sm:$0xff] }
  0x82   :  { %7051 = vmatpush3.bf16.msra.mxu0 %v7050_v34  ;;  %7073 = vmatprep.subr.bf16.mxu1 %v7072_v6  ;;  %v7076_v10 = vpack.c.bf16 %v369_v9, %v365_v8  ;;  %v368_v12 = vld [vmem:[#allocation6 + $0xa0] sm:$0xff]  ;;  %v373_v14 = vld [vmem:[#allocation6 + $0xc8] sm:$0xff]  ;;  %v367_v54 = vld [vmem:[#allocation6 + $0x98] sm:$0xff] }
  0x83   :  { %7053 = vmatprep.subr.bf16.mxu0 %v7052_v35  ;;  %v7078_v13 = vpack.c.bf16 %v368_v12, %v364_v11  ;;  %v377_v15 = vld [vmem:[#allocation6 + $0xe8] sm:$0xff]  ;;  %v372_v17 = vld [vmem:[#allocation6 + $0xc0] sm:$0xff]  ;;  %v371_v55 = vld [vmem:[#allocation6 + $0xb8] sm:$0xff] }
  0x84   :  { %v7080_v16 = vpack.c.bf16 %v377_v15, %v373_v14  ;;  %v376_v18 = vld [vmem:[#allocation6 + $0xe0] sm:$0xff]  ;;  %v381_v19 = vld [vmem:[#allocation6 + $0x108] sm:$0xff]  ;;  %v7108_v59 = vpack.c.bf16 %v371_v55, %v367_v54  ;;  %v366_v60 = vld [vmem:[#allocation6 + $0x90] sm:$0xff] }
  0x85   :  { %7075 = vmatpush1.bf16.msra.mxu1 %v7074_v7  ;;  %v385_v20 = vld [vmem:[#allocation6 + $0x128] sm:$0xff]  ;;  %v7082_v21 = vpack.c.bf16 %v376_v18, %v372_v17  ;;  %v380_v23 = vld [vmem:[#allocation6 + $0x100] sm:$0xff]  ;;  %v370_v61 = vld [vmem:[#allocation6 + $0xb0] sm:$0xff] }
  0x86   :  { %7055 = vmatpush3.bf16.msra.mxu0 %v7054_v40  ;;  %7077 = vmatprep.subr.bf16.mxu1 %v7076_v10  ;;  %v7084_v22 = vpack.c.bf16 %v385_v20, %v381_v19  ;;  %v384_v24 = vld [vmem:[#allocation6 + $0x120] sm:$0xff]  ;;  %v389_v25 = vld [vmem:[#allocation6 + $0x148] sm:$0xff]  ;;  %v375_v62 = vld [vmem:[#allocation6 + $0xd8] sm:$0xff]  ;;  %v7110_v0 = vpack.c.bf16 %v370_v61, %v366_v60 }
  0x87   :  { %7057 = vmatprep.subr.bf16.mxu0 %v7056_v41  ;;  %v393_v26 = vld [vmem:[#allocation6 + $0x168] sm:$0xff]  ;;  %v7086_v27 = vpack.c.bf16 %v384_v24, %v380_v23  ;;  %v388_v29 = vld [vmem:[#allocation6 + $0x140] sm:$0xff]  ;;  %v136_v41 = vlaneseq  ;;  %v379_v63 = vld [vmem:[#allocation6 + $0xf8] sm:$0xff] }
  0x88   :  { %v7088_v28 = vpack.c.bf16 %v393_v26, %v389_v25  ;;  %v392_v30 = vld [vmem:[#allocation6 + $0x160] sm:$0xff]  ;;  %v397_v31 = vld [vmem:[#allocation6 + $0x188] sm:$0xff]  ;;  %v374_v2 = vld [vmem:[#allocation6 + $0xd0] sm:$0xff] }
  0x89   :  { %7079 = vmatpush1.bf16.msra.mxu1 %v7078_v13  ;;  %v401_v32 = vld [vmem:[#allocation6 + $0x1a8] sm:$0xff]  ;;  %v7090_v33 = vpack.c.bf16 %v392_v30, %v388_v29  ;;  %v396_v35 = vld [vmem:[#allocation6 + $0x180] sm:$0xff]  ;;  %v9623_v42 = vand.u32 127, %v136_v41  ;;  %v378_v3 = vld [vmem:[#allocation6 + $0xf0] sm:$0xff] }
  0x8a   :  { %7059 = vmatpush3.bf16.msra.mxu0 %v7058_v46  ;;  %7081 = vmatprep.subr.bf16.mxu1 %v7080_v16  ;;  %v7092_v34 = vpack.c.bf16 %v401_v32, %v397_v31  ;;  %v400_v36 = vld [vmem:[#allocation6 + $0x1a0] sm:$0xff]  ;;  %v405_v37 = vld [vmem:[#allocation6 + $0x1c8] sm:$0xff]  ;;  %v359_v46 = vld [vmem:[#allocation6 + $0x58] sm:$0xff]  ;;  %v7114_v8 = vpack.c.bf16 %v378_v3, %v374_v2 }
  0x8b   :  { %7061 = vmatprep.subr.bf16.mxu0 %v7060_v47  ;;  %v409_v38 = vld [vmem:[#allocation6 + $0x1e8] sm:$0xff]  ;;  %v7094_v39 = vpack.c.bf16 %v400_v36, %v396_v35  ;;  %v9626_v43 = vadd.s32 128, %v9623_v42  ;;  %v363_v47 = vld [vmem:[#allocation6 + $0x78] sm:$0xff]  ;;  %v382_v10 = vld [vmem:[#allocation6 + $0x110] sm:$0xff] }
  0x8c   :  { %v7096_v40 = vpack.c.bf16 %v409_v38, %v405_v37  ;;  %v7104_v50 = vpack.c.bf16 %v363_v47, %v359_v46  ;;  %v383_v5 = vld [vmem:[#allocation6 + $0x118] sm:$0xff]  ;;  %v386_v11 = vld [vmem:[#allocation6 + $0x130] sm:$0xff]  ;;  %v404_v30 = vld [vmem:[#allocation6 + $0x1c0] sm:$0xff] }
  0x8d   :  { %7083 = vmatpush1.bf16.msra.mxu1 %v7082_v21  ;;  %v387_v6 = vld [vmem:[#allocation6 + $0x138] sm:$0xff]  ;;  %v7118_v15 = vpack.c.bf16 %v386_v11, %v382_v10  ;;  %v390_v17 = vld [vmem:[#allocation6 + $0x150] sm:$0xff]  ;;  %v408_v31 = vld [vmem:[#allocation6 + $0x1e0] sm:$0xff] }
  0x8e   :  { %7063 = vmatpush3.bf16.msra.mxu0 %v7062_v52  ;;  %7085 = vmatprep.subr.bf16.mxu1 %v7084_v22  ;;  %v362_v52 = vld [vmem:[#allocation6 + $0x70] sm:$0xff]  ;;  %v7116_v9 = vpack.c.bf16 %v387_v6, %v383_v5  ;;  %v391_v12 = vld [vmem:[#allocation6 + $0x158] sm:$0xff]  ;;  %v737_v37 = vld [vmem:[#allocation8 + $0x8] sm:$0xff] }
  0x8f   :  { %7065 = vmatprep.subr.bf16.mxu0 %v7064_v53  ;;  %v9432_v53 = vmov 1.0   ;;  %v7106_v58 = vpack.c.bf16 %v362_v52, %v358_v51  ;;  %v395_v13 = vld [vmem:[#allocation6 + $0x178] sm:$0xff]  ;;  %v394_v18 = vld [vmem:[#allocation6 + $0x170] sm:$0xff]  ;;  %v741_v38 = vld [vmem:[#allocation8 + $0x28] sm:$0xff] }
  0x90   :  { %v7120_v16 = vpack.c.bf16 %v395_v13, %v391_v12  ;;  %v399_v19 = vld [vmem:[#allocation6 + $0x198] sm:$0xff]  ;;  %v7122_v22 = vpack.c.bf16 %v394_v18, %v390_v17  ;;  %v398_v24 = vld [vmem:[#allocation6 + $0x190] sm:$0xff]  ;;  %v736_v45 = vld [vmem:[#allocation8] sm:$0xff] }
  0x91   :  { %7087 = vmatpush1.bf16.msra.mxu1 %v7086_v27  ;;  %v403_v20 = vld [vmem:[#allocation6 + $0x1b8] sm:$0xff]  ;;  %v402_v25 = vld [vmem:[#allocation6 + $0x1b0] sm:$0xff]  ;;  %v740_v46 = vld [vmem:[#allocation8 + $0x20] sm:$0xff] }
  0x92   :  { %7067 = vmatpush3.bf16.msra.mxu0 %v7066_v56  ;;  %7089 = vmatprep.subr.bf16.mxu1 %v7088_v28  ;;  %v7124_v23 = vpack.c.bf16 %v403_v20, %v399_v19  ;;  %v7126_v27 = vpack.c.bf16 %v402_v25, %v398_v24  ;;  %v407_v28 = vld [vmem:[#allocation6 + $0x1d8] sm:$0xff]  ;;  %v410_v35 = vld [vmem:[#allocation6 + $0x1f0] sm:$0xff]  ;;  %v749_v51 = vld [vmem:[#allocation8 + $0x68] sm:$0xff]  ;;  %v7134_v55 = vpack.c.bf16 %v740_v46, %v736_v45 }
  0x93   :  { %7101 = vmatprep.subr.bf16.mxu0 %v7100_v1  ;;  %v7112_v1 = vpack.c.bf16 %v379_v63, %v375_v62  ;;  %v411_v29 = vld [vmem:[#allocation6 + $0x1f8] sm:$0xff]  ;;  %v738_v47 = vld [vmem:[#allocation8 + $0x10] sm:$0xff]  ;;  %v757_v2 = vld [vmem:[#allocation8 + $0xa8] sm:$0xff] }
  0x94   :  { %v7128_v32 = vpack.c.bf16 %v411_v29, %v407_v28  ;;  %v747_v52 = vld [vmem:[#allocation8 + $0x58] sm:$0xff]  ;;  %v746_v60 = vld [vmem:[#allocation8 + $0x50] sm:$0xff]  ;;  %v756_v10 = vld [vmem:[#allocation8 + $0xa0] sm:$0xff] }
  0x95   :  { %7091 = vmatpush1.bf16.msra.mxu1 %v7090_v33  ;;  %v406_v33 = vld [vmem:[#allocation6 + $0x1d0] sm:$0xff]  ;;  %v755_v3 = vld [vmem:[#allocation8 + $0x98] sm:$0xff]  ;;  %v765_v17 = vld [vmem:[#allocation8 + $0xe8] sm:$0xff] }
  0x96   :  { %7093 = vmatprep.subr.bf16.mxu1 %v7092_v34  ;;  %v7098_v34 = vpack.c.bf16 %v408_v31, %v404_v30  ;;  %v7130_v36 = vpack.c.bf16 %v410_v35, %v406_v33  ;;  %v750_v61 = vld [vmem:[#allocation8 + $0x70] sm:$0xff]  ;;  %v763_v18 = vld [vmem:[#allocation8 + $0xd8] sm:$0xff]  ;;  %v764_v25 = vld [vmem:[#allocation8 + $0xe0] sm:$0xff] }
  0x97   :  { %v754_v11 = vld [vmem:[#allocation8 + $0x90] sm:$0xff]  ;;  %v767_v19 = vld [vmem:[#allocation8 + $0xf8] sm:$0xff]  ;;  %v769_v30 = vld [vmem:[#allocation8 + $0x108] sm:$0xff] }
  0x98   :  { %v758_v12 = vld [vmem:[#allocation8 + $0xb0] sm:$0xff]  ;;  %v9683_v29 = vpack.c.bf16 %v767_v19, %v763_v18  ;;  %v771_v33 = vld [vmem:[#allocation8 + $0x118] sm:$0xff]  ;;  %v793_v18 = vld [vmem:[#allocation8 + $0x1c8] sm:$0xff] }
  0x99   :  { %7095 = vmatpush1.bf16.msra.mxu1 %v7094_v39  ;;  %v739_v39 = vld [vmem:[#allocation8 + $0x18] sm:$0xff]  ;;  %v774_v45 = vld [vmem:[#allocation8 + $0x130] sm:$0xff] }
  0x9a   :  { %7097 = vmatprep.subr.bf16.mxu1 %v7096_v40  ;;  %v7132_v40 = vpack.c.bf16 %v741_v38, %v737_v37  ;;  %v768_v38 = vld [vmem:[#allocation8 + $0x100] sm:$0xff] }
  0x9d   :  { %7099 = vmatpush1.bf16.msra.mxu1 %v7098_v34  ;;  %v775_v34 = vld [vmem:[#allocation8 + $0x138] sm:$0xff] }
  0x9e   :  { %7133 = vmatprep.subr.bf16.mxu1 %v7132_v40  ;;  %v772_v40 = vld [vmem:[#allocation8 + $0x120] sm:$0xff] }
  0xf0   :  { %v141_v48 = vpop.permute.xlu0 %140  ;;  %v147_v56 = vpop.permute.xlu1 %146 }
  0xf1   :  { %vm163_vm0 = vcmp.eq.s32.totalorder %v9623_v42, %v141_v48  ;;  %vm164_vm1 = vcmp.eq.s32.totalorder %v9626_v43, %v141_v48  ;;  %vm168_vm2 = vcmp.eq.s32.totalorder %v9626_v43, %v147_v56  ;;  %vm167_vm5 = vcmp.eq.s32.totalorder %v9623_v42, %v147_v56  ;;  %v742_v48 = vld [vmem:[#allocation8 + $0x30] sm:$0xff] }
  0xf2   :  { %6962 = vmatprep.mubr.msk.f32.mxu0 %vm164_vm1, %v9432_v53  ;;  %v9665_v56 = vpack.c.bf16 %v742_v48, %v738_v47  ;;  %v9691_v47 = vpack.c.bf16 %v775_v34, %v771_v33  ;;  %v777_v48 = vld [vmem:[#allocation8 + $0x148] sm:$0xff] }
  0xf3   :  { %6963 = vmatmul.mubr.msk.f32.vlgmr.msra.gmra.mrb[0].mxu0 %vm163_vm0, %v9432_v53 }
  0xf4   :  { %v144_v57 = vpop.permute.xlu0 %143  ;;  %7103 = vmatpush1.bf16.msra.mxu0 %v7102_v49  ;;  %v150_v4 = vpop.permute.xlu1 %149  ;;  %v745_v49 = vld [vmem:[#allocation8 + $0x48] sm:$0xff] }
  0xf5   :  { %vm165_vm3 = vcmp.eq.s32.totalorder %v9623_v42, %v144_v57  ;;  %vm166_vm4 = vcmp.eq.s32.totalorder %v9626_v43, %v144_v57  ;;  %7105 = vmatprep.subr.bf16.mxu0 %v7104_v50  ;;  %vm170_vm6 = vcmp.eq.s32.totalorder %v9626_v43, %v150_v4  ;;  %vm169_vm7 = vcmp.eq.s32.totalorder %v9623_v42, %v150_v4  ;;  %v744_v57 = vld [vmem:[#allocation8 + $0x40] sm:$0xff]  ;;  %v759_v4 = vld [vmem:[#allocation8 + $0xb8] sm:$0xff] }
  0xf6   :  { %6964 = vmatprep.mubr.msk.f32.mxu0 %vm166_vm4, %v9432_v53  ;;  %v7136_v62 = vpack.c.bf16 %v749_v51, %v745_v49  ;;  %v779_v51 = vld [vmem:[#allocation8 + $0x158] sm:$0xff] }
  0xf7   :  { %6965 = vmatmul.mubr.msk.f32.gmra.mrb[2].mxu0 %vm165_vm3, %v9432_v53 }
  0xf8   :  { %6966 = vmatprep.mubr.msk.f32.mxu0 %vm168_vm2, %v9432_v53  ;;  %7107 = vmatpush1.bf16.msra.mxu0 %v7106_v58  ;;  %v153_v7 = vpop.permute.xlu0 %152  ;;  %v156_v14 = vpop.permute.xlu1 %155 }
  0xf9   :  { %7109 = vmatprep.subr.bf16.mxu0 %v7108_v59  ;;  %vm172_vm8 = vcmp.eq.s32.totalorder %v9626_v43, %v153_v7  ;;  %vm171_vm9 = vcmp.eq.s32.totalorder %v9623_v42, %v153_v7  ;;  %vm174_vm10 = vcmp.eq.s32.totalorder %v9626_v43, %v156_v14  ;;  %vm173_vm11 = vcmp.eq.s32.totalorder %v9623_v42, %v156_v14  ;;  %v748_v59 = vld [vmem:[#allocation8 + $0x60] sm:$0xff] }
  0xfa   :  { %v7138_v6 = vpack.c.bf16 %v748_v59, %v744_v57  ;;  %v9670_v7 = vpack.c.bf16 %v750_v61, %v746_v60  ;;  %v9675_v14 = vpack.c.bf16 %v759_v4, %v755_v3  ;;  %v776_v57 = vld [vmem:[#allocation8 + $0x140] sm:$0xff]  ;;  %v778_v60 = vld [vmem:[#allocation8 + $0x150] sm:$0xff]  ;;  %v789_v3 = vld [vmem:[#allocation8 + $0x1a8] sm:$0xff] }
  0xfb   :  { %6967 = vmatmul.mubr.msk.f32.gmra.mrb[4].mxu0 %vm167_vm5, %v9432_v53  ;;  %v780_v59 = vld [vmem:[#allocation8 + $0x160] sm:$0xff]  ;;  %v782_v61 = vld [vmem:[#allocation8 + $0x170] sm:$0xff]  ;;  %v787_v4 = vld [vmem:[#allocation8 + $0x198] sm:$0xff] }
  0xfc   :  { %6968 = vmatprep.mubr.msk.f32.mxu0 %vm170_vm6, %v9432_v53  ;;  %7111 = vmatpush1.bf16.msra.mxu0 %v7110_v0  ;;  %v159_v21 = vpop.permute.xlu0 %158  ;;  %v162_v26 = vpop.permute.xlu1 %161  ;;  %v753_v0 = vld [vmem:[#allocation8 + $0x88] sm:$0xff] }
  0xfd   :  { %7113 = vmatprep.subr.bf16.mxu0 %v7112_v1  ;;  %vm176_vm12 = vcmp.eq.s32.totalorder %v9626_v43, %v159_v21  ;;  %vm175_vm13 = vcmp.eq.s32.totalorder %v9623_v42, %v159_v21  ;;  %vm178_vm14 = vcmp.eq.s32.totalorder %v9626_v43, %v162_v26  ;;  %vm177_vm15 = vcmp.eq.s32.totalorder %v9623_v42, %v162_v26  ;;  %v743_v43 = vld [vmem:[#allocation8 + $0x38] sm:$0xff]  ;;  %v762_v26 = vld [vmem:[#allocation8 + $0xd0] sm:$0xff] }
  0xfe   :  { %v9433_v42 = vmov 0.0   ;;  %v9662_v44 = vpack.c.bf16 %v743_v43, %v739_v39  ;;  %v7140_v13 = vpack.c.bf16 %v757_v2, %v753_v0  ;;  %v770_v43 = vld [vmem:[#allocation8 + $0x110] sm:$0xff] }
  0xff   :  { %6969 = vmatmul.mubr.msk.f32.gmra.mrb[6].mxu0 %vm169_vm7, %v9432_v53  ;;  %498 = vmatprep.mubr.f32.mxu1 %v9433_v42 }
 0x100   :  { %6970 = vmatprep.mubr.msk.f32.mxu0 %vm172_vm8, %v9432_v53  ;;  %7115 = vmatpush1.bf16.msra.mxu0 %v7114_v8  ;;  %v752_v8 = vld [vmem:[#allocation8 + $0x80] sm:$0xff] }
 0x101   :  { %7117 = vmatprep.subr.bf16.mxu0 %v7116_v9  ;;  %v7142_v21 = vpack.c.bf16 %v756_v10, %v752_v8  ;;  %v7154_v8 = vpack.c.bf16 %v780_v59, %v776_v57  ;;  %v784_v10 = vld [vmem:[#allocation8 + $0x180] sm:$0xff]  ;;  %v966_v57 = vld [vmem:[#allocation9 + $0x10] sm:$0xff] }
 0x103   :  { %6971 = vmatmul.mubr.msk.f32.gmra.mrb[8].mxu0 %vm171_vm9, %v9432_v53 }
 0x104   :  { %6972 = vmatprep.mubr.msk.f32.mxu0 %vm174_vm10, %v9432_v53  ;;  %7119 = vmatpush1.bf16.msra.mxu0 %v7118_v15  ;;  %v761_v15 = vld [vmem:[#allocation8 + $0xc8] sm:$0xff] }
 0x105   :  { %7121 = vmatprep.subr.bf16.mxu0 %v7120_v16  ;;  %v7144_v28 = vpack.c.bf16 %v765_v17, %v761_v15  ;;  %v790_v15 = vld [vmem:[#allocation8 + $0x1b0] sm:$0xff] }
 0x107   :  { %6973 = vmatmul.mubr.msk.f32.gmra.mrb[10].mxu0 %vm173_vm11, %v9432_v53 }
 0x108   :  { %6974 = vmatprep.mubr.msk.f32.mxu0 %vm176_vm12, %v9432_v53  ;;  %7123 = vmatpush1.bf16.msra.mxu0 %v7122_v22  ;;  %v9678_v22 = vpack.c.bf16 %v758_v12, %v754_v11  ;;  %v788_v12 = vld [vmem:[#allocation8 + $0x1a0] sm:$0xff] }
 0x109   :  { %7125 = vmatprep.subr.bf16.mxu0 %v7124_v23  ;;  %v760_v23 = vld [vmem:[#allocation8 + $0xc0] sm:$0xff] }
 0x10b   :  { %6975 = vmatmul.mubr.msk.f32.gmra.mrb[12].mxu0 %vm175_vm13, %v9432_v53 }
 0x10c   :  { %6976 = vmatprep.mubr.msk.f32.mxu0 %vm178_vm14, %v9432_v53  ;;  %7127 = vmatpush1.bf16.msra.mxu0 %v7126_v27  ;;  %v766_v27 = vld [vmem:[#allocation8 + $0xf0] sm:$0xff] }
 0x10d   :  { %7129 = vmatprep.subr.bf16.mxu0 %v7128_v32  ;;  %v773_v32 = vld [vmem:[#allocation8 + $0x128] sm:$0xff]  ;;  %v9686_v37 = vpack.c.bf16 %v766_v27, %v762_v26  ;;  %v792_v27 = vld [vmem:[#allocation8 + $0x1c0] sm:$0xff] }
 0x10e   :  { %v7148_v46 = vpack.c.bf16 %v773_v32, %v769_v30  ;;  %v796_v30 = vld [vmem:[#allocation8 + $0x1e0] sm:$0xff]  ;;  %v798_v32 = vld [vmem:[#allocation8 + $0x1f0] sm:$0xff] }
 0x10f   :  { %6977 = vmatmul.mubr.msk.f32.gmra.mrb[14].mxu0 %vm177_vm15, %v9432_v53  ;;  %v751_v53 = vld [vmem:[#allocation8 + $0x78] sm:$0xff] }
 0x110   :  { %7131 = vmatpush1.bf16.msra.mxu0 %v7130_v36  ;;  %611 = vmatprep.mubr.f32.mxu0 %v9433_v42  ;;  %v9667_v63 = vpack.c.bf16 %v751_v53, %v747_v52  ;;  %v7146_v36 = vpack.c.bf16 %v764_v25, %v760_v23  ;;  %v783_v52 = vld [vmem:[#allocation8 + $0x178] sm:$0xff]  ;;  %v7158_v25 = vpack.c.bf16 %v788_v12, %v784_v10  ;;  %v978_v10 = vld [vmem:[#allocation9 + $0x70] sm:$0xff]  ;;  %v981_v12 = vld [vmem:[#allocation9 + $0x88] sm:$0xff] }
 0x111   :  { %7165 = vmatprep.subr.bf16.mxu0 %v9662_v44  ;;  %v9699_v0 = vpack.c.bf16 %v783_v52, %v779_v51  ;;  %v799_v23 = vld [vmem:[#allocation8 + $0x1f8] sm:$0xff]  ;;  %v964_v51 = vld [vmem:[#allocation9] sm:$0xff] }
 0x112   :  { %v968_v52 = vld [vmem:[#allocation9 + $0x20] sm:$0xff] }
 0x1c6   :  { %v7012_v50 = vpop.f32.mrb[0].mxu0 }
 0x1c7   :  { %v7013_v54 = vpop.f32.mrb[1].mxu0 }
 0x1c8   :  { %v7014_v58 = vadd.f32 %v7013_v54, %v7012_v50  ;;  %v781_v50 = vld [vmem:[#allocation8 + $0x168] sm:$0xff]  ;;  %v7150_v54 = vpack.c.bf16 %v772_v40, %v768_v38  ;;  %v7162_v38 = vpack.c.bf16 %v796_v30, %v792_v27 }
 0x1c9   :  { %v993_v30 = vld [vmem:[#allocation9 + $0xe8] sm:$0xff] }
 0x1ca   :  { %v7015_v1 = vpop.f32.mrb[2].mxu0  ;;  %499 = vmatmul.mubr.f32.vlgmr.msra.gmra.mrb[0].mxu1 %v7014_v58  ;;  %612 = vmatmul.mubr.f32.vlgmr.msra.gmra.mrb[16].mxu0 %v7014_v58 }
 0x1cb   :  { %7135 = vmatpush1.bf16.msra.mxu1 %v7134_v55  ;;  %v7016_v5 = vpop.f32.mrb[3].mxu0  ;;  %7167 = vmatpush1.bf16.msra.mxu0 %v9665_v56  ;;  %v9694_v55 = vpack.c.bf16 %v774_v45, %v770_v43  ;;  %v726_v43 = vld [vmem:[%s10700_s2] sm:$0xff]  ;;  %v965_v45 = vld [vmem:[#allocation9 + $0x8] sm:$0xff] }
 0x1cc   :  { %v7017_v9 = vadd.f32 %v7016_v5, %v7015_v1  ;;  %504 = vmatprep.mubr.f32.mxu1 %v9433_v42  ;;  %617 = vmatprep.mubr.f32.mxu0 %v9433_v42  ;;  %v785_v1 = vld [vmem:[#allocation8 + $0x188] sm:$0xff]  ;;  %v791_v5 = vld [vmem:[#allocation8 + $0x1b8] sm:$0xff] }
 0x1cd   :  { %7137 = vmatprep.subr.bf16.mxu1 %v7136_v62  ;;  %7169 = vmatprep.subr.bf16.mxu0 %v9667_v63  ;;  %v7152_v62 = vpack.c.bf16 %v781_v50, %v777_v48  ;;  %v9707_v17 = vpack.c.bf16 %v791_v5, %v787_v4  ;;  %v967_v48 = vld [vmem:[#allocation9 + $0x18] sm:$0xff]  ;;  %v976_v4 = vld [vmem:[#allocation9 + $0x60] sm:$0xff] }
 0x1ce   :  { %v7018_v16 = vpop.f32.mrb[4].mxu0  ;;  %505 = vmatmul.mubr.f32.gmra.mrb[2].mxu1 %v7017_v9  ;;  %618 = vmatmul.mubr.f32.gmra.mrb[18].mxu0 %v7017_v9  ;;  %v9702_v9 = vpack.c.bf16 %v782_v61, %v778_v60  ;;  %v971_v50 = vld [vmem:[#allocation9 + $0x38] sm:$0xff]  ;;  %v973_v60 = vld [vmem:[#allocation9 + $0x48] sm:$0xff] }
 0x1cf   :  { %7139 = vmatpush1.bf16.msra.mxu1 %v7138_v6  ;;  %v7019_v20 = vpop.f32.mrb[5].mxu0  ;;  %7171 = vmatpush1.bf16.msra.mxu0 %v9670_v7  ;;  %v977_v61 = vld [vmem:[#allocation9 + $0x68] sm:$0xff] }
 0x1d0   :  { %v7020_v24 = vadd.f32 %v7019_v20, %v7018_v16  ;;  %510 = vmatprep.mubr.f32.mxu1 %v9433_v42  ;;  %623 = vmatprep.mubr.f32.mxu0 %v9433_v42  ;;  %v7156_v16 = vpack.c.bf16 %v789_v3, %v785_v1  ;;  %v797_v20 = vld [vmem:[#allocation8 + $0x1e8] sm:$0xff]  ;;  %v7200_v1 = vpack.c.bf16 %v977_v61, %v973_v60  ;;  %v972_v3 = vld [vmem:[#allocation9 + $0x40] sm:$0xff]  ;;  %v1002_v60 = vld [vmem:[#allocation9 + $0x130] sm:$0xff] }
 0x1d1   :  { %7141 = vmatprep.subr.bf16.mxu1 %v7140_v13  ;;  %7173 = vmatprep.subr.bf16.mxu0 %v9675_v14  ;;  %v786_v13 = vld [vmem:[#allocation8 + $0x190] sm:$0xff]  ;;  %v7160_v33 = vpack.c.bf16 %v797_v20, %v793_v18  ;;  %v987_v18 = vld [vmem:[#allocation9 + $0xb8] sm:$0xff]  ;;  %v984_v20 = vld [vmem:[#allocation9 + $0xa0] sm:$0xff] }
 0x1d2   :  { %v7021_v31 = vpop.f32.mrb[6].mxu0  ;;  %511 = vmatmul.mubr.f32.gmra.mrb[4].mxu1 %v7020_v24  ;;  %624 = vmatmul.mubr.f32.gmra.mrb[20].mxu0 %v7020_v24  ;;  %v9710_v26 = vpack.c.bf16 %v790_v15, %v786_v13  ;;  %v985_v13 = vld [vmem:[#allocation9 + $0xa8] sm:$0xff]  ;;  %v983_v15 = vld [vmem:[#allocation9 + $0x98] sm:$0xff] }
 0x1d3   :  { %7143 = vmatpush1.bf16.msra.mxu1 %v7142_v21  ;;  %v7022_v35 = vpop.f32.mrb[7].mxu0  ;;  %7175 = vmatpush1.bf16.msra.mxu0 %v9678_v22  ;;  %v795_v21 = vld [vmem:[#allocation8 + $0x1d8] sm:$0xff] }
 0x1d4   :  { %v7023_v39 = vadd.f32 %v7022_v35, %v7021_v31  ;;  %516 = vmatprep.mubr.f32.mxu1 %v9433_v42  ;;  %629 = vmatprep.mubr.f32.mxu0 %v9433_v42  ;;  %v794_v31 = vld [vmem:[#allocation8 + $0x1d0] sm:$0xff]  ;;  %v9715_v34 = vpack.c.bf16 %v799_v23, %v795_v21  ;;  %v7236_v21 = vpack.c.bf16 %v987_v18, %v983_v15  ;;  %v1013_v15 = vld [vmem:[#allocation9 + $0x188] sm:$0xff]  ;;  %v1015_v18 = vld [vmem:[#allocation9 + $0x198] sm:$0xff] }
 0x1d5   :  { %7145 = vmatprep.subr.bf16.mxu1 %v7144_v28  ;;  %7177 = vmatprep.subr.bf16.mxu0 %v9683_v29 }
 0x1d6   :  { %v7024_v49 = vpop.f32.mrb[8].mxu0  ;;  %517 = vmatmul.mubr.f32.gmra.mrb[6].mxu1 %v7023_v39  ;;  %630 = vmatmul.mubr.f32.gmra.mrb[22].mxu0 %v7023_v39  ;;  %v9718_v39 = vpack.c.bf16 %v798_v32, %v794_v31  ;;  %v991_v31 = vld [vmem:[#allocation9 + $0xd8] sm:$0xff] }
 0x1d7   :  { %7147 = vmatpush1.bf16.msra.mxu1 %v7146_v36  ;;  %v7025_v53 = vpop.f32.mrb[9].mxu0  ;;  %7179 = vmatpush1.bf16.msra.mxu0 %v9686_v37 }
 0x1d8   :  { %v7026_v58 = vadd.f32 %v7025_v53, %v7024_v49  ;;  %522 = vmatprep.mubr.f32.mxu1 %v9433_v42  ;;  %635 = vmatprep.mubr.f32.mxu0 %v9433_v42  ;;  %v7228_v53 = vpack.c.bf16 %v971_v50, %v967_v48  ;;  %v997_v48 = vld [vmem:[#allocation9 + $0x108] sm:$0xff]  ;;  %v999_v50 = vld [vmem:[#allocation9 + $0x118] sm:$0xff] }
 0x1d9   :  { %7149 = vmatprep.subr.bf16.mxu1 %v7148_v46  ;;  %7181 = vmatprep.subr.bf16.mxu0 %v9691_v47  ;;  %v969_v46 = vld [vmem:[#allocation9 + $0x28] sm:$0xff] }
 0x1da   :  { %v7027_v2 = vpop.f32.mrb[10].mxu0  ;;  %523 = vmatmul.mubr.f32.gmra.mrb[8].mxu1 %v7026_v58  ;;  %636 = vmatmul.mubr.f32.gmra.mrb[24].mxu0 %v7026_v58  ;;  %v7196_v49 = vpack.c.bf16 %v969_v46, %v965_v45  ;;  %v970_v58 = vld [vmem:[#allocation9 + $0x30] sm:$0xff] }
 0x1db   :  { %7151 = vmatpush1.bf16.msra.mxu1 %v7150_v54  ;;  %v7028_v6 = vpop.f32.mrb[11].mxu0  ;;  %7183 = vmatpush1.bf16.msra.mxu0 %v9694_v55  ;;  %v7198_v54 = vpack.c.bf16 %v968_v52, %v964_v51  ;;  %v7230_v59 = vpack.c.bf16 %v970_v58, %v966_v57  ;;  %v994_v45 = vld [vmem:[#allocation9 + $0xf0] sm:$0xff]  ;;  %v1003_v52 = vld [vmem:[#allocation9 + $0x138] sm:$0xff] }
 0x1dc   :  { %v7029_v11 = vadd.f32 %v7028_v6, %v7027_v2  ;;  %528 = vmatprep.mubr.f32.mxu1 %v9433_v42  ;;  %641 = vmatprep.mubr.f32.mxu0 %v9433_v42  ;;  %v979_v2 = vld [vmem:[#allocation9 + $0x78] sm:$0xff]  ;;  %v7202_v6 = vpack.c.bf16 %v976_v4, %v972_v3  ;;  %v7244_v57 = vpack.c.bf16 %v1003_v52, %v999_v50  ;;  %v1171_v50 = vld [vmem:[#allocation11 + $0x8] sm:$0xff] }
 0x1dd   :  { %7153 = vmatprep.subr.bf16.mxu1 %v7152_v62  ;;  %7185 = vmatprep.subr.bf16.mxu0 %v9699_v0  ;;  %v975_v62 = vld [vmem:[#allocation9 + $0x58] sm:$0xff] }
 0x1de   :  { %v7030_v19 = vpop.f32.mrb[12].mxu0  ;;  %529 = vmatmul.mubr.f32.gmra.mrb[10].mxu1 %v7029_v11  ;;  %642 = vmatmul.mubr.f32.gmra.mrb[26].mxu0 %v7029_v11  ;;  %v7232_v5 = vpack.c.bf16 %v979_v2, %v975_v62  ;;  %v1005_v62 = vld [vmem:[#allocation9 + $0x148] sm:$0xff]  ;;  %v1007_v2 = vld [vmem:[#allocation9 + $0x158] sm:$0xff] }
 0x1df   :  { %7155 = vmatpush1.bf16.msra.mxu1 %v7154_v8  ;;  %v7031_v24 = vpop.f32.mrb[13].mxu0  ;;  %7187 = vmatpush1.bf16.msra.mxu0 %v9702_v9  ;;  %v974_v8 = vld [vmem:[#allocation9 + $0x50] sm:$0xff]  ;;  %v1011_v4 = vld [vmem:[#allocation9 + $0x178] sm:$0xff] }
 0x1e0   :  { %v7032_v28 = vadd.f32 %v7031_v24, %v7030_v19  ;;  %534 = vmatprep.mubr.f32.mxu1 %v9433_v42  ;;  %647 = vmatprep.mubr.f32.mxu0 %v9433_v42  ;;  %v7234_v11 = vpack.c.bf16 %v978_v10, %v974_v8  ;;  %v980_v19 = vld [vmem:[#allocation9 + $0x80] sm:$0xff]  ;;  %v982_v24 = vld [vmem:[#allocation9 + $0x90] sm:$0xff]  ;;  %v7248_v8 = vpack.c.bf16 %v1011_v4, %v1007_v2  ;;  %v1173_v52 = vld [vmem:[#allocation11 + $0x18] sm:$0xff] }
 0x1e1   :  { %7157 = vmatprep.subr.bf16.mxu1 %v7156_v16  ;;  %7189 = vmatprep.subr.bf16.mxu0 %v9707_v17  ;;  %v7204_v16 = vpack.c.bf16 %v985_v13, %v981_v12  ;;  %v7206_v23 = vpack.c.bf16 %v984_v20, %v980_v19  ;;  %v1010_v12 = vld [vmem:[#allocation9 + $0x170] sm:$0xff]  ;;  %v1019_v20 = vld [vmem:[#allocation9 + $0x1b8] sm:$0xff] }
 0x1e2   :  { %v7033_v35 = vpop.f32.mrb[14].mxu0  ;;  %535 = vmatmul.mubr.f32.gmra.mrb[12].mxu1 %v7032_v28  ;;  %648 = vmatmul.mubr.f32.gmra.mrb[28].mxu0 %v7032_v28  ;;  %v989_v28 = vld [vmem:[#allocation9 + $0xc8] sm:$0xff] }
 0x1e3   :  { %7159 = vmatpush1.bf16.msra.mxu1 %v7158_v25  ;;  %v7034_v36 = vpop.f32.mrb[15].mxu0  ;;  %7191 = vmatpush1.bf16.msra.mxu0 %v9710_v26  ;;  %v986_v25 = vld [vmem:[#allocation9 + $0xb0] sm:$0xff]  ;;  %v7208_v32 = vpack.c.bf16 %v993_v30, %v989_v28 }
 0x1e4   :  { %v7035_v40 = vadd.f32 %v7034_v36, %v7033_v35  ;;  %540 = vmatprep.mubr.f32.mxu1 %v9433_v42  ;;  %653 = vmatprep.mubr.f32.mxu0 %v9433_v42  ;;  %v7238_v27 = vpack.c.bf16 %v986_v25, %v982_v24  ;;  %v988_v35 = vld [vmem:[#allocation9 + $0xc0] sm:$0xff]  ;;  %v7252_v24 = vpack.c.bf16 %v1019_v20, %v1015_v18  ;;  %v1018_v28 = vld [vmem:[#allocation9 + $0x1b0] sm:$0xff] }
 0x1e5   :  { %7161 = vmatprep.subr.bf16.mxu1 %v7160_v33  ;;  %7193 = vmatprep.subr.bf16.mxu0 %v9715_v34  ;;  %v995_v33 = vld [vmem:[#allocation9 + $0xf8] sm:$0xff]  ;;  %v992_v36 = vld [vmem:[#allocation9 + $0xe0] sm:$0xff] }
 0x1e6   :  { %541 = vmatmul.mubr.f32.gmra.mrb[14].mxu1 %v7035_v40  ;;  %654 = vmatmul.mubr.f32.gmra.mrb[30].mxu0 %v7035_v40  ;;  %v7210_v40 = vpack.c.bf16 %v992_v36, %v988_v35  ;;  %v1027_v36 = vld [vmem:[#allocation9 + $0x1f8] sm:$0xff] }
 0x1e7   :  { %7163 = vmatpush1.bf16.msra.mxu1 %v7162_v38  ;;  %7195 = vmatpush1.bf16.msra.mxu0 %v9718_v39  ;;  %v7240_v38 = vpack.c.bf16 %v995_v33, %v991_v31  ;;  %v1021_v31 = vld [vmem:[#allocation9 + $0x1c8] sm:$0xff]  ;;  %v1023_v33 = vld [vmem:[#allocation9 + $0x1d8] sm:$0xff] }
 0x1e8   :  { %864 = vmatprep.mubr.f32.mxu1 %v9433_v42  ;;  %935 = vmatprep.mubr.f32.mxu0 %v9433_v42 }
 0x1e9   :  { %7197 = vmatprep.subr.bf16.mxu1 %v7196_v49  ;;  %7229 = vmatprep.subr.bf16.mxu0 %v7228_v53  ;;  %v1001_v49 = vld [vmem:[#allocation9 + $0x128] sm:$0xff]  ;;  %v996_v53 = vld [vmem:[#allocation9 + $0x100] sm:$0xff] }
 0x1ea   :  { %865 = vmatmul.mubr.f32.vlgmr.msra.gmra.mrb[0].mxu1 %v726_v43  ;;  %936 = vmatmul.mubr.f32.vlgmr.msra.gmra.mrb[16].mxu0 %v726_v43  ;;  %v990_v43 = vld [vmem:[#allocation9 + $0xd0] sm:$0xff]  ;;  %v7212_v51 = vpack.c.bf16 %v1001_v49, %v997_v48 }
 0x1eb   :  { %1092 = vmatprep.mubr.f32.mxu1 %v9433_v42  ;;  %1163 = vmatprep.mubr.f32.mxu0 %v9433_v42  ;;  %v7242_v46 = vpack.c.bf16 %v994_v45, %v990_v43  ;;  %v7256_v43 = vpack.c.bf16 %v1027_v36, %v1023_v33  ;;  %v1026_v48 = vld [vmem:[#allocation9 + $0x1f0] sm:$0xff] }
 0x1ec   :  { %7199 = vmatpush1.bf16.msra.mxu1 %v7198_v54  ;;  %7231 = vmatpush1.bf16.msra.mxu0 %v7230_v59  ;;  %v1000_v54 = vld [vmem:[#allocation9 + $0x120] sm:$0xff]  ;;  %v998_v59 = vld [vmem:[#allocation9 + $0x110] sm:$0xff] }
 0x1ed   :  { %7201 = vmatprep.subr.bf16.mxu1 %v7200_v1  ;;  %7233 = vmatprep.subr.bf16.mxu0 %v7232_v5  ;;  %v7214_v58 = vpack.c.bf16 %v1000_v54, %v996_v53  ;;  %v7246_v61 = vpack.c.bf16 %v1002_v60, %v998_v59  ;;  %v1009_v1 = vld [vmem:[#allocation9 + $0x168] sm:$0xff]  ;;  %v1004_v5 = vld [vmem:[#allocation9 + $0x140] sm:$0xff]  ;;  %v1177_v54 = vld [vmem:[#allocation11 + $0x38] sm:$0xff] }
 0x1ee   :  { %v7216_v3 = vpack.c.bf16 %v1009_v1, %v1005_v62  ;;  %v412_v60 = vld [vmem:[%s10704_s6] sm:$0xf] }
 0x1f0   :  { %7203 = vmatpush1.bf16.msra.mxu1 %v7202_v6  ;;  %7235 = vmatpush1.bf16.msra.mxu0 %v7234_v11  ;;  %v1008_v6 = vld [vmem:[#allocation9 + $0x160] sm:$0xff]  ;;  %v1006_v11 = vld [vmem:[#allocation9 + $0x150] sm:$0xff] }
 0x1f1   :  { %7205 = vmatprep.subr.bf16.mxu1 %v7204_v16  ;;  %7237 = vmatprep.subr.bf16.mxu0 %v7236_v21  ;;  %v7218_v10 = vpack.c.bf16 %v1008_v6, %v1004_v5  ;;  %v7250_v13 = vpack.c.bf16 %v1010_v12, %v1006_v11  ;;  %v1017_v16 = vld [vmem:[#allocation9 + $0x1a8] sm:$0xff]  ;;  %v1012_v21 = vld [vmem:[#allocation9 + $0x180] sm:$0xff] }
 0x1f2   :  { %v7220_v19 = vpack.c.bf16 %v1017_v16, %v1013_v15 }
 0x1f4   :  { %7207 = vmatpush1.bf16.msra.mxu1 %v7206_v23  ;;  %7239 = vmatpush1.bf16.msra.mxu0 %v7238_v27  ;;  %v1016_v23 = vld [vmem:[#allocation9 + $0x1a0] sm:$0xff]  ;;  %v1014_v27 = vld [vmem:[#allocation9 + $0x190] sm:$0xff] }
 0x1f5   :  { %7209 = vmatprep.subr.bf16.mxu1 %v7208_v32  ;;  %7241 = vmatprep.subr.bf16.mxu0 %v7240_v38  ;;  %v7222_v25 = vpack.c.bf16 %v1016_v23, %v1012_v21  ;;  %v7254_v30 = vpack.c.bf16 %v1018_v28, %v1014_v27  ;;  %v1025_v32 = vld [vmem:[#allocation9 + $0x1e8] sm:$0xff]  ;;  %v1020_v38 = vld [vmem:[#allocation9 + $0x1c0] sm:$0xff] }
 0x1f6   :  { %v7224_v35 = vpack.c.bf16 %v1025_v32, %v1021_v31  ;;  %v729_v27 = vld [vmem:[%s10701_s3] sm:$0xff] }
 0x1f8   :  { %7211 = vmatpush1.bf16.msra.mxu1 %v7210_v40  ;;  %7243 = vmatpush1.bf16.msra.mxu0 %v7242_v46  ;;  %v1024_v40 = vld [vmem:[#allocation9 + $0x1e0] sm:$0xff]  ;;  %v1022_v46 = vld [vmem:[#allocation9 + $0x1d0] sm:$0xff] }
 0x1f9   :  { %7213 = vmatprep.subr.bf16.mxu1 %v7212_v51  ;;  %7245 = vmatprep.subr.bf16.mxu0 %v7244_v57  ;;  %v7226_v45 = vpack.c.bf16 %v1024_v40, %v1020_v38  ;;  %v7258_v49 = vpack.c.bf16 %v1026_v48, %v1022_v46  ;;  %v1175_v51 = vld [vmem:[#allocation11 + $0x28] sm:$0xff]  ;;  %v7292_v57 = vpack.c.bf16 %v1177_v54, %v1173_v52  ;;  %v1170_v38 = vld [vmem:[#allocation11] sm:$0xff] }
 0x1fa   :  { %v7260_v53 = vpack.c.bf16 %v1175_v51, %v1171_v50  ;;  %v1174_v40 = vld [vmem:[#allocation11 + $0x20] sm:$0xff]  ;;  %v1179_v46 = vld [vmem:[#allocation11 + $0x48] sm:$0xff]  ;;  %v1185_v50 = vld [vmem:[#allocation11 + $0x78] sm:$0xff] }
 0x1fb   :  { %v1183_v48 = vld [vmem:[#allocation11 + $0x68] sm:$0xff] }
 0x1fc   :  { %7215 = vmatpush1.bf16.msra.mxu1 %v7214_v58  ;;  %7247 = vmatpush1.bf16.msra.mxu0 %v7246_v61  ;;  %v9732_v58 = vshrl.u32 %v136_v41, 7 }
 0x1fd   :  { %7217 = vmatprep.subr.bf16.mxu1 %v7216_v3  ;;  %7249 = vmatprep.subr.bf16.mxu0 %v7248_v8 }
 0x1fe   :  { %v9735_v59 = vsub.s32 0, %v9732_v58  ;;  %v9741_v61 = vsub.s32 1, %v9732_v58  ;;  %v424_v1 = vsub.s32 2, %v9732_v58  ;;  %v428_v8 = vsub.s32 3, %v9732_v58 }
 0x200   :  { %7219 = vmatpush1.bf16.msra.mxu1 %v7218_v10  ;;  %7251 = vmatpush1.bf16.msra.mxu0 %v7250_v13  ;;  %v9744_v62 = vrot.slane %v412_v60, %v9735_v59  ;;  %v9748_v2 = vrot.slane %v412_v60, %v9741_v61  ;;  %v9753_v5 = vrot.slane %v412_v60, %v424_v1 }
 0x201   :  { %7221 = vmatprep.subr.bf16.mxu1 %v7220_v19  ;;  %7253 = vmatprep.subr.bf16.mxu0 %v7252_v24  ;;  %v9760_v16 = vrot.slane %v412_v60, %v428_v8  ;;  %v1182_v60 = vld [vmem:[#allocation11 + $0x60] sm:$0xff] }
 0x204   :  { %7223 = vmatpush1.bf16.msra.mxu1 %v7222_v25  ;;  %7255 = vmatpush1.bf16.msra.mxu0 %v7254_v30 }
 0x205   :  { %7225 = vmatprep.subr.bf16.mxu1 %v7224_v35  ;;  %7257 = vmatprep.subr.bf16.mxu0 %v7256_v43  ;;  %v1172_v43 = vld [vmem:[#allocation11 + $0x10] sm:$0xff] }
 0x208   :  { %7227 = vmatpush1.bf16.msra.mxu1 %v7226_v45  ;;  %7259 = vmatpush1.bf16.msra.mxu0 %v7258_v49  ;;  %v1176_v45 = vld [vmem:[#allocation11 + $0x30] sm:$0xff]  ;;  %v1181_v49 = vld [vmem:[#allocation11 + $0x58] sm:$0xff] }
 0x209   :  { %7261 = vmatprep.subr.bf16.mxu1 %v7260_v53  ;;  %7293 = vmatprep.subr.bf16.mxu0 %v7292_v57  ;;  %v7262_v53 = vpack.c.bf16 %v1174_v40, %v1170_v38  ;;  %v7294_v54 = vpack.c.bf16 %v1176_v45, %v1172_v43  ;;  %v1178_v57 = vld [vmem:[#allocation11 + $0x40] sm:$0xff] }
 0x20a   :  { %v1194_v38 = vld [vmem:[#allocation11 + $0xc0] sm:$0xff] }
 0x20b   :  { %v1198_v40 = vld [vmem:[#allocation11 + $0xe0] sm:$0xff] }
 0x2bd   :  { %v866_v41 = vpop.f32.mrb[0].mxu1  ;;  %v937_v3 = vpop.f32.mrb[16].mxu0 }
 0x2be   :  { %v8924_v4 = vadd.f32 %v866_v41, %v9744_v62  ;;  %v868_v6 = vpop.f32.mrb[1].mxu1  ;;  %v939_v10 = vpop.f32.mrb[17].mxu0  ;;  %v8940_v15 = vadd.f32 %v937_v3, %v9753_v5  ;;  %v7264_v3 = vpack.c.bf16 %v1183_v48, %v1179_v46  ;;  %v1196_v46 = vld [vmem:[#allocation11 + $0xd0] sm:$0xff] }
 0x2bf   :  { %v8925_v11 = vadd.f32 %v868_v6, %v9748_v2  ;;  %v8941_v18 = vadd.f32 %v939_v10, %v9760_v16  ;;  %v1180_v6 = vld [vmem:[#allocation11 + $0x50] sm:$0xff] }
 0x2c0   :  { %v946_v12 = vmul.f32 0.5, %v8924_v4  ;;  %v7296_v4 = vpack.c.bf16 %v1185_v50, %v1181_v49  ;;  %v1184_v10 = vld [vmem:[#allocation11 + $0x70] sm:$0xff]  ;;  %v1203_v49 = vld [vmem:[#allocation11 + $0x108] sm:$0xff] }
 0x2c1   :  { %v950_v13 = vmul.f32 0.5, %v8925_v11  ;;  %v955_v19 = vmul.f32 0.5, %v8941_v18  ;;  %v1187_v11 = vld [vmem:[#allocation11 + $0x88] sm:$0xff]  ;;  %v7266_v18 = vpack.c.bf16 %v1182_v60, %v1178_v57  ;;  %v1200_v48 = vld [vmem:[#allocation11 + $0xf0] sm:$0xff]  ;;  %v1202_v57 = vld [vmem:[#allocation11 + $0x100] sm:$0xff] }
 0x2c2   :  { %9071 = vtanh.f32 %v946_v12  ;;  %v1191_v12 = vld [vmem:[#allocation11 + $0xa8] sm:$0xff]  ;;  %v1206_v60 = vld [vmem:[#allocation11 + $0x120] sm:$0xff] }
 0x2c3   :  { %9073 = vtanh.f32 %v950_v13  ;;  %v1189_v13 = vld [vmem:[#allocation11 + $0x98] sm:$0xff]  ;;  %v1207_v50 = vld [vmem:[#allocation11 + $0x128] sm:$0xff] }
 0x2c4   :  { %9075 = vtanh.f32 %v8940_v15  ;;  %v1193_v15 = vld [vmem:[#allocation11 + $0xb8] sm:$0xff] }
 0x2c5   :  { %9077 = vtanh.f32 %v955_v19  ;;  %v7298_v19 = vpack.c.bf16 %v1184_v10, %v1180_v6  ;;  %v1204_v6 = vld [vmem:[#allocation11 + $0x110] sm:$0xff] }
 0x2c6   :  { %v1208_v10 = vld [vmem:[#allocation11 + $0x130] sm:$0xff] }
 0x2cc   :  { %v9072_v20 = vpop.eup %9071 }
 0x2cd   :  { %v9074_v21 = vpop.eup %9073  ;;  %v948_v23 = vmul.f32 0.5, %v9072_v20  ;;  %v1186_v20 = vld [vmem:[#allocation11 + $0x80] sm:$0xff] }
 0x2ce   :  { %v952_v24 = vmul.f32 0.5, %v9074_v21  ;;  %v9076_v28 = vpop.eup %9075  ;;  %v1190_v21 = vld [vmem:[#allocation11 + $0xa0] sm:$0xff] }
 0x2cf   :  { %v949_v25 = vadd.f32 0.5, %v948_v23  ;;  %v9078_v35 = vpop.eup %9077  ;;  %v7268_v23 = vpack.c.bf16 %v1191_v12, %v1187_v11  ;;  %v1211_v11 = vld [vmem:[#allocation11 + $0x148] sm:$0xff] }
 0x2d0   :  { %v953_v30 = vadd.f32 0.5, %v952_v24  ;;  %v957_v36 = vmul.f32 0.5, %v9078_v35  ;;  %v7300_v24 = vpack.c.bf16 %v1193_v15, %v1189_v13  ;;  %v7270_v35 = vpack.c.bf16 %v1190_v21, %v1186_v20  ;;  %v1215_v12 = vld [vmem:[#allocation11 + $0x168] sm:$0xff]  ;;  %v1213_v13 = vld [vmem:[#allocation11 + $0x158] sm:$0xff]  ;;  %v1210_v20 = vld [vmem:[#allocation11 + $0x140] sm:$0xff] }
 0x2d1   :  { %v960_v31 = vmul.f32 %v9076_v28, %v949_v25  ;;  %v1188_v25 = vld [vmem:[#allocation11 + $0x90] sm:$0xff]  ;;  %v1195_v28 = vld [vmem:[#allocation11 + $0xc8] sm:$0xff]  ;;  %v1217_v15 = vld [vmem:[#allocation11 + $0x178] sm:$0xff] }
 0x2d2   :  { %v959_v32 = vmul.f32 %v953_v30, %v729_v27  ;;  %v958_v51 = vadd.f32 0.5, %v957_v36  ;;  %v1192_v27 = vld [vmem:[#allocation11 + $0xb0] sm:$0xff]  ;;  %v1199_v30 = vld [vmem:[#allocation11 + $0xe8] sm:$0xff]  ;;  %v1214_v21 = vld [vmem:[#allocation11 + $0x160] sm:$0xff] }
 0x2d3   :  { %v7302_v36 = vpack.c.bf16 %v1192_v27, %v1188_v25  ;;  %v7272_v43 = vpack.c.bf16 %v1199_v30, %v1195_v28  ;;  %v1212_v25 = vld [vmem:[#allocation11 + $0x150] sm:$0xff]  ;;  %v1219_v28 = vld [vmem:[#allocation11 + $0x188] sm:$0xff] }
 0x2d4   :  { %v9766_v33 = vadd.f32 %v960_v31, %v959_v32  ;;  %v1197_v31 = vld [vmem:[#allocation11 + $0xd8] sm:$0xff]  ;;  %v1216_v27 = vld [vmem:[#allocation11 + $0x170] sm:$0xff]  ;;  %v1223_v30 = vld [vmem:[#allocation11 + $0x1a8] sm:$0xff] }
 0x2d5   :  { %v1201_v32 = vld [vmem:[#allocation11 + $0xf8] sm:$0xff] }
 0x2d6   :  { %9079 = vtanh.f32 %v9766_v33  ;;  %v7304_v45 = vpack.c.bf16 %v1201_v32, %v1197_v31  ;;  %v1221_v31 = vld [vmem:[#allocation11 + $0x198] sm:$0xff] }
 0x2d7   :  { %v1225_v32 = vld [vmem:[#allocation11 + $0x1b8] sm:$0xff] }
 0x2e0   :  { %v9080_v52 = vpop.eup %9079 }
 0x2e1   :  { %v9769_v41 = vmul.f32 %v9080_v52, %v958_v51  ;;  %v1205_v51 = vld [vmem:[#allocation11 + $0x118] sm:$0xff] }
 0x2e2   :  { %v1209_v52 = vld [vmem:[#allocation11 + $0x138] sm:$0xff] }
 0x2e3   :  { %1093 = vmatmul.mubr.f32.vlgmr.msra.gmra.mrb[16].mxu1 %v9769_v41  ;;  %1164 = vmatmul.mubr.f32.vlgmr.msra.gmra.mrb[32].mxu0 %v9769_v41 }
 0x2e4   :  { %7263 = vmatpush1.bf16.msra.mxu1 %v7262_v53  ;;  %7295 = vmatpush1.bf16.msra.mxu0 %v7294_v54  ;;  %v7274_v53 = vpack.c.bf16 %v1198_v40, %v1194_v38  ;;  %v7306_v54 = vpack.c.bf16 %v1200_v48, %v1196_v46  ;;  %v1218_v38 = vld [vmem:[#allocation11 + $0x180] sm:$0xff]  ;;  %v1220_v46 = vld [vmem:[#allocation11 + $0x190] sm:$0xff] }
 0x2e5   :  { %7265 = vmatprep.subr.bf16.mxu1 %v7264_v3  ;;  %7297 = vmatprep.subr.bf16.mxu0 %v7296_v4  ;;  %v7276_v3 = vpack.c.bf16 %v1207_v50, %v1203_v49  ;;  %v7308_v4 = vpack.c.bf16 %v1209_v52, %v1205_v51  ;;  %v1222_v40 = vld [vmem:[#allocation11 + $0x1a0] sm:$0xff]  ;;  %v1224_v48 = vld [vmem:[#allocation11 + $0x1b0] sm:$0xff]  ;;  %v1227_v49 = vld [vmem:[#allocation11 + $0x1c8] sm:$0xff] }
 0x2e6   :  { %1298 = vmatprep.mubr.f32.mxu1 %v9433_v42  ;;  %1369 = vmatprep.mubr.f32.mxu0 %v9433_v42  ;;  %v1231_v50 = vld [vmem:[#allocation11 + $0x1e8] sm:$0xff]  ;;  %v1229_v51 = vld [vmem:[#allocation11 + $0x1d8] sm:$0xff] }
 0x2e7   :  { %v1233_v52 = vld [vmem:[#allocation11 + $0x1f8] sm:$0xff] }
 0x2e8   :  { %7267 = vmatpush1.bf16.msra.mxu1 %v7266_v18  ;;  %7299 = vmatpush1.bf16.msra.mxu0 %v7298_v19  ;;  %v7278_v18 = vpack.c.bf16 %v1206_v60, %v1202_v57  ;;  %v7310_v19 = vpack.c.bf16 %v1208_v10, %v1204_v6  ;;  %v1226_v57 = vld [vmem:[#allocation11 + $0x1c0] sm:$0xff]  ;;  %v7288_v60 = vpack.c.bf16 %v1231_v50, %v1227_v49  ;;  %v1228_v6 = vld [vmem:[#allocation11 + $0x1d0] sm:$0xff]  ;;  %v1425_v49 = vld [vmem:[#allocation12 + $0xd8] sm:$0xff] }
 0x2e9   :  { %7269 = vmatprep.subr.bf16.mxu1 %v7268_v23  ;;  %7301 = vmatprep.subr.bf16.mxu0 %v7300_v24  ;;  %v7280_v23 = vpack.c.bf16 %v1215_v12, %v1211_v11  ;;  %v7312_v24 = vpack.c.bf16 %v1217_v15, %v1213_v13  ;;  %v1232_v10 = vld [vmem:[#allocation11 + $0x1f0] sm:$0xff]  ;;  %v6978_v13 = vld [vmem:[%s10700_s2 + $0x8] sm:$0xff] }
 0x2ea   :  { %v7322_v12 = vpack.c.bf16 %v1232_v10, %v1228_v6  ;;  %v1408_v15 = vld [vmem:[#allocation12 + $0x50] sm:$0xff]  ;;  %v1508_v10 = vld [vmem:[#allocation8 + $0x8] sm:$0xff] }
 0x2ec   :  { %7271 = vmatpush1.bf16.msra.mxu1 %v7270_v35  ;;  %7303 = vmatpush1.bf16.msra.mxu0 %v7302_v36  ;;  %v7282_v35 = vpack.c.bf16 %v1214_v21, %v1210_v20  ;;  %v7314_v36 = vpack.c.bf16 %v1216_v27, %v1212_v25  ;;  %v1413_v20 = vld [vmem:[#allocation12 + $0x78] sm:$0xff]  ;;  %v1415_v27 = vld [vmem:[#allocation12 + $0x88] sm:$0xff] }
 0x2ed   :  { %7273 = vmatprep.subr.bf16.mxu1 %v7272_v43  ;;  %7305 = vmatprep.subr.bf16.mxu0 %v7304_v45  ;;  %v7284_v43 = vpack.c.bf16 %v1223_v30, %v1219_v28  ;;  %v7316_v45 = vpack.c.bf16 %v1225_v32, %v1221_v31  ;;  %v1417_v28 = vld [vmem:[#allocation12 + $0x98] sm:$0xff]  ;;  %v1414_v31 = vld [vmem:[#allocation12 + $0x80] sm:$0xff]  ;;  %v1416_v32 = vld [vmem:[#allocation12 + $0x90] sm:$0xff] }
 0x2ee   :  { %v7340_v30 = vpack.c.bf16 %v1417_v28, %v1415_v27 }
 0x2f0   :  { %7275 = vmatpush1.bf16.msra.mxu1 %v7274_v53  ;;  %7307 = vmatpush1.bf16.msra.mxu0 %v7306_v54  ;;  %v7286_v53 = vpack.c.bf16 %v1222_v40, %v1218_v38  ;;  %v7318_v54 = vpack.c.bf16 %v1224_v48, %v1220_v46  ;;  %v1421_v38 = vld [vmem:[#allocation12 + $0xb8] sm:$0xff]  ;;  %v1423_v48 = vld [vmem:[#allocation12 + $0xc8] sm:$0xff] }
 0x2f1   :  { %7277 = vmatprep.subr.bf16.mxu1 %v7276_v3  ;;  %7309 = vmatprep.subr.bf16.mxu0 %v7308_v4  ;;  %v7320_v3 = vpack.c.bf16 %v1233_v52, %v1229_v51  ;;  %v1230_v4 = vld [vmem:[#allocation11 + $0x1e0] sm:$0xff]  ;;  %v7348_v50 = vpack.c.bf16 %v1425_v49, %v1423_v48  ;;  %v1424_v52 = vld [vmem:[#allocation12 + $0xd0] sm:$0xff] }
 0x2f2   :  { %v7290_v11 = vpack.c.bf16 %v1230_v4, %v1226_v57  ;;  %v1422_v51 = vld [vmem:[#allocation12 + $0xc0] sm:$0xff]  ;;  %v1429_v57 = vld [vmem:[#allocation12 + $0xf8] sm:$0xff]  ;;  %v1428_v4 = vld [vmem:[#allocation12 + $0xf0] sm:$0xff] }
 0x2f3   :  { %v1515_v48 = vld [vmem:[#allocation8 + $0x40] sm:$0xff] }
 0x2f4   :  { %7279 = vmatpush1.bf16.msra.mxu1 %v7278_v18  ;;  %7311 = vmatpush1.bf16.msra.mxu0 %v7310_v19  ;;  %v1411_v19 = vld [vmem:[#allocation12 + $0x68] sm:$0xff]  ;;  %v1519_v49 = vld [vmem:[#allocation8 + $0x60] sm:$0xff] }
 0x2f5   :  { %7281 = vmatprep.subr.bf16.mxu1 %v7280_v23  ;;  %7313 = vmatprep.subr.bf16.mxu0 %v7312_v24  ;;  %v7336_v21 = vpack.c.bf16 %v1413_v20, %v1411_v19  ;;  %v1410_v23 = vld [vmem:[#allocation12 + $0x60] sm:$0xff]  ;;  %v1412_v24 = vld [vmem:[#allocation12 + $0x70] sm:$0xff]  ;;  %v6979_v20 = vld [vmem:[%s10701_s3 + $0x8] sm:$0xff] }
 0x2f6   :  { %v7338_v25 = vpack.c.bf16 %v1412_v24, %v1410_v23 }
 0x2f8   :  { %7283 = vmatpush1.bf16.msra.mxu1 %v7282_v35  ;;  %7315 = vmatpush1.bf16.msra.mxu0 %v7314_v36  ;;  %v7342_v35 = vpack.c.bf16 %v1416_v32, %v1414_v31  ;;  %v1419_v36 = vld [vmem:[#allocation12 + $0xa8] sm:$0xff]  ;;  %v1511_v31 = vld [vmem:[#allocation8 + $0x20] sm:$0xff] }
 0x2f9   :  { %7285 = vmatprep.subr.bf16.mxu1 %v7284_v43  ;;  %7317 = vmatprep.subr.bf16.mxu0 %v7316_v45  ;;  %v7344_v40 = vpack.c.bf16 %v1421_v38, %v1419_v36  ;;  %v1418_v43 = vld [vmem:[#allocation12 + $0xa0] sm:$0xff]  ;;  %v1420_v45 = vld [vmem:[#allocation12 + $0xb0] sm:$0xff]  ;;  %v1520_v36 = vld [vmem:[#allocation8 + $0x68] sm:$0xff] }
 0x2fa   :  { %v7346_v46 = vpack.c.bf16 %v1420_v45, %v1418_v43 }
 0x2fc   :  { %7287 = vmatpush1.bf16.msra.mxu1 %v7286_v53  ;;  %7319 = vmatpush1.bf16.msra.mxu0 %v7318_v54  ;;  %v7350_v53 = vpack.c.bf16 %v1424_v52, %v1422_v51  ;;  %v1427_v54 = vld [vmem:[#allocation12 + $0xe8] sm:$0xff]  ;;  %v9840_v52 = vpack.c.bf16 %v1519_v49, %v1515_v48  ;;  %v1735_v48 = vld [vmem:[#allocation9] sm:$0xff] }
 0x2fd   :  { %7289 = vmatprep.subr.bf16.mxu1 %v7288_v60  ;;  %7321 = vmatprep.subr.bf16.mxu0 %v7320_v3  ;;  %v7352_v60 = vpack.c.bf16 %v1429_v57, %v1427_v54  ;;  %v1426_v3 = vld [vmem:[#allocation12 + $0xe0] sm:$0xff]  ;;  %v1528_v51 = vld [vmem:[#allocation8 + $0xa8] sm:$0xff] }
 0x2fe   :  { %v7354_v6 = vpack.c.bf16 %v1428_v4, %v1426_v3  ;;  %v1523_v54 = vld [vmem:[#allocation8 + $0x80] sm:$0xff]  ;;  %v1536_v3 = vld [vmem:[#allocation8 + $0xe8] sm:$0xff] }
 0x2ff   :  { %v1527_v57 = vld [vmem:[#allocation8 + $0xa0] sm:$0xff] }
 0x300   :  { %7291 = vmatpush1.bf16.msra.mxu1 %v7290_v11  ;;  %7323 = vmatpush1.bf16.msra.mxu0 %v7322_v12  ;;  %v1512_v11 = vld [vmem:[#allocation8 + $0x28] sm:$0xff]  ;;  %v9847_v4 = vpack.c.bf16 %v1527_v57, %v1523_v54  ;;  %v1739_v49 = vld [vmem:[#allocation9 + $0x20] sm:$0xff]  ;;  %v1737_v54 = vld [vmem:[#allocation9 + $0x10] sm:$0xff] }
 0x301   :  { %7389 = vmatprep.subr.bf16.mxu0 %v9662_v44  ;;  %v1399_v44 = vld [vmem:[#allocation12 + $0x8] sm:$0xff]  ;;  %v9798_v12 = vpack.c.bf16 %v1512_v11, %v1508_v10  ;;  %v1531_v10 = vld [vmem:[#allocation8 + $0xc0] sm:$0xff]  ;;  %v1741_v57 = vld [vmem:[#allocation9 + $0x30] sm:$0xff] }
 0x302   :  { %v1535_v11 = vld [vmem:[#allocation8 + $0xe0] sm:$0xff] }
 0x303   :  { %1299 = vmatmul.mubr.f32.vlgmr.msra.gmra.mrb[16].mxu1 %v6978_v13  ;;  %1370 = vmatmul.mubr.f32.vlgmr.msra.gmra.mrb[32].mxu0 %v6978_v13  ;;  %v692_v13 = vld [vmem:[%s10707_s9] sm:$0xf] }
 0x304   :  { %7391 = vmatpush1.bf16.msra.mxu0 %v9665_v56  ;;  %1706 = vmatprep.mubr.f32.mxu0 %v9433_v42  ;;  %v1401_v56 = vld [vmem:[#allocation12 + $0x18] sm:$0xff] }
 0x305   :  { %7393 = vmatprep.subr.bf16.mxu0 %v9667_v63  ;;  %1494 = vmatprep.mubr.f32.mxu1 %v9433_v42  ;;  %v7324_v63 = vpack.c.bf16 %v1401_v56, %v1399_v44  ;;  %v9805_v44 = vrot.slane %v692_v13, %v9735_v59  ;;  %v9808_v56 = vrot.slane %v692_v13, %v9741_v61 }
 0x307   :  { %7325 = vmatprep.subr.bf16.mxu1 %v7324_v63 }
 0x308   :  { %7395 = vmatpush1.bf16.msra.mxu0 %v9670_v7  ;;  %v1398_v7 = vld [vmem:[#allocation12] sm:$0xff] }
 0x309   :  { %7397 = vmatprep.subr.bf16.mxu0 %v9675_v14  ;;  %v1400_v14 = vld [vmem:[#allocation12 + $0x10] sm:$0xff] }
 0x30c   :  { %7399 = vmatpush1.bf16.msra.mxu0 %v9678_v22  ;;  %v7326_v22 = vpack.c.bf16 %v1400_v14, %v1398_v7 }
 0x30d   :  { %7401 = vmatprep.subr.bf16.mxu0 %v9683_v29  ;;  %v1403_v29 = vld [vmem:[#allocation12 + $0x28] sm:$0xff] }
 0x30e   :  { %7327 = vmatpush1.bf16.msra.mxu1 %v7326_v22  ;;  %v9813_v22 = vrot.slane %v692_v13, %v424_v1 }
 0x310   :  { %7403 = vmatpush1.bf16.msra.mxu0 %v9686_v37  ;;  %v1405_v37 = vld [vmem:[#allocation12 + $0x38] sm:$0xff] }
 0x311   :  { %7405 = vmatprep.subr.bf16.mxu0 %v9691_v47  ;;  %v7328_v47 = vpack.c.bf16 %v1405_v37, %v1403_v29 }
 0x313   :  { %7329 = vmatprep.subr.bf16.mxu1 %v7328_v47 }
 0x314   :  { %7407 = vmatpush1.bf16.msra.mxu0 %v9694_v55  ;;  %v1402_v55 = vld [vmem:[#allocation12 + $0x20] sm:$0xff] }
 0x315   :  { %7409 = vmatprep.subr.bf16.mxu0 %v9699_v0  ;;  %v1404_v0 = vld [vmem:[#allocation12 + $0x30] sm:$0xff] }
 0x318   :  { %7411 = vmatpush1.bf16.msra.mxu0 %v9702_v9  ;;  %v7330_v9 = vpack.c.bf16 %v1404_v0, %v1402_v55 }
 0x319   :  { %7413 = vmatprep.subr.bf16.mxu0 %v9707_v17  ;;  %v1407_v17 = vld [vmem:[#allocation12 + $0x48] sm:$0xff] }
 0x31a   :  { %7331 = vmatpush1.bf16.msra.mxu1 %v7330_v9 }
 0x31c   :  { %7415 = vmatpush1.bf16.msra.mxu0 %v9710_v26  ;;  %v1409_v26 = vld [vmem:[#allocation12 + $0x58] sm:$0xff] }
 0x31d   :  { %7417 = vmatprep.subr.bf16.mxu0 %v9715_v34  ;;  %v7332_v34 = vpack.c.bf16 %v1409_v26, %v1407_v17  ;;  %v9819_v17 = vrot.slane %v692_v13, %v428_v8  ;;  %v1540_v13 = vld [vmem:[#allocation8 + $0x108] sm:$0xff] }
 0x31f   :  { %7333 = vmatprep.subr.bf16.mxu1 %v7332_v34 }
 0x320   :  { %7419 = vmatpush1.bf16.msra.mxu0 %v9718_v39  ;;  %v1406_v39 = vld [vmem:[#allocation12 + $0x40] sm:$0xff] }
 0x321   :  { %v7334_v18 = vpack.c.bf16 %v1408_v15, %v1406_v39 }
 0x323   :  { %1707 = vmatmul.mubr.f32.vlgmr.msra.gmra.mrb[18].mxu0 %v9769_v41  ;;  %7335 = vmatpush1.bf16.msra.mxu1 %v7334_v18 }
 0x324   :  { %1863 = vmatprep.mubr.f32.mxu0 %v9433_v42  ;;  %7337 = vmatprep.subr.bf16.mxu1 %v7336_v21 }
 0x327   :  { %7339 = vmatpush1.bf16.msra.mxu1 %v7338_v25 }
 0x328   :  { %7341 = vmatprep.subr.bf16.mxu1 %v7340_v30  ;;  %v1507_v30 = vld [vmem:[#allocation8] sm:$0xff] }
 0x329   :  { %v9832_v43 = vpack.c.bf16 %v1511_v31, %v1507_v30  ;;  %v1736_v31 = vld [vmem:[#allocation9 + $0x8] sm:$0xff] }
 0x32b   :  { %7343 = vmatpush1.bf16.msra.mxu1 %v7342_v35  ;;  %v1516_v35 = vld [vmem:[#allocation8 + $0x48] sm:$0xff] }
 0x32c   :  { %7345 = vmatprep.subr.bf16.mxu1 %v7344_v40 }
 0x32f   :  { %7347 = vmatpush1.bf16.msra.mxu1 %v7346_v46  ;;  %v9836_v46 = vpack.c.bf16 %v1520_v36, %v1516_v35  ;;  %v1740_v35 = vld [vmem:[#allocation9 + $0x28] sm:$0xff]  ;;  %v1738_v36 = vld [vmem:[#allocation9 + $0x18] sm:$0xff] }
 0x330   :  { %7349 = vmatprep.subr.bf16.mxu1 %v7348_v50  ;;  %v1524_v50 = vld [vmem:[#allocation8 + $0x88] sm:$0xff] }
 0x333   :  { %7351 = vmatpush1.bf16.msra.mxu1 %v7350_v53  ;;  %v9844_v53 = vpack.c.bf16 %v1528_v51, %v1524_v50  ;;  %v9887_v51 = vpack.c.bf16 %v1739_v49, %v1735_v48  ;;  %v1760_v48 = vld [vmem:[#allocation9 + $0xc8] sm:$0xff] }
 0x334   :  { %7353 = vmatprep.subr.bf16.mxu1 %v7352_v60  ;;  %v1532_v60 = vld [vmem:[#allocation8 + $0xc8] sm:$0xff] }
 0x335   :  { %v1764_v49 = vld [vmem:[#allocation9 + $0xe8] sm:$0xff] }
 0x337   :  { %7355 = vmatpush1.bf16.msra.mxu1 %v7354_v6  ;;  %v9850_v6 = vpack.c.bf16 %v1536_v3, %v1532_v60  ;;  %v9890_v60 = vpack.c.bf16 %v1741_v57, %v1737_v54  ;;  %v1748_v3 = vld [vmem:[#allocation9 + $0x68] sm:$0xff]  ;;  %v1762_v54 = vld [vmem:[#allocation9 + $0xd8] sm:$0xff]  ;;  %v7432_v57 = vpack.c.bf16 %v1764_v49, %v1760_v48  ;;  %v1775_v49 = vld [vmem:[#allocation9 + $0x140] sm:$0xff] }
 0x338   :  { %7357 = vmatprep.subr.bf16.mxu1 %v9798_v12  ;;  %v1782_v48 = vld [vmem:[#allocation9 + $0x178] sm:$0xff] }
 0x3d6   :  { %v1300_v63 = vpop.f32.mrb[16].mxu1  ;;  %v1371_v7 = vpop.f32.mrb[32].mxu0 }
 0x3d7   :  { %v8956_v14 = vadd.f32 %v1300_v63, %v9805_v44  ;;  %v1302_v29 = vpop.f32.mrb[17].mxu1  ;;  %v1373_v37 = vpop.f32.mrb[33].mxu0  ;;  %v8958_v9 = vadd.f32 %v1371_v7, %v9813_v22  ;;  %v1544_v63 = vld [vmem:[#allocation8 + $0x128] sm:$0xff]  ;;  %v9853_v7 = vpack.c.bf16 %v1535_v11, %v1531_v10  ;;  %v1746_v10 = vld [vmem:[#allocation9 + $0x58] sm:$0xff] }
 0x3d8   :  { %v8957_v47 = vadd.f32 %v1302_v29, %v9808_v56  ;;  %v8959_v26 = vadd.f32 %v1373_v37, %v9819_v17  ;;  %v1539_v29 = vld [vmem:[#allocation8 + $0x100] sm:$0xff] }
 0x3d9   :  { %v1380_v55 = vmul.f32 0.5, %v8956_v14  ;;  %v9856_v14 = vpack.c.bf16 %v1544_v63, %v1540_v13  ;;  %v1543_v37 = vld [vmem:[#allocation8 + $0x120] sm:$0xff]  ;;  %v1750_v13 = vld [vmem:[#allocation9 + $0x78] sm:$0xff] }
 0x3da   :  { %v1384_v0 = vmul.f32 0.5, %v8957_v47  ;;  %v1389_v34 = vmul.f32 0.5, %v8959_v26  ;;  %v1548_v47 = vld [vmem:[#allocation8 + $0x148] sm:$0xff]  ;;  %v1547_v26 = vld [vmem:[#allocation8 + $0x140] sm:$0xff] }
 0x3db   :  { %9081 = vtanh.f32 %v1380_v55  ;;  %v1552_v55 = vld [vmem:[#allocation8 + $0x168] sm:$0xff]  ;;  %v1743_v63 = vld [vmem:[#allocation9 + $0x40] sm:$0xff] }
 0x3dc   :  { %9083 = vtanh.f32 %v1384_v0  ;;  %v9859_v0 = vpack.c.bf16 %v1543_v37, %v1539_v29  ;;  %v1747_v29 = vld [vmem:[#allocation9 + $0x60] sm:$0xff]  ;;  %v7456_v37 = vpack.c.bf16 %v1750_v13, %v1746_v10 }
 0x3dd   :  { %9085 = vtanh.f32 %v8958_v9  ;;  %v9862_v9 = vpack.c.bf16 %v1552_v55, %v1548_v47  ;;  %v7426_v47 = vpack.c.bf16 %v1747_v29, %v1743_v63  ;;  %v1745_v55 = vld [vmem:[#allocation9 + $0x50] sm:$0xff]  ;;  %v1763_v10 = vld [vmem:[#allocation9 + $0xe0] sm:$0xff] }
 0x3de   :  { %9087 = vtanh.f32 %v1389_v34  ;;  %v1551_v34 = vld [vmem:[#allocation8 + $0x160] sm:$0xff]  ;;  %v1761_v63 = vld [vmem:[#allocation9 + $0xd0] sm:$0xff] }
 0x3df   :  { %v1765_v29 = vld [vmem:[#allocation9 + $0xf0] sm:$0xff] }
 0x3e5   :  { %v9082_v1 = vpop.eup %9081 }
 0x3e6   :  { %v9084_v39 = vpop.eup %9083  ;;  %v1382_v15 = vmul.f32 0.5, %v9082_v1  ;;  %v1556_v1 = vld [vmem:[#allocation8 + $0x188] sm:$0xff] }
 0x3e7   :  { %v1386_v18 = vmul.f32 0.5, %v9084_v39  ;;  %v9086_v21 = vpop.eup %9085  ;;  %v1560_v39 = vld [vmem:[#allocation8 + $0x1a8] sm:$0xff] }
 0x3e8   :  { %v1383_v19 = vadd.f32 0.5, %v1382_v15  ;;  %v9088_v25 = vpop.eup %9087  ;;  %v9865_v15 = vpack.c.bf16 %v1551_v34, %v1547_v26  ;;  %v1749_v26 = vld [vmem:[#allocation9 + $0x70] sm:$0xff] }
 0x3e9   :  { %v1387_v23 = vadd.f32 0.5, %v1386_v18  ;;  %v1391_v27 = vmul.f32 0.5, %v9088_v25  ;;  %v9868_v18 = vpack.c.bf16 %v1560_v39, %v1556_v1  ;;  %v1563_v25 = vld [vmem:[#allocation8 + $0x1c0] sm:$0xff]  ;;  %v7458_v34 = vpack.c.bf16 %v1749_v26, %v1745_v55  ;;  %v1752_v1 = vld [vmem:[#allocation9 + $0x88] sm:$0xff]  ;;  %v1770_v26 = vld [vmem:[#allocation9 + $0x118] sm:$0xff] }
 0x3ea   :  { %v1394_v58 = vmul.f32 %v9086_v21, %v1383_v19  ;;  %v1555_v19 = vld [vmem:[#allocation8 + $0x180] sm:$0xff]  ;;  %v1564_v21 = vld [vmem:[#allocation8 + $0x1c8] sm:$0xff] }
 0x3eb   :  { %v1393_v8 = vmul.f32 %v6979_v20, %v1387_v23  ;;  %v1392_v38 = vadd.f32 0.5, %v1391_v27  ;;  %v1559_v20 = vld [vmem:[#allocation8 + $0x1a0] sm:$0xff]  ;;  %v1568_v23 = vld [vmem:[#allocation8 + $0x1e8] sm:$0xff] }
 0x3ec   :  { %v1567_v27 = vld [vmem:[#allocation8 + $0x1e0] sm:$0xff]  ;;  %v1756_v39 = vld [vmem:[#allocation9 + $0xa8] sm:$0xff] }
 0x3ed   :  { %v9825_v24 = vadd.f32 %v1394_v58, %v1393_v8  ;;  %v9871_v58 = vpack.c.bf16 %v1559_v20, %v1555_v19  ;;  %v9874_v8 = vpack.c.bf16 %v1568_v23, %v1564_v21  ;;  %v9877_v30 = vpack.c.bf16 %v1567_v27, %v1563_v25  ;;  %v1754_v19 = vld [vmem:[#allocation9 + $0x98] sm:$0xff]  ;;  %v1751_v23 = vld [vmem:[#allocation9 + $0x80] sm:$0xff]  ;;  %v1772_v55 = vld [vmem:[#allocation9 + $0x128] sm:$0xff] }
 0x3ee   :  { %v7428_v20 = vpack.c.bf16 %v1756_v39, %v1752_v1  ;;  %v1758_v21 = vld [vmem:[#allocation9 + $0xb8] sm:$0xff]  ;;  %v1755_v25 = vld [vmem:[#allocation9 + $0xa0] sm:$0xff] }
 0x3ef   :  { %9089 = vtanh.f32 %v9825_v24  ;;  %v7460_v27 = vpack.c.bf16 %v1758_v21, %v1754_v19  ;;  %v1774_v1 = vld [vmem:[#allocation9 + $0x138] sm:$0xff]  ;;  %v1767_v39 = vld [vmem:[#allocation9 + $0x100] sm:$0xff] }
 0x3f0   :  { %v1771_v19 = vld [vmem:[#allocation9 + $0x120] sm:$0xff] }
 0x3f1   :  { %v7438_v21 = vpack.c.bf16 %v1771_v19, %v1767_v39  ;;  %v1785_v39 = vld [vmem:[#allocation9 + $0x190] sm:$0xff] }
 0x3f2   :  { %v1789_v19 = vld [vmem:[#allocation9 + $0x1b0] sm:$0xff] }
 0x3f6   :  { %v9828_v28 = vpop.f32.mrb[18].mxu0 }
 0x3f7   :  { %v9830_v32 = vpop.f32.mrb[19].mxu0 }
 0x3f9   :  { %v9090_v40 = vpop.eup %9089 }
 0x3fa   :  { %v9834_v45 = vmul.f32 %v9090_v40, %v1392_v38  ;;  %v9883_v38 = vpack.c.bf16 %v1740_v35, %v1736_v31  ;;  %v1742_v40 = vld [vmem:[#allocation9 + $0x38] sm:$0xff]  ;;  %v7430_v31 = vpack.c.bf16 %v1755_v25, %v1751_v23  ;;  %v1753_v35 = vld [vmem:[#allocation9 + $0x90] sm:$0xff] }
 0x3fb   :  { %v9885_v50 = vpack.c.bf16 %v1742_v40, %v1738_v36  ;;  %v1757_v36 = vld [vmem:[#allocation9 + $0xb0] sm:$0xff] }
 0x3fc   :  { %1495 = vmatmul.mubr.f32.vlgmr.msra.gmra.mrb[18].mxu1 %v9834_v45  ;;  %7421 = vmatprep.subr.bf16.mxu0 %v9883_v38  ;;  %v7462_v40 = vpack.c.bf16 %v1757_v36, %v1753_v35  ;;  %v1769_v23 = vld [vmem:[#allocation9 + $0x110] sm:$0xff]  ;;  %v1780_v35 = vld [vmem:[#allocation9 + $0x168] sm:$0xff]  ;;  %v1778_v36 = vld [vmem:[#allocation9 + $0x158] sm:$0xff] }
 0x3fd   :  { %7359 = vmatpush1.bf16.msra.mxu1 %v9832_v43  ;;  %1635 = vmatprep.mubr.f32.mxu1 %v9433_v42  ;;  %v1773_v25 = vld [vmem:[#allocation9 + $0x130] sm:$0xff] }
 0x3fe   :  { %7361 = vmatprep.subr.bf16.mxu1 %v9836_v46  ;;  %7423 = vmatpush1.bf16.msra.mxu0 %v9887_v51 }
 0x401   :  { %7363 = vmatpush1.bf16.msra.mxu1 %v9840_v52 }
 0x402   :  { %7365 = vmatprep.subr.bf16.mxu1 %v9844_v53 }
 0x405   :  { %7367 = vmatpush1.bf16.msra.mxu1 %v9847_v4 }
 0x406   :  { %7369 = vmatprep.subr.bf16.mxu1 %v9850_v6 }
 0x409   :  { %7371 = vmatpush1.bf16.msra.mxu1 %v9853_v7 }
 0x40a   :  { %7373 = vmatprep.subr.bf16.mxu1 %v9856_v14 }
 0x40d   :  { %7375 = vmatpush1.bf16.msra.mxu1 %v9859_v0 }
 0x40e   :  { %7377 = vmatprep.subr.bf16.mxu1 %v9862_v9 }
 0x411   :  { %7379 = vmatpush1.bf16.msra.mxu1 %v9865_v15 }
 0x412   :  { %7381 = vmatprep.subr.bf16.mxu1 %v9868_v18 }
 0x415   :  { %7383 = vmatpush1.bf16.msra.mxu1 %v9871_v58 }
 0x416   :  { %7385 = vmatprep.subr.bf16.mxu1 %v9874_v8 }
 0x419   :  { %7387 = vmatpush1.bf16.msra.mxu1 %v9877_v30 }
 0x41a   :  { %7453 = vmatprep.subr.bf16.mxu1 %v9885_v50 }
 0x41c   :  { %1636 = vmatmul.mubr.f32.vlgmr.msra.gmra.mrb[2].mxu1 %v9769_v41  ;;  %v1744_v41 = vld [vmem:[#allocation9 + $0x48] sm:$0xff] }
 0x41d   :  { %1934 = vmatprep.mubr.f32.mxu1 %v9433_v42  ;;  %7455 = vmatpush1.bf16.msra.mxu1 %v9890_v60  ;;  %v7424_v11 = vpack.c.bf16 %v1748_v3, %v1744_v41  ;;  %v1766_v41 = vld [vmem:[#allocation9 + $0xf8] sm:$0xff]  ;;  %v1759_v3 = vld [vmem:[#allocation9 + $0xc0] sm:$0xff] }
 0x41e   :  { %7457 = vmatprep.subr.bf16.mxu1 %v7456_v37  ;;  %v7434_v13 = vpack.c.bf16 %v1763_v10, %v1759_v3  ;;  %v7466_v37 = vpack.c.bf16 %v1765_v29, %v1761_v63  ;;  %v1777_v3 = vld [vmem:[#allocation9 + $0x150] sm:$0xff]  ;;  %v1788_v63 = vld [vmem:[#allocation9 + $0x1a8] sm:$0xff]  ;;  %v1786_v29 = vld [vmem:[#allocation9 + $0x198] sm:$0xff] }
 0x41f   :  { %7425 = vmatprep.subr.bf16.mxu0 %v7424_v11  ;;  %v7464_v11 = vpack.c.bf16 %v1766_v41, %v1762_v54  ;;  %v1779_v54 = vld [vmem:[#allocation9 + $0x160] sm:$0xff]  ;;  %v1781_v10 = vld [vmem:[#allocation9 + $0x170] sm:$0xff] }
 0x420   :  { %7427 = vmatpush1.bf16.msra.mxu0 %v7426_v47  ;;  %v1768_v47 = vld [vmem:[#allocation9 + $0x108] sm:$0xff]  ;;  %v7442_v41 = vpack.c.bf16 %v1779_v54, %v1775_v49  ;;  %v1797_v54 = vld [vmem:[#allocation9 + $0x1f0] sm:$0xff] }
 0x421   :  { %7459 = vmatpush1.bf16.msra.mxu1 %v7458_v34  ;;  %7429 = vmatprep.subr.bf16.mxu0 %v7428_v20  ;;  %v7436_v34 = vpack.c.bf16 %v1772_v55, %v1768_v47  ;;  %v7468_v20 = vpack.c.bf16 %v1774_v1, %v1770_v26  ;;  %v1790_v47 = vld [vmem:[#allocation9 + $0x1b8] sm:$0xff]  ;;  %v1783_v55 = vld [vmem:[#allocation9 + $0x180] sm:$0xff] }
 0x422   :  { %7461 = vmatprep.subr.bf16.mxu1 %v7460_v27  ;;  %v7470_v27 = vpack.c.bf16 %v1773_v25, %v1769_v23  ;;  %v1787_v26 = vld [vmem:[#allocation9 + $0x1a0] sm:$0xff]  ;;  %v1796_v23 = vld [vmem:[#allocation9 + $0x1e8] sm:$0xff]  ;;  %v1794_v25 = vld [vmem:[#allocation9 + $0x1d8] sm:$0xff] }
 0x423   :  { %v7446_v1 = vpack.c.bf16 %v1787_v26, %v1783_v55 }
 0x424   :  { %7431 = vmatpush1.bf16.msra.mxu0 %v7430_v31  ;;  %v1776_v31 = vld [vmem:[#allocation9 + $0x148] sm:$0xff] }
 0x425   :  { %7463 = vmatpush1.bf16.msra.mxu1 %v7462_v40  ;;  %7433 = vmatprep.subr.bf16.mxu0 %v7432_v57  ;;  %v7440_v40 = vpack.c.bf16 %v1780_v35, %v1776_v31  ;;  %v7472_v57 = vpack.c.bf16 %v1782_v48, %v1778_v36  ;;  %v1791_v36 = vld [vmem:[#allocation9 + $0x1c0] sm:$0xff]  ;;  %v1793_v48 = vld [vmem:[#allocation9 + $0x1d0] sm:$0xff] }
 0x426   :  { %7465 = vmatprep.subr.bf16.mxu1 %v7464_v11  ;;  %v7474_v11 = vpack.c.bf16 %v1781_v10, %v1777_v3  ;;  %v7482_v3 = vpack.c.bf16 %v1797_v54, %v1793_v48 }
 0x428   :  { %7435 = vmatpush1.bf16.msra.mxu0 %v7434_v13  ;;  %v1784_v13 = vld [vmem:[#allocation9 + $0x188] sm:$0xff] }
 0x429   :  { %7467 = vmatpush1.bf16.msra.mxu1 %v7466_v37  ;;  %7437 = vmatprep.subr.bf16.mxu0 %v7436_v34  ;;  %v7444_v37 = vpack.c.bf16 %v1788_v63, %v1784_v13  ;;  %v7476_v34 = vpack.c.bf16 %v1790_v47, %v1786_v29  ;;  %v1948_v13 = vld [vmem:[#allocation11 + $0x38] sm:$0xff]  ;;  %v714_v29 = vld [vmem:[%s10709_s11] sm:$0x3]  ;;  %s9435_s11 = smov [#allocation15]  }
 0x42a   :  { %7469 = vmatprep.subr.bf16.mxu1 %v7468_v20  ;;  %v1792_v20 = vld [vmem:[#allocation9 + $0x1c8] sm:$0xff]  ;;  %v9902_v47 = vrot.slane %v714_v29, %v9741_v61  ;;  %s6925_s15 = sshll.u32 %s9435_s11, 4  ;;  %s10653_s15 = int_to_ptr.vmem [resolvable:$true] %s6925_s15 }
 0x42b   :  { %v7448_v31 = vpack.c.bf16 %v1796_v23, %v1792_v20  ;;  %v8942_v23 = vadd.f32 %v9828_v28, %v9753_v5 }
 0x42c   :  { %7439 = vmatpush1.bf16.msra.mxu0 %v7438_v21  ;;  %v7478_v21 = vpack.c.bf16 %v1789_v19, %v1785_v39 }
 0x42d   :  { %7471 = vmatpush1.bf16.msra.mxu1 %v7470_v27  ;;  %7441 = vmatprep.subr.bf16.mxu0 %v7440_v40  ;;  %v1798_v27 = vld [vmem:[#allocation9 + $0x1f8] sm:$0xff]  ;;  %v1795_v40 = vld [vmem:[#allocation9 + $0x1e0] sm:$0xff] }
 0x42e   :  { %7473 = vmatprep.subr.bf16.mxu1 %v7472_v57  ;;  %v7480_v35 = vpack.c.bf16 %v1798_v27, %v1794_v25  ;;  %v7450_v49 = vpack.c.bf16 %v1795_v40, %v1791_v36  ;;  %v1942_v57 = vld [vmem:[#allocation11 + $0x8] sm:$0xff]  ;;  %v8943_v25 = vadd.f32 %v9830_v32, %v9760_v16  ;;  %v1945_v32 = vld [vmem:[#allocation11 + $0x20] sm:$0xff] }
 0x430   :  { %7443 = vmatpush1.bf16.msra.mxu0 %v7442_v41  ;;  %v1946_v41 = vld [vmem:[#allocation11 + $0x28] sm:$0xff]  ;;  %v1726_v27 = vmul.f32 0.5, %v8943_v25  ;;  %v1951_v25 = vld [vmem:[#allocation11 + $0x50] sm:$0xff] }
 0x431   :  { %7475 = vmatpush1.bf16.msra.mxu1 %v7474_v11  ;;  %7445 = vmatprep.subr.bf16.mxu0 %v7444_v37  ;;  %v7484_v10 = vpack.c.bf16 %v1946_v41, %v1942_v57  ;;  %v1944_v11 = vld [vmem:[#allocation11 + $0x18] sm:$0xff]  ;;  %v9899_v37 = vrot.slane %v714_v29, %v9735_v59  ;;  %v1950_v29 = vld [vmem:[#allocation11 + $0x48] sm:$0xff] }
 0x432   :  { %7477 = vmatprep.subr.bf16.mxu1 %v7476_v34  ;;  %v7516_v63 = vpack.c.bf16 %v1948_v13, %v1944_v11  ;;  %v1941_v11 = vld [vmem:[#allocation11] sm:$0xff]  ;;  %v1943_v13 = vld [vmem:[#allocation11 + $0x10] sm:$0xff] }
 0x434   :  { %7447 = vmatpush1.bf16.msra.mxu0 %v7446_v1 }
 0x435   :  { %7479 = vmatpush1.bf16.msra.mxu1 %v7478_v21  ;;  %7449 = vmatprep.subr.bf16.mxu0 %v7448_v31 }
 0x436   :  { %7481 = vmatprep.subr.bf16.mxu1 %v7480_v35 }
 0x438   :  { %7451 = vmatpush1.bf16.msra.mxu0 %v7450_v49 }
 0x439   :  { %7483 = vmatpush1.bf16.msra.mxu1 %v7482_v3  ;;  %7485 = vmatprep.subr.bf16.mxu0 %v7484_v10 }
 0x43a   :  { %7517 = vmatprep.subr.bf16.mxu1 %v7516_v63  ;;  %v1947_v63 = vld [vmem:[#allocation11 + $0x30] sm:$0xff] }
 0x4cf   :  { %v1496_v55 = vpop.f32.mrb[18].mxu1 }
 0x4d0   :  { %v1497_v26 = vadd.f32 %v1496_v55, %v9899_v37  ;;  %v1498_v34 = vpop.f32.mrb[19].mxu1  ;;  %v1954_v55 = vld [vmem:[#allocation11 + $0x68] sm:$0xff] }
 0x4d1   :  { %v1499_v1 = vadd.f32 %v1498_v34, %v9902_v47  ;;  %v1956_v34 = vld [vmem:[#allocation11 + $0x78] sm:$0xff] }
 0x4d2   :  { %1501 = vst [vmem:[%s10710_s12] sm:$0xff] %v1497_v26  ;;  %v1952_v26 = vld [vmem:[#allocation11 + $0x58] sm:$0xff] }
 0x4d3   :  { %1502 = vst [vmem:[%s10710_s12 + $0x8] sm:$0xff] %v1499_v1 }
 0x4ef   :  { %v1637_v39 = vpop.f32.mrb[2].mxu1 }
 0x4f0   :  { %v8926_v59 = vadd.f32 %v1637_v39, %v9744_v62  ;;  %v1639_v19 = vpop.f32.mrb[3].mxu1 }
 0x4f1   :  { %v8927_v61 = vadd.f32 %v1639_v19, %v9748_v2  ;;  %v7518_v19 = vpack.c.bf16 %v1947_v63, %v1943_v13  ;;  %v1970_v13 = vld [vmem:[#allocation11 + $0xe8] sm:$0xff]  ;;  %v1968_v63 = vld [vmem:[#allocation11 + $0xd8] sm:$0xff] }
 0x4f2   :  { %v1717_v20 = vmul.f32 0.5, %v8926_v59  ;;  %v7486_v59 = vpack.c.bf16 %v1945_v32, %v1941_v11  ;;  %v1963_v11 = vld [vmem:[#allocation11 + $0xb0] sm:$0xff]  ;;  %v1966_v32 = vld [vmem:[#allocation11 + $0xc8] sm:$0xff] }
 0x4f3   :  { %v1721_v21 = vmul.f32 0.5, %v8927_v61  ;;  %v1949_v61 = vld [vmem:[#allocation11 + $0x40] sm:$0xff] }
 0x4f4   :  { %9091 = vtanh.f32 %v1717_v20 }
 0x4f5   :  { %9093 = vtanh.f32 %v1721_v21  ;;  %v7488_v21 = vpack.c.bf16 %v1954_v55, %v1950_v29  ;;  %v1972_v29 = vld [vmem:[#allocation11 + $0xf8] sm:$0xff] }
 0x4f6   :  { %9095 = vtanh.f32 %v8942_v23  ;;  %v7520_v23 = vpack.c.bf16 %v1956_v34, %v1952_v26  ;;  %v1965_v34 = vld [vmem:[#allocation11 + $0xc0] sm:$0xff] }
 0x4f7   :  { %9097 = vtanh.f32 %v1726_v27  ;;  %v1955_v27 = vld [vmem:[#allocation11 + $0x70] sm:$0xff] }
 0x4fe   :  { %v9092_v31 = vpop.eup %9091 }
 0x4ff   :  { %v9094_v35 = vpop.eup %9093  ;;  %v1719_v36 = vmul.f32 0.5, %v9092_v31  ;;  %v1958_v31 = vld [vmem:[#allocation11 + $0x88] sm:$0xff] }
 0x500   :  { %v1723_v40 = vmul.f32 0.5, %v9094_v35  ;;  %v9096_v49 = vpop.eup %9095  ;;  %v1962_v35 = vld [vmem:[#allocation11 + $0xa8] sm:$0xff] }
 0x501   :  { %v1720_v48 = vadd.f32 0.5, %v1719_v36  ;;  %v9098_v28 = vpop.eup %9097  ;;  %v1960_v36 = vld [vmem:[#allocation11 + $0x98] sm:$0xff] }
 0x502   :  { %v1724_v54 = vadd.f32 0.5, %v1723_v40  ;;  %v1728_v10 = vmul.f32 0.5, %v9098_v28  ;;  %v1964_v40 = vld [vmem:[#allocation11 + $0xb8] sm:$0xff] }
 0x503   :  { %v1731_v57 = vmul.f32 %v9096_v49, %v1720_v48  ;;  %v7522_v49 = vpack.c.bf16 %v1955_v27, %v1951_v25  ;;  %v7524_v28 = vpack.c.bf16 %v1964_v40, %v1960_v36  ;;  %v1980_v25 = vld [vmem:[#allocation11 + $0x138] sm:$0xff]  ;;  %v1977_v36 = vld [vmem:[#allocation11 + $0x120] sm:$0xff] }
 0x504   :  { %v1730_v41 = vmul.f32 %v1724_v54, %v9766_v33  ;;  %v1729_v1 = vadd.f32 0.5, %v1728_v10  ;;  %v1953_v33 = vld [vmem:[#allocation11 + $0x60] sm:$0xff]  ;;  %v1959_v10 = vld [vmem:[#allocation11 + $0x90] sm:$0xff] }
 0x505   :  { %v7490_v48 = vpack.c.bf16 %v1953_v33, %v1949_v61  ;;  %v1957_v54 = vld [vmem:[#allocation11 + $0x80] sm:$0xff]  ;;  %v7526_v26 = vpack.c.bf16 %v1963_v11, %v1959_v10  ;;  %v1971_v61 = vld [vmem:[#allocation11 + $0xf0] sm:$0xff]  ;;  %v1974_v33 = vld [vmem:[#allocation11 + $0x108] sm:$0xff] }
 0x506   :  { %v9919_v3 = vadd.f32 %v1731_v57, %v1730_v41  ;;  %v1961_v57 = vld [vmem:[#allocation11 + $0xa0] sm:$0xff]  ;;  %v7492_v41 = vpack.c.bf16 %v1962_v35, %v1958_v31  ;;  %v1988_v10 = vld [vmem:[#allocation11 + $0x178] sm:$0xff] }
 0x507   :  { %v7494_v55 = vpack.c.bf16 %v1961_v57, %v1957_v54  ;;  %v1973_v35 = vld [vmem:[#allocation11 + $0x100] sm:$0xff]  ;;  %v1979_v54 = vld [vmem:[#allocation11 + $0x130] sm:$0xff]  ;;  %v1982_v57 = vld [vmem:[#allocation11 + $0x148] sm:$0xff] }
 0x508   :  { %9099 = vtanh.f32 %v9919_v3  ;;  %v7502_v11 = vpack.c.bf16 %v1977_v36, %v1973_v35  ;;  %v1995_v35 = vld [vmem:[#allocation11 + $0x1b0] sm:$0xff]  ;;  %v1998_v36 = vld [vmem:[#allocation11 + $0x1c8] sm:$0xff] }
 0x512   :  { %v9100_v39 = vpop.eup %9099 }
 0x513   :  { %v9922_v20 = vmul.f32 %v9100_v39, %v1729_v1  ;;  %v1969_v1 = vld [vmem:[#allocation11 + $0xe0] sm:$0xff]  ;;  %v7496_v39 = vpack.c.bf16 %v1970_v13, %v1966_v32 }
 0x514   :  { %v7498_v27 = vpack.c.bf16 %v1969_v1, %v1965_v34  ;;  %v1981_v13 = vld [vmem:[#allocation11 + $0x140] sm:$0xff]  ;;  %v1987_v34 = vld [vmem:[#allocation11 + $0x170] sm:$0xff]  ;;  %v1990_v1 = vld [vmem:[#allocation11 + $0x188] sm:$0xff] }
 0x515   :  { %1864 = vmatmul.mubr.f32.vlgmr.msra.gmra.mrb[34].mxu0 %v9922_v20  ;;  %1935 = vmatmul.mubr.f32.vlgmr.msra.gmra.mrb[20].mxu1 %v9922_v20 }
 0x516   :  { %7487 = vmatpush1.bf16.msra.mxu0 %v7486_v59  ;;  %7519 = vmatpush1.bf16.msra.mxu1 %v7518_v19  ;;  %v7528_v59 = vpack.c.bf16 %v1972_v29, %v1968_v63  ;;  %v1967_v19 = vld [vmem:[#allocation11 + $0xd0] sm:$0xff]  ;;  %v1985_v63 = vld [vmem:[#allocation11 + $0x160] sm:$0xff] }
 0x517   :  { %7489 = vmatprep.subr.bf16.mxu0 %v7488_v21  ;;  %7521 = vmatprep.subr.bf16.mxu1 %v7520_v23  ;;  %v1978_v21 = vld [vmem:[#allocation11 + $0x128] sm:$0xff]  ;;  %v1976_v23 = vld [vmem:[#allocation11 + $0x118] sm:$0xff]  ;;  %v7530_v31 = vpack.c.bf16 %v1971_v61, %v1967_v19  ;;  %v7506_v61 = vpack.c.bf16 %v1985_v63, %v1981_v13  ;;  %v2003_v13 = vld [vmem:[#allocation11 + $0x1f0] sm:$0xff] }
 0x518   :  { %2069 = vmatprep.mubr.f32.mxu0 %v9433_v42  ;;  %2140 = vmatprep.mubr.f32.mxu1 %v9433_v42  ;;  %v7500_v40 = vpack.c.bf16 %v1978_v21, %v1974_v33  ;;  %v1996_v19 = vld [vmem:[#allocation11 + $0x1b8] sm:$0xff]  ;;  %v1989_v21 = vld [vmem:[#allocation11 + $0x180] sm:$0xff] }
 0x51a   :  { %7491 = vmatpush1.bf16.msra.mxu0 %v7490_v48  ;;  %7523 = vmatpush1.bf16.msra.mxu1 %v7522_v49  ;;  %v7532_v48 = vpack.c.bf16 %v1980_v25, %v1976_v23  ;;  %v1975_v49 = vld [vmem:[#allocation11 + $0x110] sm:$0xff]  ;;  %v1993_v23 = vld [vmem:[#allocation11 + $0x1a0] sm:$0xff] }
 0x51b   :  { %7493 = vmatprep.subr.bf16.mxu0 %v7492_v41  ;;  %7525 = vmatprep.subr.bf16.mxu1 %v7524_v28  ;;  %v1986_v41 = vld [vmem:[#allocation11 + $0x168] sm:$0xff]  ;;  %v1984_v28 = vld [vmem:[#allocation11 + $0x158] sm:$0xff]  ;;  %v7534_v32 = vpack.c.bf16 %v1979_v54, %v1975_v49  ;;  %v7510_v54 = vpack.c.bf16 %v1993_v23, %v1989_v21  ;;  %v2187_v21 = vld [vmem:[#allocation12 + $0x90] sm:$0xff] }
 0x51c   :  { %v7504_v29 = vpack.c.bf16 %v1986_v41, %v1982_v57  ;;  %v2004_v49 = vld [vmem:[#allocation11 + $0x1f8] sm:$0xff]  ;;  %v1997_v41 = vld [vmem:[#allocation11 + $0x1c0] sm:$0xff] }
 0x51e   :  { %7495 = vmatpush1.bf16.msra.mxu0 %v7494_v55  ;;  %7527 = vmatpush1.bf16.msra.mxu1 %v7526_v26  ;;  %v7536_v55 = vpack.c.bf16 %v1988_v10, %v1984_v28  ;;  %v1983_v26 = vld [vmem:[#allocation11 + $0x150] sm:$0xff] }
 0x51f   :  { %7497 = vmatprep.subr.bf16.mxu0 %v7496_v39  ;;  %7529 = vmatprep.subr.bf16.mxu1 %v7528_v59  ;;  %v1994_v39 = vld [vmem:[#allocation11 + $0x1a8] sm:$0xff]  ;;  %v1992_v59 = vld [vmem:[#allocation11 + $0x198] sm:$0xff]  ;;  %v7538_v33 = vpack.c.bf16 %v1987_v34, %v1983_v26  ;;  %v2181_v34 = vld [vmem:[#allocation12 + $0x60] sm:$0xff] }
 0x520   :  { %v7508_v25 = vpack.c.bf16 %v1994_v39, %v1990_v1  ;;  %v2183_v1 = vld [vmem:[#allocation12 + $0x70] sm:$0xff] }
 0x521   :  { %v7562_v39 = vpack.c.bf16 %v2183_v1, %v2181_v34 }
 0x522   :  { %7499 = vmatpush1.bf16.msra.mxu0 %v7498_v27  ;;  %7531 = vmatpush1.bf16.msra.mxu1 %v7530_v31  ;;  %v7540_v27 = vpack.c.bf16 %v1996_v19, %v1992_v59  ;;  %v1991_v31 = vld [vmem:[#allocation11 + $0x190] sm:$0xff]  ;;  %v2186_v59 = vld [vmem:[#allocation12 + $0x88] sm:$0xff]  ;;  %v2188_v19 = vld [vmem:[#allocation12 + $0x98] sm:$0xff] }
 0x523   :  { %7501 = vmatprep.subr.bf16.mxu0 %v7500_v40  ;;  %7533 = vmatprep.subr.bf16.mxu1 %v7532_v48  ;;  %v2002_v40 = vld [vmem:[#allocation11 + $0x1e8] sm:$0xff]  ;;  %v2000_v48 = vld [vmem:[#allocation11 + $0x1d8] sm:$0xff]  ;;  %v7542_v57 = vpack.c.bf16 %v1995_v35, %v1991_v31  ;;  %v2189_v35 = vld [vmem:[#allocation12 + $0xa0] sm:$0xff] }
 0x524   :  { %v7512_v28 = vpack.c.bf16 %v2002_v40, %v1998_v36  ;;  %v7544_v10 = vpack.c.bf16 %v2004_v49, %v2000_v48  ;;  %v2191_v36 = vld [vmem:[#allocation12 + $0xb0] sm:$0xff]  ;;  %v2194_v48 = vld [vmem:[#allocation12 + $0xc8] sm:$0xff]  ;;  %v2196_v49 = vld [vmem:[#allocation12 + $0xd8] sm:$0xff] }
 0x525   :  { %v7570_v40 = vpack.c.bf16 %v2191_v36, %v2189_v35 }
 0x526   :  { %7503 = vmatpush1.bf16.msra.mxu0 %v7502_v11  ;;  %7535 = vmatpush1.bf16.msra.mxu1 %v7534_v32  ;;  %v2001_v11 = vld [vmem:[#allocation11 + $0x1e0] sm:$0xff]  ;;  %v1999_v32 = vld [vmem:[#allocation11 + $0x1d0] sm:$0xff] }
 0x527   :  { %7505 = vmatprep.subr.bf16.mxu0 %v7504_v29  ;;  %7537 = vmatprep.subr.bf16.mxu1 %v7536_v55  ;;  %v7514_v63 = vpack.c.bf16 %v2001_v11, %v1997_v41  ;;  %v7546_v29 = vpack.c.bf16 %v2003_v13, %v1999_v32  ;;  %v2184_v55 = vld [vmem:[#allocation12 + $0x78] sm:$0xff]  ;;  %v2195_v41 = vld [vmem:[#allocation12 + $0xd0] sm:$0xff]  ;;  %v2197_v13 = vld [vmem:[#allocation12 + $0xe0] sm:$0xff] }
 0x528   :  { %v2200_v11 = vld [vmem:[#allocation12 + $0xf8] sm:$0xff] }
 0x52a   :  { %7507 = vmatpush1.bf16.msra.mxu0 %v7506_v61  ;;  %7539 = vmatpush1.bf16.msra.mxu1 %v7538_v33  ;;  %v7564_v61 = vpack.c.bf16 %v2188_v19, %v2186_v59  ;;  %v2185_v33 = vld [vmem:[#allocation12 + $0x80] sm:$0xff] }
 0x52b   :  { %7509 = vmatprep.subr.bf16.mxu0 %v7508_v25  ;;  %7541 = vmatprep.subr.bf16.mxu1 %v7540_v27  ;;  %v7566_v23 = vpack.c.bf16 %v2187_v21, %v2185_v33  ;;  %v2190_v25 = vld [vmem:[#allocation12 + $0xa8] sm:$0xff]  ;;  %v2192_v27 = vld [vmem:[#allocation12 + $0xb8] sm:$0xff]  ;;  %v2280_v33 = vld [vmem:[#allocation8 + $0x10] sm:$0xff] }
 0x52c   :  { %v7568_v31 = vpack.c.bf16 %v2192_v27, %v2190_v25  ;;  %v2284_v21 = vld [vmem:[#allocation8 + $0x30] sm:$0xff]  ;;  %v2289_v25 = vld [vmem:[#allocation8 + $0x58] sm:$0xff] }
 0x52d   :  { %v2293_v27 = vld [vmem:[#allocation8 + $0x78] sm:$0xff]  ;;  %v9967_v36 = vpack.c.bf16 %v2284_v21, %v2280_v33  ;;  %v2336_v33 = vld [vmem:[#allocation8 + $0x1d0] sm:$0xff] }
 0x52e   :  { %7511 = vmatpush1.bf16.msra.mxu0 %v7510_v54  ;;  %7543 = vmatpush1.bf16.msra.mxu1 %v7542_v57  ;;  %v7572_v54 = vpack.c.bf16 %v2196_v49, %v2194_v48  ;;  %v2193_v57 = vld [vmem:[#allocation12 + $0xc0] sm:$0xff]  ;;  %v2288_v48 = vld [vmem:[#allocation8 + $0x50] sm:$0xff] }
 0x52f   :  { %7513 = vmatprep.subr.bf16.mxu0 %v7512_v28  ;;  %7545 = vmatprep.subr.bf16.mxu1 %v7544_v10  ;;  %v7574_v28 = vpack.c.bf16 %v2195_v41, %v2193_v57  ;;  %v2198_v10 = vld [vmem:[#allocation12 + $0xe8] sm:$0xff]  ;;  %v2292_v49 = vld [vmem:[#allocation8 + $0x70] sm:$0xff]  ;;  %v2301_v57 = vld [vmem:[#allocation8 + $0xb8] sm:$0xff] }
 0x530   :  { %v7576_v32 = vpack.c.bf16 %v2200_v11, %v2198_v10  ;;  %v9975_v41 = vpack.c.bf16 %v2292_v49, %v2288_v48  ;;  %v2296_v10 = vld [vmem:[#allocation8 + $0x90] sm:$0xff]  ;;  %v2521_v49 = vld [vmem:[#allocation9 + $0x78] sm:$0xff] }
 0x531   :  { %v2300_v11 = vld [vmem:[#allocation8 + $0xb0] sm:$0xff] }
 0x532   :  { %7515 = vmatpush1.bf16.msra.mxu0 %v7514_v63  ;;  %7547 = vmatpush1.bf16.msra.mxu1 %v7546_v29  ;;  %v2199_v63 = vld [vmem:[#allocation12 + $0xf0] sm:$0xff] }
 0x533   :  { %7581 = vmatprep.subr.bf16.mxu1 %v9798_v12  ;;  %v2170_v12 = vld [vmem:[#allocation12 + $0x8] sm:$0xff]  ;;  %v7578_v29 = vpack.c.bf16 %v2199_v63, %v2197_v13  ;;  %v2309_v13 = vld [vmem:[#allocation8 + $0xf8] sm:$0xff]  ;;  %v9982_v63 = vpack.c.bf16 %v2300_v11, %v2296_v10  ;;  %v2340_v21 = vld [vmem:[#allocation8 + $0x1f0] sm:$0xff] }
 0x535   :  { %2070 = vmatmul.mubr.f32.vlgmr.msra.gmra.mrb[34].mxu0 %v9834_v45  ;;  %2141 = vmatmul.mubr.f32.vlgmr.msra.gmra.mrb[20].mxu1 %v9834_v45 }
 0x536   :  { %7583 = vmatpush1.bf16.msra.mxu1 %v9832_v43  ;;  %2406 = vmatprep.mubr.f32.mxu1 %v9433_v42  ;;  %v2172_v43 = vld [vmem:[#allocation12 + $0x18] sm:$0xff] }
 0x537   :  { %7585 = vmatprep.subr.bf16.mxu1 %v9836_v46  ;;  %2265 = vmatprep.mubr.f32.mxu0 %v9433_v42  ;;  %v7548_v45 = vpack.c.bf16 %v2172_v43, %v2170_v12  ;;  %v2169_v46 = vld [vmem:[#allocation12] sm:$0xff]  ;;  %v2281_v12 = vld [vmem:[#allocation8 + $0x18] sm:$0xff] }
 0x538   :  { %v2285_v43 = vld [vmem:[#allocation8 + $0x38] sm:$0xff] }
 0x539   :  { %7549 = vmatprep.subr.bf16.mxu0 %v7548_v45  ;;  %v9952_v45 = vpack.c.bf16 %v2285_v43, %v2281_v12  ;;  %v2304_v12 = vld [vmem:[#allocation8 + $0xd0] sm:$0xff] }
 0x53a   :  { %7587 = vmatpush1.bf16.msra.mxu1 %v9840_v52  ;;  %v2171_v52 = vld [vmem:[#allocation12 + $0x10] sm:$0xff] }
 0x53b   :  { %7589 = vmatprep.subr.bf16.mxu1 %v9844_v53  ;;  %v7550_v53 = vpack.c.bf16 %v2171_v52, %v2169_v46  ;;  %v2308_v43 = vld [vmem:[#allocation8 + $0xf0] sm:$0xff] }
 0x53d   :  { %7551 = vmatpush1.bf16.msra.mxu0 %v7550_v53 }
 0x53e   :  { %7591 = vmatpush1.bf16.msra.mxu1 %v9847_v4  ;;  %v2174_v4 = vld [vmem:[#allocation12 + $0x28] sm:$0xff] }
 0x53f   :  { %7593 = vmatprep.subr.bf16.mxu1 %v9850_v6  ;;  %v2176_v6 = vld [vmem:[#allocation12 + $0x38] sm:$0xff] }
 0x542   :  { %7595 = vmatpush1.bf16.msra.mxu1 %v9853_v7  ;;  %v7552_v7 = vpack.c.bf16 %v2176_v6, %v2174_v4 }
 0x543   :  { %7597 = vmatprep.subr.bf16.mxu1 %v9856_v14  ;;  %v2173_v14 = vld [vmem:[#allocation12 + $0x20] sm:$0xff] }
 0x544   :  { %7553 = vmatprep.subr.bf16.mxu0 %v7552_v7 }
 0x546   :  { %7599 = vmatpush1.bf16.msra.mxu1 %v9859_v0  ;;  %v2175_v0 = vld [vmem:[#allocation12 + $0x30] sm:$0xff] }
 0x547   :  { %7601 = vmatprep.subr.bf16.mxu1 %v9862_v9  ;;  %v7554_v9 = vpack.c.bf16 %v2175_v0, %v2173_v14 }
 0x549   :  { %7555 = vmatpush1.bf16.msra.mxu0 %v7554_v9 }
 0x54a   :  { %7603 = vmatpush1.bf16.msra.mxu1 %v9865_v15  ;;  %v2178_v15 = vld [vmem:[#allocation12 + $0x48] sm:$0xff] }
 0x54b   :  { %7605 = vmatprep.subr.bf16.mxu1 %v9868_v18  ;;  %v2180_v18 = vld [vmem:[#allocation12 + $0x58] sm:$0xff] }
 0x54e   :  { %7607 = vmatpush1.bf16.msra.mxu1 %v9871_v58  ;;  %v7556_v58 = vpack.c.bf16 %v2180_v18, %v2178_v15 }
 0x54f   :  { %7609 = vmatprep.subr.bf16.mxu1 %v9874_v8  ;;  %v2177_v8 = vld [vmem:[#allocation12 + $0x40] sm:$0xff] }
 0x550   :  { %7557 = vmatprep.subr.bf16.mxu0 %v7556_v58 }
 0x552   :  { %7611 = vmatpush1.bf16.msra.mxu1 %v9877_v30  ;;  %v2179_v30 = vld [vmem:[#allocation12 + $0x50] sm:$0xff] }
 0x553   :  { %7645 = vmatprep.subr.bf16.mxu1 %v9883_v38  ;;  %v7558_v38 = vpack.c.bf16 %v2179_v30, %v2177_v8 }
 0x555   :  { %2407 = vmatmul.mubr.f32.vlgmr.msra.gmra.mrb[4].mxu1 %v9922_v20  ;;  %7559 = vmatpush1.bf16.msra.mxu0 %v7558_v38 }
 0x556   :  { %7647 = vmatpush1.bf16.msra.mxu1 %v9887_v51  ;;  %2634 = vmatprep.mubr.f32.mxu1 %v9433_v42  ;;  %v2182_v51 = vld [vmem:[#allocation12 + $0x68] sm:$0xff] }
 0x557   :  { %v7560_v26 = vpack.c.bf16 %v2184_v55, %v2182_v51 }
 0x559   :  { %7561 = vmatprep.subr.bf16.mxu0 %v7560_v26 }
 0x55a   :  { %7563 = vmatpush1.bf16.msra.mxu0 %v7562_v39 }
 0x55b   :  { %7565 = vmatprep.subr.bf16.mxu0 %v7564_v61 }
 0x55e   :  { %7567 = vmatpush1.bf16.msra.mxu0 %v7566_v23 }
 0x55f   :  { %7569 = vmatprep.subr.bf16.mxu0 %v7568_v31 }
 0x562   :  { %7571 = vmatpush1.bf16.msra.mxu0 %v7570_v40 }
 0x563   :  { %7573 = vmatprep.subr.bf16.mxu0 %v7572_v54  ;;  %v2297_v54 = vld [vmem:[#allocation8 + $0x98] sm:$0xff] }
 0x566   :  { %7575 = vmatpush1.bf16.msra.mxu0 %v7574_v28  ;;  %v9979_v28 = vpack.c.bf16 %v2301_v57, %v2297_v54  ;;  %v2514_v54 = vld [vmem:[#allocation9 + $0x40] sm:$0xff] }
 0x567   :  { %7577 = vmatprep.subr.bf16.mxu0 %v7576_v32  ;;  %v2305_v32 = vld [vmem:[#allocation8 + $0xd8] sm:$0xff]  ;;  %v2518_v57 = vld [vmem:[#allocation9 + $0x60] sm:$0xff] }
 0x568   :  { %v7650_v11 = vpack.c.bf16 %v2518_v57, %v2514_v54  ;;  %v2543_v54 = vld [vmem:[#allocation9 + $0x128] sm:$0xff]  ;;  %v2541_v57 = vld [vmem:[#allocation9 + $0x118] sm:$0xff] }
 0x56a   :  { %7579 = vmatpush1.bf16.msra.mxu0 %v7578_v29  ;;  %v9985_v29 = vpack.c.bf16 %v2309_v13, %v2305_v32  ;;  %v2516_v32 = vld [vmem:[#allocation9 + $0x50] sm:$0xff] }
 0x56b   :  { %7613 = vmatprep.subr.bf16.mxu0 %v9952_v45  ;;  %v2520_v13 = vld [vmem:[#allocation9 + $0x70] sm:$0xff] }
 0x608   :  { %v2071_v46 = vpop.f32.mrb[34].mxu0  ;;  %v2142_v52 = vpop.f32.mrb[20].mxu1 }
 0x609   :  { %v8960_v53 = vadd.f32 %v2071_v46, %v9805_v44  ;;  %v2073_v4 = vpop.f32.mrb[35].mxu0  ;;  %v2144_v6 = vpop.f32.mrb[21].mxu1  ;;  %v8962_v9 = vadd.f32 %v2142_v52, %v9813_v22  ;;  %v2313_v46 = vld [vmem:[#allocation8 + $0x118] sm:$0xff] }
 0x60a   :  { %v8961_v7 = vadd.f32 %v2073_v4, %v9808_v56  ;;  %v8963_v15 = vadd.f32 %v2144_v6, %v9819_v17  ;;  %v2317_v52 = vld [vmem:[#allocation8 + $0x138] sm:$0xff]  ;;  %v2312_v6 = vld [vmem:[#allocation8 + $0x110] sm:$0xff] }
 0x60b   :  { %v2151_v14 = vmul.f32 0.5, %v8960_v53  ;;  %v9988_v53 = vpack.c.bf16 %v2308_v43, %v2304_v12  ;;  %v9991_v4 = vpack.c.bf16 %v2317_v52, %v2313_v46  ;;  %v7682_v12 = vpack.c.bf16 %v2520_v13, %v2516_v32  ;;  %v2529_v46 = vld [vmem:[#allocation9 + $0xb8] sm:$0xff]  ;;  %v2522_v52 = vld [vmem:[#allocation9 + $0x80] sm:$0xff] }
 0x60c   :  { %v2155_v0 = vmul.f32 0.5, %v8961_v7  ;;  %v2160_v18 = vmul.f32 0.5, %v8963_v15  ;;  %v2316_v7 = vld [vmem:[#allocation8 + $0x130] sm:$0xff]  ;;  %v2538_v32 = vld [vmem:[#allocation9 + $0x100] sm:$0xff] }
 0x60d   :  { %9101 = vtanh.f32 %v2151_v14  ;;  %v2321_v14 = vld [vmem:[#allocation8 + $0x158] sm:$0xff]  ;;  %v2542_v13 = vld [vmem:[#allocation9 + $0x120] sm:$0xff] }
 0x60e   :  { %9103 = vtanh.f32 %v2155_v0  ;;  %v2325_v0 = vld [vmem:[#allocation8 + $0x178] sm:$0xff] }
 0x60f   :  { %9105 = vtanh.f32 %v8962_v9  ;;  %v9994_v9 = vpack.c.bf16 %v2316_v7, %v2312_v6  ;;  %v9997_v15 = vpack.c.bf16 %v2325_v0, %v2321_v14  ;;  %v2526_v6 = vld [vmem:[#allocation9 + $0xa0] sm:$0xff]  ;;  %v2524_v0 = vld [vmem:[#allocation9 + $0x90] sm:$0xff] }
 0x610   :  { %9107 = vtanh.f32 %v2160_v18  ;;  %v2320_v18 = vld [vmem:[#allocation8 + $0x150] sm:$0xff]  ;;  %v7654_v14 = vpack.c.bf16 %v2526_v6, %v2522_v52  ;;  %v2551_v52 = vld [vmem:[#allocation9 + $0x168] sm:$0xff]  ;;  %v2549_v6 = vld [vmem:[#allocation9 + $0x158] sm:$0xff] }
 0x617   :  { %v9102_v58 = vpop.eup %9101 }
 0x618   :  { %v9104_v8 = vpop.eup %9103  ;;  %v2153_v30 = vmul.f32 0.5, %v9102_v58  ;;  %v2324_v58 = vld [vmem:[#allocation8 + $0x170] sm:$0xff] }
 0x619   :  { %v2157_v38 = vmul.f32 0.5, %v9104_v8  ;;  %v9106_v55 = vpop.eup %9105  ;;  %v2329_v8 = vld [vmem:[#allocation8 + $0x198] sm:$0xff] }
 0x61a   :  { %v2154_v51 = vadd.f32 0.5, %v2153_v30  ;;  %v9108_v59 = vpop.eup %9107  ;;  %v2333_v30 = vld [vmem:[#allocation8 + $0x1b8] sm:$0xff] }
 0x61b   :  { %v2158_v26 = vadd.f32 0.5, %v2157_v38  ;;  %v2162_v19 = vmul.f32 0.5, %v9108_v59  ;;  %v10000_v38 = vpack.c.bf16 %v2324_v58, %v2320_v18  ;;  %v2528_v18 = vld [vmem:[#allocation9 + $0xb0] sm:$0xff] }
 0x61c   :  { %v2165_v34 = vmul.f32 %v9106_v55, %v2154_v51  ;;  %v10003_v51 = vpack.c.bf16 %v2333_v30, %v2329_v8  ;;  %v2328_v55 = vld [vmem:[#allocation8 + $0x190] sm:$0xff]  ;;  %v7686_v58 = vpack.c.bf16 %v2528_v18, %v2524_v0  ;;  %v2531_v8 = vld [vmem:[#allocation9 + $0xc8] sm:$0xff]  ;;  %v2546_v0 = vld [vmem:[#allocation9 + $0x140] sm:$0xff] }
 0x61d   :  { %v2164_v1 = vmul.f32 %v2158_v26, %v9825_v24  ;;  %v2163_v31 = vadd.f32 0.5, %v2162_v19  ;;  %v9971_v24 = vpack.c.bf16 %v2293_v27, %v2289_v25  ;;  %v2332_v26 = vld [vmem:[#allocation8 + $0x1b0] sm:$0xff]  ;;  %v10012_v25 = vpack.c.bf16 %v2340_v21, %v2336_v33  ;;  %v2515_v27 = vld [vmem:[#allocation9 + $0x48] sm:$0xff]  ;;  %v2534_v33 = vld [vmem:[#allocation9 + $0xe0] sm:$0xff] }
 0x61e   :  { %v10006_v59 = vpack.c.bf16 %v2332_v26, %v2328_v55  ;;  %v2535_v30 = vld [vmem:[#allocation9 + $0xe8] sm:$0xff]  ;;  %v2533_v55 = vld [vmem:[#allocation9 + $0xd8] sm:$0xff]  ;;  %v2550_v18 = vld [vmem:[#allocation9 + $0x160] sm:$0xff] }
 0x61f   :  { %v9960_v39 = vadd.f32 %v2165_v34, %v2164_v1  ;;  %v2337_v34 = vld [vmem:[#allocation8 + $0x1d8] sm:$0xff]  ;;  %v7656_v26 = vpack.c.bf16 %v2535_v30, %v2531_v8  ;;  %v7666_v8 = vpack.c.bf16 %v2550_v18, %v2546_v0  ;;  %v2548_v30 = vld [vmem:[#allocation9 + $0x150] sm:$0xff]  ;;  %v2717_v0 = vld [vmem:[#allocation11 + $0x28] sm:$0xff] }
 0x620   :  { %v2341_v1 = vld [vmem:[#allocation8 + $0x1f8] sm:$0xff] }
 0x621   :  { %9109 = vtanh.f32 %v9960_v39  ;;  %v10009_v19 = vpack.c.bf16 %v2341_v1, %v2337_v34  ;;  %v2537_v34 = vld [vmem:[#allocation9 + $0xf8] sm:$0xff]  ;;  %v2530_v1 = vld [vmem:[#allocation9 + $0xc0] sm:$0xff] }
 0x622   :  { %v7688_v21 = vpack.c.bf16 %v2537_v34, %v2533_v55  ;;  %v2552_v55 = vld [vmem:[#allocation9 + $0x170] sm:$0xff]  ;;  %v2555_v34 = vld [vmem:[#allocation9 + $0x188] sm:$0xff]  ;;  %v2715_v18 = vld [vmem:[#allocation11 + $0x18] sm:$0xff] }
 0x628   :  { %v9963_v61 = vpop.f32.mrb[4].mxu1 }
 0x629   :  { %v9965_v23 = vpop.f32.mrb[5].mxu1 }
 0x62b   :  { %v9110_v35 = vpop.eup %9109 }
 0x62c   :  { %v9969_v40 = vmul.f32 %v9110_v35, %v2163_v31  ;;  %v2519_v31 = vld [vmem:[#allocation9 + $0x68] sm:$0xff]  ;;  %v2517_v35 = vld [vmem:[#allocation9 + $0x58] sm:$0xff] }
 0x62d   :  { %v7648_v48 = vpack.c.bf16 %v2519_v31, %v2515_v27  ;;  %v7680_v10 = vpack.c.bf16 %v2521_v49, %v2517_v35  ;;  %v7658_v27 = vpack.c.bf16 %v2534_v33, %v2530_v1  ;;  %v2532_v31 = vld [vmem:[#allocation9 + $0xd0] sm:$0xff]  ;;  %v2539_v49 = vld [vmem:[#allocation9 + $0x108] sm:$0xff]  ;;  %v2557_v33 = vld [vmem:[#allocation9 + $0x198] sm:$0xff] }
 0x62e   :  { %2266 = vmatmul.mubr.f32.vlgmr.msra.gmra.mrb[36].mxu0 %v9969_v40  ;;  %v2536_v35 = vld [vmem:[#allocation9 + $0xf0] sm:$0xff]  ;;  %v2559_v1 = vld [vmem:[#allocation9 + $0x1a8] sm:$0xff] }
 0x62f   :  { %7615 = vmatpush1.bf16.msra.mxu0 %v9967_v36  ;;  %2477 = vmatprep.mubr.f32.mxu0 %v9433_v42 }
 0x630   :  { %7617 = vmatprep.subr.bf16.mxu0 %v9971_v24  ;;  %7649 = vmatprep.subr.bf16.mxu1 %v7648_v48  ;;  %v7690_v48 = vpack.c.bf16 %v2536_v35, %v2532_v31  ;;  %v2554_v31 = vld [vmem:[#allocation9 + $0x180] sm:$0xff] }
 0x631   :  { %7651 = vmatpush1.bf16.msra.mxu1 %v7650_v11  ;;  %v2545_v11 = vld [vmem:[#allocation9 + $0x138] sm:$0xff]  ;;  %v2558_v35 = vld [vmem:[#allocation9 + $0x1a0] sm:$0xff] }
 0x633   :  { %7619 = vmatpush1.bf16.msra.mxu0 %v9975_v41 }
 0x634   :  { %7621 = vmatprep.subr.bf16.mxu0 %v9979_v28 }
 0x637   :  { %7623 = vmatpush1.bf16.msra.mxu0 %v9982_v63 }
 0x638   :  { %7625 = vmatprep.subr.bf16.mxu0 %v9985_v29 }
 0x63b   :  { %7627 = vmatpush1.bf16.msra.mxu0 %v9988_v53 }
 0x63c   :  { %7629 = vmatprep.subr.bf16.mxu0 %v9991_v4 }
 0x63f   :  { %7631 = vmatpush1.bf16.msra.mxu0 %v9994_v9 }
 0x640   :  { %7633 = vmatprep.subr.bf16.mxu0 %v9997_v15 }
 0x643   :  { %7635 = vmatpush1.bf16.msra.mxu0 %v10000_v38 }
 0x644   :  { %7637 = vmatprep.subr.bf16.mxu0 %v10003_v51 }
 0x647   :  { %7639 = vmatpush1.bf16.msra.mxu0 %v10006_v59 }
 0x648   :  { %7641 = vmatprep.subr.bf16.mxu0 %v10009_v19 }
 0x64b   :  { %7643 = vmatpush1.bf16.msra.mxu0 %v10012_v25 }
 0x64c   :  { %7677 = vmatprep.subr.bf16.mxu0 %v9885_v50  ;;  %v2523_v50 = vld [vmem:[#allocation9 + $0x88] sm:$0xff] }
 0x64e   :  { %2478 = vmatmul.mubr.f32.vlgmr.msra.gmra.mrb[20].mxu0 %v9922_v20  ;;  %v2527_v20 = vld [vmem:[#allocation9 + $0xa8] sm:$0xff] }
 0x64f   :  { %7679 = vmatpush1.bf16.msra.mxu0 %v9890_v60  ;;  %2705 = vmatprep.mubr.f32.mxu0 %v9433_v42  ;;  %v2525_v60 = vld [vmem:[#allocation9 + $0x98] sm:$0xff]  ;;  %v7652_v43 = vpack.c.bf16 %v2527_v20, %v2523_v50  ;;  %v7662_v50 = vpack.c.bf16 %v2542_v13, %v2538_v32  ;;  %v2540_v20 = vld [vmem:[#allocation9 + $0x110] sm:$0xff]  ;;  %v2567_v32 = vld [vmem:[#allocation9 + $0x1e8] sm:$0xff] }
 0x650   :  { %7681 = vmatprep.subr.bf16.mxu0 %v7680_v10  ;;  %v7684_v7 = vpack.c.bf16 %v2529_v46, %v2525_v60  ;;  %v7660_v10 = vpack.c.bf16 %v2543_v54, %v2539_v49  ;;  %v2544_v60 = vld [vmem:[#allocation9 + $0x130] sm:$0xff]  ;;  %v2547_v46 = vld [vmem:[#allocation9 + $0x148] sm:$0xff]  ;;  %v7670_v49 = vpack.c.bf16 %v2558_v35, %v2554_v31  ;;  %v2565_v13 = vld [vmem:[#allocation9 + $0x1d8] sm:$0xff] }
 0x651   :  { %7653 = vmatprep.subr.bf16.mxu1 %v7652_v43  ;;  %v7694_v43 = vpack.c.bf16 %v2544_v60, %v2540_v20  ;;  %v2556_v54 = vld [vmem:[#allocation9 + $0x190] sm:$0xff]  ;;  %v2562_v20 = vld [vmem:[#allocation9 + $0x1c0] sm:$0xff] }
 0x652   :  { %7655 = vmatpush1.bf16.msra.mxu1 %v7654_v14  ;;  %v2553_v14 = vld [vmem:[#allocation9 + $0x178] sm:$0xff]  ;;  %v2566_v60 = vld [vmem:[#allocation9 + $0x1e0] sm:$0xff] }
 0x653   :  { %7683 = vmatpush1.bf16.msra.mxu0 %v7682_v12  ;;  %7657 = vmatprep.subr.bf16.mxu1 %v7656_v26  ;;  %v7692_v12 = vpack.c.bf16 %v2545_v11, %v2541_v57  ;;  %v7698_v26 = vpack.c.bf16 %v2552_v55, %v2548_v30  ;;  %v2560_v57 = vld [vmem:[#allocation9 + $0x1b0] sm:$0xff]  ;;  %v2563_v11 = vld [vmem:[#allocation9 + $0x1c8] sm:$0xff] }
 0x654   :  { %7685 = vmatprep.subr.bf16.mxu0 %v7684_v7  ;;  %v7664_v7 = vpack.c.bf16 %v2551_v52, %v2547_v46  ;;  %v7674_v46 = vpack.c.bf16 %v2566_v60, %v2562_v20  ;;  %v2564_v52 = vld [vmem:[#allocation9 + $0x1d0] sm:$0xff] }
 0x656   :  { %7659 = vmatpush1.bf16.msra.mxu1 %v7658_v27  ;;  %v2561_v27 = vld [vmem:[#allocation9 + $0x1b8] sm:$0xff] }
 0x657   :  { %7687 = vmatpush1.bf16.msra.mxu0 %v7686_v58  ;;  %7661 = vmatprep.subr.bf16.mxu1 %v7660_v10  ;;  %v7696_v58 = vpack.c.bf16 %v2553_v14, %v2549_v6  ;;  %v7702_v10 = vpack.c.bf16 %v2560_v57, %v2556_v54  ;;  %v2568_v6 = vld [vmem:[#allocation9 + $0x1f0] sm:$0xff]  ;;  %v2713_v14 = vld [vmem:[#allocation11 + $0x8] sm:$0xff] }
 0x658   :  { %7689 = vmatprep.subr.bf16.mxu0 %v7688_v21  ;;  %v7668_v21 = vpack.c.bf16 %v2559_v1, %v2555_v34 }
 0x65a   :  { %7663 = vmatpush1.bf16.msra.mxu1 %v7662_v50  ;;  %v2569_v50 = vld [vmem:[#allocation9 + $0x1f8] sm:$0xff] }
 0x65b   :  { %7691 = vmatpush1.bf16.msra.mxu0 %v7690_v48  ;;  %7665 = vmatprep.subr.bf16.mxu1 %v7664_v7  ;;  %v7700_v48 = vpack.c.bf16 %v2561_v27, %v2557_v33  ;;  %v7706_v7 = vpack.c.bf16 %v2568_v6, %v2564_v52  ;;  %v8929_v33 = vadd.f32 %v9965_v23, %v9748_v2  ;;  %v2712_v52 = vld [vmem:[#allocation11] sm:$0xff] }
 0x65c   :  { %7693 = vmatprep.subr.bf16.mxu0 %v7692_v12  ;;  %v7672_v12 = vpack.c.bf16 %v2567_v32, %v2563_v11  ;;  %v2716_v6 = vld [vmem:[#allocation11 + $0x20] sm:$0xff] }
 0x65d   :  { %v2492_v27 = vmul.f32 0.5, %v8929_v33 }
 0x65e   :  { %7667 = vmatpush1.bf16.msra.mxu1 %v7666_v8  ;;  %v2719_v8 = vld [vmem:[#allocation11 + $0x38] sm:$0xff] }
 0x65f   :  { %7695 = vmatpush1.bf16.msra.mxu0 %v7694_v43  ;;  %7669 = vmatprep.subr.bf16.mxu1 %v7668_v21  ;;  %v7704_v43 = vpack.c.bf16 %v2569_v50, %v2565_v13  ;;  %v7740_v30 = vpack.c.bf16 %v2719_v8, %v2715_v18  ;;  %v8928_v21 = vadd.f32 %v9963_v61, %v9744_v62  ;;  %9111 = vtanh.f32 %v2492_v27  ;;  %v2725_v18 = vld [vmem:[#allocation11 + $0x68] sm:$0xff]  ;;  %v2727_v8 = vld [vmem:[#allocation11 + $0x78] sm:$0xff] }
 0x660   :  { %7697 = vmatprep.subr.bf16.mxu0 %v7696_v58  ;;  %v7708_v58 = vpack.c.bf16 %v2717_v0, %v2713_v14  ;;  %v2718_v14 = vld [vmem:[#allocation11 + $0x30] sm:$0xff]  ;;  %v2721_v0 = vld [vmem:[#allocation11 + $0x48] sm:$0xff] }
 0x661   :  { %v2488_v31 = vmul.f32 0.5, %v8928_v21  ;;  %v7712_v21 = vpack.c.bf16 %v2725_v18, %v2721_v0  ;;  %v2740_v0 = vld [vmem:[#allocation11 + $0xe0] sm:$0xff] }
 0x662   :  { %7671 = vmatpush1.bf16.msra.mxu1 %v7670_v49 }
 0x663   :  { %7699 = vmatpush1.bf16.msra.mxu0 %v7698_v26  ;;  %7673 = vmatprep.subr.bf16.mxu1 %v7672_v12  ;;  %9113 = vtanh.f32 %v2488_v31  ;;  %v2722_v31 = vld [vmem:[#allocation11 + $0x50] sm:$0xff] }
 0x664   :  { %7701 = vmatprep.subr.bf16.mxu0 %v7700_v48 }
 0x666   :  { %7675 = vmatpush1.bf16.msra.mxu1 %v7674_v46 }
 0x667   :  { %7703 = vmatpush1.bf16.msra.mxu0 %v7702_v10  ;;  %7709 = vmatprep.subr.bf16.mxu1 %v7708_v58  ;;  %v2723_v58 = vld [vmem:[#allocation11 + $0x58] sm:$0xff] }
 0x668   :  { %7705 = vmatprep.subr.bf16.mxu0 %v7704_v43  ;;  %v7744_v27 = vpack.c.bf16 %v2727_v8, %v2723_v58  ;;  %v2738_v8 = vld [vmem:[#allocation11 + $0xd0] sm:$0xff] }
 0x669   :  { %v9112_v57 = vpop.eup %9111 }
 0x66a   :  { %v2494_v11 = vmul.f32 0.5, %v9112_v57  ;;  %v2735_v57 = vld [vmem:[#allocation11 + $0xb8] sm:$0xff] }
 0x66b   :  { %7707 = vmatpush1.bf16.msra.mxu0 %v7706_v7  ;;  %v2714_v7 = vld [vmem:[#allocation11 + $0x10] sm:$0xff] }
 0x66c   :  { %7741 = vmatprep.subr.bf16.mxu0 %v7740_v30  ;;  %v2495_v23 = vadd.f32 0.5, %v2494_v11 }
 0x66d   :  { %v9114_v10 = vpop.eup %9113 }
 0x66e   :  { %v2490_v13 = vmul.f32 0.5, %v9114_v10  ;;  %v2501_v50 = vmul.f32 %v2495_v23, %v9919_v3  ;;  %v2720_v3 = vld [vmem:[#allocation11 + $0x40] sm:$0xff] }
 0x670   :  { %v2491_v12 = vadd.f32 0.5, %v2490_v13  ;;  %v2732_v13 = vld [vmem:[#allocation11 + $0xa0] sm:$0xff] }
 0x701   :  { %v2267_v55 = vpop.f32.mrb[36].mxu0 }
 0x702   :  { %v2268_v26 = vadd.f32 %v2267_v55, %v9899_v37  ;;  %v2269_v34 = vpop.f32.mrb[37].mxu0 }
 0x703   :  { %v2270_v1 = vadd.f32 %v2269_v34, %v9902_v47  ;;  %v7742_v34 = vpack.c.bf16 %v2718_v14, %v2714_v7  ;;  %v2736_v14 = vld [vmem:[#allocation11 + $0xc0] sm:$0xff] }
 0x704   :  { %2272 = vst [vmem:[%s10710_s12 + $0x10] sm:$0xff] %v2268_v26  ;;  %v7710_v26 = vpack.c.bf16 %v2716_v6, %v2712_v52  ;;  %v2743_v52 = vld [vmem:[#allocation11 + $0xf8] sm:$0xff] }
 0x705   :  { %2273 = vst [vmem:[%s10710_s12 + $0x18] sm:$0xff] %v2270_v1  ;;  %v2724_v1 = vld [vmem:[#allocation11 + $0x60] sm:$0xff] }
 0x706   :  { %v7714_v10 = vpack.c.bf16 %v2724_v1, %v2720_v3  ;;  %v2751_v3 = vld [vmem:[#allocation11 + $0x138] sm:$0xff]  ;;  %v7722_v1 = vpack.c.bf16 %v2740_v0, %v2736_v14 }
 0x707   :  { %v2767_v14 = vld [vmem:[#allocation11 + $0x1b8] sm:$0xff] }
 0x721   :  { %v2479_v35 = vpop.f32.mrb[20].mxu0 }
 0x722   :  { %v8944_v48 = vadd.f32 %v2479_v35, %v9753_v5  ;;  %v2481_v49 = vpop.f32.mrb[21].mxu0  ;;  %v2726_v35 = vld [vmem:[#allocation11 + $0x70] sm:$0xff] }
 0x723   :  { %v8945_v54 = vadd.f32 %v2481_v49, %v9760_v16  ;;  %v2733_v49 = vld [vmem:[#allocation11 + $0xa8] sm:$0xff]  ;;  %v7746_v11 = vpack.c.bf16 %v2726_v35, %v2722_v31  ;;  %v2748_v31 = vld [vmem:[#allocation11 + $0x120] sm:$0xff] }
 0x724   :  { %9115 = vtanh.f32 %v8944_v48  ;;  %v2729_v48 = vld [vmem:[#allocation11 + $0x88] sm:$0xff] }
 0x725   :  { %v2497_v32 = vmul.f32 0.5, %v8945_v54  ;;  %v2731_v54 = vld [vmem:[#allocation11 + $0x98] sm:$0xff]  ;;  %v7716_v23 = vpack.c.bf16 %v2733_v49, %v2729_v48  ;;  %v2746_v49 = vld [vmem:[#allocation11 + $0x110] sm:$0xff] }
 0x727   :  { %9117 = vtanh.f32 %v2497_v32  ;;  %v2728_v32 = vld [vmem:[#allocation11 + $0x80] sm:$0xff] }
 0x728   :  { %v7718_v6 = vpack.c.bf16 %v2732_v13, %v2728_v32  ;;  %v2759_v32 = vld [vmem:[#allocation11 + $0x178] sm:$0xff] }
 0x72e   :  { %v9116_v61 = vpop.eup %9115 }
 0x72f   :  { %v2502_v20 = vmul.f32 %v9116_v61, %v2491_v12  ;;  %v7748_v12 = vpack.c.bf16 %v2735_v57, %v2731_v54  ;;  %v2730_v61 = vld [vmem:[#allocation11 + $0x90] sm:$0xff]  ;;  %v2753_v57 = vld [vmem:[#allocation11 + $0x148] sm:$0xff] }
 0x730   :  { %v2750_v54 = vld [vmem:[#allocation11 + $0x130] sm:$0xff] }
 0x731   :  { %v10035_v60 = vadd.f32 %v2502_v20, %v2501_v50  ;;  %v9118_v43 = vpop.eup %9117  ;;  %v2734_v50 = vld [vmem:[#allocation11 + $0xb0] sm:$0xff]  ;;  %v2737_v20 = vld [vmem:[#allocation11 + $0xc8] sm:$0xff] }
 0x732   :  { %v2499_v46 = vmul.f32 0.5, %v9118_v43  ;;  %v2741_v43 = vld [vmem:[#allocation11 + $0xe8] sm:$0xff]  ;;  %v7750_v7 = vpack.c.bf16 %v2734_v50, %v2730_v61  ;;  %v2756_v61 = vld [vmem:[#allocation11 + $0x160] sm:$0xff] }
 0x733   :  { %9119 = vtanh.f32 %v10035_v60  ;;  %v7720_v18 = vpack.c.bf16 %v2741_v43, %v2737_v20  ;;  %v2754_v43 = vld [vmem:[#allocation11 + $0x150] sm:$0xff] }
 0x734   :  { %v2500_v30 = vadd.f32 0.5, %v2499_v46  ;;  %v2739_v46 = vld [vmem:[#allocation11 + $0xd8] sm:$0xff] }
 0x735   :  { %v7752_v58 = vpack.c.bf16 %v2743_v52, %v2739_v46  ;;  %v2758_v46 = vld [vmem:[#allocation11 + $0x170] sm:$0xff]  ;;  %v2761_v52 = vld [vmem:[#allocation11 + $0x188] sm:$0xff] }
 0x73d   :  { %v9120_v55 = vpop.eup %9119 }
 0x73e   :  { %v10038_v33 = vmul.f32 %v9120_v55, %v2500_v30  ;;  %v2742_v30 = vld [vmem:[#allocation11 + $0xf0] sm:$0xff]  ;;  %v2745_v55 = vld [vmem:[#allocation11 + $0x108] sm:$0xff] }
 0x740   :  { %2635 = vmatmul.mubr.f32.vlgmr.msra.gmra.mrb[22].mxu1 %v10038_v33  ;;  %2706 = vmatmul.mubr.f32.vlgmr.msra.gmra.mrb[38].mxu0 %v10038_v33 }
 0x741   :  { %7711 = vmatpush1.bf16.msra.mxu1 %v7710_v26  ;;  %7743 = vmatpush1.bf16.msra.mxu0 %v7742_v34  ;;  %v2749_v26 = vld [vmem:[#allocation11 + $0x128] sm:$0xff]  ;;  %v2747_v34 = vld [vmem:[#allocation11 + $0x118] sm:$0xff] }
 0x742   :  { %7713 = vmatprep.subr.bf16.mxu1 %v7712_v21  ;;  %7745 = vmatprep.subr.bf16.mxu0 %v7744_v27  ;;  %v7754_v21 = vpack.c.bf16 %v2742_v30, %v2738_v8  ;;  %v2744_v27 = vld [vmem:[#allocation11 + $0x100] sm:$0xff]  ;;  %v7724_v35 = vpack.c.bf16 %v2749_v26, %v2745_v55  ;;  %v7756_v48 = vpack.c.bf16 %v2751_v3, %v2747_v34  ;;  %v2762_v26 = vld [vmem:[#allocation11 + $0x190] sm:$0xff]  ;;  %v2769_v3 = vld [vmem:[#allocation11 + $0x1c8] sm:$0xff] }
 0x743   :  { %2840 = vmatprep.mubr.f32.mxu1 %v9433_v42  ;;  %2911 = vmatprep.mubr.f32.mxu0 %v9433_v42  ;;  %v7726_v13 = vpack.c.bf16 %v2748_v31, %v2744_v27  ;;  %v2764_v8 = vld [vmem:[#allocation11 + $0x1a0] sm:$0xff]  ;;  %v2766_v34 = vld [vmem:[#allocation11 + $0x1b0] sm:$0xff]  ;;  %v2775_v27 = vld [vmem:[#allocation11 + $0x1f8] sm:$0xff] }
 0x745   :  { %7715 = vmatpush1.bf16.msra.mxu1 %v7714_v10  ;;  %7747 = vmatpush1.bf16.msra.mxu0 %v7746_v11  ;;  %v2757_v10 = vld [vmem:[#allocation11 + $0x168] sm:$0xff]  ;;  %v2755_v11 = vld [vmem:[#allocation11 + $0x158] sm:$0xff] }
 0x746   :  { %7717 = vmatprep.subr.bf16.mxu1 %v7716_v23  ;;  %7749 = vmatprep.subr.bf16.mxu0 %v7748_v12  ;;  %v7758_v23 = vpack.c.bf16 %v2750_v54, %v2746_v49  ;;  %v2752_v12 = vld [vmem:[#allocation11 + $0x140] sm:$0xff]  ;;  %v7728_v50 = vpack.c.bf16 %v2757_v10, %v2753_v57  ;;  %v7760_v20 = vpack.c.bf16 %v2759_v32, %v2755_v11  ;;  %v2770_v10 = vld [vmem:[#allocation11 + $0x1d0] sm:$0xff] }
 0x747   :  { %v7730_v0 = vpack.c.bf16 %v2756_v61, %v2752_v12  ;;  %v2772_v57 = vld [vmem:[#allocation11 + $0x1e0] sm:$0xff]  ;;  %v2774_v11 = vld [vmem:[#allocation11 + $0x1f0] sm:$0xff]  ;;  %v2953_v12 = vld [vmem:[#allocation12 + $0x68] sm:$0xff] }
 0x748   :  { %v2955_v61 = vld [vmem:[#allocation12 + $0x78] sm:$0xff] }
 0x749   :  { %7719 = vmatpush1.bf16.msra.mxu1 %v7718_v6  ;;  %7751 = vmatpush1.bf16.msra.mxu0 %v7750_v7  ;;  %v2765_v6 = vld [vmem:[#allocation11 + $0x1a8] sm:$0xff]  ;;  %v2763_v7 = vld [vmem:[#allocation11 + $0x198] sm:$0xff] }
 0x74a   :  { %7721 = vmatprep.subr.bf16.mxu1 %v7720_v18  ;;  %7753 = vmatprep.subr.bf16.mxu0 %v7752_v58  ;;  %v7762_v18 = vpack.c.bf16 %v2758_v46, %v2754_v43  ;;  %v2760_v58 = vld [vmem:[#allocation11 + $0x180] sm:$0xff]  ;;  %v7732_v30 = vpack.c.bf16 %v2765_v6, %v2761_v52  ;;  %v7764_v55 = vpack.c.bf16 %v2767_v14, %v2763_v7  ;;  %v2954_v43 = vld [vmem:[#allocation12 + $0x70] sm:$0xff]  ;;  %v2957_v52 = vld [vmem:[#allocation12 + $0x88] sm:$0xff] }
 0x74b   :  { %v7734_v31 = vpack.c.bf16 %v2764_v8, %v2760_v58  ;;  %v2959_v6 = vld [vmem:[#allocation12 + $0x98] sm:$0xff]  ;;  %v2956_v14 = vld [vmem:[#allocation12 + $0x80] sm:$0xff]  ;;  %v2961_v58 = vld [vmem:[#allocation12 + $0xa8] sm:$0xff] }
 0x74c   :  { %v7788_v7 = vpack.c.bf16 %v2959_v6, %v2957_v52  ;;  %v2963_v8 = vld [vmem:[#allocation12 + $0xb8] sm:$0xff]  ;;  %v3049_v6 = vld [vmem:[#allocation8] sm:$0xff] }
 0x74d   :  { %7723 = vmatpush1.bf16.msra.mxu1 %v7722_v1  ;;  %7755 = vmatpush1.bf16.msra.mxu0 %v7754_v21  ;;  %v2773_v1 = vld [vmem:[#allocation11 + $0x1e8] sm:$0xff]  ;;  %v2771_v21 = vld [vmem:[#allocation11 + $0x1d8] sm:$0xff] }
 0x74e   :  { %7725 = vmatprep.subr.bf16.mxu1 %v7724_v35  ;;  %7757 = vmatprep.subr.bf16.mxu0 %v7756_v48  ;;  %v7766_v35 = vpack.c.bf16 %v2766_v34, %v2762_v26  ;;  %v2768_v48 = vld [vmem:[#allocation11 + $0x1c0] sm:$0xff]  ;;  %v7736_v49 = vpack.c.bf16 %v2773_v1, %v2769_v3  ;;  %v7768_v54 = vpack.c.bf16 %v2775_v27, %v2771_v21  ;;  %v2962_v26 = vld [vmem:[#allocation12 + $0xb0] sm:$0xff]  ;;  %v2965_v3 = vld [vmem:[#allocation12 + $0xc8] sm:$0xff] }
 0x74f   :  { %v7738_v32 = vpack.c.bf16 %v2772_v57, %v2768_v48  ;;  %v2967_v1 = vld [vmem:[#allocation12 + $0xd8] sm:$0xff]  ;;  %v2964_v27 = vld [vmem:[#allocation12 + $0xc0] sm:$0xff]  ;;  %v2969_v48 = vld [vmem:[#allocation12 + $0xe8] sm:$0xff] }
 0x750   :  { %v7796_v21 = vpack.c.bf16 %v2967_v1, %v2965_v3  ;;  %v2968_v57 = vld [vmem:[#allocation12 + $0xe0] sm:$0xff]  ;;  %v3066_v3 = vld [vmem:[#allocation8 + $0x88] sm:$0xff] }
 0x751   :  { %7727 = vmatpush1.bf16.msra.mxu1 %v7726_v13  ;;  %7759 = vmatpush1.bf16.msra.mxu0 %v7758_v23  ;;  %v7770_v13 = vpack.c.bf16 %v2774_v11, %v2770_v10  ;;  %v2970_v10 = vld [vmem:[#allocation12 + $0xf0] sm:$0xff]  ;;  %v3070_v1 = vld [vmem:[#allocation8 + $0xa8] sm:$0xff] }
 0x752   :  { %7729 = vmatprep.subr.bf16.mxu1 %v7728_v50  ;;  %7761 = vmatprep.subr.bf16.mxu0 %v7760_v20  ;;  %v7784_v50 = vpack.c.bf16 %v2955_v61, %v2953_v12  ;;  %v2952_v20 = vld [vmem:[#allocation12 + $0x60] sm:$0xff]  ;;  %v7802_v11 = vpack.c.bf16 %v2970_v10, %v2968_v57 }
 0x753   :  { %v7786_v46 = vpack.c.bf16 %v2954_v43, %v2952_v20  ;;  %v3073_v10 = vld [vmem:[#allocation8 + $0xc0] sm:$0xff] }
 0x755   :  { %7731 = vmatpush1.bf16.msra.mxu1 %v7730_v0  ;;  %7763 = vmatpush1.bf16.msra.mxu0 %v7762_v18  ;;  %v2958_v0 = vld [vmem:[#allocation12 + $0x90] sm:$0xff] }
 0x756   :  { %7733 = vmatprep.subr.bf16.mxu1 %v7732_v30  ;;  %7765 = vmatprep.subr.bf16.mxu0 %v7764_v55  ;;  %v7790_v18 = vpack.c.bf16 %v2958_v0, %v2956_v14  ;;  %v7792_v30 = vpack.c.bf16 %v2963_v8, %v2961_v58  ;;  %v2960_v55 = vld [vmem:[#allocation12 + $0xa0] sm:$0xff]  ;;  %v3058_v0 = vld [vmem:[#allocation8 + $0x48] sm:$0xff] }
 0x757   :  { %v7794_v34 = vpack.c.bf16 %v2962_v26, %v2960_v55  ;;  %v3057_v26 = vld [vmem:[#allocation8 + $0x40] sm:$0xff] }
 0x759   :  { %7735 = vmatpush1.bf16.msra.mxu1 %v7734_v31  ;;  %7767 = vmatpush1.bf16.msra.mxu0 %v7766_v35  ;;  %v2966_v31 = vld [vmem:[#allocation12 + $0xd0] sm:$0xff] }
 0x75a   :  { %7737 = vmatprep.subr.bf16.mxu1 %v7736_v49  ;;  %7769 = vmatprep.subr.bf16.mxu0 %v7768_v54  ;;  %v7798_v35 = vpack.c.bf16 %v2966_v31, %v2964_v27  ;;  %v2971_v49 = vld [vmem:[#allocation12 + $0xf8] sm:$0xff]  ;;  %v10093_v27 = vpack.c.bf16 %v3070_v1, %v3066_v3  ;;  %v3065_v31 = vld [vmem:[#allocation8 + $0x80] sm:$0xff] }
 0x75b   :  { %v7800_v54 = vpack.c.bf16 %v2971_v49, %v2969_v48  ;;  %v3074_v48 = vld [vmem:[#allocation8 + $0xc8] sm:$0xff] }
 0x75c   :  { %v3078_v49 = vld [vmem:[#allocation8 + $0xe8] sm:$0xff] }
 0x75d   :  { %7739 = vmatpush1.bf16.msra.mxu1 %v7738_v32  ;;  %7771 = vmatpush1.bf16.msra.mxu0 %v7770_v13  ;;  %v3050_v32 = vld [vmem:[#allocation8 + $0x8] sm:$0xff]  ;;  %v10099_v57 = vpack.c.bf16 %v3078_v49, %v3074_v48 }
 0x75e   :  { %7837 = vmatprep.subr.bf16.mxu0 %v9952_v45  ;;  %v2941_v45 = vld [vmem:[#allocation12 + $0x8] sm:$0xff] }
 0x75f   :  { %v3054_v13 = vld [vmem:[#allocation8 + $0x28] sm:$0xff] }
 0x760   :  { %2841 = vmatmul.mubr.f32.vlgmr.msra.gmra.mrb[22].mxu1 %v9969_v40  ;;  %2912 = vmatmul.mubr.f32.vlgmr.msra.gmra.mrb[38].mxu0 %v9969_v40  ;;  %v3290_v49 = vld [vmem:[#allocation9 + $0x68] sm:$0xff] }
 0x761   :  { %7839 = vmatpush1.bf16.msra.mxu0 %v9967_v36  ;;  %3248 = vmatprep.mubr.f32.mxu0 %v9433_v42  ;;  %v2943_v36 = vld [vmem:[#allocation12 + $0x18] sm:$0xff] }
 0x762   :  { %7841 = vmatprep.subr.bf16.mxu0 %v9971_v24  ;;  %3036 = vmatprep.mubr.f32.mxu1 %v9433_v42  ;;  %v7772_v40 = vpack.c.bf16 %v2943_v36, %v2941_v45  ;;  %v2940_v24 = vld [vmem:[#allocation12] sm:$0xff]  ;;  %v10066_v45 = vpack.c.bf16 %v3054_v13, %v3050_v32  ;;  %v3082_v32 = vld [vmem:[#allocation8 + $0x108] sm:$0xff] }
 0x763   :  { %v3086_v13 = vld [vmem:[#allocation8 + $0x128] sm:$0xff] }
 0x764   :  { %7773 = vmatprep.subr.bf16.mxu1 %v7772_v40 }
 0x765   :  { %7843 = vmatpush1.bf16.msra.mxu0 %v9975_v41  ;;  %v2942_v41 = vld [vmem:[#allocation12 + $0x10] sm:$0xff] }
 0x766   :  { %7845 = vmatprep.subr.bf16.mxu0 %v9979_v28  ;;  %v7774_v28 = vpack.c.bf16 %v2942_v41, %v2940_v24 }
 0x768   :  { %7775 = vmatpush1.bf16.msra.mxu1 %v7774_v28 }
 0x769   :  { %7847 = vmatpush1.bf16.msra.mxu0 %v9982_v63  ;;  %v2945_v63 = vld [vmem:[#allocation12 + $0x28] sm:$0xff] }
 0x76a   :  { %7849 = vmatprep.subr.bf16.mxu0 %v9985_v29  ;;  %v2947_v29 = vld [vmem:[#allocation12 + $0x38] sm:$0xff] }
 0x76d   :  { %7851 = vmatpush1.bf16.msra.mxu0 %v9988_v53  ;;  %v7776_v53 = vpack.c.bf16 %v2947_v29, %v2945_v63 }
 0x76e   :  { %7853 = vmatprep.subr.bf16.mxu0 %v9991_v4  ;;  %v2944_v4 = vld [vmem:[#allocation12 + $0x20] sm:$0xff] }
 0x76f   :  { %7777 = vmatprep.subr.bf16.mxu1 %v7776_v53 }
 0x771   :  { %7855 = vmatpush1.bf16.msra.mxu0 %v9994_v9  ;;  %v2946_v9 = vld [vmem:[#allocation12 + $0x30] sm:$0xff] }
 0x772   :  { %7857 = vmatprep.subr.bf16.mxu0 %v9997_v15  ;;  %v7778_v15 = vpack.c.bf16 %v2946_v9, %v2944_v4 }
 0x774   :  { %7779 = vmatpush1.bf16.msra.mxu1 %v7778_v15 }
 0x775   :  { %7859 = vmatpush1.bf16.msra.mxu0 %v10000_v38  ;;  %v2949_v38 = vld [vmem:[#allocation12 + $0x48] sm:$0xff] }
 0x776   :  { %7861 = vmatprep.subr.bf16.mxu0 %v10003_v51  ;;  %v2951_v51 = vld [vmem:[#allocation12 + $0x58] sm:$0xff] }
 0x779   :  { %7863 = vmatpush1.bf16.msra.mxu0 %v10006_v59  ;;  %v7780_v59 = vpack.c.bf16 %v2951_v51, %v2949_v38 }
 0x77a   :  { %7865 = vmatprep.subr.bf16.mxu0 %v10009_v19  ;;  %v2948_v19 = vld [vmem:[#allocation12 + $0x40] sm:$0xff] }
 0x77b   :  { %7781 = vmatprep.subr.bf16.mxu1 %v7780_v59 }
 0x77d   :  { %7867 = vmatpush1.bf16.msra.mxu0 %v10012_v25  ;;  %v2950_v25 = vld [vmem:[#allocation12 + $0x50] sm:$0xff] }
 0x77e   :  { %v7782_v23 = vpack.c.bf16 %v2950_v25, %v2948_v19 }
 0x780   :  { %3249 = vmatmul.mubr.f32.vlgmr.msra.gmra.mrb[22].mxu0 %v10038_v33  ;;  %7783 = vmatpush1.bf16.msra.mxu1 %v7782_v23 }
 0x781   :  { %3405 = vmatprep.mubr.f32.mxu0 %v9433_v42  ;;  %7785 = vmatprep.subr.bf16.mxu1 %v7784_v50 }
 0x784   :  { %7787 = vmatpush1.bf16.msra.mxu1 %v7786_v46 }
 0x785   :  { %7789 = vmatprep.subr.bf16.mxu1 %v7788_v7  ;;  %v3053_v7 = vld [vmem:[#allocation8 + $0x20] sm:$0xff] }
 0x788   :  { %7791 = vmatpush1.bf16.msra.mxu1 %v7790_v18  ;;  %v3062_v18 = vld [vmem:[#allocation8 + $0x68] sm:$0xff] }
 0x789   :  { %7793 = vmatprep.subr.bf16.mxu1 %v7792_v30  ;;  %v10081_v30 = vpack.c.bf16 %v3053_v7, %v3049_v6  ;;  %v3278_v7 = vld [vmem:[#allocation9 + $0x8] sm:$0xff] }
 0x78c   :  { %7795 = vmatpush1.bf16.msra.mxu1 %v7794_v34  ;;  %v3061_v34 = vld [vmem:[#allocation8 + $0x60] sm:$0xff] }
 0x78d   :  { %7797 = vmatprep.subr.bf16.mxu1 %v7796_v21  ;;  %v10089_v21 = vpack.c.bf16 %v3061_v34, %v3057_v26  ;;  %v3277_v26 = vld [vmem:[#allocation9] sm:$0xff] }
 0x78e   :  { %v3281_v34 = vld [vmem:[#allocation9 + $0x20] sm:$0xff] }
 0x78f   :  { %v10136_v1 = vpack.c.bf16 %v3281_v34, %v3277_v26  ;;  %v3302_v26 = vld [vmem:[#allocation9 + $0xc8] sm:$0xff] }
 0x790   :  { %7799 = vmatpush1.bf16.msra.mxu1 %v7798_v35  ;;  %v3069_v35 = vld [vmem:[#allocation8 + $0xa0] sm:$0xff]  ;;  %v3306_v34 = vld [vmem:[#allocation9 + $0xe8] sm:$0xff] }
 0x791   :  { %7801 = vmatprep.subr.bf16.mxu1 %v7800_v54  ;;  %v10096_v54 = vpack.c.bf16 %v3069_v35, %v3065_v31  ;;  %v3279_v31 = vld [vmem:[#allocation9 + $0x10] sm:$0xff] }
 0x792   :  { %v3283_v35 = vld [vmem:[#allocation9 + $0x30] sm:$0xff] }
 0x793   :  { %v10139_v48 = vpack.c.bf16 %v3283_v35, %v3279_v31  ;;  %v3304_v31 = vld [vmem:[#allocation9 + $0xd8] sm:$0xff]  ;;  %v7880_v35 = vpack.c.bf16 %v3306_v34, %v3302_v26  ;;  %v3317_v34 = vld [vmem:[#allocation9 + $0x140] sm:$0xff] }
 0x794   :  { %7803 = vmatpush1.bf16.msra.mxu1 %v7802_v11  ;;  %v3077_v11 = vld [vmem:[#allocation8 + $0xe0] sm:$0xff]  ;;  %v3324_v26 = vld [vmem:[#allocation9 + $0x178] sm:$0xff] }
 0x795   :  { %7805 = vmatprep.subr.bf16.mxu1 %v10066_v45 }
 0x833   :  { %v2842_v36 = vpop.f32.mrb[22].mxu1  ;;  %v2913_v40 = vpop.f32.mrb[38].mxu0 }
 0x834   :  { %v8964_v24 = vadd.f32 %v2842_v36, %v9805_v44  ;;  %v2844_v41 = vpop.f32.mrb[23].mxu1  ;;  %v2915_v28 = vpop.f32.mrb[39].mxu0  ;;  %v8966_v4 = vadd.f32 %v2913_v40, %v9813_v22  ;;  %v10102_v36 = vpack.c.bf16 %v3077_v11, %v3073_v10  ;;  %v10105_v40 = vpack.c.bf16 %v3086_v13, %v3082_v32  ;;  %v3288_v10 = vld [vmem:[#allocation9 + $0x58] sm:$0xff]  ;;  %v3285_v13 = vld [vmem:[#allocation9 + $0x40] sm:$0xff] }
 0x835   :  { %v8965_v63 = vadd.f32 %v2844_v41, %v9808_v56  ;;  %v8967_v9 = vadd.f32 %v2915_v28, %v9819_v17  ;;  %v3085_v41 = vld [vmem:[#allocation8 + $0x120] sm:$0xff]  ;;  %v3090_v28 = vld [vmem:[#allocation8 + $0x148] sm:$0xff]  ;;  %v3292_v32 = vld [vmem:[#allocation9 + $0x78] sm:$0xff] }
 0x836   :  { %v2922_v29 = vmul.f32 0.5, %v8964_v24  ;;  %v3081_v24 = vld [vmem:[#allocation8 + $0x100] sm:$0xff] }
 0x837   :  { %v2926_v53 = vmul.f32 0.5, %v8965_v63  ;;  %v2931_v15 = vmul.f32 0.5, %v8967_v9  ;;  %v3094_v63 = vld [vmem:[#allocation8 + $0x168] sm:$0xff]  ;;  %v3093_v9 = vld [vmem:[#allocation8 + $0x160] sm:$0xff] }
 0x838   :  { %9121 = vtanh.f32 %v2922_v29  ;;  %v10108_v29 = vpack.c.bf16 %v3085_v41, %v3081_v24  ;;  %v3289_v24 = vld [vmem:[#allocation9 + $0x60] sm:$0xff]  ;;  %v7904_v41 = vpack.c.bf16 %v3292_v32, %v3288_v10 }
 0x839   :  { %9123 = vtanh.f32 %v2926_v53  ;;  %v10111_v53 = vpack.c.bf16 %v3094_v63, %v3090_v28  ;;  %v7874_v28 = vpack.c.bf16 %v3289_v24, %v3285_v13  ;;  %v3287_v63 = vld [vmem:[#allocation9 + $0x50] sm:$0xff]  ;;  %v3305_v10 = vld [vmem:[#allocation9 + $0xe0] sm:$0xff] }
 0x83a   :  { %9125 = vtanh.f32 %v8966_v4  ;;  %v3089_v4 = vld [vmem:[#allocation8 + $0x140] sm:$0xff]  ;;  %v3303_v13 = vld [vmem:[#allocation9 + $0xd0] sm:$0xff] }
 0x83b   :  { %9127 = vtanh.f32 %v2931_v15  ;;  %v3098_v15 = vld [vmem:[#allocation8 + $0x188] sm:$0xff]  ;;  %v3307_v24 = vld [vmem:[#allocation9 + $0xf0] sm:$0xff] }
 0x842   :  { %v9122_v38 = vpop.eup %9121 }
 0x843   :  { %v9124_v51 = vpop.eup %9123  ;;  %v2924_v59 = vmul.f32 0.5, %v9122_v38  ;;  %v3102_v38 = vld [vmem:[#allocation8 + $0x1a8] sm:$0xff] }
 0x844   :  { %v2928_v19 = vmul.f32 0.5, %v9124_v51  ;;  %v9126_v23 = vpop.eup %9125  ;;  %v10114_v51 = vpack.c.bf16 %v3093_v9, %v3089_v4  ;;  %v3291_v4 = vld [vmem:[#allocation9 + $0x70] sm:$0xff] }
 0x845   :  { %v2925_v25 = vadd.f32 0.5, %v2924_v59  ;;  %v9128_v43 = vpop.eup %9127  ;;  %v10117_v59 = vpack.c.bf16 %v3102_v38, %v3098_v15  ;;  %v7906_v9 = vpack.c.bf16 %v3291_v4, %v3287_v63  ;;  %v3294_v15 = vld [vmem:[#allocation9 + $0x88] sm:$0xff]  ;;  %v3312_v4 = vld [vmem:[#allocation9 + $0x118] sm:$0xff] }
 0x846   :  { %v2929_v12 = vadd.f32 0.5, %v2928_v19  ;;  %v2933_v46 = vmul.f32 0.5, %v9128_v43  ;;  %v3097_v19 = vld [vmem:[#allocation8 + $0x180] sm:$0xff]  ;;  %v3298_v38 = vld [vmem:[#allocation9 + $0xa8] sm:$0xff] }
 0x847   :  { %v2936_v61 = vmul.f32 %v9126_v23, %v2925_v25  ;;  %v3101_v25 = vld [vmem:[#allocation8 + $0x1a0] sm:$0xff]  ;;  %v3106_v23 = vld [vmem:[#allocation8 + $0x1c8] sm:$0xff] }
 0x848   :  { %v2935_v50 = vmul.f32 %v2929_v12, %v9960_v39  ;;  %v2934_v58 = vadd.f32 0.5, %v2933_v46  ;;  %v10085_v39 = vpack.c.bf16 %v3062_v18, %v3058_v0  ;;  %v3110_v12 = vld [vmem:[#allocation8 + $0x1e8] sm:$0xff]  ;;  %v3105_v43 = vld [vmem:[#allocation8 + $0x1c0] sm:$0xff]  ;;  %v3280_v18 = vld [vmem:[#allocation9 + $0x18] sm:$0xff] }
 0x849   :  { %v3109_v46 = vld [vmem:[#allocation8 + $0x1e0] sm:$0xff]  ;;  %v3282_v0 = vld [vmem:[#allocation9 + $0x28] sm:$0xff] }
 0x84a   :  { %v10074_v20 = vadd.f32 %v2936_v61, %v2935_v50  ;;  %v10120_v61 = vpack.c.bf16 %v3101_v25, %v3097_v19  ;;  %v10123_v50 = vpack.c.bf16 %v3110_v12, %v3106_v23  ;;  %v10126_v6 = vpack.c.bf16 %v3109_v46, %v3105_v43  ;;  %v3296_v19 = vld [vmem:[#allocation9 + $0x98] sm:$0xff]  ;;  %v3293_v12 = vld [vmem:[#allocation9 + $0x80] sm:$0xff]  ;;  %v3314_v63 = vld [vmem:[#allocation9 + $0x128] sm:$0xff] }
 0x84b   :  { %v7876_v25 = vpack.c.bf16 %v3298_v38, %v3294_v15  ;;  %v3300_v23 = vld [vmem:[#allocation9 + $0xb8] sm:$0xff]  ;;  %v3297_v43 = vld [vmem:[#allocation9 + $0xa0] sm:$0xff] }
 0x84c   :  { %9129 = vtanh.f32 %v10074_v20  ;;  %v7908_v46 = vpack.c.bf16 %v3300_v23, %v3296_v19  ;;  %v3316_v15 = vld [vmem:[#allocation9 + $0x138] sm:$0xff]  ;;  %v3309_v38 = vld [vmem:[#allocation9 + $0x100] sm:$0xff] }
 0x84d   :  { %v3313_v19 = vld [vmem:[#allocation9 + $0x120] sm:$0xff] }
 0x84e   :  { %v7886_v23 = vpack.c.bf16 %v3313_v19, %v3309_v38  ;;  %v3327_v38 = vld [vmem:[#allocation9 + $0x190] sm:$0xff] }
 0x84f   :  { %v3331_v19 = vld [vmem:[#allocation9 + $0x1b0] sm:$0xff] }
 0x853   :  { %v10077_v52 = vpop.f32.mrb[22].mxu0 }
 0x854   :  { %v10079_v14 = vpop.f32.mrb[23].mxu0 }
 0x856   :  { %v9130_v8 = vpop.eup %9129 }
 0x857   :  { %v10083_v55 = vmul.f32 %v9130_v8, %v2934_v58  ;;  %v10132_v58 = vpack.c.bf16 %v3282_v0, %v3278_v7  ;;  %v3284_v8 = vld [vmem:[#allocation9 + $0x38] sm:$0xff]  ;;  %v7878_v7 = vpack.c.bf16 %v3297_v43, %v3293_v12  ;;  %v3295_v0 = vld [vmem:[#allocation9 + $0x90] sm:$0xff] }
 0x858   :  { %v10134_v3 = vpack.c.bf16 %v3284_v8, %v3280_v18  ;;  %v3299_v18 = vld [vmem:[#allocation9 + $0xb0] sm:$0xff] }
 0x859   :  { %3037 = vmatmul.mubr.f32.vlgmr.msra.gmra.mrb[24].mxu1 %v10083_v55  ;;  %7869 = vmatprep.subr.bf16.mxu0 %v10132_v58  ;;  %v7910_v8 = vpack.c.bf16 %v3299_v18, %v3295_v0  ;;  %v3311_v12 = vld [vmem:[#allocation9 + $0x110] sm:$0xff]  ;;  %v3322_v0 = vld [vmem:[#allocation9 + $0x168] sm:$0xff]  ;;  %v3320_v18 = vld [vmem:[#allocation9 + $0x158] sm:$0xff] }
 0x85a   :  { %7807 = vmatpush1.bf16.msra.mxu1 %v10081_v30  ;;  %3177 = vmatprep.mubr.f32.mxu1 %v9433_v42  ;;  %v3315_v43 = vld [vmem:[#allocation9 + $0x130] sm:$0xff] }
 0x85b   :  { %7809 = vmatprep.subr.bf16.mxu1 %v10085_v39  ;;  %7871 = vmatpush1.bf16.msra.mxu0 %v10136_v1 }
 0x85e   :  { %7811 = vmatpush1.bf16.msra.mxu1 %v10089_v21 }
 0x85f   :  { %7813 = vmatprep.subr.bf16.mxu1 %v10093_v27 }
 0x862   :  { %7815 = vmatpush1.bf16.msra.mxu1 %v10096_v54 }
 0x863   :  { %7817 = vmatprep.subr.bf16.mxu1 %v10099_v57 }
 0x866   :  { %7819 = vmatpush1.bf16.msra.mxu1 %v10102_v36 }
 0x867   :  { %7821 = vmatprep.subr.bf16.mxu1 %v10105_v40 }
 0x86a   :  { %7823 = vmatpush1.bf16.msra.mxu1 %v10108_v29 }
 0x86b   :  { %7825 = vmatprep.subr.bf16.mxu1 %v10111_v53 }
 0x86e   :  { %7827 = vmatpush1.bf16.msra.mxu1 %v10114_v51 }
 0x86f   :  { %7829 = vmatprep.subr.bf16.mxu1 %v10117_v59 }
 0x872   :  { %7831 = vmatpush1.bf16.msra.mxu1 %v10120_v61 }
 0x873   :  { %7833 = vmatprep.subr.bf16.mxu1 %v10123_v50 }
 0x876   :  { %7835 = vmatpush1.bf16.msra.mxu1 %v10126_v6 }
 0x877   :  { %7901 = vmatprep.subr.bf16.mxu1 %v10134_v3 }
 0x879   :  { %3178 = vmatmul.mubr.f32.vlgmr.msra.gmra.mrb[6].mxu1 %v10038_v33  ;;  %v3286_v33 = vld [vmem:[#allocation9 + $0x48] sm:$0xff] }
 0x87a   :  { %3476 = vmatprep.mubr.f32.mxu1 %v9433_v42  ;;  %7903 = vmatpush1.bf16.msra.mxu1 %v10139_v48  ;;  %v7872_v11 = vpack.c.bf16 %v3290_v49, %v3286_v33  ;;  %v3308_v33 = vld [vmem:[#allocation9 + $0xf8] sm:$0xff]  ;;  %v3301_v49 = vld [vmem:[#allocation9 + $0xc0] sm:$0xff] }
 0x87b   :  { %7905 = vmatprep.subr.bf16.mxu1 %v7904_v41  ;;  %v7882_v32 = vpack.c.bf16 %v3305_v10, %v3301_v49  ;;  %v7914_v41 = vpack.c.bf16 %v3307_v24, %v3303_v13  ;;  %v3319_v49 = vld [vmem:[#allocation9 + $0x150] sm:$0xff]  ;;  %v3330_v13 = vld [vmem:[#allocation9 + $0x1a8] sm:$0xff]  ;;  %v3328_v24 = vld [vmem:[#allocation9 + $0x198] sm:$0xff] }
 0x87c   :  { %7873 = vmatprep.subr.bf16.mxu0 %v7872_v11  ;;  %v7912_v11 = vpack.c.bf16 %v3308_v33, %v3304_v31  ;;  %v3321_v31 = vld [vmem:[#allocation9 + $0x160] sm:$0xff]  ;;  %v3323_v10 = vld [vmem:[#allocation9 + $0x170] sm:$0xff] }
 0x87d   :  { %7875 = vmatpush1.bf16.msra.mxu0 %v7874_v28  ;;  %v3310_v28 = vld [vmem:[#allocation9 + $0x108] sm:$0xff]  ;;  %v7890_v33 = vpack.c.bf16 %v3321_v31, %v3317_v34  ;;  %v3339_v31 = vld [vmem:[#allocation9 + $0x1f0] sm:$0xff] }
 0x87e   :  { %7907 = vmatpush1.bf16.msra.mxu1 %v7906_v9  ;;  %7877 = vmatprep.subr.bf16.mxu0 %v7876_v25  ;;  %v7884_v9 = vpack.c.bf16 %v3314_v63, %v3310_v28  ;;  %v7916_v25 = vpack.c.bf16 %v3316_v15, %v3312_v4  ;;  %v3332_v28 = vld [vmem:[#allocation9 + $0x1b8] sm:$0xff]  ;;  %v3325_v63 = vld [vmem:[#allocation9 + $0x180] sm:$0xff] }
 0x87f   :  { %7909 = vmatprep.subr.bf16.mxu1 %v7908_v46  ;;  %v7918_v46 = vpack.c.bf16 %v3315_v43, %v3311_v12  ;;  %v3329_v4 = vld [vmem:[#allocation9 + $0x1a0] sm:$0xff]  ;;  %v3338_v12 = vld [vmem:[#allocation9 + $0x1e8] sm:$0xff]  ;;  %v3336_v43 = vld [vmem:[#allocation9 + $0x1d8] sm:$0xff] }
 0x880   :  { %v7894_v15 = vpack.c.bf16 %v3329_v4, %v3325_v63 }
 0x881   :  { %7879 = vmatpush1.bf16.msra.mxu0 %v7878_v7  ;;  %v3318_v7 = vld [vmem:[#allocation9 + $0x148] sm:$0xff] }
 0x882   :  { %7911 = vmatpush1.bf16.msra.mxu1 %v7910_v8  ;;  %7881 = vmatprep.subr.bf16.mxu0 %v7880_v35  ;;  %v7888_v8 = vpack.c.bf16 %v3322_v0, %v3318_v7  ;;  %v7920_v35 = vpack.c.bf16 %v3324_v26, %v3320_v18  ;;  %v3333_v18 = vld [vmem:[#allocation9 + $0x1c0] sm:$0xff]  ;;  %v3335_v26 = vld [vmem:[#allocation9 + $0x1d0] sm:$0xff] }
 0x883   :  { %7913 = vmatprep.subr.bf16.mxu1 %v7912_v11  ;;  %v7922_v11 = vpack.c.bf16 %v3323_v10, %v3319_v49  ;;  %v7930_v49 = vpack.c.bf16 %v3339_v31, %v3335_v26 }
 0x885   :  { %7883 = vmatpush1.bf16.msra.mxu0 %v7882_v32  ;;  %v3326_v32 = vld [vmem:[#allocation9 + $0x188] sm:$0xff] }
 0x886   :  { %7915 = vmatpush1.bf16.msra.mxu1 %v7914_v41  ;;  %7885 = vmatprep.subr.bf16.mxu0 %v7884_v9  ;;  %v7892_v41 = vpack.c.bf16 %v3330_v13, %v3326_v32  ;;  %v7924_v9 = vpack.c.bf16 %v3332_v28, %v3328_v24  ;;  %v3490_v32 = vld [vmem:[#allocation11 + $0x38] sm:$0xff] }
 0x887   :  { %7917 = vmatprep.subr.bf16.mxu1 %v7916_v25  ;;  %v3334_v25 = vld [vmem:[#allocation9 + $0x1c8] sm:$0xff] }
 0x888   :  { %v7896_v7 = vpack.c.bf16 %v3338_v12, %v3334_v25  ;;  %v8947_v12 = vadd.f32 %v10079_v14, %v9760_v16  ;;  %v3487_v14 = vld [vmem:[#allocation11 + $0x20] sm:$0xff] }
 0x889   :  { %7887 = vmatpush1.bf16.msra.mxu0 %v7886_v23  ;;  %v7926_v23 = vpack.c.bf16 %v3331_v19, %v3327_v38 }
 0x88a   :  { %7919 = vmatpush1.bf16.msra.mxu1 %v7918_v46  ;;  %7889 = vmatprep.subr.bf16.mxu0 %v7888_v8  ;;  %v3340_v46 = vld [vmem:[#allocation9 + $0x1f8] sm:$0xff]  ;;  %v3337_v8 = vld [vmem:[#allocation9 + $0x1e0] sm:$0xff] }
 0x88b   :  { %7921 = vmatprep.subr.bf16.mxu1 %v7920_v35  ;;  %v7928_v0 = vpack.c.bf16 %v3340_v46, %v3336_v43  ;;  %v7898_v34 = vpack.c.bf16 %v3337_v8, %v3333_v18  ;;  %v3484_v35 = vld [vmem:[#allocation11 + $0x8] sm:$0xff]  ;;  %v3268_v43 = vmul.f32 0.5, %v8947_v12  ;;  %v3493_v12 = vld [vmem:[#allocation11 + $0x50] sm:$0xff] }
 0x88d   :  { %7891 = vmatpush1.bf16.msra.mxu0 %v7890_v33  ;;  %v3488_v33 = vld [vmem:[#allocation11 + $0x28] sm:$0xff] }
 0x88e   :  { %7923 = vmatpush1.bf16.msra.mxu1 %v7922_v11  ;;  %7893 = vmatprep.subr.bf16.mxu0 %v7892_v41  ;;  %v7932_v10 = vpack.c.bf16 %v3488_v33, %v3484_v35  ;;  %v3486_v11 = vld [vmem:[#allocation11 + $0x18] sm:$0xff] }
 0x88f   :  { %7925 = vmatprep.subr.bf16.mxu1 %v7924_v9  ;;  %v7964_v13 = vpack.c.bf16 %v3490_v32, %v3486_v11  ;;  %v3485_v11 = vld [vmem:[#allocation11 + $0x10] sm:$0xff] }
 0x890   :  { %v3489_v32 = vld [vmem:[#allocation11 + $0x30] sm:$0xff] }
 0x891   :  { %7895 = vmatpush1.bf16.msra.mxu0 %v7894_v15 }
 0x892   :  { %7927 = vmatpush1.bf16.msra.mxu1 %v7926_v23  ;;  %7897 = vmatprep.subr.bf16.mxu0 %v7896_v7  ;;  %v8946_v23 = vadd.f32 %v10077_v52, %v9753_v5 }
 0x893   :  { %7929 = vmatprep.subr.bf16.mxu1 %v7928_v0 }
 0x895   :  { %7899 = vmatpush1.bf16.msra.mxu0 %v7898_v34 }
 0x896   :  { %7931 = vmatpush1.bf16.msra.mxu1 %v7930_v49  ;;  %7933 = vmatprep.subr.bf16.mxu0 %v7932_v10  ;;  %v3483_v10 = vld [vmem:[#allocation11] sm:$0xff] }
 0x897   :  { %7965 = vmatprep.subr.bf16.mxu1 %v7964_v13  ;;  %v3492_v13 = vld [vmem:[#allocation11 + $0x48] sm:$0xff] }
 0x92c   :  { %v3038_v24 = vpop.f32.mrb[24].mxu1 }
 0x92d   :  { %v3039_v41 = vadd.f32 %v3038_v24, %v9899_v37  ;;  %v3040_v28 = vpop.f32.mrb[25].mxu1  ;;  %v3496_v24 = vld [vmem:[#allocation11 + $0x68] sm:$0xff] }
 0x92e   :  { %v3041_v63 = vadd.f32 %v3040_v28, %v9902_v47  ;;  %v3498_v28 = vld [vmem:[#allocation11 + $0x78] sm:$0xff] }
 0x92f   :  { %3043 = vst [vmem:[%s10710_s12 + $0x20] sm:$0xff] %v3039_v41  ;;  %v3494_v41 = vld [vmem:[#allocation11 + $0x58] sm:$0xff] }
 0x930   :  { %3044 = vst [vmem:[%s10710_s12 + $0x28] sm:$0xff] %v3041_v63 }
 0x94c   :  { %v3179_v4 = vpop.f32.mrb[6].mxu1 }
 0x94d   :  { %v8930_v9 = vadd.f32 %v3179_v4, %v9744_v62  ;;  %v3181_v15 = vpop.f32.mrb[7].mxu1 }
 0x94e   :  { %v8931_v38 = vadd.f32 %v3181_v15, %v9748_v2  ;;  %v7966_v15 = vpack.c.bf16 %v3489_v32, %v3485_v11  ;;  %v3512_v11 = vld [vmem:[#allocation11 + $0xe8] sm:$0xff]  ;;  %v3510_v32 = vld [vmem:[#allocation11 + $0xd8] sm:$0xff] }
 0x94f   :  { %v3259_v19 = vmul.f32 0.5, %v8930_v9  ;;  %v7934_v9 = vpack.c.bf16 %v3487_v14, %v3483_v10  ;;  %v3505_v10 = vld [vmem:[#allocation11 + $0xb0] sm:$0xff]  ;;  %v3508_v14 = vld [vmem:[#allocation11 + $0xc8] sm:$0xff] }
 0x950   :  { %v3263_v25 = vmul.f32 0.5, %v8931_v38  ;;  %v3491_v38 = vld [vmem:[#allocation11 + $0x40] sm:$0xff] }
 0x951   :  { %9131 = vtanh.f32 %v3259_v19 }
 0x952   :  { %9133 = vtanh.f32 %v3263_v25  ;;  %v7936_v25 = vpack.c.bf16 %v3496_v24, %v3492_v13  ;;  %v3514_v13 = vld [vmem:[#allocation11 + $0xf8] sm:$0xff] }
 0x953   :  { %9135 = vtanh.f32 %v8946_v23  ;;  %v7968_v23 = vpack.c.bf16 %v3498_v28, %v3494_v41  ;;  %v3507_v28 = vld [vmem:[#allocation11 + $0xc0] sm:$0xff] }
 0x954   :  { %9137 = vtanh.f32 %v3268_v43  ;;  %v3497_v43 = vld [vmem:[#allocation11 + $0x70] sm:$0xff] }
 0x95b   :  { %v9132_v46 = vpop.eup %9131 }
 0x95c   :  { %v9134_v7 = vpop.eup %9133  ;;  %v3261_v0 = vmul.f32 0.5, %v9132_v46  ;;  %v3500_v46 = vld [vmem:[#allocation11 + $0x88] sm:$0xff] }
 0x95d   :  { %v3265_v18 = vmul.f32 0.5, %v9134_v7  ;;  %v9136_v26 = vpop.eup %9135  ;;  %v3504_v7 = vld [vmem:[#allocation11 + $0xa8] sm:$0xff] }
 0x95e   :  { %v3262_v8 = vadd.f32 0.5, %v3261_v0  ;;  %v9138_v52 = vpop.eup %9137  ;;  %v3502_v0 = vld [vmem:[#allocation11 + $0x98] sm:$0xff] }
 0x95f   :  { %v3266_v34 = vadd.f32 0.5, %v3265_v18  ;;  %v3270_v49 = vmul.f32 0.5, %v9138_v52  ;;  %v3506_v18 = vld [vmem:[#allocation11 + $0xb8] sm:$0xff] }
 0x960   :  { %v3273_v31 = vmul.f32 %v9136_v26, %v3262_v8  ;;  %v7970_v26 = vpack.c.bf16 %v3497_v43, %v3493_v12  ;;  %v7972_v52 = vpack.c.bf16 %v3506_v18, %v3502_v0  ;;  %v3522_v12 = vld [vmem:[#allocation11 + $0x138] sm:$0xff]  ;;  %v3519_v0 = vld [vmem:[#allocation11 + $0x120] sm:$0xff] }
 0x961   :  { %v3272_v35 = vmul.f32 %v3266_v34, %v10035_v60  ;;  %v3271_v63 = vadd.f32 0.5, %v3270_v49  ;;  %v3495_v60 = vld [vmem:[#allocation11 + $0x60] sm:$0xff]  ;;  %v3501_v49 = vld [vmem:[#allocation11 + $0x90] sm:$0xff] }
 0x962   :  { %v7938_v8 = vpack.c.bf16 %v3495_v60, %v3491_v38  ;;  %v3499_v34 = vld [vmem:[#allocation11 + $0x80] sm:$0xff]  ;;  %v7974_v41 = vpack.c.bf16 %v3505_v10, %v3501_v49  ;;  %v3513_v38 = vld [vmem:[#allocation11 + $0xf0] sm:$0xff]  ;;  %v3516_v60 = vld [vmem:[#allocation11 + $0x108] sm:$0xff] }
 0x963   :  { %v10159_v33 = vadd.f32 %v3273_v31, %v3272_v35  ;;  %v3503_v31 = vld [vmem:[#allocation11 + $0xa0] sm:$0xff]  ;;  %v7940_v35 = vpack.c.bf16 %v3504_v7, %v3500_v46  ;;  %v3530_v49 = vld [vmem:[#allocation11 + $0x178] sm:$0xff] }
 0x964   :  { %v7942_v24 = vpack.c.bf16 %v3503_v31, %v3499_v34  ;;  %v3515_v7 = vld [vmem:[#allocation11 + $0x100] sm:$0xff]  ;;  %v3521_v34 = vld [vmem:[#allocation11 + $0x130] sm:$0xff]  ;;  %v3524_v31 = vld [vmem:[#allocation11 + $0x148] sm:$0xff] }
 0x965   :  { %9139 = vtanh.f32 %v10159_v33  ;;  %v7950_v10 = vpack.c.bf16 %v3519_v0, %v3515_v7  ;;  %v3537_v7 = vld [vmem:[#allocation11 + $0x1b0] sm:$0xff]  ;;  %v3540_v0 = vld [vmem:[#allocation11 + $0x1c8] sm:$0xff] }
 0x96f   :  { %v9140_v4 = vpop.eup %9139 }
 0x970   :  { %v10162_v19 = vmul.f32 %v9140_v4, %v3271_v63  ;;  %v3511_v63 = vld [vmem:[#allocation11 + $0xe0] sm:$0xff]  ;;  %v7944_v4 = vpack.c.bf16 %v3512_v11, %v3508_v14 }
 0x971   :  { %v7946_v43 = vpack.c.bf16 %v3511_v63, %v3507_v28  ;;  %v3523_v11 = vld [vmem:[#allocation11 + $0x140] sm:$0xff]  ;;  %v3529_v28 = vld [vmem:[#allocation11 + $0x170] sm:$0xff]  ;;  %v3532_v63 = vld [vmem:[#allocation11 + $0x188] sm:$0xff] }
 0x972   :  { %3406 = vmatmul.mubr.f32.vlgmr.msra.gmra.mrb[40].mxu0 %v10162_v19  ;;  %3477 = vmatmul.mubr.f32.vlgmr.msra.gmra.mrb[26].mxu1 %v10162_v19 }
 0x973   :  { %7935 = vmatpush1.bf16.msra.mxu0 %v7934_v9  ;;  %7967 = vmatpush1.bf16.msra.mxu1 %v7966_v15  ;;  %v7976_v9 = vpack.c.bf16 %v3514_v13, %v3510_v32  ;;  %v3509_v15 = vld [vmem:[#allocation11 + $0xd0] sm:$0xff]  ;;  %v3527_v32 = vld [vmem:[#allocation11 + $0x160] sm:$0xff] }
 0x974   :  { %7937 = vmatprep.subr.bf16.mxu0 %v7936_v25  ;;  %7969 = vmatprep.subr.bf16.mxu1 %v7968_v23  ;;  %v3520_v25 = vld [vmem:[#allocation11 + $0x128] sm:$0xff]  ;;  %v3518_v23 = vld [vmem:[#allocation11 + $0x118] sm:$0xff]  ;;  %v7978_v46 = vpack.c.bf16 %v3513_v38, %v3509_v15  ;;  %v7954_v38 = vpack.c.bf16 %v3527_v32, %v3523_v11  ;;  %v3545_v11 = vld [vmem:[#allocation11 + $0x1f0] sm:$0xff] }
 0x975   :  { %3611 = vmatprep.mubr.f32.mxu0 %v9433_v42  ;;  %3682 = vmatprep.mubr.f32.mxu1 %v9433_v42  ;;  %v7948_v18 = vpack.c.bf16 %v3520_v25, %v3516_v60  ;;  %v3538_v15 = vld [vmem:[#allocation11 + $0x1b8] sm:$0xff]  ;;  %v3531_v25 = vld [vmem:[#allocation11 + $0x180] sm:$0xff] }
 0x977   :  { %7939 = vmatpush1.bf16.msra.mxu0 %v7938_v8  ;;  %7971 = vmatpush1.bf16.msra.mxu1 %v7970_v26  ;;  %v7980_v8 = vpack.c.bf16 %v3522_v12, %v3518_v23  ;;  %v3517_v26 = vld [vmem:[#allocation11 + $0x110] sm:$0xff]  ;;  %v3535_v23 = vld [vmem:[#allocation11 + $0x1a0] sm:$0xff] }
 0x978   :  { %7941 = vmatprep.subr.bf16.mxu0 %v7940_v35  ;;  %7973 = vmatprep.subr.bf16.mxu1 %v7972_v52  ;;  %v3528_v35 = vld [vmem:[#allocation11 + $0x168] sm:$0xff]  ;;  %v3526_v52 = vld [vmem:[#allocation11 + $0x158] sm:$0xff]  ;;  %v7982_v14 = vpack.c.bf16 %v3521_v34, %v3517_v26  ;;  %v7958_v34 = vpack.c.bf16 %v3535_v23, %v3531_v25  ;;  %v3729_v25 = vld [vmem:[#allocation12 + $0x90] sm:$0xff] }
 0x979   :  { %v7952_v13 = vpack.c.bf16 %v3528_v35, %v3524_v31  ;;  %v3546_v26 = vld [vmem:[#allocation11 + $0x1f8] sm:$0xff]  ;;  %v3539_v35 = vld [vmem:[#allocation11 + $0x1c0] sm:$0xff] }
 0x97b   :  { %7943 = vmatpush1.bf16.msra.mxu0 %v7942_v24  ;;  %7975 = vmatpush1.bf16.msra.mxu1 %v7974_v41  ;;  %v7984_v24 = vpack.c.bf16 %v3530_v49, %v3526_v52  ;;  %v3525_v41 = vld [vmem:[#allocation11 + $0x150] sm:$0xff] }
 0x97c   :  { %7945 = vmatprep.subr.bf16.mxu0 %v7944_v4  ;;  %7977 = vmatprep.subr.bf16.mxu1 %v7976_v9  ;;  %v3536_v4 = vld [vmem:[#allocation11 + $0x1a8] sm:$0xff]  ;;  %v3534_v9 = vld [vmem:[#allocation11 + $0x198] sm:$0xff]  ;;  %v7986_v60 = vpack.c.bf16 %v3529_v28, %v3525_v41  ;;  %v3723_v28 = vld [vmem:[#allocation12 + $0x60] sm:$0xff] }
 0x97d   :  { %v7956_v12 = vpack.c.bf16 %v3536_v4, %v3532_v63  ;;  %v3725_v63 = vld [vmem:[#allocation12 + $0x70] sm:$0xff] }
 0x97e   :  { %v8010_v4 = vpack.c.bf16 %v3725_v63, %v3723_v28 }
 0x97f   :  { %7947 = vmatpush1.bf16.msra.mxu0 %v7946_v43  ;;  %7979 = vmatpush1.bf16.msra.mxu1 %v7978_v46  ;;  %v7988_v43 = vpack.c.bf16 %v3538_v15, %v3534_v9  ;;  %v3533_v46 = vld [vmem:[#allocation11 + $0x190] sm:$0xff]  ;;  %v3728_v9 = vld [vmem:[#allocation12 + $0x88] sm:$0xff]  ;;  %v3730_v15 = vld [vmem:[#allocation12 + $0x98] sm:$0xff] }
 0x980   :  { %7949 = vmatprep.subr.bf16.mxu0 %v7948_v18  ;;  %7981 = vmatprep.subr.bf16.mxu1 %v7980_v8  ;;  %v3544_v18 = vld [vmem:[#allocation11 + $0x1e8] sm:$0xff]  ;;  %v3542_v8 = vld [vmem:[#allocation11 + $0x1d8] sm:$0xff]  ;;  %v7990_v31 = vpack.c.bf16 %v3537_v7, %v3533_v46  ;;  %v3731_v7 = vld [vmem:[#allocation12 + $0xa0] sm:$0xff] }
 0x981   :  { %v7960_v52 = vpack.c.bf16 %v3544_v18, %v3540_v0  ;;  %v7992_v49 = vpack.c.bf16 %v3546_v26, %v3542_v8  ;;  %v3733_v0 = vld [vmem:[#allocation12 + $0xb0] sm:$0xff]  ;;  %v3736_v8 = vld [vmem:[#allocation12 + $0xc8] sm:$0xff]  ;;  %v3738_v26 = vld [vmem:[#allocation12 + $0xd8] sm:$0xff] }
 0x982   :  { %v8018_v18 = vpack.c.bf16 %v3733_v0, %v3731_v7 }
 0x983   :  { %7951 = vmatpush1.bf16.msra.mxu0 %v7950_v10  ;;  %7983 = vmatpush1.bf16.msra.mxu1 %v7982_v14  ;;  %v3543_v10 = vld [vmem:[#allocation11 + $0x1e0] sm:$0xff]  ;;  %v3541_v14 = vld [vmem:[#allocation11 + $0x1d0] sm:$0xff] }
 0x984   :  { %7953 = vmatprep.subr.bf16.mxu0 %v7952_v13  ;;  %7985 = vmatprep.subr.bf16.mxu1 %v7984_v24  ;;  %v7962_v32 = vpack.c.bf16 %v3543_v10, %v3539_v35  ;;  %v7994_v13 = vpack.c.bf16 %v3545_v11, %v3541_v14  ;;  %v3726_v24 = vld [vmem:[#allocation12 + $0x78] sm:$0xff]  ;;  %v3737_v35 = vld [vmem:[#allocation12 + $0xd0] sm:$0xff]  ;;  %v3739_v11 = vld [vmem:[#allocation12 + $0xe0] sm:$0xff] }
 0x985   :  { %v3742_v10 = vld [vmem:[#allocation12 + $0xf8] sm:$0xff] }
 0x987   :  { %7955 = vmatpush1.bf16.msra.mxu0 %v7954_v38  ;;  %7987 = vmatpush1.bf16.msra.mxu1 %v7986_v60  ;;  %v8012_v38 = vpack.c.bf16 %v3730_v15, %v3728_v9  ;;  %v3727_v60 = vld [vmem:[#allocation12 + $0x80] sm:$0xff] }
 0x988   :  { %7957 = vmatprep.subr.bf16.mxu0 %v7956_v12  ;;  %7989 = vmatprep.subr.bf16.mxu1 %v7988_v43  ;;  %v8014_v23 = vpack.c.bf16 %v3729_v25, %v3727_v60  ;;  %v3732_v12 = vld [vmem:[#allocation12 + $0xa8] sm:$0xff]  ;;  %v3734_v43 = vld [vmem:[#allocation12 + $0xb8] sm:$0xff]  ;;  %v3822_v60 = vld [vmem:[#allocation8 + $0x10] sm:$0xff] }
 0x989   :  { %v8016_v46 = vpack.c.bf16 %v3734_v43, %v3732_v12  ;;  %v3826_v25 = vld [vmem:[#allocation8 + $0x30] sm:$0xff]  ;;  %v3831_v12 = vld [vmem:[#allocation8 + $0x58] sm:$0xff] }
 0x98a   :  { %v3835_v43 = vld [vmem:[#allocation8 + $0x78] sm:$0xff]  ;;  %v10207_v0 = vpack.c.bf16 %v3826_v25, %v3822_v60  ;;  %v3878_v60 = vld [vmem:[#allocation8 + $0x1d0] sm:$0xff] }
 0x98b   :  { %7959 = vmatpush1.bf16.msra.mxu0 %v7958_v34  ;;  %7991 = vmatpush1.bf16.msra.mxu1 %v7990_v31  ;;  %v8020_v34 = vpack.c.bf16 %v3738_v26, %v3736_v8  ;;  %v3735_v31 = vld [vmem:[#allocation12 + $0xc0] sm:$0xff]  ;;  %v3830_v8 = vld [vmem:[#allocation8 + $0x50] sm:$0xff] }
 0x98c   :  { %7961 = vmatprep.subr.bf16.mxu0 %v7960_v52  ;;  %7993 = vmatprep.subr.bf16.mxu1 %v7992_v49  ;;  %v8022_v52 = vpack.c.bf16 %v3737_v35, %v3735_v31  ;;  %v3740_v49 = vld [vmem:[#allocation12 + $0xe8] sm:$0xff]  ;;  %v3834_v26 = vld [vmem:[#allocation8 + $0x70] sm:$0xff]  ;;  %v3843_v31 = vld [vmem:[#allocation8 + $0xb8] sm:$0xff] }
 0x98d   :  { %v8024_v14 = vpack.c.bf16 %v3742_v10, %v3740_v49  ;;  %v10215_v35 = vpack.c.bf16 %v3834_v26, %v3830_v8  ;;  %v3838_v49 = vld [vmem:[#allocation8 + $0x90] sm:$0xff]  ;;  %v4063_v26 = vld [vmem:[#allocation9 + $0x78] sm:$0xff] }
 0x98e   :  { %v3842_v10 = vld [vmem:[#allocation8 + $0xb0] sm:$0xff] }
 0x98f   :  { %7963 = vmatpush1.bf16.msra.mxu0 %v7962_v32  ;;  %7995 = vmatpush1.bf16.msra.mxu1 %v7994_v13  ;;  %v3741_v32 = vld [vmem:[#allocation12 + $0xf0] sm:$0xff] }
 0x990   :  { %8029 = vmatprep.subr.bf16.mxu1 %v10066_v45  ;;  %v3712_v45 = vld [vmem:[#allocation12 + $0x8] sm:$0xff]  ;;  %v8026_v13 = vpack.c.bf16 %v3741_v32, %v3739_v11  ;;  %v3851_v11 = vld [vmem:[#allocation8 + $0xf8] sm:$0xff]  ;;  %v10222_v32 = vpack.c.bf16 %v3842_v10, %v3838_v49  ;;  %v3882_v25 = vld [vmem:[#allocation8 + $0x1f0] sm:$0xff] }
 0x992   :  { %3612 = vmatmul.mubr.f32.vlgmr.msra.gmra.mrb[40].mxu0 %v10083_v55  ;;  %3683 = vmatmul.mubr.f32.vlgmr.msra.gmra.mrb[26].mxu1 %v10083_v55 }
 0x993   :  { %8031 = vmatpush1.bf16.msra.mxu1 %v10081_v30  ;;  %3948 = vmatprep.mubr.f32.mxu1 %v9433_v42  ;;  %v3714_v30 = vld [vmem:[#allocation12 + $0x18] sm:$0xff] }
 0x994   :  { %8033 = vmatprep.subr.bf16.mxu1 %v10085_v39  ;;  %3807 = vmatprep.mubr.f32.mxu0 %v9433_v42  ;;  %v7996_v55 = vpack.c.bf16 %v3714_v30, %v3712_v45  ;;  %v3711_v39 = vld [vmem:[#allocation12] sm:$0xff]  ;;  %v3823_v45 = vld [vmem:[#allocation8 + $0x18] sm:$0xff] }
 0x995   :  { %v3827_v30 = vld [vmem:[#allocation8 + $0x38] sm:$0xff] }
 0x996   :  { %7997 = vmatprep.subr.bf16.mxu0 %v7996_v55  ;;  %v10192_v55 = vpack.c.bf16 %v3827_v30, %v3823_v45  ;;  %v3846_v45 = vld [vmem:[#allocation8 + $0xd0] sm:$0xff] }
 0x997   :  { %8035 = vmatpush1.bf16.msra.mxu1 %v10089_v21  ;;  %v3713_v21 = vld [vmem:[#allocation12 + $0x10] sm:$0xff] }
 0x998   :  { %8037 = vmatprep.subr.bf16.mxu1 %v10093_v27  ;;  %v7998_v27 = vpack.c.bf16 %v3713_v21, %v3711_v39  ;;  %v3850_v30 = vld [vmem:[#allocation8 + $0xf0] sm:$0xff] }
 0x99a   :  { %7999 = vmatpush1.bf16.msra.mxu0 %v7998_v27 }
 0x99b   :  { %8039 = vmatpush1.bf16.msra.mxu1 %v10096_v54  ;;  %v3716_v54 = vld [vmem:[#allocation12 + $0x28] sm:$0xff] }
 0x99c   :  { %8041 = vmatprep.subr.bf16.mxu1 %v10099_v57  ;;  %v3718_v57 = vld [vmem:[#allocation12 + $0x38] sm:$0xff] }
 0x99f   :  { %8043 = vmatpush1.bf16.msra.mxu1 %v10102_v36  ;;  %v8000_v36 = vpack.c.bf16 %v3718_v57, %v3716_v54 }
 0x9a0   :  { %8045 = vmatprep.subr.bf16.mxu1 %v10105_v40  ;;  %v3715_v40 = vld [vmem:[#allocation12 + $0x20] sm:$0xff] }
 0x9a1   :  { %8001 = vmatprep.subr.bf16.mxu0 %v8000_v36 }
 0x9a3   :  { %8047 = vmatpush1.bf16.msra.mxu1 %v10108_v29  ;;  %v3717_v29 = vld [vmem:[#allocation12 + $0x30] sm:$0xff] }
 0x9a4   :  { %8049 = vmatprep.subr.bf16.mxu1 %v10111_v53  ;;  %v8002_v53 = vpack.c.bf16 %v3717_v29, %v3715_v40 }
 0x9a6   :  { %8003 = vmatpush1.bf16.msra.mxu0 %v8002_v53 }
 0x9a7   :  { %8051 = vmatpush1.bf16.msra.mxu1 %v10114_v51  ;;  %v3720_v51 = vld [vmem:[#allocation12 + $0x48] sm:$0xff] }
 0x9a8   :  { %8053 = vmatprep.subr.bf16.mxu1 %v10117_v59  ;;  %v3722_v59 = vld [vmem:[#allocation12 + $0x58] sm:$0xff] }
 0x9ab   :  { %8055 = vmatpush1.bf16.msra.mxu1 %v10120_v61  ;;  %v8004_v61 = vpack.c.bf16 %v3722_v59, %v3720_v51 }
 0x9ac   :  { %8057 = vmatprep.subr.bf16.mxu1 %v10123_v50  ;;  %v3719_v50 = vld [vmem:[#allocation12 + $0x40] sm:$0xff] }
 0x9ad   :  { %8005 = vmatprep.subr.bf16.mxu0 %v8004_v61 }
 0x9af   :  { %8059 = vmatpush1.bf16.msra.mxu1 %v10126_v6  ;;  %v3721_v6 = vld [vmem:[#allocation12 + $0x50] sm:$0xff] }
 0x9b0   :  { %8093 = vmatprep.subr.bf16.mxu1 %v10132_v58  ;;  %v8006_v58 = vpack.c.bf16 %v3721_v6, %v3719_v50 }
 0x9b2   :  { %3949 = vmatmul.mubr.f32.vlgmr.msra.gmra.mrb[8].mxu1 %v10162_v19  ;;  %8007 = vmatpush1.bf16.msra.mxu0 %v8006_v58 }
 0x9b3   :  { %8095 = vmatpush1.bf16.msra.mxu1 %v10136_v1  ;;  %4176 = vmatprep.mubr.f32.mxu1 %v9433_v42  ;;  %v3724_v1 = vld [vmem:[#allocation12 + $0x68] sm:$0xff] }
 0x9b4   :  { %v8008_v41 = vpack.c.bf16 %v3726_v24, %v3724_v1 }
 0x9b6   :  { %8009 = vmatprep.subr.bf16.mxu0 %v8008_v41 }
 0x9b7   :  { %8011 = vmatpush1.bf16.msra.mxu0 %v8010_v4 }
 0x9b8   :  { %8013 = vmatprep.subr.bf16.mxu0 %v8012_v38 }
 0x9bb   :  { %8015 = vmatpush1.bf16.msra.mxu0 %v8014_v23 }
 0x9bc   :  { %8017 = vmatprep.subr.bf16.mxu0 %v8016_v46 }
 0x9bf   :  { %8019 = vmatpush1.bf16.msra.mxu0 %v8018_v18 }
 0x9c0   :  { %8021 = vmatprep.subr.bf16.mxu0 %v8020_v34  ;;  %v3839_v34 = vld [vmem:[#allocation8 + $0x98] sm:$0xff] }
 0x9c3   :  { %8023 = vmatpush1.bf16.msra.mxu0 %v8022_v52  ;;  %v10219_v52 = vpack.c.bf16 %v3843_v31, %v3839_v34  ;;  %v4056_v34 = vld [vmem:[#allocation9 + $0x40] sm:$0xff] }
 0x9c4   :  { %8025 = vmatprep.subr.bf16.mxu0 %v8024_v14  ;;  %v3847_v14 = vld [vmem:[#allocation8 + $0xd8] sm:$0xff]  ;;  %v4060_v31 = vld [vmem:[#allocation9 + $0x60] sm:$0xff] }
 0x9c5   :  { %v8098_v10 = vpack.c.bf16 %v4060_v31, %v4056_v34  ;;  %v4085_v34 = vld [vmem:[#allocation9 + $0x128] sm:$0xff]  ;;  %v4083_v31 = vld [vmem:[#allocation9 + $0x118] sm:$0xff] }
 0x9c7   :  { %8027 = vmatpush1.bf16.msra.mxu0 %v8026_v13  ;;  %v10225_v13 = vpack.c.bf16 %v3851_v11, %v3847_v14  ;;  %v4058_v14 = vld [vmem:[#allocation9 + $0x50] sm:$0xff] }
 0x9c8   :  { %8061 = vmatprep.subr.bf16.mxu0 %v10192_v55  ;;  %v4062_v11 = vld [vmem:[#allocation9 + $0x70] sm:$0xff] }
 0xa65   :  { %v3613_v39 = vpop.f32.mrb[40].mxu0  ;;  %v3684_v21 = vpop.f32.mrb[26].mxu1 }
 0xa66   :  { %v8968_v27 = vadd.f32 %v3613_v39, %v9805_v44  ;;  %v3615_v54 = vpop.f32.mrb[41].mxu0  ;;  %v3686_v57 = vpop.f32.mrb[27].mxu1  ;;  %v8970_v53 = vadd.f32 %v3684_v21, %v9813_v22  ;;  %v3855_v39 = vld [vmem:[#allocation8 + $0x118] sm:$0xff] }
 0xa67   :  { %v8969_v36 = vadd.f32 %v3615_v54, %v9808_v56  ;;  %v8971_v51 = vadd.f32 %v3686_v57, %v9819_v17  ;;  %v3859_v21 = vld [vmem:[#allocation8 + $0x138] sm:$0xff]  ;;  %v3854_v57 = vld [vmem:[#allocation8 + $0x110] sm:$0xff] }
 0xa68   :  { %v3693_v40 = vmul.f32 0.5, %v8968_v27  ;;  %v10228_v27 = vpack.c.bf16 %v3850_v30, %v3846_v45  ;;  %v10231_v54 = vpack.c.bf16 %v3859_v21, %v3855_v39  ;;  %v8130_v45 = vpack.c.bf16 %v4062_v11, %v4058_v14  ;;  %v4071_v39 = vld [vmem:[#allocation9 + $0xb8] sm:$0xff]  ;;  %v4064_v21 = vld [vmem:[#allocation9 + $0x80] sm:$0xff] }
 0xa69   :  { %v3697_v29 = vmul.f32 0.5, %v8969_v36  ;;  %v3702_v59 = vmul.f32 0.5, %v8971_v51  ;;  %v3858_v36 = vld [vmem:[#allocation8 + $0x130] sm:$0xff]  ;;  %v4080_v14 = vld [vmem:[#allocation9 + $0x100] sm:$0xff] }
 0xa6a   :  { %9141 = vtanh.f32 %v3693_v40  ;;  %v3863_v40 = vld [vmem:[#allocation8 + $0x158] sm:$0xff]  ;;  %v4084_v11 = vld [vmem:[#allocation9 + $0x120] sm:$0xff] }
 0xa6b   :  { %9143 = vtanh.f32 %v3697_v29  ;;  %v3867_v29 = vld [vmem:[#allocation8 + $0x178] sm:$0xff] }
 0xa6c   :  { %9145 = vtanh.f32 %v8970_v53  ;;  %v10234_v53 = vpack.c.bf16 %v3858_v36, %v3854_v57  ;;  %v10237_v51 = vpack.c.bf16 %v3867_v29, %v3863_v40  ;;  %v4068_v57 = vld [vmem:[#allocation9 + $0xa0] sm:$0xff]  ;;  %v4066_v29 = vld [vmem:[#allocation9 + $0x90] sm:$0xff] }
 0xa6d   :  { %9147 = vtanh.f32 %v3702_v59  ;;  %v3862_v59 = vld [vmem:[#allocation8 + $0x150] sm:$0xff]  ;;  %v8102_v40 = vpack.c.bf16 %v4068_v57, %v4064_v21  ;;  %v4093_v21 = vld [vmem:[#allocation9 + $0x168] sm:$0xff]  ;;  %v4091_v57 = vld [vmem:[#allocation9 + $0x158] sm:$0xff] }
 0xa74   :  { %v9142_v61 = vpop.eup %9141 }
 0xa75   :  { %v9144_v50 = vpop.eup %9143  ;;  %v3695_v6 = vmul.f32 0.5, %v9142_v61  ;;  %v3866_v61 = vld [vmem:[#allocation8 + $0x170] sm:$0xff] }
 0xa76   :  { %v3699_v58 = vmul.f32 0.5, %v9144_v50  ;;  %v9146_v24 = vpop.eup %9145  ;;  %v3871_v50 = vld [vmem:[#allocation8 + $0x198] sm:$0xff] }
 0xa77   :  { %v3696_v1 = vadd.f32 0.5, %v3695_v6  ;;  %v9148_v9 = vpop.eup %9147  ;;  %v3875_v6 = vld [vmem:[#allocation8 + $0x1b8] sm:$0xff] }
 0xa78   :  { %v3700_v41 = vadd.f32 0.5, %v3699_v58  ;;  %v3704_v15 = vmul.f32 0.5, %v9148_v9  ;;  %v10240_v58 = vpack.c.bf16 %v3866_v61, %v3862_v59  ;;  %v4070_v59 = vld [vmem:[#allocation9 + $0xb0] sm:$0xff] }
 0xa79   :  { %v3707_v28 = vmul.f32 %v9146_v24, %v3696_v1  ;;  %v10243_v1 = vpack.c.bf16 %v3875_v6, %v3871_v50  ;;  %v3870_v24 = vld [vmem:[#allocation8 + $0x190] sm:$0xff]  ;;  %v8134_v61 = vpack.c.bf16 %v4070_v59, %v4066_v29  ;;  %v4073_v50 = vld [vmem:[#allocation9 + $0xc8] sm:$0xff]  ;;  %v4088_v29 = vld [vmem:[#allocation9 + $0x140] sm:$0xff] }
 0xa7a   :  { %v3706_v63 = vmul.f32 %v3700_v41, %v10074_v20  ;;  %v3705_v46 = vadd.f32 0.5, %v3704_v15  ;;  %v10211_v20 = vpack.c.bf16 %v3835_v43, %v3831_v12  ;;  %v3874_v41 = vld [vmem:[#allocation8 + $0x1b0] sm:$0xff]  ;;  %v10252_v12 = vpack.c.bf16 %v3882_v25, %v3878_v60  ;;  %v4057_v43 = vld [vmem:[#allocation9 + $0x48] sm:$0xff]  ;;  %v4076_v60 = vld [vmem:[#allocation9 + $0xe0] sm:$0xff] }
 0xa7b   :  { %v10246_v9 = vpack.c.bf16 %v3874_v41, %v3870_v24  ;;  %v4077_v6 = vld [vmem:[#allocation9 + $0xe8] sm:$0xff]  ;;  %v4075_v24 = vld [vmem:[#allocation9 + $0xd8] sm:$0xff]  ;;  %v4092_v59 = vld [vmem:[#allocation9 + $0x160] sm:$0xff] }
 0xa7c   :  { %v10200_v4 = vadd.f32 %v3707_v28, %v3706_v63  ;;  %v3879_v28 = vld [vmem:[#allocation8 + $0x1d8] sm:$0xff]  ;;  %v8104_v41 = vpack.c.bf16 %v4077_v6, %v4073_v50  ;;  %v8114_v50 = vpack.c.bf16 %v4092_v59, %v4088_v29  ;;  %v4090_v6 = vld [vmem:[#allocation9 + $0x150] sm:$0xff]  ;;  %v4259_v29 = vld [vmem:[#allocation11 + $0x28] sm:$0xff] }
 0xa7d   :  { %v3883_v63 = vld [vmem:[#allocation8 + $0x1f8] sm:$0xff] }
 0xa7e   :  { %9149 = vtanh.f32 %v10200_v4  ;;  %v10249_v15 = vpack.c.bf16 %v3883_v63, %v3879_v28  ;;  %v4079_v28 = vld [vmem:[#allocation9 + $0xf8] sm:$0xff]  ;;  %v4072_v63 = vld [vmem:[#allocation9 + $0xc0] sm:$0xff] }
 0xa7f   :  { %v8136_v25 = vpack.c.bf16 %v4079_v28, %v4075_v24  ;;  %v4094_v24 = vld [vmem:[#allocation9 + $0x170] sm:$0xff]  ;;  %v4097_v28 = vld [vmem:[#allocation9 + $0x188] sm:$0xff]  ;;  %v4257_v59 = vld [vmem:[#allocation11 + $0x18] sm:$0xff] }
 0xa85   :  { %v10203_v38 = vpop.f32.mrb[8].mxu1 }
 0xa86   :  { %v10205_v23 = vpop.f32.mrb[9].mxu1 }
 0xa88   :  { %v9150_v7 = vpop.eup %9149 }
 0xa89   :  { %v10209_v18 = vmul.f32 %v9150_v7, %v3705_v46  ;;  %v4061_v46 = vld [vmem:[#allocation9 + $0x68] sm:$0xff]  ;;  %v4059_v7 = vld [vmem:[#allocation9 + $0x58] sm:$0xff] }
 0xa8a   :  { %v8096_v8 = vpack.c.bf16 %v4061_v46, %v4057_v43  ;;  %v8128_v49 = vpack.c.bf16 %v4063_v26, %v4059_v7  ;;  %v8106_v43 = vpack.c.bf16 %v4076_v60, %v4072_v63  ;;  %v4074_v46 = vld [vmem:[#allocation9 + $0xd0] sm:$0xff]  ;;  %v4081_v26 = vld [vmem:[#allocation9 + $0x108] sm:$0xff]  ;;  %v4099_v60 = vld [vmem:[#allocation9 + $0x198] sm:$0xff] }
 0xa8b   :  { %3808 = vmatmul.mubr.f32.vlgmr.msra.gmra.mrb[42].mxu0 %v10209_v18  ;;  %v4078_v7 = vld [vmem:[#allocation9 + $0xf0] sm:$0xff]  ;;  %v4101_v63 = vld [vmem:[#allocation9 + $0x1a8] sm:$0xff] }
 0xa8c   :  { %8063 = vmatpush1.bf16.msra.mxu0 %v10207_v0  ;;  %4019 = vmatprep.mubr.f32.mxu0 %v9433_v42 }
 0xa8d   :  { %8065 = vmatprep.subr.bf16.mxu0 %v10211_v20  ;;  %8097 = vmatprep.subr.bf16.mxu1 %v8096_v8  ;;  %v8138_v8 = vpack.c.bf16 %v4078_v7, %v4074_v46  ;;  %v4096_v46 = vld [vmem:[#allocation9 + $0x180] sm:$0xff] }
 0xa8e   :  { %8099 = vmatpush1.bf16.msra.mxu1 %v8098_v10  ;;  %v4087_v10 = vld [vmem:[#allocation9 + $0x138] sm:$0xff]  ;;  %v4100_v7 = vld [vmem:[#allocation9 + $0x1a0] sm:$0xff] }
 0xa90   :  { %8067 = vmatpush1.bf16.msra.mxu0 %v10215_v35 }
 0xa91   :  { %8069 = vmatprep.subr.bf16.mxu0 %v10219_v52 }
 0xa94   :  { %8071 = vmatpush1.bf16.msra.mxu0 %v10222_v32 }
 0xa95   :  { %8073 = vmatprep.subr.bf16.mxu0 %v10225_v13 }
 0xa98   :  { %8075 = vmatpush1.bf16.msra.mxu0 %v10228_v27 }
 0xa99   :  { %8077 = vmatprep.subr.bf16.mxu0 %v10231_v54 }
 0xa9c   :  { %8079 = vmatpush1.bf16.msra.mxu0 %v10234_v53 }
 0xa9d   :  { %8081 = vmatprep.subr.bf16.mxu0 %v10237_v51 }
 0xaa0   :  { %8083 = vmatpush1.bf16.msra.mxu0 %v10240_v58 }
 0xaa1   :  { %8085 = vmatprep.subr.bf16.mxu0 %v10243_v1 }
 0xaa4   :  { %8087 = vmatpush1.bf16.msra.mxu0 %v10246_v9 }
 0xaa5   :  { %8089 = vmatprep.subr.bf16.mxu0 %v10249_v15 }
 0xaa8   :  { %8091 = vmatpush1.bf16.msra.mxu0 %v10252_v12 }
 0xaa9   :  { %8125 = vmatprep.subr.bf16.mxu0 %v10134_v3  ;;  %v4065_v3 = vld [vmem:[#allocation9 + $0x88] sm:$0xff] }
 0xaab   :  { %4020 = vmatmul.mubr.f32.vlgmr.msra.gmra.mrb[24].mxu0 %v10162_v19  ;;  %v4069_v19 = vld [vmem:[#allocation9 + $0xa8] sm:$0xff] }
 0xaac   :  { %8127 = vmatpush1.bf16.msra.mxu0 %v10139_v48  ;;  %4247 = vmatprep.mubr.f32.mxu0 %v9433_v42  ;;  %v4067_v48 = vld [vmem:[#allocation9 + $0x98] sm:$0xff]  ;;  %v8100_v30 = vpack.c.bf16 %v4069_v19, %v4065_v3  ;;  %v8110_v3 = vpack.c.bf16 %v4084_v11, %v4080_v14  ;;  %v4082_v19 = vld [vmem:[#allocation9 + $0x110] sm:$0xff]  ;;  %v4109_v14 = vld [vmem:[#allocation9 + $0x1e8] sm:$0xff] }
 0xaad   :  { %8129 = vmatprep.subr.bf16.mxu0 %v8128_v49  ;;  %v8132_v36 = vpack.c.bf16 %v4071_v39, %v4067_v48  ;;  %v8108_v49 = vpack.c.bf16 %v4085_v34, %v4081_v26  ;;  %v4086_v48 = vld [vmem:[#allocation9 + $0x130] sm:$0xff]  ;;  %v4089_v39 = vld [vmem:[#allocation9 + $0x148] sm:$0xff]  ;;  %v8118_v26 = vpack.c.bf16 %v4100_v7, %v4096_v46  ;;  %v4107_v11 = vld [vmem:[#allocation9 + $0x1d8] sm:$0xff] }
 0xaae   :  { %8101 = vmatprep.subr.bf16.mxu1 %v8100_v30  ;;  %v8142_v30 = vpack.c.bf16 %v4086_v48, %v4082_v19  ;;  %v4098_v34 = vld [vmem:[#allocation9 + $0x190] sm:$0xff]  ;;  %v4104_v19 = vld [vmem:[#allocation9 + $0x1c0] sm:$0xff] }
 0xaaf   :  { %8103 = vmatpush1.bf16.msra.mxu1 %v8102_v40  ;;  %v4095_v40 = vld [vmem:[#allocation9 + $0x178] sm:$0xff]  ;;  %v4108_v48 = vld [vmem:[#allocation9 + $0x1e0] sm:$0xff] }
 0xab0   :  { %8131 = vmatpush1.bf16.msra.mxu0 %v8130_v45  ;;  %8105 = vmatprep.subr.bf16.mxu1 %v8104_v41  ;;  %v8140_v45 = vpack.c.bf16 %v4087_v10, %v4083_v31  ;;  %v8146_v41 = vpack.c.bf16 %v4094_v24, %v4090_v6  ;;  %v4102_v31 = vld [vmem:[#allocation9 + $0x1b0] sm:$0xff]  ;;  %v4105_v10 = vld [vmem:[#allocation9 + $0x1c8] sm:$0xff] }
 0xab1   :  { %8133 = vmatprep.subr.bf16.mxu0 %v8132_v36  ;;  %v8112_v36 = vpack.c.bf16 %v4093_v21, %v4089_v39  ;;  %v8122_v39 = vpack.c.bf16 %v4108_v48, %v4104_v19  ;;  %v4106_v21 = vld [vmem:[#allocation9 + $0x1d0] sm:$0xff] }
 0xab3   :  { %8107 = vmatpush1.bf16.msra.mxu1 %v8106_v43  ;;  %v4103_v43 = vld [vmem:[#allocation9 + $0x1b8] sm:$0xff] }
 0xab4   :  { %8135 = vmatpush1.bf16.msra.mxu0 %v8134_v61  ;;  %8109 = vmatprep.subr.bf16.mxu1 %v8108_v49  ;;  %v8144_v61 = vpack.c.bf16 %v4095_v40, %v4091_v57  ;;  %v8150_v49 = vpack.c.bf16 %v4102_v31, %v4098_v34  ;;  %v4110_v57 = vld [vmem:[#allocation9 + $0x1f0] sm:$0xff]  ;;  %v4255_v40 = vld [vmem:[#allocation11 + $0x8] sm:$0xff] }
 0xab5   :  { %8137 = vmatprep.subr.bf16.mxu0 %v8136_v25  ;;  %v8116_v25 = vpack.c.bf16 %v4101_v63, %v4097_v28 }
 0xab7   :  { %8111 = vmatpush1.bf16.msra.mxu1 %v8110_v3  ;;  %v4111_v3 = vld [vmem:[#allocation9 + $0x1f8] sm:$0xff] }
 0xab8   :  { %8139 = vmatpush1.bf16.msra.mxu0 %v8138_v8  ;;  %8113 = vmatprep.subr.bf16.mxu1 %v8112_v36  ;;  %v8148_v8 = vpack.c.bf16 %v4103_v43, %v4099_v60  ;;  %v8154_v36 = vpack.c.bf16 %v4110_v57, %v4106_v21  ;;  %v8933_v60 = vadd.f32 %v10205_v23, %v9748_v2  ;;  %v4254_v21 = vld [vmem:[#allocation11] sm:$0xff] }
 0xab9   :  { %8141 = vmatprep.subr.bf16.mxu0 %v8140_v45  ;;  %v8120_v45 = vpack.c.bf16 %v4109_v14, %v4105_v10  ;;  %v4258_v57 = vld [vmem:[#allocation11 + $0x20] sm:$0xff] }
 0xaba   :  { %v4034_v43 = vmul.f32 0.5, %v8933_v60 }
 0xabb   :  { %8115 = vmatpush1.bf16.msra.mxu1 %v8114_v50  ;;  %v4261_v50 = vld [vmem:[#allocation11 + $0x38] sm:$0xff] }
 0xabc   :  { %8143 = vmatpush1.bf16.msra.mxu0 %v8142_v30  ;;  %8117 = vmatprep.subr.bf16.mxu1 %v8116_v25  ;;  %v8152_v30 = vpack.c.bf16 %v4111_v3, %v4107_v11  ;;  %v8188_v6 = vpack.c.bf16 %v4261_v50, %v4257_v59  ;;  %v8932_v25 = vadd.f32 %v10203_v38, %v9744_v62  ;;  %9151 = vtanh.f32 %v4034_v43  ;;  %v4267_v59 = vld [vmem:[#allocation11 + $0x68] sm:$0xff]  ;;  %v4269_v50 = vld [vmem:[#allocation11 + $0x78] sm:$0xff] }
 0xabd   :  { %8145 = vmatprep.subr.bf16.mxu0 %v8144_v61  ;;  %v8156_v61 = vpack.c.bf16 %v4259_v29, %v4255_v40  ;;  %v4260_v40 = vld [vmem:[#allocation11 + $0x30] sm:$0xff]  ;;  %v4263_v29 = vld [vmem:[#allocation11 + $0x48] sm:$0xff] }
 0xabe   :  { %v4030_v46 = vmul.f32 0.5, %v8932_v25  ;;  %v8160_v25 = vpack.c.bf16 %v4267_v59, %v4263_v29  ;;  %v4282_v29 = vld [vmem:[#allocation11 + $0xe0] sm:$0xff] }
 0xabf   :  { %8119 = vmatpush1.bf16.msra.mxu1 %v8118_v26 }
 0xac0   :  { %8147 = vmatpush1.bf16.msra.mxu0 %v8146_v41  ;;  %8121 = vmatprep.subr.bf16.mxu1 %v8120_v45  ;;  %9153 = vtanh.f32 %v4030_v46  ;;  %v4264_v46 = vld [vmem:[#allocation11 + $0x50] sm:$0xff] }
 0xac1   :  { %8149 = vmatprep.subr.bf16.mxu0 %v8148_v8 }
 0xac3   :  { %8123 = vmatpush1.bf16.msra.mxu1 %v8122_v39 }
 0xac4   :  { %8151 = vmatpush1.bf16.msra.mxu0 %v8150_v49  ;;  %8157 = vmatprep.subr.bf16.mxu1 %v8156_v61  ;;  %v4265_v61 = vld [vmem:[#allocation11 + $0x58] sm:$0xff] }
 0xac5   :  { %8153 = vmatprep.subr.bf16.mxu0 %v8152_v30  ;;  %v8192_v43 = vpack.c.bf16 %v4269_v50, %v4265_v61  ;;  %v4280_v50 = vld [vmem:[#allocation11 + $0xd0] sm:$0xff] }
 0xac6   :  { %v9152_v31 = vpop.eup %9151 }
 0xac7   :  { %v4036_v10 = vmul.f32 0.5, %v9152_v31  ;;  %v4277_v31 = vld [vmem:[#allocation11 + $0xb8] sm:$0xff] }
 0xac8   :  { %8155 = vmatpush1.bf16.msra.mxu0 %v8154_v36  ;;  %v4256_v36 = vld [vmem:[#allocation11 + $0x10] sm:$0xff] }
 0xac9   :  { %8189 = vmatprep.subr.bf16.mxu0 %v8188_v6  ;;  %v4037_v23 = vadd.f32 0.5, %v4036_v10 }
 0xaca   :  { %v9154_v49 = vpop.eup %9153 }
 0xacb   :  { %v4032_v11 = vmul.f32 0.5, %v9154_v49  ;;  %v4043_v3 = vmul.f32 %v4037_v23, %v10159_v33  ;;  %v4262_v33 = vld [vmem:[#allocation11 + $0x40] sm:$0xff] }
 0xacd   :  { %v4033_v45 = vadd.f32 0.5, %v4032_v11  ;;  %v4274_v11 = vld [vmem:[#allocation11 + $0xa0] sm:$0xff] }
 0xb5e   :  { %v3809_v24 = vpop.f32.mrb[42].mxu0 }
 0xb5f   :  { %v3810_v41 = vadd.f32 %v3809_v24, %v9899_v37  ;;  %v3811_v28 = vpop.f32.mrb[43].mxu0 }
 0xb60   :  { %v3812_v63 = vadd.f32 %v3811_v28, %v9902_v47  ;;  %v8190_v28 = vpack.c.bf16 %v4260_v40, %v4256_v36  ;;  %v4278_v40 = vld [vmem:[#allocation11 + $0xc0] sm:$0xff] }
 0xb61   :  { %3814 = vst [vmem:[%s10710_s12 + $0x30] sm:$0xff] %v3810_v41  ;;  %v8158_v41 = vpack.c.bf16 %v4258_v57, %v4254_v21  ;;  %v4285_v21 = vld [vmem:[#allocation11 + $0xf8] sm:$0xff] }
 0xb62   :  { %3815 = vst [vmem:[%s10710_s12 + $0x38] sm:$0xff] %v3812_v63  ;;  %v4266_v63 = vld [vmem:[#allocation11 + $0x60] sm:$0xff] }
 0xb63   :  { %v8162_v49 = vpack.c.bf16 %v4266_v63, %v4262_v33  ;;  %v4293_v33 = vld [vmem:[#allocation11 + $0x138] sm:$0xff]  ;;  %v8170_v63 = vpack.c.bf16 %v4282_v29, %v4278_v40 }
 0xb64   :  { %v4309_v40 = vld [vmem:[#allocation11 + $0x1b8] sm:$0xff] }
 0xb7e   :  { %v4021_v7 = vpop.f32.mrb[24].mxu0 }
 0xb7f   :  { %v8948_v8 = vadd.f32 %v4021_v7, %v9753_v5  ;;  %v4023_v26 = vpop.f32.mrb[25].mxu0  ;;  %v4268_v7 = vld [vmem:[#allocation11 + $0x70] sm:$0xff] }
 0xb80   :  { %v8949_v34 = vadd.f32 %v4023_v26, %v9760_v16  ;;  %v4275_v26 = vld [vmem:[#allocation11 + $0xa8] sm:$0xff]  ;;  %v8194_v10 = vpack.c.bf16 %v4268_v7, %v4264_v46  ;;  %v4290_v46 = vld [vmem:[#allocation11 + $0x120] sm:$0xff] }
 0xb81   :  { %9155 = vtanh.f32 %v8948_v8  ;;  %v4271_v8 = vld [vmem:[#allocation11 + $0x88] sm:$0xff] }
 0xb82   :  { %v4039_v14 = vmul.f32 0.5, %v8949_v34  ;;  %v4273_v34 = vld [vmem:[#allocation11 + $0x98] sm:$0xff]  ;;  %v8164_v23 = vpack.c.bf16 %v4275_v26, %v4271_v8  ;;  %v4288_v26 = vld [vmem:[#allocation11 + $0x110] sm:$0xff] }
 0xb84   :  { %9157 = vtanh.f32 %v4039_v14  ;;  %v4270_v14 = vld [vmem:[#allocation11 + $0x80] sm:$0xff] }
 0xb85   :  { %v8166_v57 = vpack.c.bf16 %v4274_v11, %v4270_v14  ;;  %v4301_v14 = vld [vmem:[#allocation11 + $0x178] sm:$0xff] }
 0xb8b   :  { %v9156_v38 = vpop.eup %9155 }
 0xb8c   :  { %v4044_v19 = vmul.f32 %v9156_v38, %v4033_v45  ;;  %v8196_v45 = vpack.c.bf16 %v4277_v31, %v4273_v34  ;;  %v4272_v38 = vld [vmem:[#allocation11 + $0x90] sm:$0xff]  ;;  %v4295_v31 = vld [vmem:[#allocation11 + $0x148] sm:$0xff] }
 0xb8d   :  { %v4292_v34 = vld [vmem:[#allocation11 + $0x130] sm:$0xff] }
 0xb8e   :  { %v10275_v48 = vadd.f32 %v4044_v19, %v4043_v3  ;;  %v9158_v30 = vpop.eup %9157  ;;  %v4276_v3 = vld [vmem:[#allocation11 + $0xb0] sm:$0xff]  ;;  %v4279_v19 = vld [vmem:[#allocation11 + $0xc8] sm:$0xff] }
 0xb8f   :  { %v4041_v39 = vmul.f32 0.5, %v9158_v30  ;;  %v4283_v30 = vld [vmem:[#allocation11 + $0xe8] sm:$0xff]  ;;  %v8198_v36 = vpack.c.bf16 %v4276_v3, %v4272_v38  ;;  %v4298_v38 = vld [vmem:[#allocation11 + $0x160] sm:$0xff] }
 0xb90   :  { %9159 = vtanh.f32 %v10275_v48  ;;  %v8168_v59 = vpack.c.bf16 %v4283_v30, %v4279_v19  ;;  %v4296_v30 = vld [vmem:[#allocation11 + $0x150] sm:$0xff] }
 0xb91   :  { %v4042_v6 = vadd.f32 0.5, %v4041_v39  ;;  %v4281_v39 = vld [vmem:[#allocation11 + $0xd8] sm:$0xff] }
 0xb92   :  { %v8200_v61 = vpack.c.bf16 %v4285_v21, %v4281_v39  ;;  %v4300_v39 = vld [vmem:[#allocation11 + $0x170] sm:$0xff]  ;;  %v4303_v21 = vld [vmem:[#allocation11 + $0x188] sm:$0xff] }
 0xb9a   :  { %v9160_v24 = vpop.eup %9159 }
 0xb9b   :  { %v10278_v60 = vmul.f32 %v9160_v24, %v4042_v6  ;;  %v4284_v6 = vld [vmem:[#allocation11 + $0xf0] sm:$0xff]  ;;  %v4287_v24 = vld [vmem:[#allocation11 + $0x108] sm:$0xff] }
 0xb9d   :  { %4177 = vmatmul.mubr.f32.vlgmr.msra.gmra.mrb[28].mxu1 %v10278_v60  ;;  %4248 = vmatmul.mubr.f32.vlgmr.msra.gmra.mrb[44].mxu0 %v10278_v60 }
 0xb9e   :  { %8159 = vmatpush1.bf16.msra.mxu1 %v8158_v41  ;;  %8191 = vmatpush1.bf16.msra.mxu0 %v8190_v28  ;;  %v4291_v41 = vld [vmem:[#allocation11 + $0x128] sm:$0xff]  ;;  %v4289_v28 = vld [vmem:[#allocation11 + $0x118] sm:$0xff] }
 0xb9f   :  { %8161 = vmatprep.subr.bf16.mxu1 %v8160_v25  ;;  %8193 = vmatprep.subr.bf16.mxu0 %v8192_v43  ;;  %v8202_v25 = vpack.c.bf16 %v4284_v6, %v4280_v50  ;;  %v4286_v43 = vld [vmem:[#allocation11 + $0x100] sm:$0xff]  ;;  %v8172_v7 = vpack.c.bf16 %v4291_v41, %v4287_v24  ;;  %v8204_v8 = vpack.c.bf16 %v4293_v33, %v4289_v28  ;;  %v4304_v41 = vld [vmem:[#allocation11 + $0x190] sm:$0xff]  ;;  %v4311_v33 = vld [vmem:[#allocation11 + $0x1c8] sm:$0xff] }
 0xba0   :  { %4382 = vmatprep.mubr.f32.mxu1 %v9433_v42  ;;  %4453 = vmatprep.mubr.f32.mxu0 %v9433_v42  ;;  %v8174_v11 = vpack.c.bf16 %v4290_v46, %v4286_v43  ;;  %v4306_v50 = vld [vmem:[#allocation11 + $0x1a0] sm:$0xff]  ;;  %v4308_v28 = vld [vmem:[#allocation11 + $0x1b0] sm:$0xff]  ;;  %v4317_v43 = vld [vmem:[#allocation11 + $0x1f8] sm:$0xff] }
 0xba2   :  { %8163 = vmatpush1.bf16.msra.mxu1 %v8162_v49  ;;  %8195 = vmatpush1.bf16.msra.mxu0 %v8194_v10  ;;  %v4299_v49 = vld [vmem:[#allocation11 + $0x168] sm:$0xff]  ;;  %v4297_v10 = vld [vmem:[#allocation11 + $0x158] sm:$0xff] }
 0xba3   :  { %8165 = vmatprep.subr.bf16.mxu1 %v8164_v23  ;;  %8197 = vmatprep.subr.bf16.mxu0 %v8196_v45  ;;  %v8206_v23 = vpack.c.bf16 %v4292_v34, %v4288_v26  ;;  %v4294_v45 = vld [vmem:[#allocation11 + $0x140] sm:$0xff]  ;;  %v8176_v3 = vpack.c.bf16 %v4299_v49, %v4295_v31  ;;  %v8208_v19 = vpack.c.bf16 %v4301_v14, %v4297_v10  ;;  %v4312_v49 = vld [vmem:[#allocation11 + $0x1d0] sm:$0xff] }
 0xba4   :  { %v8178_v29 = vpack.c.bf16 %v4298_v38, %v4294_v45  ;;  %v4314_v31 = vld [vmem:[#allocation11 + $0x1e0] sm:$0xff]  ;;  %v4316_v10 = vld [vmem:[#allocation11 + $0x1f0] sm:$0xff]  ;;  %v4495_v45 = vld [vmem:[#allocation12 + $0x68] sm:$0xff] }
 0xba5   :  { %v4497_v38 = vld [vmem:[#allocation12 + $0x78] sm:$0xff] }
 0xba6   :  { %8167 = vmatpush1.bf16.msra.mxu1 %v8166_v57  ;;  %8199 = vmatpush1.bf16.msra.mxu0 %v8198_v36  ;;  %v4307_v57 = vld [vmem:[#allocation11 + $0x1a8] sm:$0xff]  ;;  %v4305_v36 = vld [vmem:[#allocation11 + $0x198] sm:$0xff] }
 0xba7   :  { %8169 = vmatprep.subr.bf16.mxu1 %v8168_v59  ;;  %8201 = vmatprep.subr.bf16.mxu0 %v8200_v61  ;;  %v8210_v59 = vpack.c.bf16 %v4300_v39, %v4296_v30  ;;  %v4302_v61 = vld [vmem:[#allocation11 + $0x180] sm:$0xff]  ;;  %v8180_v6 = vpack.c.bf16 %v4307_v57, %v4303_v21  ;;  %v8212_v24 = vpack.c.bf16 %v4309_v40, %v4305_v36  ;;  %v4496_v30 = vld [vmem:[#allocation12 + $0x70] sm:$0xff]  ;;  %v4499_v21 = vld [vmem:[#allocation12 + $0x88] sm:$0xff] }
 0xba8   :  { %v8182_v46 = vpack.c.bf16 %v4306_v50, %v4302_v61  ;;  %v4501_v57 = vld [vmem:[#allocation12 + $0x98] sm:$0xff]  ;;  %v4498_v40 = vld [vmem:[#allocation12 + $0x80] sm:$0xff]  ;;  %v4503_v61 = vld [vmem:[#allocation12 + $0xa8] sm:$0xff] }
 0xba9   :  { %v8236_v36 = vpack.c.bf16 %v4501_v57, %v4499_v21  ;;  %v4505_v50 = vld [vmem:[#allocation12 + $0xb8] sm:$0xff]  ;;  %v4591_v57 = vld [vmem:[#allocation8] sm:$0xff] }
 0xbaa   :  { %8171 = vmatpush1.bf16.msra.mxu1 %v8170_v63  ;;  %8203 = vmatpush1.bf16.msra.mxu0 %v8202_v25  ;;  %v4315_v63 = vld [vmem:[#allocation11 + $0x1e8] sm:$0xff]  ;;  %v4313_v25 = vld [vmem:[#allocation11 + $0x1d8] sm:$0xff] }
 0xbab   :  { %8173 = vmatprep.subr.bf16.mxu1 %v8172_v7  ;;  %8205 = vmatprep.subr.bf16.mxu0 %v8204_v8  ;;  %v8214_v7 = vpack.c.bf16 %v4308_v28, %v4304_v41  ;;  %v4310_v8 = vld [vmem:[#allocation11 + $0x1c0] sm:$0xff]  ;;  %v8184_v26 = vpack.c.bf16 %v4315_v63, %v4311_v33  ;;  %v8216_v34 = vpack.c.bf16 %v4317_v43, %v4313_v25  ;;  %v4504_v41 = vld [vmem:[#allocation12 + $0xb0] sm:$0xff]  ;;  %v4507_v33 = vld [vmem:[#allocation12 + $0xc8] sm:$0xff] }
 0xbac   :  { %v8186_v14 = vpack.c.bf16 %v4314_v31, %v4310_v8  ;;  %v4509_v63 = vld [vmem:[#allocation12 + $0xd8] sm:$0xff]  ;;  %v4506_v43 = vld [vmem:[#allocation12 + $0xc0] sm:$0xff]  ;;  %v4511_v8 = vld [vmem:[#allocation12 + $0xe8] sm:$0xff] }
 0xbad   :  { %v8244_v25 = vpack.c.bf16 %v4509_v63, %v4507_v33  ;;  %v4510_v31 = vld [vmem:[#allocation12 + $0xe0] sm:$0xff]  ;;  %v4608_v33 = vld [vmem:[#allocation8 + $0x88] sm:$0xff] }
 0xbae   :  { %8175 = vmatpush1.bf16.msra.mxu1 %v8174_v11  ;;  %8207 = vmatpush1.bf16.msra.mxu0 %v8206_v23  ;;  %v8218_v11 = vpack.c.bf16 %v4316_v10, %v4312_v49  ;;  %v4512_v49 = vld [vmem:[#allocation12 + $0xf0] sm:$0xff]  ;;  %v4612_v63 = vld [vmem:[#allocation8 + $0xa8] sm:$0xff] }
 0xbaf   :  { %8177 = vmatprep.subr.bf16.mxu1 %v8176_v3  ;;  %8209 = vmatprep.subr.bf16.mxu0 %v8208_v19  ;;  %v8232_v3 = vpack.c.bf16 %v4497_v38, %v4495_v45  ;;  %v4494_v19 = vld [vmem:[#allocation12 + $0x60] sm:$0xff]  ;;  %v8250_v10 = vpack.c.bf16 %v4512_v49, %v4510_v31 }
 0xbb0   :  { %v8234_v39 = vpack.c.bf16 %v4496_v30, %v4494_v19  ;;  %v4615_v49 = vld [vmem:[#allocation8 + $0xc0] sm:$0xff] }
 0xbb2   :  { %8179 = vmatpush1.bf16.msra.mxu1 %v8178_v29  ;;  %8211 = vmatpush1.bf16.msra.mxu0 %v8210_v59  ;;  %v4500_v29 = vld [vmem:[#allocation12 + $0x90] sm:$0xff] }
 0xbb3   :  { %8181 = vmatprep.subr.bf16.mxu1 %v8180_v6  ;;  %8213 = vmatprep.subr.bf16.mxu0 %v8212_v24  ;;  %v8238_v59 = vpack.c.bf16 %v4500_v29, %v4498_v40  ;;  %v8240_v6 = vpack.c.bf16 %v4505_v50, %v4503_v61  ;;  %v4502_v24 = vld [vmem:[#allocation12 + $0xa0] sm:$0xff]  ;;  %v4600_v29 = vld [vmem:[#allocation8 + $0x48] sm:$0xff] }
 0xbb4   :  { %v8242_v28 = vpack.c.bf16 %v4504_v41, %v4502_v24  ;;  %v4599_v41 = vld [vmem:[#allocation8 + $0x40] sm:$0xff] }
 0xbb6   :  { %8183 = vmatpush1.bf16.msra.mxu1 %v8182_v46  ;;  %8215 = vmatpush1.bf16.msra.mxu0 %v8214_v7  ;;  %v4508_v46 = vld [vmem:[#allocation12 + $0xd0] sm:$0xff] }
 0xbb7   :  { %8185 = vmatprep.subr.bf16.mxu1 %v8184_v26  ;;  %8217 = vmatprep.subr.bf16.mxu0 %v8216_v34  ;;  %v8246_v7 = vpack.c.bf16 %v4508_v46, %v4506_v43  ;;  %v4513_v26 = vld [vmem:[#allocation12 + $0xf8] sm:$0xff]  ;;  %v10333_v43 = vpack.c.bf16 %v4612_v63, %v4608_v33  ;;  %v4607_v46 = vld [vmem:[#allocation8 + $0x80] sm:$0xff] }
 0xbb8   :  { %v8248_v34 = vpack.c.bf16 %v4513_v26, %v4511_v8  ;;  %v4616_v8 = vld [vmem:[#allocation8 + $0xc8] sm:$0xff] }
 0xbb9   :  { %v4620_v26 = vld [vmem:[#allocation8 + $0xe8] sm:$0xff] }
 0xbba   :  { %8187 = vmatpush1.bf16.msra.mxu1 %v8186_v14  ;;  %8219 = vmatpush1.bf16.msra.mxu0 %v8218_v11  ;;  %v4592_v14 = vld [vmem:[#allocation8 + $0x8] sm:$0xff]  ;;  %v10339_v31 = vpack.c.bf16 %v4620_v26, %v4616_v8 }
 0xbbb   :  { %8285 = vmatprep.subr.bf16.mxu0 %v10192_v55  ;;  %v4483_v55 = vld [vmem:[#allocation12 + $0x8] sm:$0xff] }
 0xbbc   :  { %v4596_v11 = vld [vmem:[#allocation8 + $0x28] sm:$0xff] }
 0xbbd   :  { %4383 = vmatmul.mubr.f32.vlgmr.msra.gmra.mrb[28].mxu1 %v10209_v18  ;;  %4454 = vmatmul.mubr.f32.vlgmr.msra.gmra.mrb[44].mxu0 %v10209_v18  ;;  %v4832_v26 = vld [vmem:[#allocation9 + $0x68] sm:$0xff] }
 0xbbe   :  { %8287 = vmatpush1.bf16.msra.mxu0 %v10207_v0  ;;  %4790 = vmatprep.mubr.f32.mxu0 %v9433_v42  ;;  %v4485_v0 = vld [vmem:[#allocation12 + $0x18] sm:$0xff] }
 0xbbf   :  { %8289 = vmatprep.subr.bf16.mxu0 %v10211_v20  ;;  %4578 = vmatprep.mubr.f32.mxu1 %v9433_v42  ;;  %v8220_v18 = vpack.c.bf16 %v4485_v0, %v4483_v55  ;;  %v4482_v20 = vld [vmem:[#allocation12] sm:$0xff]  ;;  %v10306_v55 = vpack.c.bf16 %v4596_v11, %v4592_v14  ;;  %v4624_v14 = vld [vmem:[#allocation8 + $0x108] sm:$0xff] }
 0xbc0   :  { %v4628_v11 = vld [vmem:[#allocation8 + $0x128] sm:$0xff] }
 0xbc1   :  { %8221 = vmatprep.subr.bf16.mxu1 %v8220_v18 }
 0xbc2   :  { %8291 = vmatpush1.bf16.msra.mxu0 %v10215_v35  ;;  %v4484_v35 = vld [vmem:[#allocation12 + $0x10] sm:$0xff] }
 0xbc3   :  { %8293 = vmatprep.subr.bf16.mxu0 %v10219_v52  ;;  %v8222_v52 = vpack.c.bf16 %v4484_v35, %v4482_v20 }
 0xbc5   :  { %8223 = vmatpush1.bf16.msra.mxu1 %v8222_v52 }
 0xbc6   :  { %8295 = vmatpush1.bf16.msra.mxu0 %v10222_v32  ;;  %v4487_v32 = vld [vmem:[#allocation12 + $0x28] sm:$0xff] }
 0xbc7   :  { %8297 = vmatprep.subr.bf16.mxu0 %v10225_v13  ;;  %v4489_v13 = vld [vmem:[#allocation12 + $0x38] sm:$0xff] }
 0xbca   :  { %8299 = vmatpush1.bf16.msra.mxu0 %v10228_v27  ;;  %v8224_v27 = vpack.c.bf16 %v4489_v13, %v4487_v32 }
 0xbcb   :  { %8301 = vmatprep.subr.bf16.mxu0 %v10231_v54  ;;  %v4486_v54 = vld [vmem:[#allocation12 + $0x20] sm:$0xff] }
 0xbcc   :  { %8225 = vmatprep.subr.bf16.mxu1 %v8224_v27 }
 0xbce   :  { %8303 = vmatpush1.bf16.msra.mxu0 %v10234_v53  ;;  %v4488_v53 = vld [vmem:[#allocation12 + $0x30] sm:$0xff] }
 0xbcf   :  { %8305 = vmatprep.subr.bf16.mxu0 %v10237_v51  ;;  %v8226_v51 = vpack.c.bf16 %v4488_v53, %v4486_v54 }
 0xbd1   :  { %8227 = vmatpush1.bf16.msra.mxu1 %v8226_v51 }
 0xbd2   :  { %8307 = vmatpush1.bf16.msra.mxu0 %v10240_v58  ;;  %v4491_v58 = vld [vmem:[#allocation12 + $0x48] sm:$0xff] }
 0xbd3   :  { %8309 = vmatprep.subr.bf16.mxu0 %v10243_v1  ;;  %v4493_v1 = vld [vmem:[#allocation12 + $0x58] sm:$0xff] }
 0xbd6   :  { %8311 = vmatpush1.bf16.msra.mxu0 %v10246_v9  ;;  %v8228_v9 = vpack.c.bf16 %v4493_v1, %v4491_v58 }
 0xbd7   :  { %8313 = vmatprep.subr.bf16.mxu0 %v10249_v15  ;;  %v4490_v15 = vld [vmem:[#allocation12 + $0x40] sm:$0xff] }
 0xbd8   :  { %8229 = vmatprep.subr.bf16.mxu1 %v8228_v9 }
 0xbda   :  { %8315 = vmatpush1.bf16.msra.mxu0 %v10252_v12  ;;  %v4492_v12 = vld [vmem:[#allocation12 + $0x50] sm:$0xff] }
 0xbdb   :  { %v8230_v23 = vpack.c.bf16 %v4492_v12, %v4490_v15 }
 0xbdd   :  { %4791 = vmatmul.mubr.f32.vlgmr.msra.gmra.mrb[26].mxu0 %v10278_v60  ;;  %8231 = vmatpush1.bf16.msra.mxu1 %v8230_v23 }
 0xbde   :  { %4947 = vmatprep.mubr.f32.mxu0 %v9433_v42  ;;  %8233 = vmatprep.subr.bf16.mxu1 %v8232_v3 }
 0xbe1   :  { %8235 = vmatpush1.bf16.msra.mxu1 %v8234_v39 }
 0xbe2   :  { %8237 = vmatprep.subr.bf16.mxu1 %v8236_v36  ;;  %v4595_v36 = vld [vmem:[#allocation8 + $0x20] sm:$0xff] }
 0xbe5   :  { %8239 = vmatpush1.bf16.msra.mxu1 %v8238_v59  ;;  %v4604_v59 = vld [vmem:[#allocation8 + $0x68] sm:$0xff] }
 0xbe6   :  { %8241 = vmatprep.subr.bf16.mxu1 %v8240_v6  ;;  %v10321_v6 = vpack.c.bf16 %v4595_v36, %v4591_v57  ;;  %v4820_v36 = vld [vmem:[#allocation9 + $0x8] sm:$0xff] }
 0xbe9   :  { %8243 = vmatpush1.bf16.msra.mxu1 %v8242_v28  ;;  %v4603_v28 = vld [vmem:[#allocation8 + $0x60] sm:$0xff] }
 0xbea   :  { %8245 = vmatprep.subr.bf16.mxu1 %v8244_v25  ;;  %v10329_v25 = vpack.c.bf16 %v4603_v28, %v4599_v41  ;;  %v4819_v41 = vld [vmem:[#allocation9] sm:$0xff] }
 0xbeb   :  { %v4823_v28 = vld [vmem:[#allocation9 + $0x20] sm:$0xff] }
 0xbec   :  { %v10376_v63 = vpack.c.bf16 %v4823_v28, %v4819_v41  ;;  %v4844_v41 = vld [vmem:[#allocation9 + $0xc8] sm:$0xff] }
 0xbed   :  { %8247 = vmatpush1.bf16.msra.mxu1 %v8246_v7  ;;  %v4611_v7 = vld [vmem:[#allocation8 + $0xa0] sm:$0xff]  ;;  %v4848_v28 = vld [vmem:[#allocation9 + $0xe8] sm:$0xff] }
 0xbee   :  { %8249 = vmatprep.subr.bf16.mxu1 %v8248_v34  ;;  %v10336_v34 = vpack.c.bf16 %v4611_v7, %v4607_v46  ;;  %v4821_v46 = vld [vmem:[#allocation9 + $0x10] sm:$0xff] }
 0xbef   :  { %v4825_v7 = vld [vmem:[#allocation9 + $0x30] sm:$0xff] }
 0xbf0   :  { %v10379_v8 = vpack.c.bf16 %v4825_v7, %v4821_v46  ;;  %v4846_v46 = vld [vmem:[#allocation9 + $0xd8] sm:$0xff]  ;;  %v8328_v7 = vpack.c.bf16 %v4848_v28, %v4844_v41  ;;  %v4859_v28 = vld [vmem:[#allocation9 + $0x140] sm:$0xff] }
 0xbf1   :  { %8251 = vmatpush1.bf16.msra.mxu1 %v8250_v10  ;;  %v4619_v10 = vld [vmem:[#allocation8 + $0xe0] sm:$0xff]  ;;  %v4866_v41 = vld [vmem:[#allocation9 + $0x178] sm:$0xff] }
 0xbf2   :  { %8253 = vmatprep.subr.bf16.mxu1 %v10306_v55 }
 0xc90   :  { %v4384_v0 = vpop.f32.mrb[28].mxu1  ;;  %v4455_v18 = vpop.f32.mrb[44].mxu0 }
 0xc91   :  { %v8972_v20 = vadd.f32 %v4384_v0, %v9805_v44  ;;  %v4386_v35 = vpop.f32.mrb[29].mxu1  ;;  %v4457_v52 = vpop.f32.mrb[45].mxu0  ;;  %v8974_v54 = vadd.f32 %v4455_v18, %v9813_v22  ;;  %v10342_v0 = vpack.c.bf16 %v4619_v10, %v4615_v49  ;;  %v10345_v18 = vpack.c.bf16 %v4628_v11, %v4624_v14  ;;  %v4830_v49 = vld [vmem:[#allocation9 + $0x58] sm:$0xff]  ;;  %v4827_v11 = vld [vmem:[#allocation9 + $0x40] sm:$0xff] }
 0xc92   :  { %v8973_v32 = vadd.f32 %v4386_v35, %v9808_v56  ;;  %v8975_v53 = vadd.f32 %v4457_v52, %v9819_v17  ;;  %v4627_v35 = vld [vmem:[#allocation8 + $0x120] sm:$0xff]  ;;  %v4632_v52 = vld [vmem:[#allocation8 + $0x148] sm:$0xff]  ;;  %v4834_v14 = vld [vmem:[#allocation9 + $0x78] sm:$0xff] }
 0xc93   :  { %v4464_v13 = vmul.f32 0.5, %v8972_v20  ;;  %v4623_v20 = vld [vmem:[#allocation8 + $0x100] sm:$0xff] }
 0xc94   :  { %v4468_v27 = vmul.f32 0.5, %v8973_v32  ;;  %v4473_v51 = vmul.f32 0.5, %v8975_v53  ;;  %v4636_v32 = vld [vmem:[#allocation8 + $0x168] sm:$0xff]  ;;  %v4635_v53 = vld [vmem:[#allocation8 + $0x160] sm:$0xff] }
 0xc95   :  { %9161 = vtanh.f32 %v4464_v13  ;;  %v10348_v13 = vpack.c.bf16 %v4627_v35, %v4623_v20  ;;  %v4831_v20 = vld [vmem:[#allocation9 + $0x60] sm:$0xff]  ;;  %v8352_v35 = vpack.c.bf16 %v4834_v14, %v4830_v49 }
 0xc96   :  { %9163 = vtanh.f32 %v4468_v27  ;;  %v10351_v27 = vpack.c.bf16 %v4636_v32, %v4632_v52  ;;  %v8322_v52 = vpack.c.bf16 %v4831_v20, %v4827_v11  ;;  %v4829_v32 = vld [vmem:[#allocation9 + $0x50] sm:$0xff]  ;;  %v4847_v49 = vld [vmem:[#allocation9 + $0xe0] sm:$0xff] }
 0xc97   :  { %9165 = vtanh.f32 %v8974_v54  ;;  %v4631_v54 = vld [vmem:[#allocation8 + $0x140] sm:$0xff]  ;;  %v4845_v11 = vld [vmem:[#allocation9 + $0xd0] sm:$0xff] }
 0xc98   :  { %9167 = vtanh.f32 %v4473_v51  ;;  %v4640_v51 = vld [vmem:[#allocation8 + $0x188] sm:$0xff]  ;;  %v4849_v20 = vld [vmem:[#allocation9 + $0xf0] sm:$0xff] }
 0xc9f   :  { %v9162_v58 = vpop.eup %9161 }
 0xca0   :  { %v9164_v1 = vpop.eup %9163  ;;  %v4466_v9 = vmul.f32 0.5, %v9162_v58  ;;  %v4644_v58 = vld [vmem:[#allocation8 + $0x1a8] sm:$0xff] }
 0xca1   :  { %v4470_v15 = vmul.f32 0.5, %v9164_v1  ;;  %v9166_v23 = vpop.eup %9165  ;;  %v10354_v1 = vpack.c.bf16 %v4635_v53, %v4631_v54  ;;  %v4833_v54 = vld [vmem:[#allocation9 + $0x70] sm:$0xff] }
 0xca2   :  { %v4467_v12 = vadd.f32 0.5, %v4466_v9  ;;  %v9168_v30 = vpop.eup %9167  ;;  %v10357_v9 = vpack.c.bf16 %v4644_v58, %v4640_v51  ;;  %v8354_v53 = vpack.c.bf16 %v4833_v54, %v4829_v32  ;;  %v4836_v51 = vld [vmem:[#allocation9 + $0x88] sm:$0xff]  ;;  %v4854_v54 = vld [vmem:[#allocation9 + $0x118] sm:$0xff] }
 0xca3   :  { %v4471_v45 = vadd.f32 0.5, %v4470_v15  ;;  %v4475_v39 = vmul.f32 0.5, %v9168_v30  ;;  %v4639_v15 = vld [vmem:[#allocation8 + $0x180] sm:$0xff]  ;;  %v4840_v58 = vld [vmem:[#allocation9 + $0xa8] sm:$0xff] }
 0xca4   :  { %v4478_v38 = vmul.f32 %v9166_v23, %v4467_v12  ;;  %v4643_v12 = vld [vmem:[#allocation8 + $0x1a0] sm:$0xff]  ;;  %v4648_v23 = vld [vmem:[#allocation8 + $0x1c8] sm:$0xff] }
 0xca5   :  { %v4477_v3 = vmul.f32 %v4471_v45, %v10200_v4  ;;  %v4476_v61 = vadd.f32 0.5, %v4475_v39  ;;  %v10325_v4 = vpack.c.bf16 %v4604_v59, %v4600_v29  ;;  %v4652_v45 = vld [vmem:[#allocation8 + $0x1e8] sm:$0xff]  ;;  %v4647_v30 = vld [vmem:[#allocation8 + $0x1c0] sm:$0xff]  ;;  %v4822_v59 = vld [vmem:[#allocation9 + $0x18] sm:$0xff] }
 0xca6   :  { %v4651_v39 = vld [vmem:[#allocation8 + $0x1e0] sm:$0xff]  ;;  %v4824_v29 = vld [vmem:[#allocation9 + $0x28] sm:$0xff] }
 0xca7   :  { %v10314_v19 = vadd.f32 %v4478_v38, %v4477_v3  ;;  %v10360_v38 = vpack.c.bf16 %v4643_v12, %v4639_v15  ;;  %v10363_v3 = vpack.c.bf16 %v4652_v45, %v4648_v23  ;;  %v10366_v57 = vpack.c.bf16 %v4651_v39, %v4647_v30  ;;  %v4838_v15 = vld [vmem:[#allocation9 + $0x98] sm:$0xff]  ;;  %v4835_v45 = vld [vmem:[#allocation9 + $0x80] sm:$0xff]  ;;  %v4856_v32 = vld [vmem:[#allocation9 + $0x128] sm:$0xff] }
 0xca8   :  { %v8324_v12 = vpack.c.bf16 %v4840_v58, %v4836_v51  ;;  %v4842_v23 = vld [vmem:[#allocation9 + $0xb8] sm:$0xff]  ;;  %v4839_v30 = vld [vmem:[#allocation9 + $0xa0] sm:$0xff] }
 0xca9   :  { %9169 = vtanh.f32 %v10314_v19  ;;  %v8356_v39 = vpack.c.bf16 %v4842_v23, %v4838_v15  ;;  %v4858_v51 = vld [vmem:[#allocation9 + $0x138] sm:$0xff]  ;;  %v4851_v58 = vld [vmem:[#allocation9 + $0x100] sm:$0xff] }
 0xcaa   :  { %v4855_v15 = vld [vmem:[#allocation9 + $0x120] sm:$0xff] }
 0xcab   :  { %v8334_v23 = vpack.c.bf16 %v4855_v15, %v4851_v58  ;;  %v4869_v58 = vld [vmem:[#allocation9 + $0x190] sm:$0xff] }
 0xcac   :  { %v4873_v15 = vld [vmem:[#allocation9 + $0x1b0] sm:$0xff] }
 0xcb0   :  { %v10317_v21 = vpop.f32.mrb[26].mxu0 }
 0xcb1   :  { %v10319_v40 = vpop.f32.mrb[27].mxu0 }
 0xcb3   :  { %v9170_v50 = vpop.eup %9169 }
 0xcb4   :  { %v10323_v24 = vmul.f32 %v9170_v50, %v4476_v61  ;;  %v10372_v61 = vpack.c.bf16 %v4824_v29, %v4820_v36  ;;  %v4826_v50 = vld [vmem:[#allocation9 + $0x38] sm:$0xff]  ;;  %v8326_v36 = vpack.c.bf16 %v4839_v30, %v4835_v45  ;;  %v4837_v29 = vld [vmem:[#allocation9 + $0x90] sm:$0xff] }
 0xcb5   :  { %v10374_v33 = vpack.c.bf16 %v4826_v50, %v4822_v59  ;;  %v4841_v59 = vld [vmem:[#allocation9 + $0xb0] sm:$0xff] }
 0xcb6   :  { %4579 = vmatmul.mubr.f32.vlgmr.msra.gmra.mrb[30].mxu1 %v10323_v24  ;;  %8317 = vmatprep.subr.bf16.mxu0 %v10372_v61  ;;  %v8358_v50 = vpack.c.bf16 %v4841_v59, %v4837_v29  ;;  %v4853_v45 = vld [vmem:[#allocation9 + $0x110] sm:$0xff]  ;;  %v4864_v29 = vld [vmem:[#allocation9 + $0x168] sm:$0xff]  ;;  %v4862_v59 = vld [vmem:[#allocation9 + $0x158] sm:$0xff] }
 0xcb7   :  { %8255 = vmatpush1.bf16.msra.mxu1 %v10321_v6  ;;  %4719 = vmatprep.mubr.f32.mxu1 %v9433_v42  ;;  %v4857_v30 = vld [vmem:[#allocation9 + $0x130] sm:$0xff] }
 0xcb8   :  { %8257 = vmatprep.subr.bf16.mxu1 %v10325_v4  ;;  %8319 = vmatpush1.bf16.msra.mxu0 %v10376_v63 }
 0xcbb   :  { %8259 = vmatpush1.bf16.msra.mxu1 %v10329_v25 }
 0xcbc   :  { %8261 = vmatprep.subr.bf16.mxu1 %v10333_v43 }
 0xcbf   :  { %8263 = vmatpush1.bf16.msra.mxu1 %v10336_v34 }
 0xcc0   :  { %8265 = vmatprep.subr.bf16.mxu1 %v10339_v31 }
 0xcc3   :  { %8267 = vmatpush1.bf16.msra.mxu1 %v10342_v0 }
 0xcc4   :  { %8269 = vmatprep.subr.bf16.mxu1 %v10345_v18 }
 0xcc7   :  { %8271 = vmatpush1.bf16.msra.mxu1 %v10348_v13 }
 0xcc8   :  { %8273 = vmatprep.subr.bf16.mxu1 %v10351_v27 }
 0xccb   :  { %8275 = vmatpush1.bf16.msra.mxu1 %v10354_v1 }
 0xccc   :  { %8277 = vmatprep.subr.bf16.mxu1 %v10357_v9 }
 0xccf   :  { %8279 = vmatpush1.bf16.msra.mxu1 %v10360_v38 }
 0xcd0   :  { %8281 = vmatprep.subr.bf16.mxu1 %v10363_v3 }
 0xcd3   :  { %8283 = vmatpush1.bf16.msra.mxu1 %v10366_v57 }
 0xcd4   :  { %8349 = vmatprep.subr.bf16.mxu1 %v10374_v33 }
 0xcd6   :  { %4720 = vmatmul.mubr.f32.vlgmr.msra.gmra.mrb[10].mxu1 %v10278_v60  ;;  %v4828_v60 = vld [vmem:[#allocation9 + $0x48] sm:$0xff] }
 0xcd7   :  { %5018 = vmatprep.mubr.f32.mxu1 %v9433_v42  ;;  %8351 = vmatpush1.bf16.msra.mxu1 %v10379_v8  ;;  %v8320_v10 = vpack.c.bf16 %v4832_v26, %v4828_v60  ;;  %v4850_v60 = vld [vmem:[#allocation9 + $0xf8] sm:$0xff]  ;;  %v4843_v26 = vld [vmem:[#allocation9 + $0xc0] sm:$0xff] }
 0xcd8   :  { %8353 = vmatprep.subr.bf16.mxu1 %v8352_v35  ;;  %v8330_v14 = vpack.c.bf16 %v4847_v49, %v4843_v26  ;;  %v8362_v35 = vpack.c.bf16 %v4849_v20, %v4845_v11  ;;  %v4861_v26 = vld [vmem:[#allocation9 + $0x150] sm:$0xff]  ;;  %v4872_v11 = vld [vmem:[#allocation9 + $0x1a8] sm:$0xff]  ;;  %v4870_v20 = vld [vmem:[#allocation9 + $0x198] sm:$0xff] }
 0xcd9   :  { %8321 = vmatprep.subr.bf16.mxu0 %v8320_v10  ;;  %v8360_v10 = vpack.c.bf16 %v4850_v60, %v4846_v46  ;;  %v4863_v46 = vld [vmem:[#allocation9 + $0x160] sm:$0xff]  ;;  %v4865_v49 = vld [vmem:[#allocation9 + $0x170] sm:$0xff] }
 0xcda   :  { %8323 = vmatpush1.bf16.msra.mxu0 %v8322_v52  ;;  %v4852_v52 = vld [vmem:[#allocation9 + $0x108] sm:$0xff]  ;;  %v8338_v60 = vpack.c.bf16 %v4863_v46, %v4859_v28  ;;  %v4881_v46 = vld [vmem:[#allocation9 + $0x1f0] sm:$0xff] }
 0xcdb   :  { %8355 = vmatpush1.bf16.msra.mxu1 %v8354_v53  ;;  %8325 = vmatprep.subr.bf16.mxu0 %v8324_v12  ;;  %v8332_v53 = vpack.c.bf16 %v4856_v32, %v4852_v52  ;;  %v8364_v12 = vpack.c.bf16 %v4858_v51, %v4854_v54  ;;  %v4874_v52 = vld [vmem:[#allocation9 + $0x1b8] sm:$0xff]  ;;  %v4867_v32 = vld [vmem:[#allocation9 + $0x180] sm:$0xff] }
 0xcdc   :  { %8357 = vmatprep.subr.bf16.mxu1 %v8356_v39  ;;  %v8366_v39 = vpack.c.bf16 %v4857_v30, %v4853_v45  ;;  %v4871_v54 = vld [vmem:[#allocation9 + $0x1a0] sm:$0xff]  ;;  %v4880_v45 = vld [vmem:[#allocation9 + $0x1e8] sm:$0xff]  ;;  %v4878_v30 = vld [vmem:[#allocation9 + $0x1d8] sm:$0xff] }
 0xcdd   :  { %v8342_v51 = vpack.c.bf16 %v4871_v54, %v4867_v32 }
 0xcde   :  { %8327 = vmatpush1.bf16.msra.mxu0 %v8326_v36  ;;  %v4860_v36 = vld [vmem:[#allocation9 + $0x148] sm:$0xff] }
 0xcdf   :  { %8359 = vmatpush1.bf16.msra.mxu1 %v8358_v50  ;;  %8329 = vmatprep.subr.bf16.mxu0 %v8328_v7  ;;  %v8336_v50 = vpack.c.bf16 %v4864_v29, %v4860_v36  ;;  %v8368_v7 = vpack.c.bf16 %v4866_v41, %v4862_v59  ;;  %v4875_v59 = vld [vmem:[#allocation9 + $0x1c0] sm:$0xff]  ;;  %v4877_v41 = vld [vmem:[#allocation9 + $0x1d0] sm:$0xff] }
 0xce0   :  { %8361 = vmatprep.subr.bf16.mxu1 %v8360_v10  ;;  %v8370_v10 = vpack.c.bf16 %v4865_v49, %v4861_v26  ;;  %v8378_v26 = vpack.c.bf16 %v4881_v46, %v4877_v41 }
 0xce2   :  { %8331 = vmatpush1.bf16.msra.mxu0 %v8330_v14  ;;  %v4868_v14 = vld [vmem:[#allocation9 + $0x188] sm:$0xff] }
 0xce3   :  { %8363 = vmatpush1.bf16.msra.mxu1 %v8362_v35  ;;  %8333 = vmatprep.subr.bf16.mxu0 %v8332_v53  ;;  %v8340_v35 = vpack.c.bf16 %v4872_v11, %v4868_v14  ;;  %v8372_v53 = vpack.c.bf16 %v4874_v52, %v4870_v20  ;;  %v5032_v14 = vld [vmem:[#allocation11 + $0x38] sm:$0xff] }
 0xce4   :  { %8365 = vmatprep.subr.bf16.mxu1 %v8364_v12  ;;  %v4876_v12 = vld [vmem:[#allocation9 + $0x1c8] sm:$0xff] }
 0xce5   :  { %v8344_v36 = vpack.c.bf16 %v4880_v45, %v4876_v12  ;;  %v8951_v45 = vadd.f32 %v10319_v40, %v9760_v16  ;;  %v5029_v40 = vld [vmem:[#allocation11 + $0x20] sm:$0xff] }
 0xce6   :  { %8335 = vmatpush1.bf16.msra.mxu0 %v8334_v23  ;;  %v8374_v23 = vpack.c.bf16 %v4873_v15, %v4869_v58 }
 0xce7   :  { %8367 = vmatpush1.bf16.msra.mxu1 %v8366_v39  ;;  %8337 = vmatprep.subr.bf16.mxu0 %v8336_v50  ;;  %v4882_v39 = vld [vmem:[#allocation9 + $0x1f8] sm:$0xff]  ;;  %v4879_v50 = vld [vmem:[#allocation9 + $0x1e0] sm:$0xff] }
 0xce8   :  { %8369 = vmatprep.subr.bf16.mxu1 %v8368_v7  ;;  %v8376_v29 = vpack.c.bf16 %v4882_v39, %v4878_v30  ;;  %v8346_v28 = vpack.c.bf16 %v4879_v50, %v4875_v59  ;;  %v5026_v7 = vld [vmem:[#allocation11 + $0x8] sm:$0xff]  ;;  %v4810_v30 = vmul.f32 0.5, %v8951_v45  ;;  %v5035_v45 = vld [vmem:[#allocation11 + $0x50] sm:$0xff] }
 0xcea   :  { %8339 = vmatpush1.bf16.msra.mxu0 %v8338_v60  ;;  %v5030_v60 = vld [vmem:[#allocation11 + $0x28] sm:$0xff] }
 0xceb   :  { %8371 = vmatpush1.bf16.msra.mxu1 %v8370_v10  ;;  %8341 = vmatprep.subr.bf16.mxu0 %v8340_v35  ;;  %v8380_v49 = vpack.c.bf16 %v5030_v60, %v5026_v7  ;;  %v5028_v10 = vld [vmem:[#allocation11 + $0x18] sm:$0xff] }
 0xcec   :  { %8373 = vmatprep.subr.bf16.mxu1 %v8372_v53  ;;  %v8412_v11 = vpack.c.bf16 %v5032_v14, %v5028_v10  ;;  %v5027_v10 = vld [vmem:[#allocation11 + $0x10] sm:$0xff] }
 0xced   :  { %v5031_v14 = vld [vmem:[#allocation11 + $0x30] sm:$0xff] }
 0xcee   :  { %8343 = vmatpush1.bf16.msra.mxu0 %v8342_v51 }
 0xcef   :  { %8375 = vmatpush1.bf16.msra.mxu1 %v8374_v23  ;;  %8345 = vmatprep.subr.bf16.mxu0 %v8344_v36  ;;  %v8950_v23 = vadd.f32 %v10317_v21, %v9753_v5 }
 0xcf0   :  { %8377 = vmatprep.subr.bf16.mxu1 %v8376_v29 }
 0xcf2   :  { %8347 = vmatpush1.bf16.msra.mxu0 %v8346_v28 }
 0xcf3   :  { %8379 = vmatpush1.bf16.msra.mxu1 %v8378_v26  ;;  %8381 = vmatprep.subr.bf16.mxu0 %v8380_v49  ;;  %v5025_v49 = vld [vmem:[#allocation11] sm:$0xff] }
 0xcf4   :  { %8413 = vmatprep.subr.bf16.mxu1 %v8412_v11  ;;  %v5034_v11 = vld [vmem:[#allocation11 + $0x48] sm:$0xff] }
 0xd89   :  { %v4580_v20 = vpop.f32.mrb[30].mxu1 }
 0xd8a   :  { %v4581_v35 = vadd.f32 %v4580_v20, %v9899_v37  ;;  %v4582_v52 = vpop.f32.mrb[31].mxu1  ;;  %v5038_v20 = vld [vmem:[#allocation11 + $0x68] sm:$0xff] }
 0xd8b   :  { %v4583_v32 = vadd.f32 %v4582_v52, %v9902_v47  ;;  %v5040_v52 = vld [vmem:[#allocation11 + $0x78] sm:$0xff] }
 0xd8c   :  { %4585 = vst [vmem:[%s10710_s12 + $0x40] sm:$0xff] %v4581_v35  ;;  %v5036_v35 = vld [vmem:[#allocation11 + $0x58] sm:$0xff] }
 0xd8d   :  { %4586 = vst [vmem:[%s10710_s12 + $0x48] sm:$0xff] %v4583_v32 }
 0xda9   :  { %v4721_v54 = vpop.f32.mrb[10].mxu1 }
 0xdaa   :  { %v8934_v53 = vadd.f32 %v4721_v54, %v9744_v62  ;;  %v4723_v51 = vpop.f32.mrb[11].mxu1 }
 0xdab   :  { %v8935_v58 = vadd.f32 %v4723_v51, %v9748_v2  ;;  %v8414_v51 = vpack.c.bf16 %v5031_v14, %v5027_v10  ;;  %v5054_v10 = vld [vmem:[#allocation11 + $0xe8] sm:$0xff]  ;;  %v5052_v14 = vld [vmem:[#allocation11 + $0xd8] sm:$0xff] }
 0xdac   :  { %v4801_v15 = vmul.f32 0.5, %v8934_v53  ;;  %v8382_v53 = vpack.c.bf16 %v5029_v40, %v5025_v49  ;;  %v5047_v49 = vld [vmem:[#allocation11 + $0xb0] sm:$0xff]  ;;  %v5050_v40 = vld [vmem:[#allocation11 + $0xc8] sm:$0xff] }
 0xdad   :  { %v4805_v12 = vmul.f32 0.5, %v8935_v58  ;;  %v5033_v58 = vld [vmem:[#allocation11 + $0x40] sm:$0xff] }
 0xdae   :  { %9171 = vtanh.f32 %v4801_v15 }
 0xdaf   :  { %9173 = vtanh.f32 %v4805_v12  ;;  %v8384_v12 = vpack.c.bf16 %v5038_v20, %v5034_v11  ;;  %v5056_v11 = vld [vmem:[#allocation11 + $0xf8] sm:$0xff] }
 0xdb0   :  { %9175 = vtanh.f32 %v8950_v23  ;;  %v8416_v23 = vpack.c.bf16 %v5040_v52, %v5036_v35  ;;  %v5049_v52 = vld [vmem:[#allocation11 + $0xc0] sm:$0xff] }
 0xdb1   :  { %9177 = vtanh.f32 %v4810_v30  ;;  %v5039_v30 = vld [vmem:[#allocation11 + $0x70] sm:$0xff] }
 0xdb8   :  { %v9172_v39 = vpop.eup %9171 }
 0xdb9   :  { %v9174_v36 = vpop.eup %9173  ;;  %v4803_v29 = vmul.f32 0.5, %v9172_v39  ;;  %v5042_v39 = vld [vmem:[#allocation11 + $0x88] sm:$0xff] }
 0xdba   :  { %v4807_v59 = vmul.f32 0.5, %v9174_v36  ;;  %v9176_v41 = vpop.eup %9175  ;;  %v5046_v36 = vld [vmem:[#allocation11 + $0xa8] sm:$0xff] }
 0xdbb   :  { %v4804_v50 = vadd.f32 0.5, %v4803_v29  ;;  %v9178_v21 = vpop.eup %9177  ;;  %v5044_v29 = vld [vmem:[#allocation11 + $0x98] sm:$0xff] }
 0xdbc   :  { %v4808_v28 = vadd.f32 0.5, %v4807_v59  ;;  %v4812_v26 = vmul.f32 0.5, %v9178_v21  ;;  %v5048_v59 = vld [vmem:[#allocation11 + $0xb8] sm:$0xff] }
 0xdbd   :  { %v4815_v46 = vmul.f32 %v9176_v41, %v4804_v50  ;;  %v8418_v41 = vpack.c.bf16 %v5039_v30, %v5035_v45  ;;  %v8420_v21 = vpack.c.bf16 %v5048_v59, %v5044_v29  ;;  %v5064_v45 = vld [vmem:[#allocation11 + $0x138] sm:$0xff]  ;;  %v5061_v29 = vld [vmem:[#allocation11 + $0x120] sm:$0xff] }
 0xdbe   :  { %v4814_v7 = vmul.f32 %v4808_v28, %v10275_v48  ;;  %v4813_v32 = vadd.f32 0.5, %v4812_v26  ;;  %v5037_v48 = vld [vmem:[#allocation11 + $0x60] sm:$0xff]  ;;  %v5043_v26 = vld [vmem:[#allocation11 + $0x90] sm:$0xff] }
 0xdbf   :  { %v8386_v50 = vpack.c.bf16 %v5037_v48, %v5033_v58  ;;  %v5041_v28 = vld [vmem:[#allocation11 + $0x80] sm:$0xff]  ;;  %v8422_v35 = vpack.c.bf16 %v5047_v49, %v5043_v26  ;;  %v5055_v58 = vld [vmem:[#allocation11 + $0xf0] sm:$0xff]  ;;  %v5058_v48 = vld [vmem:[#allocation11 + $0x108] sm:$0xff] }
 0xdc0   :  { %v10399_v60 = vadd.f32 %v4815_v46, %v4814_v7  ;;  %v5045_v46 = vld [vmem:[#allocation11 + $0xa0] sm:$0xff]  ;;  %v8388_v7 = vpack.c.bf16 %v5046_v36, %v5042_v39  ;;  %v5072_v26 = vld [vmem:[#allocation11 + $0x178] sm:$0xff] }
 0xdc1   :  { %v8390_v20 = vpack.c.bf16 %v5045_v46, %v5041_v28  ;;  %v5057_v36 = vld [vmem:[#allocation11 + $0x100] sm:$0xff]  ;;  %v5063_v28 = vld [vmem:[#allocation11 + $0x130] sm:$0xff]  ;;  %v5066_v46 = vld [vmem:[#allocation11 + $0x148] sm:$0xff] }
 0xdc2   :  { %9179 = vtanh.f32 %v10399_v60  ;;  %v8398_v49 = vpack.c.bf16 %v5061_v29, %v5057_v36  ;;  %v5079_v36 = vld [vmem:[#allocation11 + $0x1b0] sm:$0xff]  ;;  %v5082_v29 = vld [vmem:[#allocation11 + $0x1c8] sm:$0xff] }
 0xdcc   :  { %v9180_v54 = vpop.eup %9179 }
 0xdcd   :  { %v10402_v15 = vmul.f32 %v9180_v54, %v4813_v32  ;;  %v5053_v32 = vld [vmem:[#allocation11 + $0xe0] sm:$0xff]  ;;  %v8392_v54 = vpack.c.bf16 %v5054_v10, %v5050_v40 }
 0xdce   :  { %v8394_v30 = vpack.c.bf16 %v5053_v32, %v5049_v52  ;;  %v5065_v10 = vld [vmem:[#allocation11 + $0x140] sm:$0xff]  ;;  %v5071_v52 = vld [vmem:[#allocation11 + $0x170] sm:$0xff]  ;;  %v5074_v32 = vld [vmem:[#allocation11 + $0x188] sm:$0xff] }
 0xdcf   :  { %4948 = vmatmul.mubr.f32.vlgmr.msra.gmra.mrb[46].mxu0 %v10402_v15  ;;  %5019 = vmatmul.mubr.f32.vlgmr.msra.gmra.mrb[32].mxu1 %v10402_v15 }
 0xdd0   :  { %8383 = vmatpush1.bf16.msra.mxu0 %v8382_v53  ;;  %8415 = vmatpush1.bf16.msra.mxu1 %v8414_v51  ;;  %v8424_v53 = vpack.c.bf16 %v5056_v11, %v5052_v14  ;;  %v5051_v51 = vld [vmem:[#allocation11 + $0xd0] sm:$0xff]  ;;  %v5069_v14 = vld [vmem:[#allocation11 + $0x160] sm:$0xff] }
 0xdd1   :  { %8385 = vmatprep.subr.bf16.mxu0 %v8384_v12  ;;  %8417 = vmatprep.subr.bf16.mxu1 %v8416_v23  ;;  %v5062_v12 = vld [vmem:[#allocation11 + $0x128] sm:$0xff]  ;;  %v5060_v23 = vld [vmem:[#allocation11 + $0x118] sm:$0xff]  ;;  %v8426_v39 = vpack.c.bf16 %v5055_v58, %v5051_v51  ;;  %v8402_v58 = vpack.c.bf16 %v5069_v14, %v5065_v10  ;;  %v5087_v10 = vld [vmem:[#allocation11 + $0x1f0] sm:$0xff] }
 0xdd2   :  { %5153 = vmatprep.mubr.f32.mxu0 %v9433_v42  ;;  %5224 = vmatprep.mubr.f32.mxu1 %v9433_v42  ;;  %v8396_v59 = vpack.c.bf16 %v5062_v12, %v5058_v48  ;;  %v5080_v51 = vld [vmem:[#allocation11 + $0x1b8] sm:$0xff]  ;;  %v5073_v12 = vld [vmem:[#allocation11 + $0x180] sm:$0xff] }
 0xdd4   :  { %8387 = vmatpush1.bf16.msra.mxu0 %v8386_v50  ;;  %8419 = vmatpush1.bf16.msra.mxu1 %v8418_v41  ;;  %v8428_v50 = vpack.c.bf16 %v5064_v45, %v5060_v23  ;;  %v5059_v41 = vld [vmem:[#allocation11 + $0x110] sm:$0xff]  ;;  %v5077_v23 = vld [vmem:[#allocation11 + $0x1a0] sm:$0xff] }
 0xdd5   :  { %8389 = vmatprep.subr.bf16.mxu0 %v8388_v7  ;;  %8421 = vmatprep.subr.bf16.mxu1 %v8420_v21  ;;  %v5070_v7 = vld [vmem:[#allocation11 + $0x168] sm:$0xff]  ;;  %v5068_v21 = vld [vmem:[#allocation11 + $0x158] sm:$0xff]  ;;  %v8430_v40 = vpack.c.bf16 %v5063_v28, %v5059_v41  ;;  %v8406_v28 = vpack.c.bf16 %v5077_v23, %v5073_v12  ;;  %v5271_v12 = vld [vmem:[#allocation12 + $0x90] sm:$0xff] }
 0xdd6   :  { %v8400_v11 = vpack.c.bf16 %v5070_v7, %v5066_v46  ;;  %v5088_v41 = vld [vmem:[#allocation11 + $0x1f8] sm:$0xff]  ;;  %v5081_v7 = vld [vmem:[#allocation11 + $0x1c0] sm:$0xff] }
 0xdd8   :  { %8391 = vmatpush1.bf16.msra.mxu0 %v8390_v20  ;;  %8423 = vmatpush1.bf16.msra.mxu1 %v8422_v35  ;;  %v8432_v20 = vpack.c.bf16 %v5072_v26, %v5068_v21  ;;  %v5067_v35 = vld [vmem:[#allocation11 + $0x150] sm:$0xff] }
 0xdd9   :  { %8393 = vmatprep.subr.bf16.mxu0 %v8392_v54  ;;  %8425 = vmatprep.subr.bf16.mxu1 %v8424_v53  ;;  %v5078_v54 = vld [vmem:[#allocation11 + $0x1a8] sm:$0xff]  ;;  %v5076_v53 = vld [vmem:[#allocation11 + $0x198] sm:$0xff]  ;;  %v8434_v48 = vpack.c.bf16 %v5071_v52, %v5067_v35  ;;  %v5265_v52 = vld [vmem:[#allocation12 + $0x60] sm:$0xff] }
 0xdda   :  { %v8404_v45 = vpack.c.bf16 %v5078_v54, %v5074_v32  ;;  %v5267_v32 = vld [vmem:[#allocation12 + $0x70] sm:$0xff] }
 0xddb   :  { %v8458_v54 = vpack.c.bf16 %v5267_v32, %v5265_v52 }
 0xddc   :  { %8395 = vmatpush1.bf16.msra.mxu0 %v8394_v30  ;;  %8427 = vmatpush1.bf16.msra.mxu1 %v8426_v39  ;;  %v8436_v30 = vpack.c.bf16 %v5080_v51, %v5076_v53  ;;  %v5075_v39 = vld [vmem:[#allocation11 + $0x190] sm:$0xff]  ;;  %v5270_v53 = vld [vmem:[#allocation12 + $0x88] sm:$0xff]  ;;  %v5272_v51 = vld [vmem:[#allocation12 + $0x98] sm:$0xff] }
 0xddd   :  { %8397 = vmatprep.subr.bf16.mxu0 %v8396_v59  ;;  %8429 = vmatprep.subr.bf16.mxu1 %v8428_v50  ;;  %v5086_v59 = vld [vmem:[#allocation11 + $0x1e8] sm:$0xff]  ;;  %v5084_v50 = vld [vmem:[#allocation11 + $0x1d8] sm:$0xff]  ;;  %v8438_v46 = vpack.c.bf16 %v5079_v36, %v5075_v39  ;;  %v5273_v36 = vld [vmem:[#allocation12 + $0xa0] sm:$0xff] }
 0xdde   :  { %v8408_v21 = vpack.c.bf16 %v5086_v59, %v5082_v29  ;;  %v8440_v26 = vpack.c.bf16 %v5088_v41, %v5084_v50  ;;  %v5275_v29 = vld [vmem:[#allocation12 + $0xb0] sm:$0xff]  ;;  %v5278_v50 = vld [vmem:[#allocation12 + $0xc8] sm:$0xff]  ;;  %v5280_v41 = vld [vmem:[#allocation12 + $0xd8] sm:$0xff] }
 0xddf   :  { %v8466_v59 = vpack.c.bf16 %v5275_v29, %v5273_v36 }
 0xde0   :  { %8399 = vmatpush1.bf16.msra.mxu0 %v8398_v49  ;;  %8431 = vmatpush1.bf16.msra.mxu1 %v8430_v40  ;;  %v5085_v49 = vld [vmem:[#allocation11 + $0x1e0] sm:$0xff]  ;;  %v5083_v40 = vld [vmem:[#allocation11 + $0x1d0] sm:$0xff] }
 0xde1   :  { %8401 = vmatprep.subr.bf16.mxu0 %v8400_v11  ;;  %8433 = vmatprep.subr.bf16.mxu1 %v8432_v20  ;;  %v8410_v14 = vpack.c.bf16 %v5085_v49, %v5081_v7  ;;  %v8442_v11 = vpack.c.bf16 %v5087_v10, %v5083_v40  ;;  %v5268_v20 = vld [vmem:[#allocation12 + $0x78] sm:$0xff]  ;;  %v5279_v7 = vld [vmem:[#allocation12 + $0xd0] sm:$0xff]  ;;  %v5281_v10 = vld [vmem:[#allocation12 + $0xe0] sm:$0xff] }
 0xde2   :  { %v5284_v49 = vld [vmem:[#allocation12 + $0xf8] sm:$0xff] }
 0xde4   :  { %8403 = vmatpush1.bf16.msra.mxu0 %v8402_v58  ;;  %8435 = vmatpush1.bf16.msra.mxu1 %v8434_v48  ;;  %v8460_v58 = vpack.c.bf16 %v5272_v51, %v5270_v53  ;;  %v5269_v48 = vld [vmem:[#allocation12 + $0x80] sm:$0xff] }
 0xde5   :  { %8405 = vmatprep.subr.bf16.mxu0 %v8404_v45  ;;  %8437 = vmatprep.subr.bf16.mxu1 %v8436_v30  ;;  %v8462_v23 = vpack.c.bf16 %v5271_v12, %v5269_v48  ;;  %v5274_v45 = vld [vmem:[#allocation12 + $0xa8] sm:$0xff]  ;;  %v5276_v30 = vld [vmem:[#allocation12 + $0xb8] sm:$0xff]  ;;  %v5364_v48 = vld [vmem:[#allocation8 + $0x10] sm:$0xff] }
 0xde6   :  { %v8464_v39 = vpack.c.bf16 %v5276_v30, %v5274_v45  ;;  %v5368_v12 = vld [vmem:[#allocation8 + $0x30] sm:$0xff]  ;;  %v5373_v45 = vld [vmem:[#allocation8 + $0x58] sm:$0xff] }
 0xde7   :  { %v5377_v30 = vld [vmem:[#allocation8 + $0x78] sm:$0xff]  ;;  %v10447_v29 = vpack.c.bf16 %v5368_v12, %v5364_v48  ;;  %v5420_v48 = vld [vmem:[#allocation8 + $0x1d0] sm:$0xff] }
 0xde8   :  { %8407 = vmatpush1.bf16.msra.mxu0 %v8406_v28  ;;  %8439 = vmatpush1.bf16.msra.mxu1 %v8438_v46  ;;  %v8468_v28 = vpack.c.bf16 %v5280_v41, %v5278_v50  ;;  %v5277_v46 = vld [vmem:[#allocation12 + $0xc0] sm:$0xff]  ;;  %v5372_v50 = vld [vmem:[#allocation8 + $0x50] sm:$0xff] }
 0xde9   :  { %8409 = vmatprep.subr.bf16.mxu0 %v8408_v21  ;;  %8441 = vmatprep.subr.bf16.mxu1 %v8440_v26  ;;  %v8470_v21 = vpack.c.bf16 %v5279_v7, %v5277_v46  ;;  %v5282_v26 = vld [vmem:[#allocation12 + $0xe8] sm:$0xff]  ;;  %v5376_v41 = vld [vmem:[#allocation8 + $0x70] sm:$0xff]  ;;  %v5385_v46 = vld [vmem:[#allocation8 + $0xb8] sm:$0xff] }
 0xdea   :  { %v8472_v40 = vpack.c.bf16 %v5284_v49, %v5282_v26  ;;  %v10455_v7 = vpack.c.bf16 %v5376_v41, %v5372_v50  ;;  %v5380_v26 = vld [vmem:[#allocation8 + $0x90] sm:$0xff]  ;;  %v5605_v41 = vld [vmem:[#allocation9 + $0x78] sm:$0xff] }
 0xdeb   :  { %v5384_v49 = vld [vmem:[#allocation8 + $0xb0] sm:$0xff] }
 0xdec   :  { %8411 = vmatpush1.bf16.msra.mxu0 %v8410_v14  ;;  %8443 = vmatpush1.bf16.msra.mxu1 %v8442_v11  ;;  %v5283_v14 = vld [vmem:[#allocation12 + $0xf0] sm:$0xff] }
 0xded   :  { %8477 = vmatprep.subr.bf16.mxu1 %v10306_v55  ;;  %v5254_v55 = vld [vmem:[#allocation12 + $0x8] sm:$0xff]  ;;  %v8474_v11 = vpack.c.bf16 %v5283_v14, %v5281_v10  ;;  %v5393_v10 = vld [vmem:[#allocation8 + $0xf8] sm:$0xff]  ;;  %v10462_v14 = vpack.c.bf16 %v5384_v49, %v5380_v26  ;;  %v5424_v12 = vld [vmem:[#allocation8 + $0x1f0] sm:$0xff] }
 0xdef   :  { %5154 = vmatmul.mubr.f32.vlgmr.msra.gmra.mrb[46].mxu0 %v10323_v24  ;;  %5225 = vmatmul.mubr.f32.vlgmr.msra.gmra.mrb[32].mxu1 %v10323_v24 }
 0xdf0   :  { %8479 = vmatpush1.bf16.msra.mxu1 %v10321_v6  ;;  %5490 = vmatprep.mubr.f32.mxu1 %v9433_v42  ;;  %v5256_v6 = vld [vmem:[#allocation12 + $0x18] sm:$0xff] }
 0xdf1   :  { %8481 = vmatprep.subr.bf16.mxu1 %v10325_v4  ;;  %5349 = vmatprep.mubr.f32.mxu0 %v9433_v42  ;;  %v8444_v24 = vpack.c.bf16 %v5256_v6, %v5254_v55  ;;  %v5253_v4 = vld [vmem:[#allocation12] sm:$0xff]  ;;  %v5365_v55 = vld [vmem:[#allocation8 + $0x18] sm:$0xff] }
 0xdf2   :  { %v5369_v6 = vld [vmem:[#allocation8 + $0x38] sm:$0xff] }
 0xdf3   :  { %8445 = vmatprep.subr.bf16.mxu0 %v8444_v24  ;;  %v10432_v24 = vpack.c.bf16 %v5369_v6, %v5365_v55  ;;  %v5388_v55 = vld [vmem:[#allocation8 + $0xd0] sm:$0xff] }
 0xdf4   :  { %8483 = vmatpush1.bf16.msra.mxu1 %v10329_v25  ;;  %v5255_v25 = vld [vmem:[#allocation12 + $0x10] sm:$0xff] }
 0xdf5   :  { %8485 = vmatprep.subr.bf16.mxu1 %v10333_v43  ;;  %v8446_v43 = vpack.c.bf16 %v5255_v25, %v5253_v4  ;;  %v5392_v6 = vld [vmem:[#allocation8 + $0xf0] sm:$0xff] }
 0xdf7   :  { %8447 = vmatpush1.bf16.msra.mxu0 %v8446_v43 }
 0xdf8   :  { %8487 = vmatpush1.bf16.msra.mxu1 %v10336_v34  ;;  %v5258_v34 = vld [vmem:[#allocation12 + $0x28] sm:$0xff] }
 0xdf9   :  { %8489 = vmatprep.subr.bf16.mxu1 %v10339_v31  ;;  %v5260_v31 = vld [vmem:[#allocation12 + $0x38] sm:$0xff] }
 0xdfc   :  { %8491 = vmatpush1.bf16.msra.mxu1 %v10342_v0  ;;  %v8448_v0 = vpack.c.bf16 %v5260_v31, %v5258_v34 }
 0xdfd   :  { %8493 = vmatprep.subr.bf16.mxu1 %v10345_v18  ;;  %v5257_v18 = vld [vmem:[#allocation12 + $0x20] sm:$0xff] }
 0xdfe   :  { %8449 = vmatprep.subr.bf16.mxu0 %v8448_v0 }
 0xe00   :  { %8495 = vmatpush1.bf16.msra.mxu1 %v10348_v13  ;;  %v5259_v13 = vld [vmem:[#allocation12 + $0x30] sm:$0xff] }
 0xe01   :  { %8497 = vmatprep.subr.bf16.mxu1 %v10351_v27  ;;  %v8450_v27 = vpack.c.bf16 %v5259_v13, %v5257_v18 }
 0xe03   :  { %8451 = vmatpush1.bf16.msra.mxu0 %v8450_v27 }
 0xe04   :  { %8499 = vmatpush1.bf16.msra.mxu1 %v10354_v1  ;;  %v5262_v1 = vld [vmem:[#allocation12 + $0x48] sm:$0xff] }
 0xe05   :  { %8501 = vmatprep.subr.bf16.mxu1 %v10357_v9  ;;  %v5264_v9 = vld [vmem:[#allocation12 + $0x58] sm:$0xff] }
 0xe08   :  { %8503 = vmatpush1.bf16.msra.mxu1 %v10360_v38  ;;  %v8452_v38 = vpack.c.bf16 %v5264_v9, %v5262_v1 }
 0xe09   :  { %8505 = vmatprep.subr.bf16.mxu1 %v10363_v3  ;;  %v5261_v3 = vld [vmem:[#allocation12 + $0x40] sm:$0xff] }
 0xe0a   :  { %8453 = vmatprep.subr.bf16.mxu0 %v8452_v38 }
 0xe0c   :  { %8507 = vmatpush1.bf16.msra.mxu1 %v10366_v57  ;;  %v5263_v57 = vld [vmem:[#allocation12 + $0x50] sm:$0xff] }
 0xe0d   :  { %8541 = vmatprep.subr.bf16.mxu1 %v10372_v61  ;;  %v8454_v61 = vpack.c.bf16 %v5263_v57, %v5261_v3 }
 0xe0f   :  { %5491 = vmatmul.mubr.f32.vlgmr.msra.gmra.mrb[12].mxu1 %v10402_v15  ;;  %8455 = vmatpush1.bf16.msra.mxu0 %v8454_v61 }
 0xe10   :  { %8543 = vmatpush1.bf16.msra.mxu1 %v10376_v63  ;;  %5718 = vmatprep.mubr.f32.mxu1 %v9433_v42  ;;  %v5266_v63 = vld [vmem:[#allocation12 + $0x68] sm:$0xff] }
 0xe11   :  { %v8456_v35 = vpack.c.bf16 %v5268_v20, %v5266_v63 }
 0xe13   :  { %8457 = vmatprep.subr.bf16.mxu0 %v8456_v35 }
 0xe14   :  { %8459 = vmatpush1.bf16.msra.mxu0 %v8458_v54 }
 0xe15   :  { %8461 = vmatprep.subr.bf16.mxu0 %v8460_v58 }
 0xe18   :  { %8463 = vmatpush1.bf16.msra.mxu0 %v8462_v23 }
 0xe19   :  { %8465 = vmatprep.subr.bf16.mxu0 %v8464_v39 }
 0xe1c   :  { %8467 = vmatpush1.bf16.msra.mxu0 %v8466_v59 }
 0xe1d   :  { %8469 = vmatprep.subr.bf16.mxu0 %v8468_v28  ;;  %v5381_v28 = vld [vmem:[#allocation8 + $0x98] sm:$0xff] }
 0xe20   :  { %8471 = vmatpush1.bf16.msra.mxu0 %v8470_v21  ;;  %v10459_v21 = vpack.c.bf16 %v5385_v46, %v5381_v28  ;;  %v5598_v28 = vld [vmem:[#allocation9 + $0x40] sm:$0xff] }
 0xe21   :  { %8473 = vmatprep.subr.bf16.mxu0 %v8472_v40  ;;  %v5389_v40 = vld [vmem:[#allocation8 + $0xd8] sm:$0xff]  ;;  %v5602_v46 = vld [vmem:[#allocation9 + $0x60] sm:$0xff] }
 0xe22   :  { %v8546_v49 = vpack.c.bf16 %v5602_v46, %v5598_v28  ;;  %v5627_v28 = vld [vmem:[#allocation9 + $0x128] sm:$0xff]  ;;  %v5625_v46 = vld [vmem:[#allocation9 + $0x118] sm:$0xff] }
 0xe24   :  { %8475 = vmatpush1.bf16.msra.mxu0 %v8474_v11  ;;  %v10465_v11 = vpack.c.bf16 %v5393_v10, %v5389_v40  ;;  %v5600_v40 = vld [vmem:[#allocation9 + $0x50] sm:$0xff] }
 0xe25   :  { %8509 = vmatprep.subr.bf16.mxu0 %v10432_v24  ;;  %v5604_v10 = vld [vmem:[#allocation9 + $0x70] sm:$0xff] }
 0xec2   :  { %v5155_v4 = vpop.f32.mrb[46].mxu0  ;;  %v5226_v25 = vpop.f32.mrb[32].mxu1 }
 0xec3   :  { %v8976_v43 = vadd.f32 %v5155_v4, %v9805_v44  ;;  %v5157_v34 = vpop.f32.mrb[47].mxu0  ;;  %v5228_v31 = vpop.f32.mrb[33].mxu1  ;;  %v8978_v27 = vadd.f32 %v5226_v25, %v9813_v22  ;;  %v5397_v4 = vld [vmem:[#allocation8 + $0x118] sm:$0xff] }
 0xec4   :  { %v8977_v0 = vadd.f32 %v5157_v34, %v9808_v56  ;;  %v8979_v1 = vadd.f32 %v5228_v31, %v9819_v17  ;;  %v5401_v25 = vld [vmem:[#allocation8 + $0x138] sm:$0xff]  ;;  %v5396_v31 = vld [vmem:[#allocation8 + $0x110] sm:$0xff] }
 0xec5   :  { %v5235_v18 = vmul.f32 0.5, %v8976_v43  ;;  %v10468_v43 = vpack.c.bf16 %v5392_v6, %v5388_v55  ;;  %v10471_v34 = vpack.c.bf16 %v5401_v25, %v5397_v4  ;;  %v8578_v55 = vpack.c.bf16 %v5604_v10, %v5600_v40  ;;  %v5613_v4 = vld [vmem:[#allocation9 + $0xb8] sm:$0xff]  ;;  %v5606_v25 = vld [vmem:[#allocation9 + $0x80] sm:$0xff] }
 0xec6   :  { %v5239_v13 = vmul.f32 0.5, %v8977_v0  ;;  %v5244_v9 = vmul.f32 0.5, %v8979_v1  ;;  %v5400_v0 = vld [vmem:[#allocation8 + $0x130] sm:$0xff]  ;;  %v5622_v40 = vld [vmem:[#allocation9 + $0x100] sm:$0xff] }
 0xec7   :  { %9181 = vtanh.f32 %v5235_v18  ;;  %v5405_v18 = vld [vmem:[#allocation8 + $0x158] sm:$0xff]  ;;  %v5626_v10 = vld [vmem:[#allocation9 + $0x120] sm:$0xff] }
 0xec8   :  { %9183 = vtanh.f32 %v5239_v13  ;;  %v5409_v13 = vld [vmem:[#allocation8 + $0x178] sm:$0xff] }
 0xec9   :  { %9185 = vtanh.f32 %v8978_v27  ;;  %v10474_v27 = vpack.c.bf16 %v5400_v0, %v5396_v31  ;;  %v10477_v1 = vpack.c.bf16 %v5409_v13, %v5405_v18  ;;  %v5610_v31 = vld [vmem:[#allocation9 + $0xa0] sm:$0xff]  ;;  %v5608_v13 = vld [vmem:[#allocation9 + $0x90] sm:$0xff] }
 0xeca   :  { %9187 = vtanh.f32 %v5244_v9  ;;  %v5404_v9 = vld [vmem:[#allocation8 + $0x150] sm:$0xff]  ;;  %v8550_v18 = vpack.c.bf16 %v5610_v31, %v5606_v25  ;;  %v5635_v25 = vld [vmem:[#allocation9 + $0x168] sm:$0xff]  ;;  %v5633_v31 = vld [vmem:[#allocation9 + $0x158] sm:$0xff] }
 0xed1   :  { %v9182_v38 = vpop.eup %9181 }
 0xed2   :  { %v9184_v3 = vpop.eup %9183  ;;  %v5237_v57 = vmul.f32 0.5, %v9182_v38  ;;  %v5408_v38 = vld [vmem:[#allocation8 + $0x170] sm:$0xff] }
 0xed3   :  { %v5241_v61 = vmul.f32 0.5, %v9184_v3  ;;  %v9186_v20 = vpop.eup %9185  ;;  %v5413_v3 = vld [vmem:[#allocation8 + $0x198] sm:$0xff] }
 0xed4   :  { %v5238_v63 = vadd.f32 0.5, %v5237_v57  ;;  %v9188_v53 = vpop.eup %9187  ;;  %v5417_v57 = vld [vmem:[#allocation8 + $0x1b8] sm:$0xff] }
 0xed5   :  { %v5242_v35 = vadd.f32 0.5, %v5241_v61  ;;  %v5246_v51 = vmul.f32 0.5, %v9188_v53  ;;  %v10480_v61 = vpack.c.bf16 %v5408_v38, %v5404_v9  ;;  %v5612_v9 = vld [vmem:[#allocation9 + $0xb0] sm:$0xff] }
 0xed6   :  { %v5249_v52 = vmul.f32 %v9186_v20, %v5238_v63  ;;  %v10483_v63 = vpack.c.bf16 %v5417_v57, %v5413_v3  ;;  %v5412_v20 = vld [vmem:[#allocation8 + $0x190] sm:$0xff]  ;;  %v8582_v38 = vpack.c.bf16 %v5612_v9, %v5608_v13  ;;  %v5615_v3 = vld [vmem:[#allocation9 + $0xc8] sm:$0xff]  ;;  %v5630_v13 = vld [vmem:[#allocation9 + $0x140] sm:$0xff] }
 0xed7   :  { %v5248_v32 = vmul.f32 %v5242_v35, %v10314_v19  ;;  %v5247_v39 = vadd.f32 0.5, %v5246_v51  ;;  %v10451_v19 = vpack.c.bf16 %v5377_v30, %v5373_v45  ;;  %v5416_v35 = vld [vmem:[#allocation8 + $0x1b0] sm:$0xff]  ;;  %v10492_v45 = vpack.c.bf16 %v5424_v12, %v5420_v48  ;;  %v5599_v30 = vld [vmem:[#allocation9 + $0x48] sm:$0xff]  ;;  %v5618_v48 = vld [vmem:[#allocation9 + $0xe0] sm:$0xff] }
 0xed8   :  { %v10486_v53 = vpack.c.bf16 %v5416_v35, %v5412_v20  ;;  %v5619_v57 = vld [vmem:[#allocation9 + $0xe8] sm:$0xff]  ;;  %v5617_v20 = vld [vmem:[#allocation9 + $0xd8] sm:$0xff]  ;;  %v5634_v9 = vld [vmem:[#allocation9 + $0x160] sm:$0xff] }
 0xed9   :  { %v10440_v54 = vadd.f32 %v5249_v52, %v5248_v32  ;;  %v5421_v52 = vld [vmem:[#allocation8 + $0x1d8] sm:$0xff]  ;;  %v8552_v35 = vpack.c.bf16 %v5619_v57, %v5615_v3  ;;  %v8562_v3 = vpack.c.bf16 %v5634_v9, %v5630_v13  ;;  %v5632_v57 = vld [vmem:[#allocation9 + $0x150] sm:$0xff]  ;;  %v5801_v13 = vld [vmem:[#allocation11 + $0x28] sm:$0xff] }
 0xeda   :  { %v5425_v32 = vld [vmem:[#allocation8 + $0x1f8] sm:$0xff] }
 0xedb   :  { %9189 = vtanh.f32 %v10440_v54  ;;  %v10489_v51 = vpack.c.bf16 %v5425_v32, %v5421_v52  ;;  %v5621_v52 = vld [vmem:[#allocation9 + $0xf8] sm:$0xff]  ;;  %v5614_v32 = vld [vmem:[#allocation9 + $0xc0] sm:$0xff] }
 0xedc   :  { %v8584_v12 = vpack.c.bf16 %v5621_v52, %v5617_v20  ;;  %v5636_v20 = vld [vmem:[#allocation9 + $0x170] sm:$0xff]  ;;  %v5639_v52 = vld [vmem:[#allocation9 + $0x188] sm:$0xff]  ;;  %v5799_v9 = vld [vmem:[#allocation11 + $0x18] sm:$0xff] }
 0xee2   :  { %v10443_v58 = vpop.f32.mrb[12].mxu1 }
 0xee3   :  { %v10445_v23 = vpop.f32.mrb[13].mxu1 }
 0xee5   :  { %v9190_v36 = vpop.eup %9189 }
 0xee6   :  { %v10449_v59 = vmul.f32 %v9190_v36, %v5247_v39  ;;  %v5603_v39 = vld [vmem:[#allocation9 + $0x68] sm:$0xff]  ;;  %v5601_v36 = vld [vmem:[#allocation9 + $0x58] sm:$0xff] }
 0xee7   :  { %v8544_v50 = vpack.c.bf16 %v5603_v39, %v5599_v30  ;;  %v8576_v26 = vpack.c.bf16 %v5605_v41, %v5601_v36  ;;  %v8554_v30 = vpack.c.bf16 %v5618_v48, %v5614_v32  ;;  %v5616_v39 = vld [vmem:[#allocation9 + $0xd0] sm:$0xff]  ;;  %v5623_v41 = vld [vmem:[#allocation9 + $0x108] sm:$0xff]  ;;  %v5641_v48 = vld [vmem:[#allocation9 + $0x198] sm:$0xff] }
 0xee8   :  { %5350 = vmatmul.mubr.f32.vlgmr.msra.gmra.mrb[48].mxu0 %v10449_v59  ;;  %v5620_v36 = vld [vmem:[#allocation9 + $0xf0] sm:$0xff]  ;;  %v5643_v32 = vld [vmem:[#allocation9 + $0x1a8] sm:$0xff] }
 0xee9   :  { %8511 = vmatpush1.bf16.msra.mxu0 %v10447_v29  ;;  %5561 = vmatprep.mubr.f32.mxu0 %v9433_v42 }
 0xeea   :  { %8513 = vmatprep.subr.bf16.mxu0 %v10451_v19  ;;  %8545 = vmatprep.subr.bf16.mxu1 %v8544_v50  ;;  %v8586_v50 = vpack.c.bf16 %v5620_v36, %v5616_v39  ;;  %v5638_v39 = vld [vmem:[#allocation9 + $0x180] sm:$0xff] }
 0xeeb   :  { %8547 = vmatpush1.bf16.msra.mxu1 %v8546_v49  ;;  %v5629_v49 = vld [vmem:[#allocation9 + $0x138] sm:$0xff]  ;;  %v5642_v36 = vld [vmem:[#allocation9 + $0x1a0] sm:$0xff] }
 0xeed   :  { %8515 = vmatpush1.bf16.msra.mxu0 %v10455_v7 }
 0xeee   :  { %8517 = vmatprep.subr.bf16.mxu0 %v10459_v21 }
 0xef1   :  { %8519 = vmatpush1.bf16.msra.mxu0 %v10462_v14 }
 0xef2   :  { %8521 = vmatprep.subr.bf16.mxu0 %v10465_v11 }
 0xef5   :  { %8523 = vmatpush1.bf16.msra.mxu0 %v10468_v43 }
 0xef6   :  { %8525 = vmatprep.subr.bf16.mxu0 %v10471_v34 }
 0xef9   :  { %8527 = vmatpush1.bf16.msra.mxu0 %v10474_v27 }
 0xefa   :  { %8529 = vmatprep.subr.bf16.mxu0 %v10477_v1 }
 0xefd   :  { %8531 = vmatpush1.bf16.msra.mxu0 %v10480_v61 }
 0xefe   :  { %8533 = vmatprep.subr.bf16.mxu0 %v10483_v63 }
 0xf01   :  { %8535 = vmatpush1.bf16.msra.mxu0 %v10486_v53 }
 0xf02   :  { %8537 = vmatprep.subr.bf16.mxu0 %v10489_v51 }
 0xf05   :  { %8539 = vmatpush1.bf16.msra.mxu0 %v10492_v45 }
 0xf06   :  { %8573 = vmatprep.subr.bf16.mxu0 %v10374_v33  ;;  %v5607_v33 = vld [vmem:[#allocation9 + $0x88] sm:$0xff] }
 0xf08   :  { %5562 = vmatmul.mubr.f32.vlgmr.msra.gmra.mrb[28].mxu0 %v10402_v15  ;;  %v5611_v15 = vld [vmem:[#allocation9 + $0xa8] sm:$0xff] }
 0xf09   :  { %8575 = vmatpush1.bf16.msra.mxu0 %v10379_v8  ;;  %5789 = vmatprep.mubr.f32.mxu0 %v9433_v42  ;;  %v5609_v8 = vld [vmem:[#allocation9 + $0x98] sm:$0xff]  ;;  %v8548_v6 = vpack.c.bf16 %v5611_v15, %v5607_v33  ;;  %v8558_v33 = vpack.c.bf16 %v5626_v10, %v5622_v40  ;;  %v5624_v15 = vld [vmem:[#allocation9 + $0x110] sm:$0xff]  ;;  %v5651_v40 = vld [vmem:[#allocation9 + $0x1e8] sm:$0xff] }
 0xf0a   :  { %8577 = vmatprep.subr.bf16.mxu0 %v8576_v26  ;;  %v8580_v0 = vpack.c.bf16 %v5613_v4, %v5609_v8  ;;  %v8556_v26 = vpack.c.bf16 %v5627_v28, %v5623_v41  ;;  %v5628_v8 = vld [vmem:[#allocation9 + $0x130] sm:$0xff]  ;;  %v5631_v4 = vld [vmem:[#allocation9 + $0x148] sm:$0xff]  ;;  %v8566_v41 = vpack.c.bf16 %v5642_v36, %v5638_v39  ;;  %v5649_v10 = vld [vmem:[#allocation9 + $0x1d8] sm:$0xff] }
 0xf0b   :  { %8549 = vmatprep.subr.bf16.mxu1 %v8548_v6  ;;  %v8590_v6 = vpack.c.bf16 %v5628_v8, %v5624_v15  ;;  %v5640_v28 = vld [vmem:[#allocation9 + $0x190] sm:$0xff]  ;;  %v5646_v15 = vld [vmem:[#allocation9 + $0x1c0] sm:$0xff] }
 0xf0c   :  { %8551 = vmatpush1.bf16.msra.mxu1 %v8550_v18  ;;  %v5637_v18 = vld [vmem:[#allocation9 + $0x178] sm:$0xff]  ;;  %v5650_v8 = vld [vmem:[#allocation9 + $0x1e0] sm:$0xff] }
 0xf0d   :  { %8579 = vmatpush1.bf16.msra.mxu0 %v8578_v55  ;;  %8553 = vmatprep.subr.bf16.mxu1 %v8552_v35  ;;  %v8588_v55 = vpack.c.bf16 %v5629_v49, %v5625_v46  ;;  %v8594_v35 = vpack.c.bf16 %v5636_v20, %v5632_v57  ;;  %v5644_v46 = vld [vmem:[#allocation9 + $0x1b0] sm:$0xff]  ;;  %v5647_v49 = vld [vmem:[#allocation9 + $0x1c8] sm:$0xff] }
 0xf0e   :  { %8581 = vmatprep.subr.bf16.mxu0 %v8580_v0  ;;  %v8560_v0 = vpack.c.bf16 %v5635_v25, %v5631_v4  ;;  %v8570_v4 = vpack.c.bf16 %v5650_v8, %v5646_v15  ;;  %v5648_v25 = vld [vmem:[#allocation9 + $0x1d0] sm:$0xff] }
 0xf10   :  { %8555 = vmatpush1.bf16.msra.mxu1 %v8554_v30  ;;  %v5645_v30 = vld [vmem:[#allocation9 + $0x1b8] sm:$0xff] }
 0xf11   :  { %8583 = vmatpush1.bf16.msra.mxu0 %v8582_v38  ;;  %8557 = vmatprep.subr.bf16.mxu1 %v8556_v26  ;;  %v8592_v38 = vpack.c.bf16 %v5637_v18, %v5633_v31  ;;  %v8598_v26 = vpack.c.bf16 %v5644_v46, %v5640_v28  ;;  %v5652_v31 = vld [vmem:[#allocation9 + $0x1f0] sm:$0xff]  ;;  %v5797_v18 = vld [vmem:[#allocation11 + $0x8] sm:$0xff] }
 0xf12   :  { %8585 = vmatprep.subr.bf16.mxu0 %v8584_v12  ;;  %v8564_v12 = vpack.c.bf16 %v5643_v32, %v5639_v52 }
 0xf14   :  { %8559 = vmatpush1.bf16.msra.mxu1 %v8558_v33  ;;  %v5653_v33 = vld [vmem:[#allocation9 + $0x1f8] sm:$0xff] }
 0xf15   :  { %8587 = vmatpush1.bf16.msra.mxu0 %v8586_v50  ;;  %8561 = vmatprep.subr.bf16.mxu1 %v8560_v0  ;;  %v8596_v50 = vpack.c.bf16 %v5645_v30, %v5641_v48  ;;  %v8602_v0 = vpack.c.bf16 %v5652_v31, %v5648_v25  ;;  %v8937_v48 = vadd.f32 %v10445_v23, %v9748_v2  ;;  %v5796_v25 = vld [vmem:[#allocation11] sm:$0xff] }
 0xf16   :  { %8589 = vmatprep.subr.bf16.mxu0 %v8588_v55  ;;  %v8568_v55 = vpack.c.bf16 %v5651_v40, %v5647_v49  ;;  %v5800_v31 = vld [vmem:[#allocation11 + $0x20] sm:$0xff] }
 0xf17   :  { %v5576_v30 = vmul.f32 0.5, %v8937_v48 }
 0xf18   :  { %8563 = vmatpush1.bf16.msra.mxu1 %v8562_v3  ;;  %v5803_v3 = vld [vmem:[#allocation11 + $0x38] sm:$0xff] }
 0xf19   :  { %8591 = vmatpush1.bf16.msra.mxu0 %v8590_v6  ;;  %8565 = vmatprep.subr.bf16.mxu1 %v8564_v12  ;;  %v8600_v6 = vpack.c.bf16 %v5653_v33, %v5649_v10  ;;  %v8636_v57 = vpack.c.bf16 %v5803_v3, %v5799_v9  ;;  %v8936_v12 = vadd.f32 %v10443_v58, %v9744_v62  ;;  %9191 = vtanh.f32 %v5576_v30  ;;  %v5809_v9 = vld [vmem:[#allocation11 + $0x68] sm:$0xff]  ;;  %v5811_v3 = vld [vmem:[#allocation11 + $0x78] sm:$0xff] }
 0xf1a   :  { %8593 = vmatprep.subr.bf16.mxu0 %v8592_v38  ;;  %v8604_v38 = vpack.c.bf16 %v5801_v13, %v5797_v18  ;;  %v5802_v18 = vld [vmem:[#allocation11 + $0x30] sm:$0xff]  ;;  %v5805_v13 = vld [vmem:[#allocation11 + $0x48] sm:$0xff] }
 0xf1b   :  { %v5572_v39 = vmul.f32 0.5, %v8936_v12  ;;  %v8608_v12 = vpack.c.bf16 %v5809_v9, %v5805_v13  ;;  %v5824_v13 = vld [vmem:[#allocation11 + $0xe0] sm:$0xff] }
 0xf1c   :  { %8567 = vmatpush1.bf16.msra.mxu1 %v8566_v41 }
 0xf1d   :  { %8595 = vmatpush1.bf16.msra.mxu0 %v8594_v35  ;;  %8569 = vmatprep.subr.bf16.mxu1 %v8568_v55  ;;  %9193 = vtanh.f32 %v5572_v39  ;;  %v5806_v39 = vld [vmem:[#allocation11 + $0x50] sm:$0xff] }
 0xf1e   :  { %8597 = vmatprep.subr.bf16.mxu0 %v8596_v50 }
 0xf20   :  { %8571 = vmatpush1.bf16.msra.mxu1 %v8570_v4 }
 0xf21   :  { %8599 = vmatpush1.bf16.msra.mxu0 %v8598_v26  ;;  %8605 = vmatprep.subr.bf16.mxu1 %v8604_v38  ;;  %v5807_v38 = vld [vmem:[#allocation11 + $0x58] sm:$0xff] }
 0xf22   :  { %8601 = vmatprep.subr.bf16.mxu0 %v8600_v6  ;;  %v8640_v30 = vpack.c.bf16 %v5811_v3, %v5807_v38  ;;  %v5822_v3 = vld [vmem:[#allocation11 + $0xd0] sm:$0xff] }
 0xf23   :  { %v9192_v46 = vpop.eup %9191 }
 0xf24   :  { %v5578_v49 = vmul.f32 0.5, %v9192_v46  ;;  %v5819_v46 = vld [vmem:[#allocation11 + $0xb8] sm:$0xff] }
 0xf25   :  { %8603 = vmatpush1.bf16.msra.mxu0 %v8602_v0  ;;  %v5798_v0 = vld [vmem:[#allocation11 + $0x10] sm:$0xff] }
 0xf26   :  { %8637 = vmatprep.subr.bf16.mxu0 %v8636_v57  ;;  %v5579_v23 = vadd.f32 0.5, %v5578_v49 }
 0xf27   :  { %v9194_v26 = vpop.eup %9193 }
 0xf28   :  { %v5574_v10 = vmul.f32 0.5, %v9194_v26  ;;  %v5585_v33 = vmul.f32 %v5579_v23, %v10399_v60  ;;  %v5804_v60 = vld [vmem:[#allocation11 + $0x40] sm:$0xff] }
 0xf2a   :  { %v5575_v55 = vadd.f32 0.5, %v5574_v10  ;;  %v5816_v10 = vld [vmem:[#allocation11 + $0xa0] sm:$0xff] }
 0xfbb   :  { %v5351_v20 = vpop.f32.mrb[48].mxu0 }
 0xfbc   :  { %v5352_v35 = vadd.f32 %v5351_v20, %v9899_v37  ;;  %v5353_v52 = vpop.f32.mrb[49].mxu0 }
 0xfbd   :  { %v5354_v32 = vadd.f32 %v5353_v52, %v9902_v47  ;;  %v8638_v52 = vpack.c.bf16 %v5802_v18, %v5798_v0  ;;  %v5820_v18 = vld [vmem:[#allocation11 + $0xc0] sm:$0xff] }
 0xfbe   :  { %5356 = vst [vmem:[%s10710_s12 + $0x50] sm:$0xff] %v5352_v35  ;;  %v8606_v35 = vpack.c.bf16 %v5800_v31, %v5796_v25  ;;  %v5827_v25 = vld [vmem:[#allocation11 + $0xf8] sm:$0xff] }
 0xfbf   :  { %5357 = vst [vmem:[%s10710_s12 + $0x58] sm:$0xff] %v5354_v32  ;;  %v5808_v32 = vld [vmem:[#allocation11 + $0x60] sm:$0xff] }
 0xfc0   :  { %v8610_v26 = vpack.c.bf16 %v5808_v32, %v5804_v60  ;;  %v5835_v60 = vld [vmem:[#allocation11 + $0x138] sm:$0xff]  ;;  %v8618_v32 = vpack.c.bf16 %v5824_v13, %v5820_v18 }
 0xfc1   :  { %v5851_v18 = vld [vmem:[#allocation11 + $0x1b8] sm:$0xff] }
 0xfdb   :  { %v5563_v36 = vpop.f32.mrb[28].mxu0 }
 0xfdc   :  { %v8952_v50 = vadd.f32 %v5563_v36, %v9753_v5  ;;  %v5565_v41 = vpop.f32.mrb[29].mxu0  ;;  %v5810_v36 = vld [vmem:[#allocation11 + $0x70] sm:$0xff] }
 0xfdd   :  { %v8953_v28 = vadd.f32 %v5565_v41, %v9760_v16  ;;  %v5817_v41 = vld [vmem:[#allocation11 + $0xa8] sm:$0xff]  ;;  %v8642_v49 = vpack.c.bf16 %v5810_v36, %v5806_v39  ;;  %v5832_v39 = vld [vmem:[#allocation11 + $0x120] sm:$0xff] }
 0xfde   :  { %9195 = vtanh.f32 %v8952_v50  ;;  %v5813_v50 = vld [vmem:[#allocation11 + $0x88] sm:$0xff] }
 0xfdf   :  { %v5581_v40 = vmul.f32 0.5, %v8953_v28  ;;  %v5815_v28 = vld [vmem:[#allocation11 + $0x98] sm:$0xff]  ;;  %v8612_v23 = vpack.c.bf16 %v5817_v41, %v5813_v50  ;;  %v5830_v41 = vld [vmem:[#allocation11 + $0x110] sm:$0xff] }
 0xfe1   :  { %9197 = vtanh.f32 %v5581_v40  ;;  %v5812_v40 = vld [vmem:[#allocation11 + $0x80] sm:$0xff] }
 0xfe2   :  { %v8614_v31 = vpack.c.bf16 %v5816_v10, %v5812_v40  ;;  %v5843_v40 = vld [vmem:[#allocation11 + $0x178] sm:$0xff] }
 0xfe8   :  { %v9196_v58 = vpop.eup %9195 }
 0xfe9   :  { %v5586_v15 = vmul.f32 %v9196_v58, %v5575_v55  ;;  %v8644_v55 = vpack.c.bf16 %v5819_v46, %v5815_v28  ;;  %v5814_v58 = vld [vmem:[#allocation11 + $0x90] sm:$0xff]  ;;  %v5837_v46 = vld [vmem:[#allocation11 + $0x148] sm:$0xff] }
 0xfea   :  { %v5834_v28 = vld [vmem:[#allocation11 + $0x130] sm:$0xff] }
 0xfeb   :  { %v10515_v8 = vadd.f32 %v5586_v15, %v5585_v33  ;;  %v9198_v6 = vpop.eup %9197  ;;  %v5818_v33 = vld [vmem:[#allocation11 + $0xb0] sm:$0xff]  ;;  %v5821_v15 = vld [vmem:[#allocation11 + $0xc8] sm:$0xff] }
 0xfec   :  { %v5583_v4 = vmul.f32 0.5, %v9198_v6  ;;  %v5825_v6 = vld [vmem:[#allocation11 + $0xe8] sm:$0xff]  ;;  %v8646_v0 = vpack.c.bf16 %v5818_v33, %v5814_v58  ;;  %v5840_v58 = vld [vmem:[#allocation11 + $0x160] sm:$0xff] }
 0xfed   :  { %9199 = vtanh.f32 %v10515_v8  ;;  %v8616_v9 = vpack.c.bf16 %v5825_v6, %v5821_v15  ;;  %v5838_v6 = vld [vmem:[#allocation11 + $0x150] sm:$0xff] }
 0xfee   :  { %v5584_v57 = vadd.f32 0.5, %v5583_v4  ;;  %v5823_v4 = vld [vmem:[#allocation11 + $0xd8] sm:$0xff] }
 0xfef   :  { %v8648_v38 = vpack.c.bf16 %v5827_v25, %v5823_v4  ;;  %v5842_v4 = vld [vmem:[#allocation11 + $0x170] sm:$0xff]  ;;  %v5845_v25 = vld [vmem:[#allocation11 + $0x188] sm:$0xff] }
 0xff7   :  { %v9200_v20 = vpop.eup %9199 }
 0xff8   :  { %v10518_v48 = vmul.f32 %v9200_v20, %v5584_v57  ;;  %v5826_v57 = vld [vmem:[#allocation11 + $0xf0] sm:$0xff]  ;;  %v5829_v20 = vld [vmem:[#allocation11 + $0x108] sm:$0xff] }
 0xffa   :  { %5719 = vmatmul.mubr.f32.vlgmr.msra.gmra.mrb[34].mxu1 %v10518_v48  ;;  %5790 = vmatmul.mubr.f32.vlgmr.msra.gmra.mrb[50].mxu0 %v10518_v48 }
 0xffb   :  { %8607 = vmatpush1.bf16.msra.mxu1 %v8606_v35  ;;  %8639 = vmatpush1.bf16.msra.mxu0 %v8638_v52  ;;  %v5833_v35 = vld [vmem:[#allocation11 + $0x128] sm:$0xff]  ;;  %v5831_v52 = vld [vmem:[#allocation11 + $0x118] sm:$0xff] }
 0xffc   :  { %8609 = vmatprep.subr.bf16.mxu1 %v8608_v12  ;;  %8641 = vmatprep.subr.bf16.mxu0 %v8640_v30  ;;  %v8650_v12 = vpack.c.bf16 %v5826_v57, %v5822_v3  ;;  %v5828_v30 = vld [vmem:[#allocation11 + $0x100] sm:$0xff]  ;;  %v8620_v36 = vpack.c.bf16 %v5833_v35, %v5829_v20  ;;  %v8652_v50 = vpack.c.bf16 %v5835_v60, %v5831_v52  ;;  %v5846_v35 = vld [vmem:[#allocation11 + $0x190] sm:$0xff]  ;;  %v5853_v60 = vld [vmem:[#allocation11 + $0x1c8] sm:$0xff] }
 0xffd   :  { %5924 = vmatprep.mubr.f32.mxu1 %v9433_v42  ;;  %5995 = vmatprep.mubr.f32.mxu0 %v9433_v42  ;;  %v8622_v10 = vpack.c.bf16 %v5832_v39, %v5828_v30  ;;  %v5848_v3 = vld [vmem:[#allocation11 + $0x1a0] sm:$0xff]  ;;  %v5850_v52 = vld [vmem:[#allocation11 + $0x1b0] sm:$0xff]  ;;  %v5859_v30 = vld [vmem:[#allocation11 + $0x1f8] sm:$0xff] }
 0xfff   :  { %8611 = vmatpush1.bf16.msra.mxu1 %v8610_v26  ;;  %8643 = vmatpush1.bf16.msra.mxu0 %v8642_v49  ;;  %v5841_v26 = vld [vmem:[#allocation11 + $0x168] sm:$0xff]  ;;  %v5839_v49 = vld [vmem:[#allocation11 + $0x158] sm:$0xff] }
0x1000   :  { %8613 = vmatprep.subr.bf16.mxu1 %v8612_v23  ;;  %8645 = vmatprep.subr.bf16.mxu0 %v8644_v55  ;;  %v8654_v23 = vpack.c.bf16 %v5834_v28, %v5830_v41  ;;  %v5836_v55 = vld [vmem:[#allocation11 + $0x140] sm:$0xff]  ;;  %v8624_v33 = vpack.c.bf16 %v5841_v26, %v5837_v46  ;;  %v8656_v15 = vpack.c.bf16 %v5843_v40, %v5839_v49  ;;  %v5854_v26 = vld [vmem:[#allocation11 + $0x1d0] sm:$0xff] }
0x1001   :  { %v8626_v13 = vpack.c.bf16 %v5840_v58, %v5836_v55  ;;  %v5856_v46 = vld [vmem:[#allocation11 + $0x1e0] sm:$0xff]  ;;  %v5858_v49 = vld [vmem:[#allocation11 + $0x1f0] sm:$0xff]  ;;  %v6037_v55 = vld [vmem:[#allocation12 + $0x68] sm:$0xff] }
0x1002   :  { %v6039_v58 = vld [vmem:[#allocation12 + $0x78] sm:$0xff] }
0x1003   :  { %8615 = vmatpush1.bf16.msra.mxu1 %v8614_v31  ;;  %8647 = vmatpush1.bf16.msra.mxu0 %v8646_v0  ;;  %v5849_v31 = vld [vmem:[#allocation11 + $0x1a8] sm:$0xff]  ;;  %v5847_v0 = vld [vmem:[#allocation11 + $0x198] sm:$0xff] }
0x1004   :  { %8617 = vmatprep.subr.bf16.mxu1 %v8616_v9  ;;  %8649 = vmatprep.subr.bf16.mxu0 %v8648_v38  ;;  %v8658_v9 = vpack.c.bf16 %v5842_v4, %v5838_v6  ;;  %v5844_v38 = vld [vmem:[#allocation11 + $0x180] sm:$0xff]  ;;  %v8628_v57 = vpack.c.bf16 %v5849_v31, %v5845_v25  ;;  %v8660_v20 = vpack.c.bf16 %v5851_v18, %v5847_v0  ;;  %v6038_v6 = vld [vmem:[#allocation12 + $0x70] sm:$0xff]  ;;  %v6041_v25 = vld [vmem:[#allocation12 + $0x88] sm:$0xff] }
0x1005   :  { %v8630_v39 = vpack.c.bf16 %v5848_v3, %v5844_v38  ;;  %v6043_v31 = vld [vmem:[#allocation12 + $0x98] sm:$0xff]  ;;  %v6040_v18 = vld [vmem:[#allocation12 + $0x80] sm:$0xff]  ;;  %v6045_v38 = vld [vmem:[#allocation12 + $0xa8] sm:$0xff] }
0x1006   :  { %v10570_v0 = vpack.c.bf16 %v6043_v31, %v6041_v25  ;;  %v6047_v3 = vld [vmem:[#allocation12 + $0xb8] sm:$0xff] }
0x1007   :  { %8619 = vmatpush1.bf16.msra.mxu1 %v8618_v32  ;;  %8651 = vmatpush1.bf16.msra.mxu0 %v8650_v12  ;;  %v5857_v32 = vld [vmem:[#allocation11 + $0x1e8] sm:$0xff]  ;;  %v5855_v12 = vld [vmem:[#allocation11 + $0x1d8] sm:$0xff] }
0x1008   :  { %8621 = vmatprep.subr.bf16.mxu1 %v8620_v36  ;;  %8653 = vmatprep.subr.bf16.mxu0 %v8652_v50  ;;  %v8662_v36 = vpack.c.bf16 %v5850_v52, %v5846_v35  ;;  %v5852_v50 = vld [vmem:[#allocation11 + $0x1c0] sm:$0xff]  ;;  %v8632_v41 = vpack.c.bf16 %v5857_v32, %v5853_v60  ;;  %v8664_v28 = vpack.c.bf16 %v5859_v30, %v5855_v12  ;;  %v6046_v35 = vld [vmem:[#allocation12 + $0xb0] sm:$0xff]  ;;  %v6049_v60 = vld [vmem:[#allocation12 + $0xc8] sm:$0xff] }
0x1009   :  { %v8634_v40 = vpack.c.bf16 %v5856_v46, %v5852_v50  ;;  %v6051_v32 = vld [vmem:[#allocation12 + $0xd8] sm:$0xff]  ;;  %v6048_v30 = vld [vmem:[#allocation12 + $0xc0] sm:$0xff]  ;;  %v6053_v50 = vld [vmem:[#allocation12 + $0xe8] sm:$0xff] }
0x100a   :  { %v10582_v12 = vpack.c.bf16 %v6051_v32, %v6049_v60  ;;  %v6052_v46 = vld [vmem:[#allocation12 + $0xe0] sm:$0xff] }
0x100b   :  { %8623 = vmatpush1.bf16.msra.mxu1 %v8622_v10  ;;  %8655 = vmatpush1.bf16.msra.mxu0 %v8654_v23  ;;  %v8666_v10 = vpack.c.bf16 %v5858_v49, %v5854_v26  ;;  %v6054_v26 = vld [vmem:[#allocation12 + $0xf0] sm:$0xff]  ;;  %v6133_v32 = vld [vmem:[#allocation8] sm:$0xff] }
0x100c   :  { %8625 = vmatprep.subr.bf16.mxu1 %v8624_v33  ;;  %8657 = vmatprep.subr.bf16.mxu0 %v8656_v15  ;;  %v10564_v33 = vpack.c.bf16 %v6039_v58, %v6037_v55  ;;  %v6036_v15 = vld [vmem:[#allocation12 + $0x60] sm:$0xff]  ;;  %v10590_v49 = vpack.c.bf16 %v6054_v26, %v6052_v46 }
0x100d   :  { %v10566_v4 = vpack.c.bf16 %v6038_v6, %v6036_v15 }
0x100f   :  { %8627 = vmatpush1.bf16.msra.mxu1 %v8626_v13  ;;  %8659 = vmatpush1.bf16.msra.mxu0 %v8658_v9  ;;  %v6042_v13 = vld [vmem:[#allocation12 + $0x90] sm:$0xff] }
0x1010   :  { %8629 = vmatprep.subr.bf16.mxu1 %v8628_v57  ;;  %8661 = vmatprep.subr.bf16.mxu0 %v8660_v20  ;;  %v10572_v9 = vpack.c.bf16 %v6042_v13, %v6040_v18  ;;  %v10576_v57 = vpack.c.bf16 %v6047_v3, %v6045_v38  ;;  %v6044_v20 = vld [vmem:[#allocation12 + $0xa0] sm:$0xff] }
0x1011   :  { %v10578_v52 = vpack.c.bf16 %v6046_v35, %v6044_v20 }
0x1013   :  { %8631 = vmatpush1.bf16.msra.mxu1 %v8630_v39  ;;  %8663 = vmatpush1.bf16.msra.mxu0 %v8662_v36  ;;  %v6050_v39 = vld [vmem:[#allocation12 + $0xd0] sm:$0xff] }
0x1014   :  { %8633 = vmatprep.subr.bf16.mxu1 %v8632_v41  ;;  %8665 = vmatprep.subr.bf16.mxu0 %v8664_v28  ;;  %v10584_v36 = vpack.c.bf16 %v6050_v39, %v6048_v30  ;;  %v6055_v41 = vld [vmem:[#allocation12 + $0xf8] sm:$0xff]  ;;  %v6137_v30 = vld [vmem:[#allocation8 + $0x20] sm:$0xff] }
0x1015   :  { %v10588_v28 = vpack.c.bf16 %v6055_v41, %v6053_v50  ;;  %v6142_v50 = vld [vmem:[#allocation8 + $0x48] sm:$0xff] }
0x1016   :  { %v6146_v41 = vld [vmem:[#allocation8 + $0x68] sm:$0xff] }
0x1017   :  { %8635 = vmatpush1.bf16.msra.mxu1 %v8634_v40  ;;  %8667 = vmatpush1.bf16.msra.mxu0 %v8666_v10  ;;  %v6134_v40 = vld [vmem:[#allocation8 + $0x8] sm:$0xff] }
0x1018   :  { %8733 = vmatprep.subr.bf16.mxu0 %v10432_v24  ;;  %v6025_v24 = vld [vmem:[#allocation12 + $0x8] sm:$0xff] }
0x1019   :  { %v6138_v10 = vld [vmem:[#allocation8 + $0x28] sm:$0xff] }
0x101a   :  { %5925 = vmatmul.mubr.f32.vlgmr.msra.gmra.mrb[34].mxu1 %v10449_v59  ;;  %5996 = vmatmul.mubr.f32.vlgmr.msra.gmra.mrb[50].mxu0 %v10449_v59 }
0x101b   :  { %8735 = vmatpush1.bf16.msra.mxu0 %v10447_v29  ;;  %6332 = vmatprep.mubr.f32.mxu0 %v9433_v42  ;;  %v6027_v29 = vld [vmem:[#allocation12 + $0x18] sm:$0xff] }
0x101c   :  { %8737 = vmatprep.subr.bf16.mxu0 %v10451_v19  ;;  %6120 = vmatprep.mubr.f32.mxu1 %v9433_v42  ;;  %v10546_v59 = vpack.c.bf16 %v6027_v29, %v6025_v24  ;;  %v6024_v19 = vld [vmem:[#allocation12] sm:$0xff]  ;;  %v8700_v24 = vpack.c.bf16 %v6138_v10, %v6134_v40  ;;  %v8702_v40 = vpack.c.bf16 %v6137_v30, %v6133_v32 }
0x101d   :  { %v6173_v30 = vld [vmem:[#allocation8 + $0x140] sm:$0xff] }
0x101e   :  { %8669 = vmatprep.subr.bf16.mxu1 %v10546_v59 }
0x101f   :  { %8739 = vmatpush1.bf16.msra.mxu0 %v10455_v7  ;;  %v6026_v7 = vld [vmem:[#allocation12 + $0x10] sm:$0xff] }
0x1020   :  { %8741 = vmatprep.subr.bf16.mxu0 %v10459_v21  ;;  %v10548_v21 = vpack.c.bf16 %v6026_v7, %v6024_v19 }
0x1022   :  { %8671 = vmatpush1.bf16.msra.mxu1 %v10548_v21 }
0x1023   :  { %8743 = vmatpush1.bf16.msra.mxu0 %v10462_v14  ;;  %v6029_v14 = vld [vmem:[#allocation12 + $0x28] sm:$0xff] }
0x1024   :  { %8745 = vmatprep.subr.bf16.mxu0 %v10465_v11  ;;  %v6031_v11 = vld [vmem:[#allocation12 + $0x38] sm:$0xff] }
0x1027   :  { %8747 = vmatpush1.bf16.msra.mxu0 %v10468_v43  ;;  %v10552_v43 = vpack.c.bf16 %v6031_v11, %v6029_v14 }
0x1028   :  { %8749 = vmatprep.subr.bf16.mxu0 %v10471_v34  ;;  %v6028_v34 = vld [vmem:[#allocation12 + $0x20] sm:$0xff] }
0x1029   :  { %8673 = vmatprep.subr.bf16.mxu1 %v10552_v43 }
0x102b   :  { %8751 = vmatpush1.bf16.msra.mxu0 %v10474_v27  ;;  %v6030_v27 = vld [vmem:[#allocation12 + $0x30] sm:$0xff] }
0x102c   :  { %8753 = vmatprep.subr.bf16.mxu0 %v10477_v1  ;;  %v10554_v1 = vpack.c.bf16 %v6030_v27, %v6028_v34 }
0x102e   :  { %8675 = vmatpush1.bf16.msra.mxu1 %v10554_v1 }
0x102f   :  { %8755 = vmatpush1.bf16.msra.mxu0 %v10480_v61  ;;  %v6033_v61 = vld [vmem:[#allocation12 + $0x48] sm:$0xff] }
0x1030   :  { %8757 = vmatprep.subr.bf16.mxu0 %v10483_v63  ;;  %v6035_v63 = vld [vmem:[#allocation12 + $0x58] sm:$0xff] }
0x1033   :  { %8759 = vmatpush1.bf16.msra.mxu0 %v10486_v53  ;;  %v10558_v53 = vpack.c.bf16 %v6035_v63, %v6033_v61 }
0x1034   :  { %8761 = vmatprep.subr.bf16.mxu0 %v10489_v51  ;;  %v6032_v51 = vld [vmem:[#allocation12 + $0x40] sm:$0xff] }
0x1035   :  { %8677 = vmatprep.subr.bf16.mxu1 %v10558_v53 }
0x1037   :  { %8763 = vmatpush1.bf16.msra.mxu0 %v10492_v45  ;;  %v6034_v45 = vld [vmem:[#allocation12 + $0x50] sm:$0xff] }
0x1038   :  { %v10560_v23 = vpack.c.bf16 %v6034_v45, %v6032_v51 }
0x103a   :  { %6333 = vmatmul.mubr.f32.vlgmr.msra.gmra.mrb[30].mxu0 %v10518_v48  ;;  %8679 = vmatpush1.bf16.msra.mxu1 %v10560_v23 }
0x103b   :  { %6489 = vmatprep.mubr.f32.mxu0 %v9433_v42  ;;  %8681 = vmatprep.subr.bf16.mxu1 %v10564_v33 }
0x103e   :  { %8683 = vmatpush1.bf16.msra.mxu1 %v10566_v4 }
0x103f   :  { %8685 = vmatprep.subr.bf16.mxu1 %v10570_v0 }
0x1042   :  { %8687 = vmatpush1.bf16.msra.mxu1 %v10572_v9 }
0x1043   :  { %8689 = vmatprep.subr.bf16.mxu1 %v10576_v57 }
0x1046   :  { %8691 = vmatpush1.bf16.msra.mxu1 %v10578_v52 }
0x1047   :  { %8693 = vmatprep.subr.bf16.mxu1 %v10582_v12 }
0x104a   :  { %8695 = vmatpush1.bf16.msra.mxu1 %v10584_v36 }
0x104b   :  { %8697 = vmatprep.subr.bf16.mxu1 %v10588_v28 }
0x104e   :  { %8699 = vmatpush1.bf16.msra.mxu1 %v10590_v49 }
0x104f   :  { %8701 = vmatprep.subr.bf16.mxu1 %v8700_v24  ;;  %v6141_v24 = vld [vmem:[#allocation8 + $0x40] sm:$0xff] }
0x10ed   :  { %v5926_v29 = vpop.f32.mrb[34].mxu1  ;;  %v5997_v19 = vpop.f32.mrb[50].mxu0 }
0x10ee   :  { %v8980_v7 = vadd.f32 %v5926_v29, %v9805_v44  ;;  %v5928_v14 = vpop.f32.mrb[35].mxu1  ;;  %v5999_v11 = vpop.f32.mrb[51].mxu0  ;;  %v8982_v63 = vadd.f32 %v5997_v19, %v9813_v22  ;;  %v6145_v29 = vld [vmem:[#allocation8 + $0x60] sm:$0xff]  ;;  %v6150_v19 = vld [vmem:[#allocation8 + $0x88] sm:$0xff] }
0x10ef   :  { %v8981_v34 = vadd.f32 %v5928_v14, %v9808_v56  ;;  %v8983_v51 = vadd.f32 %v5999_v11, %v9819_v17  ;;  %v8706_v14 = vpack.c.bf16 %v6145_v29, %v6141_v24  ;;  %v6185_v24 = vld [vmem:[#allocation8 + $0x1a0] sm:$0xff]  ;;  %v6190_v29 = vld [vmem:[#allocation8 + $0x1c8] sm:$0xff] }
0x10f0   :  { %v6006_v27 = vmul.f32 0.5, %v8980_v7  ;;  %v6154_v7 = vld [vmem:[#allocation8 + $0xa8] sm:$0xff] }
0x10f1   :  { %v6010_v61 = vmul.f32 0.5, %v8981_v34  ;;  %v6015_v45 = vmul.f32 0.5, %v8983_v51  ;;  %v8708_v11 = vpack.c.bf16 %v6154_v7, %v6150_v19  ;;  %v6149_v34 = vld [vmem:[#allocation8 + $0x80] sm:$0xff]  ;;  %v6194_v19 = vld [vmem:[#allocation8 + $0x1e8] sm:$0xff] }
0x10f2   :  { %9201 = vtanh.f32 %v6006_v27  ;;  %v6153_v27 = vld [vmem:[#allocation8 + $0xa0] sm:$0xff] }
0x10f3   :  { %9203 = vtanh.f32 %v6010_v61  ;;  %v6158_v61 = vld [vmem:[#allocation8 + $0xc8] sm:$0xff]  ;;  %v8710_v51 = vpack.c.bf16 %v6153_v27, %v6149_v34  ;;  %v6193_v34 = vld [vmem:[#allocation8 + $0x1e0] sm:$0xff] }
0x10f4   :  { %9205 = vtanh.f32 %v8982_v63  ;;  %v6162_v63 = vld [vmem:[#allocation8 + $0xe8] sm:$0xff] }
0x10f5   :  { %9207 = vtanh.f32 %v6015_v45  ;;  %v8712_v45 = vpack.c.bf16 %v6162_v63, %v6158_v61  ;;  %v6362_v61 = vld [vmem:[#allocation9 + $0x8] sm:$0xff] }
0x10f6   :  { %v6366_v63 = vld [vmem:[#allocation9 + $0x28] sm:$0xff] }
0x10fc   :  { %v9202_v55 = vpop.eup %9201 }
0x10fd   :  { %v9204_v58 = vpop.eup %9203  ;;  %v6008_v15 = vmul.f32 0.5, %v9202_v55  ;;  %v6157_v55 = vld [vmem:[#allocation8 + $0xc0] sm:$0xff] }
0x10fe   :  { %v6012_v6 = vmul.f32 0.5, %v9204_v58  ;;  %v9206_v31 = vpop.eup %9205  ;;  %v6161_v58 = vld [vmem:[#allocation8 + $0xe0] sm:$0xff] }
0x10ff   :  { %v6009_v25 = vadd.f32 0.5, %v6008_v15  ;;  %v9208_v20 = vpop.eup %9207  ;;  %v6166_v15 = vld [vmem:[#allocation8 + $0x108] sm:$0xff] }
0x1100   :  { %v6013_v18 = vadd.f32 0.5, %v6012_v6  ;;  %v6017_v35 = vmul.f32 0.5, %v9208_v20  ;;  %v6170_v6 = vld [vmem:[#allocation8 + $0x128] sm:$0xff] }
0x1101   :  { %v6020_v13 = vmul.f32 %v9206_v31, %v6009_v25  ;;  %v8714_v25 = vpack.c.bf16 %v6161_v58, %v6157_v55  ;;  %v8716_v31 = vpack.c.bf16 %v6170_v6, %v6166_v15  ;;  %v6178_v20 = vld [vmem:[#allocation8 + $0x168] sm:$0xff]  ;;  %v6368_v55 = vld [vmem:[#allocation9 + $0x38] sm:$0xff]  ;;  %v6361_v58 = vld [vmem:[#allocation9] sm:$0xff] }
0x1102   :  { %v6019_v38 = vmul.f32 %v6013_v18, %v10440_v54  ;;  %v6018_v46 = vadd.f32 0.5, %v6017_v35  ;;  %v8704_v54 = vpack.c.bf16 %v6146_v41, %v6142_v50  ;;  %v6165_v18 = vld [vmem:[#allocation8 + $0x100] sm:$0xff]  ;;  %v6182_v41 = vld [vmem:[#allocation8 + $0x188] sm:$0xff] }
0x1103   :  { %v6177_v50 = vld [vmem:[#allocation8 + $0x160] sm:$0xff] }
0x1104   :  { %v10599_v3 = vadd.f32 %v6020_v13, %v6019_v38  ;;  %v6169_v13 = vld [vmem:[#allocation8 + $0x120] sm:$0xff]  ;;  %v6174_v38 = vld [vmem:[#allocation8 + $0x148] sm:$0xff] }
0x1105   :  { %v8718_v35 = vpack.c.bf16 %v6169_v13, %v6165_v18  ;;  %v8720_v32 = vpack.c.bf16 %v6178_v20, %v6174_v38  ;;  %v6365_v15 = vld [vmem:[#allocation9 + $0x20] sm:$0xff]  ;;  %v6367_v18 = vld [vmem:[#allocation9 + $0x30] sm:$0xff]  ;;  %v6370_v38 = vld [vmem:[#allocation9 + $0x48] sm:$0xff] }
0x1106   :  { %9209 = vtanh.f32 %v10599_v3  ;;  %v6374_v20 = vld [vmem:[#allocation9 + $0x68] sm:$0xff] }
0x110d   :  { %v10602_v60 = vpop.f32.mrb[30].mxu0 }
0x110e   :  { %v10604_v39 = vpop.f32.mrb[31].mxu0 }
0x1110   :  { %v9210_v26 = vpop.eup %9209 }
0x1111   :  { %v10606_v10 = vmul.f32 %v9210_v26, %v6018_v46  ;;  %v6186_v46 = vld [vmem:[#allocation8 + $0x1a8] sm:$0xff]  ;;  %v8722_v26 = vpack.c.bf16 %v6177_v50, %v6173_v30  ;;  %v6369_v30 = vld [vmem:[#allocation9 + $0x40] sm:$0xff] }
0x1112   :  { %v6373_v50 = vld [vmem:[#allocation9 + $0x60] sm:$0xff] }
0x1113   :  { %6121 = vmatmul.mubr.f32.vlgmr.msra.gmra.mrb[36].mxu1 %v10606_v10 }
0x1114   :  { %8703 = vmatpush1.bf16.msra.mxu1 %v8702_v40  ;;  %6261 = vmatprep.mubr.f32.mxu1 %v9433_v42  ;;  %v8724_v40 = vpack.c.bf16 %v6186_v46, %v6182_v41  ;;  %v8770_v46 = vpack.c.bf16 %v6373_v50, %v6369_v30  ;;  %v6398_v30 = vld [vmem:[#allocation9 + $0x128] sm:$0xff]  ;;  %v6396_v50 = vld [vmem:[#allocation9 + $0x118] sm:$0xff] }
0x1115   :  { %8705 = vmatprep.subr.bf16.mxu1 %v8704_v54  ;;  %v6181_v54 = vld [vmem:[#allocation8 + $0x180] sm:$0xff] }
0x1116   :  { %v8726_v7 = vpack.c.bf16 %v6185_v24, %v6181_v54  ;;  %v6378_v24 = vld [vmem:[#allocation9 + $0x88] sm:$0xff] }
0x1118   :  { %8707 = vmatpush1.bf16.msra.mxu1 %v8706_v14  ;;  %v8728_v14 = vpack.c.bf16 %v6194_v19, %v6190_v29  ;;  %v6382_v29 = vld [vmem:[#allocation9 + $0xa8] sm:$0xff]  ;;  %v6380_v19 = vld [vmem:[#allocation9 + $0x98] sm:$0xff] }
0x1119   :  { %8709 = vmatprep.subr.bf16.mxu1 %v8708_v11  ;;  %v6189_v11 = vld [vmem:[#allocation8 + $0x1c0] sm:$0xff] }
0x111a   :  { %v8730_v27 = vpack.c.bf16 %v6193_v34, %v6189_v11  ;;  %v6377_v11 = vld [vmem:[#allocation9 + $0x80] sm:$0xff] }
0x111b   :  { %v6381_v34 = vld [vmem:[#allocation9 + $0xa0] sm:$0xff] }
0x111c   :  { %8711 = vmatpush1.bf16.msra.mxu1 %v8710_v51  ;;  %v6364_v51 = vld [vmem:[#allocation9 + $0x18] sm:$0xff] }
0x111d   :  { %8713 = vmatprep.subr.bf16.mxu1 %v8712_v45  ;;  %v8764_v45 = vpack.c.bf16 %v6366_v63, %v6362_v61  ;;  %v8796_v6 = vpack.c.bf16 %v6368_v55, %v6364_v51  ;;  %v8774_v61 = vpack.c.bf16 %v6381_v34, %v6377_v11  ;;  %v6379_v63 = vld [vmem:[#allocation9 + $0x90] sm:$0xff]  ;;  %v6386_v55 = vld [vmem:[#allocation9 + $0xc8] sm:$0xff]  ;;  %v6404_v34 = vld [vmem:[#allocation9 + $0x158] sm:$0xff] }
0x111e   :  { %v6383_v51 = vld [vmem:[#allocation9 + $0xb0] sm:$0xff]  ;;  %v6406_v11 = vld [vmem:[#allocation9 + $0x168] sm:$0xff] }
0x111f   :  { %8765 = vmatprep.subr.bf16.mxu0 %v8764_v45  ;;  %v8806_v45 = vpack.c.bf16 %v6383_v51, %v6379_v63  ;;  %v6401_v63 = vld [vmem:[#allocation9 + $0x140] sm:$0xff] }
0x1120   :  { %8715 = vmatpush1.bf16.msra.mxu1 %v8714_v25  ;;  %v8766_v25 = vpack.c.bf16 %v6365_v15, %v6361_v58  ;;  %v6390_v58 = vld [vmem:[#allocation9 + $0xe8] sm:$0xff]  ;;  %v6388_v15 = vld [vmem:[#allocation9 + $0xd8] sm:$0xff]  ;;  %v6405_v51 = vld [vmem:[#allocation9 + $0x160] sm:$0xff] }
0x1121   :  { %8717 = vmatprep.subr.bf16.mxu1 %v8716_v31  ;;  %v6363_v31 = vld [vmem:[#allocation9 + $0x10] sm:$0xff] }
0x1122   :  { %v8798_v13 = vpack.c.bf16 %v6367_v18, %v6363_v31  ;;  %8767 = vmatpush1.bf16.msra.mxu0 %v8766_v25  ;;  %v6392_v25 = vld [vmem:[#allocation9 + $0xf8] sm:$0xff]  ;;  %v6385_v31 = vld [vmem:[#allocation9 + $0xc0] sm:$0xff] }
0x1123   :  { %v6389_v18 = vld [vmem:[#allocation9 + $0xe0] sm:$0xff] }
0x1124   :  { %8719 = vmatpush1.bf16.msra.mxu1 %v8718_v35  ;;  %v8768_v35 = vpack.c.bf16 %v6374_v20, %v6370_v38  ;;  %v8778_v38 = vpack.c.bf16 %v6389_v18, %v6385_v31  ;;  %v6387_v20 = vld [vmem:[#allocation9 + $0xd0] sm:$0xff]  ;;  %v6414_v31 = vld [vmem:[#allocation9 + $0x1a8] sm:$0xff]  ;;  %v6412_v18 = vld [vmem:[#allocation9 + $0x198] sm:$0xff] }
0x1125   :  { %8721 = vmatprep.subr.bf16.mxu1 %v8720_v32  ;;  %v6376_v32 = vld [vmem:[#allocation9 + $0x78] sm:$0xff] }
0x1126   :  { %8769 = vmatprep.subr.bf16.mxu0 %v8768_v35 }
0x1127   :  { %8771 = vmatpush1.bf16.msra.mxu0 %v8770_v46  ;;  %v6400_v46 = vld [vmem:[#allocation9 + $0x138] sm:$0xff] }
0x1128   :  { %8723 = vmatpush1.bf16.msra.mxu1 %v8722_v26  ;;  %v6371_v26 = vld [vmem:[#allocation9 + $0x50] sm:$0xff] }
0x1129   :  { %8725 = vmatprep.subr.bf16.mxu1 %v8724_v40  ;;  %v6375_v40 = vld [vmem:[#allocation9 + $0x70] sm:$0xff] }
0x112a   :  { %v8802_v54 = vpack.c.bf16 %v6375_v40, %v6371_v26  ;;  %v6393_v26 = vld [vmem:[#allocation9 + $0x100] sm:$0xff] }
0x112b   :  { %v6397_v40 = vld [vmem:[#allocation9 + $0x120] sm:$0xff] }
0x112c   :  { %8727 = vmatpush1.bf16.msra.mxu1 %v8726_v7  ;;  %v8772_v7 = vpack.c.bf16 %v6382_v29, %v6378_v24  ;;  %v8782_v24 = vpack.c.bf16 %v6397_v40, %v6393_v26  ;;  %v6395_v29 = vld [vmem:[#allocation9 + $0x110] sm:$0xff]  ;;  %v6422_v26 = vld [vmem:[#allocation9 + $0x1e8] sm:$0xff]  ;;  %v6420_v40 = vld [vmem:[#allocation9 + $0x1d8] sm:$0xff] }
0x112d   :  { %8729 = vmatprep.subr.bf16.mxu1 %v8728_v14  ;;  %v6384_v14 = vld [vmem:[#allocation9 + $0xb8] sm:$0xff] }
0x112e   :  { %8773 = vmatprep.subr.bf16.mxu0 %v8772_v7 }
0x112f   :  { %8775 = vmatpush1.bf16.msra.mxu0 %v8774_v61  ;;  %v6408_v61 = vld [vmem:[#allocation9 + $0x178] sm:$0xff] }
0x1130   :  { %8731 = vmatpush1.bf16.msra.mxu1 %v8730_v27  ;;  %v8804_v27 = vpack.c.bf16 %v6384_v14, %v6380_v19  ;;  %v6399_v19 = vld [vmem:[#allocation9 + $0x130] sm:$0xff]  ;;  %v6402_v14 = vld [vmem:[#allocation9 + $0x148] sm:$0xff] }
0x1131   :  { %8797 = vmatprep.subr.bf16.mxu1 %v8796_v6  ;;  %v8776_v6 = vpack.c.bf16 %v6390_v58, %v6386_v55  ;;  %v8814_v7 = vpack.c.bf16 %v6399_v19, %v6395_v29  ;;  %v8786_v55 = vpack.c.bf16 %v6405_v51, %v6401_v63  ;;  %v6403_v58 = vld [vmem:[#allocation9 + $0x150] sm:$0xff]  ;;  %v6417_v19 = vld [vmem:[#allocation9 + $0x1c0] sm:$0xff] }
0x1133   :  { %6262 = vmatmul.mubr.f32.vlgmr.msra.gmra.mrb[14].mxu1 %v10518_v48  ;;  %v6372_v48 = vld [vmem:[#allocation9 + $0x58] sm:$0xff]  ;;  %8777 = vmatprep.subr.bf16.mxu0 %v8776_v6 }
0x1134   :  { %6560 = vmatprep.mubr.f32.mxu1 %v9433_v42  ;;  %8799 = vmatpush1.bf16.msra.mxu1 %v8798_v13  ;;  %v8800_v41 = vpack.c.bf16 %v6376_v32, %v6372_v48  ;;  %v8808_v13 = vpack.c.bf16 %v6392_v25, %v6388_v15  ;;  %v6391_v48 = vld [vmem:[#allocation9 + $0xf0] sm:$0xff]  ;;  %v6394_v32 = vld [vmem:[#allocation9 + $0x108] sm:$0xff] }
0x1135   :  { %v8810_v35 = vpack.c.bf16 %v6391_v48, %v6387_v20  ;;  %8779 = vmatpush1.bf16.msra.mxu0 %v8778_v38  ;;  %v6407_v15 = vld [vmem:[#allocation9 + $0x170] sm:$0xff]  ;;  %v6410_v25 = vld [vmem:[#allocation9 + $0x188] sm:$0xff]  ;;  %v6416_v38 = vld [vmem:[#allocation9 + $0x1b8] sm:$0xff] }
0x1136   :  { %8801 = vmatprep.subr.bf16.mxu1 %v8800_v41  ;;  %v8780_v41 = vpack.c.bf16 %v6398_v30, %v6394_v32  ;;  %v8818_v6 = vpack.c.bf16 %v6407_v15, %v6403_v58  ;;  %v6409_v20 = vld [vmem:[#allocation9 + $0x180] sm:$0xff]  ;;  %v6411_v30 = vld [vmem:[#allocation9 + $0x190] sm:$0xff] }
0x1137   :  { %v6413_v48 = vld [vmem:[#allocation9 + $0x1a0] sm:$0xff] }
0x1138   :  { %8803 = vmatpush1.bf16.msra.mxu1 %v8802_v54  ;;  %v8812_v54 = vpack.c.bf16 %v6400_v46, %v6396_v50  ;;  %8781 = vmatprep.subr.bf16.mxu0 %v8780_v41  ;;  %v8790_v32 = vpack.c.bf16 %v6413_v48, %v6409_v20  ;;  %v6415_v50 = vld [vmem:[#allocation9 + $0x1b0] sm:$0xff]  ;;  %v6418_v41 = vld [vmem:[#allocation9 + $0x1c8] sm:$0xff] }
0x1139   :  { %8805 = vmatprep.subr.bf16.mxu1 %v8804_v27  ;;  %8783 = vmatpush1.bf16.msra.mxu0 %v8782_v24  ;;  %v8784_v27 = vpack.c.bf16 %v6406_v11, %v6402_v14  ;;  %v8822_v46 = vpack.c.bf16 %v6415_v50, %v6411_v30  ;;  %v8792_v24 = vpack.c.bf16 %v6422_v26, %v6418_v41  ;;  %v6419_v14 = vld [vmem:[#allocation9 + $0x1d0] sm:$0xff] }
0x113a   :  { %v8955_v30 = vadd.f32 %v10604_v39, %v9760_v16  ;;  %v6569_v16 = vld [vmem:[#allocation11 + $0x10] sm:$0xff] }
0x113b   :  { %8785 = vmatprep.subr.bf16.mxu0 %v8784_v27  ;;  %v6568_v27 = vld [vmem:[#allocation11 + $0x8] sm:$0xff]  ;;  %v6573_v39 = vld [vmem:[#allocation11 + $0x30] sm:$0xff] }
0x113c   :  { %8807 = vmatpush1.bf16.msra.mxu1 %v8806_v45  ;;  %v8816_v45 = vpack.c.bf16 %v6408_v61, %v6404_v34  ;;  %v6423_v34 = vld [vmem:[#allocation9 + $0x1f0] sm:$0xff]  ;;  %v6572_v61 = vld [vmem:[#allocation11 + $0x28] sm:$0xff]  ;;  %v6352_v50 = vmul.f32 0.5, %v8955_v30  ;;  %v6583_v30 = vld [vmem:[#allocation11 + $0x80] sm:$0xff] }
0x113d   :  { %8809 = vmatprep.subr.bf16.mxu1 %v8808_v13  ;;  %8787 = vmatpush1.bf16.msra.mxu0 %v8786_v55  ;;  %v8788_v13 = vpack.c.bf16 %v6414_v31, %v6410_v25  ;;  %v8826_v63 = vpack.c.bf16 %v6423_v34, %v6419_v14  ;;  %v8828_v51 = vpack.c.bf16 %v6572_v61, %v6568_v27  ;;  %v6574_v55 = vld [vmem:[#allocation11 + $0x38] sm:$0xff]  ;;  %v6571_v14 = vld [vmem:[#allocation11 + $0x20] sm:$0xff]  ;;  %v6580_v34 = vld [vmem:[#allocation11 + $0x68] sm:$0xff] }
0x113e   :  { %v6578_v27 = vld [vmem:[#allocation11 + $0x58] sm:$0xff] }
0x113f   :  { %8789 = vmatprep.subr.bf16.mxu0 %v8788_v13  ;;  %v6582_v61 = vld [vmem:[#allocation11 + $0x78] sm:$0xff] }
0x1140   :  { %8811 = vmatpush1.bf16.msra.mxu1 %v8810_v35  ;;  %v8820_v35 = vpack.c.bf16 %v6416_v38, %v6412_v18 }
0x1141   :  { %8813 = vmatprep.subr.bf16.mxu1 %v8812_v54  ;;  %v6424_v54 = vld [vmem:[#allocation9 + $0x1f8] sm:$0xff]  ;;  %8791 = vmatpush1.bf16.msra.mxu0 %v8790_v32  ;;  %v8954_v32 = vadd.f32 %v10602_v60, %v9753_v5 }
0x1142   :  { %v8824_v29 = vpack.c.bf16 %v6424_v54, %v6420_v40  ;;  %8793 = vmatprep.subr.bf16.mxu0 %v8792_v24 }
0x1144   :  { %8815 = vmatpush1.bf16.msra.mxu1 %v8814_v7  ;;  %v6421_v7 = vld [vmem:[#allocation9 + $0x1e0] sm:$0xff] }
0x1145   :  { %8817 = vmatprep.subr.bf16.mxu1 %v8816_v45  ;;  %v8794_v11 = vpack.c.bf16 %v6421_v7, %v6417_v19  ;;  %v6570_v45 = vld [vmem:[#allocation11 + $0x18] sm:$0xff]  ;;  %v6567_v7 = vld [vmem:[#allocation11] sm:$0xff] }
0x1146   :  { %v8860_v58 = vpack.c.bf16 %v6574_v55, %v6570_v45  ;;  %v8830_v45 = vpack.c.bf16 %v6571_v14, %v6567_v7  ;;  %v8862_v55 = vpack.c.bf16 %v6573_v39, %v6569_v16  ;;  %v6593_v16 = vld [vmem:[#allocation11 + $0xd0] sm:$0xff] }
0x1147   :  { %8795 = vmatpush1.bf16.msra.mxu0 %v8794_v11  ;;  %v6576_v11 = vld [vmem:[#allocation11 + $0x48] sm:$0xff]  ;;  %v6597_v39 = vld [vmem:[#allocation11 + $0xf0] sm:$0xff] }
0x1148   :  { %8819 = vmatpush1.bf16.msra.mxu1 %v8818_v6  ;;  %8829 = vmatprep.subr.bf16.mxu0 %v8828_v51 }
0x1149   :  { %8821 = vmatprep.subr.bf16.mxu1 %v8820_v35 }
0x114c   :  { %8823 = vmatpush1.bf16.msra.mxu1 %v8822_v46 }
0x114d   :  { %8825 = vmatprep.subr.bf16.mxu1 %v8824_v29 }
0x1150   :  { %8827 = vmatpush1.bf16.msra.mxu1 %v8826_v63 }
0x1151   :  { %8861 = vmatprep.subr.bf16.mxu1 %v8860_v58  ;;  %v6575_v58 = vld [vmem:[#allocation11 + $0x40] sm:$0xff] }
0x11e6   :  { %v6122_v15 = vpop.f32.mrb[36].mxu1 }
0x11e7   :  { %v6123_v6 = vadd.f32 %v6122_v15, %v9899_v37  ;;  %v6124_v25 = vpop.f32.mrb[37].mxu1  ;;  %v6579_v15 = vld [vmem:[#allocation11 + $0x60] sm:$0xff] }
0x11e8   :  { %v6125_v31 = vadd.f32 %v6124_v25, %v9902_v47  ;;  %v8864_v25 = vpack.c.bf16 %v6582_v61, %v6578_v27  ;;  %v6602_v27 = vld [vmem:[#allocation11 + $0x118] sm:$0xff] }
0x11e9   :  { %6127 = vst [vmem:[%s10710_s12 + $0x60] sm:$0xff] %v6123_v6  ;;  %v8832_v6 = vpack.c.bf16 %v6580_v34, %v6576_v11  ;;  %v6600_v11 = vld [vmem:[#allocation11 + $0x108] sm:$0xff]  ;;  %v6606_v61 = vld [vmem:[#allocation11 + $0x138] sm:$0xff] }
0x11ea   :  { %6128 = vst [vmem:[%s10710_s12 + $0x68] sm:$0xff] %v6125_v31  ;;  %v6577_v31 = vld [vmem:[#allocation11 + $0x50] sm:$0xff]  ;;  %v6604_v34 = vld [vmem:[#allocation11 + $0x128] sm:$0xff] }
0x1206   :  { %v6263_v18 = vpop.f32.mrb[14].mxu1 }
0x1207   :  { %v8938_v13 = vadd.f32 %v6263_v18, %v9744_v62  ;;  %v6265_v38 = vpop.f32.mrb[15].mxu1  ;;  %v6581_v18 = vld [vmem:[#allocation11 + $0x70] sm:$0xff] }
0x1208   :  { %v8939_v20 = vadd.f32 %v6265_v38, %v9748_v2  ;;  %v6588_v38 = vld [vmem:[#allocation11 + $0xa8] sm:$0xff] }
0x1209   :  { %v6343_v48 = vmul.f32 0.5, %v8938_v13  ;;  %v6584_v13 = vld [vmem:[#allocation11 + $0x88] sm:$0xff] }
0x120a   :  { %v6347_v35 = vmul.f32 0.5, %v8939_v20  ;;  %v6586_v20 = vld [vmem:[#allocation11 + $0x98] sm:$0xff] }
0x120b   :  { %9211 = vtanh.f32 %v6343_v48  ;;  %v6590_v48 = vld [vmem:[#allocation11 + $0xb8] sm:$0xff] }
0x120c   :  { %9213 = vtanh.f32 %v6347_v35  ;;  %v8834_v35 = vpack.c.bf16 %v6579_v15, %v6575_v58  ;;  %v8844_v58 = vpack.c.bf16 %v6604_v34, %v6600_v11  ;;  %v8876_v15 = vpack.c.bf16 %v6606_v61, %v6602_v27  ;;  %v6630_v11 = vld [vmem:[#allocation11 + $0x1f8] sm:$0xff]  ;;  %v6623_v61 = vld [vmem:[#allocation11 + $0x1c0] sm:$0xff] }
0x120d   :  { %9215 = vtanh.f32 %v8954_v32  ;;  %v8866_v32 = vpack.c.bf16 %v6581_v18, %v6577_v31  ;;  %v6612_v31 = vld [vmem:[#allocation11 + $0x168] sm:$0xff]  ;;  %v6610_v18 = vld [vmem:[#allocation11 + $0x158] sm:$0xff] }
0x120e   :  { %9217 = vtanh.f32 %v6352_v50  ;;  %v6587_v50 = vld [vmem:[#allocation11 + $0xa0] sm:$0xff] }
0x1215   :  { %v9212_v41 = vpop.eup %9211 }
0x1216   :  { %v9214_v46 = vpop.eup %9213  ;;  %v6345_v26 = vmul.f32 0.5, %v9212_v41  ;;  %v8836_v41 = vpack.c.bf16 %v6588_v38, %v6584_v13  ;;  %v6614_v13 = vld [vmem:[#allocation11 + $0x178] sm:$0xff] }
0x1217   :  { %v6349_v62 = vmul.f32 0.5, %v9214_v46  ;;  %v9216_v54 = vpop.eup %9215  ;;  %v8868_v46 = vpack.c.bf16 %v6590_v48, %v6586_v20  ;;  %v6607_v48 = vld [vmem:[#allocation11 + $0x140] sm:$0xff] }
0x1218   :  { %v6346_v40 = vadd.f32 0.5, %v6345_v26  ;;  %v9218_v5 = vpop.eup %9217  ;;  %v6585_v26 = vld [vmem:[#allocation11 + $0x90] sm:$0xff] }
0x1219   :  { %v6350_v2 = vadd.f32 0.5, %v6349_v62  ;;  %v6354_v60 = vmul.f32 0.5, %v9218_v5  ;;  %v6589_v62 = vld [vmem:[#allocation11 + $0xb0] sm:$0xff]  ;;  %v6591_v5 = vld [vmem:[#allocation11 + $0xc0] sm:$0xff] }
0x121a   :  { %v6357_v24 = vmul.f32 %v9216_v54, %v6346_v40  ;;  %v6592_v40 = vld [vmem:[#allocation11 + $0xc8] sm:$0xff] }
0x121b   :  { %v6356_v29 = vmul.f32 %v6350_v2, %v10515_v8  ;;  %v6355_v63 = vadd.f32 0.5, %v6354_v60  ;;  %v6596_v54 = vld [vmem:[#allocation11 + $0xe8] sm:$0xff]  ;;  %v6594_v2 = vld [vmem:[#allocation11 + $0xd8] sm:$0xff]  ;;  %v6595_v60 = vld [vmem:[#allocation11 + $0xe0] sm:$0xff] }
0x121c   :  { %v8840_v7 = vpack.c.bf16 %v6596_v54, %v6592_v40  ;;  %v6622_v40 = vld [vmem:[#allocation11 + $0x1b8] sm:$0xff] }
0x121d   :  { %v6358_v19 = vadd.f32 %v6357_v24, %v6356_v29  ;;  %v6598_v24 = vld [vmem:[#allocation11 + $0xf8] sm:$0xff]  ;;  %v8838_v29 = vpack.c.bf16 %v6587_v50, %v6583_v30  ;;  %v8880_v30 = vpack.c.bf16 %v6614_v13, %v6610_v18  ;;  %v6609_v50 = vld [vmem:[#allocation11 + $0x150] sm:$0xff] }
0x121e   :  { %v8872_v14 = vpack.c.bf16 %v6598_v24, %v6594_v2  ;;  %v6615_v24 = vld [vmem:[#allocation11 + $0x180] sm:$0xff] }
0x121f   :  { %9219 = vtanh.f32 %v6358_v19  ;;  %6901 = vst [vmem:[#allocation15] sm:$0xff] %v6358_v19  ;;  %v8870_v19 = vpack.c.bf16 %v6589_v62, %v6585_v26  ;;  %v6620_v26 = vld [vmem:[#allocation11 + $0x1a8] sm:$0xff]  ;;  %v6618_v62 = vld [vmem:[#allocation11 + $0x198] sm:$0xff] }
0x1229   :  { %v9220_v51 = vpop.eup %9219 }
0x122a   :  { %v6360_v8 = vmul.f32 %v9220_v51, %v6355_v63  ;;  %v8842_v63 = vpack.c.bf16 %v6595_v60, %v6591_v5  ;;  %v8874_v51 = vpack.c.bf16 %v6597_v39, %v6593_v16  ;;  %v8884_v5 = vpack.c.bf16 %v6622_v40, %v6618_v62  ;;  %v6617_v60 = vld [vmem:[#allocation11 + $0x190] sm:$0xff]  ;;  %v6628_v16 = vld [vmem:[#allocation11 + $0x1e8] sm:$0xff]  ;;  %v6626_v39 = vld [vmem:[#allocation11 + $0x1d8] sm:$0xff] }
0x122c   :  { %6490 = vmatmul.mubr.f32.vlgmr.msra.gmra.mrb[52].mxu0 %v6360_v8  ;;  %6900 = vst [vmem:[#allocation14] sm:$0xff] %v6360_v8  ;;  %6561 = vmatmul.mubr.f32.vlgmr.msra.gmra.mrb[38].mxu1 %v6360_v8  ;;  %v6601_v8 = vld [vmem:[#allocation11 + $0x110] sm:$0xff] }
0x122d   :  { %8831 = vmatpush1.bf16.msra.mxu0 %v8830_v45  ;;  %8863 = vmatpush1.bf16.msra.mxu1 %v8862_v55  ;;  %v6599_v45 = vld [vmem:[#allocation11 + $0x100] sm:$0xff] }
0x122e   :  { %8833 = vmatprep.subr.bf16.mxu0 %v8832_v6  ;;  %8865 = vmatprep.subr.bf16.mxu1 %v8864_v25  ;;  %v6603_v55 = vld [vmem:[#allocation11 + $0x120] sm:$0xff]  ;;  %v6605_v6 = vld [vmem:[#allocation11 + $0x130] sm:$0xff]  ;;  %v6608_v25 = vld [vmem:[#allocation11 + $0x148] sm:$0xff] }
0x122f   :  { %6695 = vmatprep.mubr.f32.mxu0 %v9433_v42  ;;  %6766 = vmatprep.mubr.f32.mxu1 %v9433_v42  ;;  %v8846_v38 = vpack.c.bf16 %v6603_v55, %v6599_v45  ;;  %v8878_v20 = vpack.c.bf16 %v6605_v6, %v6601_v8  ;;  %v6627_v45 = vld [vmem:[#allocation11 + $0x1e0] sm:$0xff]  ;;  %v6625_v55 = vld [vmem:[#allocation11 + $0x1d0] sm:$0xff] }
0x1231   :  { %8835 = vmatpush1.bf16.msra.mxu0 %v8834_v35  ;;  %8867 = vmatpush1.bf16.msra.mxu1 %v8866_v32  ;;  %v6611_v35 = vld [vmem:[#allocation11 + $0x160] sm:$0xff]  ;;  %v8848_v32 = vpack.c.bf16 %v6612_v31, %v6608_v25 }
0x1232   :  { %8837 = vmatprep.subr.bf16.mxu0 %v8836_v41  ;;  %8869 = vmatprep.subr.bf16.mxu1 %v8868_v46  ;;  %v6613_v41 = vld [vmem:[#allocation11 + $0x170] sm:$0xff]  ;;  %v6616_v46 = vld [vmem:[#allocation11 + $0x188] sm:$0xff]  ;;  %v8850_v54 = vpack.c.bf16 %v6611_v35, %v6607_v48 }
0x1233   :  { %v8882_v2 = vpack.c.bf16 %v6613_v41, %v6609_v50 }
0x1235   :  { %8839 = vmatpush1.bf16.msra.mxu0 %v8838_v29  ;;  %8871 = vmatpush1.bf16.msra.mxu1 %v8870_v19  ;;  %v6619_v29 = vld [vmem:[#allocation11 + $0x1a0] sm:$0xff]  ;;  %v8852_v19 = vpack.c.bf16 %v6620_v26, %v6616_v46 }
0x1236   :  { %8841 = vmatprep.subr.bf16.mxu0 %v8840_v7  ;;  %8873 = vmatprep.subr.bf16.mxu1 %v8872_v14  ;;  %v6621_v7 = vld [vmem:[#allocation11 + $0x1b0] sm:$0xff]  ;;  %v6624_v14 = vld [vmem:[#allocation11 + $0x1c8] sm:$0xff]  ;;  %v8854_v34 = vpack.c.bf16 %v6619_v29, %v6615_v24 }
0x1237   :  { %v8886_v27 = vpack.c.bf16 %v6621_v7, %v6617_v60 }
0x1239   :  { %8843 = vmatpush1.bf16.msra.mxu0 %v8842_v63  ;;  %8875 = vmatpush1.bf16.msra.mxu1 %v8874_v51  ;;  %v8856_v63 = vpack.c.bf16 %v6628_v16, %v6624_v14  ;;  %v8888_v51 = vpack.c.bf16 %v6630_v11, %v6626_v39 }
0x123a   :  { %8845 = vmatprep.subr.bf16.mxu0 %v8844_v58  ;;  %8877 = vmatprep.subr.bf16.mxu1 %v8876_v15  ;;  %v6629_v58 = vld [vmem:[#allocation11 + $0x1f0] sm:$0xff]  ;;  %v8858_v15 = vpack.c.bf16 %v6627_v45, %v6623_v61 }
0x123b   :  { %v8890_v8 = vpack.c.bf16 %v6629_v58, %v6625_v55 }
0x123d   :  { %8847 = vmatpush1.bf16.msra.mxu0 %v8846_v38  ;;  %8879 = vmatpush1.bf16.msra.mxu1 %v8878_v20 }
0x123e   :  { %8849 = vmatprep.subr.bf16.mxu0 %v8848_v32  ;;  %8881 = vmatprep.subr.bf16.mxu1 %v8880_v30 }
0x1241   :  { %8851 = vmatpush1.bf16.msra.mxu0 %v8850_v54  ;;  %8883 = vmatpush1.bf16.msra.mxu1 %v8882_v2 }
0x1242   :  { %8853 = vmatprep.subr.bf16.mxu0 %v8852_v19  ;;  %8885 = vmatprep.subr.bf16.mxu1 %v8884_v5 }
0x1245   :  { %8855 = vmatpush1.bf16.msra.mxu0 %v8854_v34  ;;  %8887 = vmatpush1.bf16.msra.mxu1 %v8886_v27 }
0x1246   :  { %8857 = vmatprep.subr.bf16.mxu0 %v8856_v63  ;;  %8889 = vmatprep.subr.bf16.mxu1 %v8888_v51 }
0x1249   :  { %8859 = vmatpush1.bf16.msra.mxu0 %v8858_v15  ;;  %8891 = vmatpush1.bf16.msra.mxu1 %v8890_v8 }
0x124a   :  { %8893 = vmatprep.subr.bf16.mxu0 %v10546_v59 }
0x124c   :  { %6696 = vmatmul.mubr.f32.vlgmr.msra.gmra.mrb[52].mxu0 %v10606_v10  ;;  %6767 = vmatmul.mubr.f32.vlgmr.msra.gmra.mrb[38].mxu1 %v10606_v10 }
0x124d   :  { %8895 = vmatpush1.bf16.msra.mxu0 %v10548_v21  ;;  %6891 = vmatprep.mubr.f32.mxu0 %v9433_v42 }
0x124e   :  { %8897 = vmatprep.subr.bf16.mxu0 %v10552_v43 }
0x1251   :  { %8899 = vmatpush1.bf16.msra.mxu0 %v10554_v1 }
0x1252   :  { %8901 = vmatprep.subr.bf16.mxu0 %v10558_v53 }
0x1255   :  { %8903 = vmatpush1.bf16.msra.mxu0 %v10560_v23 }
0x1256   :  { %8905 = vmatprep.subr.bf16.mxu0 %v10564_v33 }
0x1259   :  { %8907 = vmatpush1.bf16.msra.mxu0 %v10566_v4 }
0x125a   :  { %8909 = vmatprep.subr.bf16.mxu0 %v10570_v0 }
0x125d   :  { %8911 = vmatpush1.bf16.msra.mxu0 %v10572_v9 }
0x125e   :  { %8913 = vmatprep.subr.bf16.mxu0 %v10576_v57 }
0x1261   :  { %8915 = vmatpush1.bf16.msra.mxu0 %v10578_v52 }
0x1262   :  { %8917 = vmatprep.subr.bf16.mxu0 %v10582_v12 }
0x1265   :  { %8919 = vmatpush1.bf16.msra.mxu0 %v10584_v36 }
0x1266   :  { %8921 = vmatprep.subr.bf16.mxu0 %v10588_v28 }
0x1269   :  { %8923 = vmatpush1.bf16.msra.mxu0 %v10590_v49 }
0x131f   :  { %v6697_v42 = vpop.f32.mrb[52].mxu0  ;;  %v6768_v59 = vpop.f32.mrb[38].mxu1 }
0x1320   :  { %v8984_v21 = vadd.f32 %v6697_v42, %v9805_v44  ;;  %v6699_v43 = vpop.f32.mrb[53].mxu0  ;;  %v6770_v1 = vpop.f32.mrb[39].mxu1  ;;  %v8986_v4 = vadd.f32 %v6768_v59, %v9813_v22 }
0x1321   :  { %v8985_v53 = vadd.f32 %v6699_v43, %v9808_v56  ;;  %v8987_v0 = vadd.f32 %v6770_v1, %v9819_v17 }
0x1322   :  { %v6777_v23 = vmul.f32 0.5, %v8984_v21 }
0x1323   :  { %v6781_v33 = vmul.f32 0.5, %v8985_v53  ;;  %v6786_v9 = vmul.f32 0.5, %v8987_v0 }
0x1324   :  { %9221 = vtanh.f32 %v6777_v23 }
0x1325   :  { %9223 = vtanh.f32 %v6781_v33 }
0x1326   :  { %9225 = vtanh.f32 %v8986_v4 }
0x1327   :  { %9227 = vtanh.f32 %v6786_v9 }
0x132e   :  { %v9222_v57 = vpop.eup %9221 }
0x132f   :  { %v9224_v52 = vpop.eup %9223  ;;  %v6779_v12 = vmul.f32 0.5, %v9222_v57 }
0x1330   :  { %v6783_v36 = vmul.f32 0.5, %v9224_v52  ;;  %v9226_v28 = vpop.eup %9225 }
0x1331   :  { %v6780_v44 = vadd.f32 0.5, %v6779_v12  ;;  %v9228_v22 = vpop.eup %9227 }
0x1332   :  { %v6784_v49 = vadd.f32 0.5, %v6783_v36  ;;  %v6788_v25 = vmul.f32 0.5, %v9228_v22 }
0x1333   :  { %v6791_v10 = vmul.f32 %v9226_v28, %v6780_v44 }
0x1334   :  { %v6790_v56 = vmul.f32 %v6784_v49, %v10599_v3  ;;  %v6789_v31 = vadd.f32 0.5, %v6788_v25 }
0x1336   :  { %v6792_v6 = vadd.f32 %v6791_v10, %v6790_v56 }
0x1338   :  { %9229 = vtanh.f32 %v6792_v6  ;;  %6905 = vst [vmem:[#allocation15 + $0x8] sm:$0xff] %v6792_v6 }
0x1342   :  { %v9230_v18 = vpop.eup %9229 }
0x1343   :  { %v6794_v17 = vmul.f32 %v9230_v18, %v6789_v31 }
0x1345   :  { %6903 = vst [vmem:[#allocation14 + $0x8] sm:$0xff] %v6794_v17  ;;  %6892 = vmatmul.mubr.f32.vlgmr.msra.gmra.mrb[54].mxu0 %v6794_v17 }
0x1346   :  { %9374 = shalt.err (!%p9371_p10)
}
0x1347   :  { %s9375_s25 = scalar_lea.hbm %s10711_s13, 256 }
0x1348   :  { %p9376_p11 = scmp.ne.s32.totalorder %s10711_s13, %s9375_s25  ;;  %p9379_p12 = scmp.lt.u32.totalorder %s9375_s25, %s10711_s13 }
0x134a   :  { %p9381_p13 = pnand %p9379_p12, %p9376_p11 }
0x134c   :  { %9384 = shalt.err (!%p9381_p13)
}
0x134d   :  { %6919 = dma.vmem_to_hbm [thread:$0]  %s6914_s1, 256, %s10711_s13, [#allocation5], %s9424_s7, %s9424_s7, %s9425_s28  }
0x134e   :  { %s9385_s6 = scalar_lea.vmem %s10653_s15, 256  ;;  %p9390_p1 = scmp.lt.s32.totalorder %s10653_s15, %s10653_s15 }
0x134f   :  { %p9386_p0 = scmp.ne.s32.totalorder %s10653_s15, %s9385_s6  ;;  %p9391_p2 = scmp.lt.s32.totalorder %s9385_s6, %s9385_s6 }
0x1351   :  { %p9392_p3 = por %p9391_p2, %p9390_p1 }
0x1353   :  { %p9393_p4 = pnand %p9392_p3, %p9386_p0 }
0x1355   :  { %9396 = shalt.err (!%p9393_p4)
}
0x1356   :  { %s9397_s17 = scalar_lea.hbm %s10712_s14, 256 }
0x1357   :  { %p9398_p5 = scmp.ne.s32.totalorder %s10712_s14, %s9397_s17  ;;  %p9401_p6 = scmp.lt.u32.totalorder %s9397_s17, %s10712_s14 }
0x1359   :  { %p9403_p7 = pnand %p9401_p6, %p9398_p5 }
0x135b   :  { %9406 = shalt.err (!%p9403_p7)
}
0x135c   :  { %6931 = dma.vmem_to_hbm [thread:$0]  %s10653_s15, 256, %s10712_s14, [#allocation16], %s9424_s7, %s9424_s7, %s9425_s28  }
0x1418   :  { %v6893_v3 = vpop.f32.mrb[54].mxu0 }
0x1419   :  { %v6894_v13 = vadd.f32 %v6893_v3, %v9899_v37  ;;  %v6895_v38 = vpop.f32.mrb[55].mxu0 }
0x141a   :  { %v6896_v20 = vadd.f32 %v6895_v38, %v9902_v47 }
0x141b   :  { %6898 = vst [vmem:[%s10710_s12 + $0x70] sm:$0xff] %v6894_v13 }
0x141c   :  { %6899 = vst [vmem:[%s10710_s12 + $0x78] sm:$0xff] %v6896_v20 }
0x141d   :  { %9415 = dma.done.wait [#allocation5], 256  }
0x141e   :  { %9416 = vsyncadd [#allocation5], 4294967040 }
0x141f   :  { %9417 = dma.done.wait [#allocation16], 256  }
0x1420   :  { %9418 = vsyncadd [#allocation16], 4294967040 }
0x1421   :  { %6940 = vsyncpa [#allocation4], 1 }
0x1422   :  { %6941 = vsyncpa [#allocation7], 1 }
0x1423   :  { %6942 = vsyncpa [#allocation10], 1 }
0x1424   :  { %6943 = vsyncpa [#allocation13], 1 }
0x1425   :  { %6944 = vsyncpa [#allocation5], 1 }
0x1426   :  { %6945 = vsyncpa [#allocation16], 1 }

</bundles_post_ra>
